<compile_context>
chip_gen: v5e
topology: v5e:2x2
jax: 0.10.0
libtpu: 0.0.40
codegen_flags: <defaults>
</compile_context>

<pallas_src>
import random

import jax
import jax.numpy as jnp
from jax.experimental import pallas as pl
from jax.experimental.pallas import tpu as pltpu

# ---- model sizes (consistent with the module's forward) ---------------------
SRC_VOCAB = 20
TRG_VOCAB = 18
EMB = 16
ENC_HID = 32
DEC_HID = 32
SRC_LEN = 7
TRG_LEN = 8
BATCH = 2

VPAD = 128           # lane-dense padded target vocab (padded bias = -1e30 -> argmax safe)
SVPAD = 32           # padded source vocab for the in-kernel one-hot matmul
GW = 128             # packed gate width: r at [0:H), z at [H:2H), n at [2H:3H), pad to 128
SBP = 16             # padded B*SRC_LEN rows for encoder-output / attention buffers
CAT_W = 128          # concatenated decoder activation row width
CAT_HID = 0          # [hidden | ctx_f | ctx_b | emb | pad]
CAT_CTX = DEC_HID                    # 32
CAT_EMB = CAT_CTX + 2 * ENC_HID      # 96
_NEG = -1e30

_VMEM = pl.BlockSpec(memory_space=pltpu.MemorySpace.VMEM)
_SMEM = pl.BlockSpec(memory_space=pltpu.MemorySpace.SMEM)


# ---------------------------- in-kernel helpers -------------------------------
def _gru_from_gi(gi, h, whh_ref, bhh_ref, hdim):
    """PyTorch GRU cell given precomputed input-side gates gi = x@Wih + bih.

    Gates packed contiguously along lanes: [r | z | n] at offsets 0, H, 2H.
    """
    gh = jnp.dot(h, whh_ref[...], preferred_element_type=jnp.float32) + bhh_ref[...]
    r = jax.nn.sigmoid(gi[:, 0:hdim] + gh[:, 0:hdim])
    z = jax.nn.sigmoid(gi[:, hdim:2 * hdim] + gh[:, hdim:2 * hdim])
    n = jnp.tanh(gi[:, 2 * hdim:3 * hdim] + r * gh[:, 2 * hdim:3 * hdim])
    return (1.0 - z) * n + z * h


# ---------------------------- fused seq2seq kernel -----------------------------
def _seq2seq_kernel(
        # SMEM inputs
        src_ref, trg_ref, tf_ref,
        # VMEM weights
        enc_emb_ref,
        wih_f_ref, whh_f_ref, bih_f_ref, bhh_f_ref,
        wih_b_ref, whh_b_ref, bih_b_ref, bhh_b_ref,
        fc_wf_ref, fc_wb_ref, fc_b_ref,
        attn_we_ref, attn_b_ref, attn_wh_ref, attn_v_ref,
        dec_emb_ref, dec_wgi_ref, dec_whh_ref, dec_bih_ref, dec_bhh_ref,
        out_w_ref, out_b_ref,
        # output
        out_ref,
        # VMEM scratch
        enc_ref, cat_ref):
    f32 = jnp.float32

    # ============================ encoder =====================================
    # Source one-hot built in-kernel from SMEM token ids (time-major rows t*B+b).
    row_s = jax.lax.broadcasted_iota(jnp.int32, (SRC_LEN * BATCH, SVPAD), 0)
    lane_s = jax.lax.broadcasted_iota(jnp.int32, (SRC_LEN * BATCH, SVPAD), 1)
    src_oh = jnp.zeros((SRC_LEN * BATCH, SVPAD), f32)
    for t in range(SRC_LEN):
        for b in range(BATCH):
            tok = src_ref[t, b]
            src_oh = src_oh + jnp.where(
                (row_s == t * BATCH + b) & (lane_s == tok), 1.0, 0.0)
    emb_all = jnp.dot(src_oh, enc_emb_ref[...],
                      preferred_element_type=f32)                    # [S*B, EMB]

    # Hoisted input-side gate matmuls for BOTH directions (one matmul each).
    gif_all = jnp.dot(emb_all, wih_f_ref[...],
                      preferred_element_type=f32) + bih_f_ref[...]   # [S*B, GW]
    gib_all = jnp.dot(emb_all, wih_b_ref[...],
                      preferred_element_type=f32) + bih_b_ref[...]   # [S*B, GW]

    # Encoder-output scratch: batch-major rows b*S+s, fwd lanes 0:32, bwd 32:64.
    enc_ref[...] = jnp.zeros((SBP, 2 * ENC_HID), f32)

    hf = jnp.zeros((BATCH, ENC_HID), f32)
    hb = jnp.zeros((BATCH, ENC_HID), f32)
    for t in range(SRC_LEN):
        tb = SRC_LEN - 1 - t
        gif = gif_all[t * BATCH:(t + 1) * BATCH, :]
        hf = _gru_from_gi(gif, hf, whh_f_ref, bhh_f_ref, ENC_HID)
        gib = gib_all[tb * BATCH:(tb + 1) * BATCH, :]
        hb = _gru_from_gi(gib, hb, whh_b_ref, bhh_b_ref, ENC_HID)
        for b in range(BATCH):
            rf = b * SRC_LEN + t
            rb_ = b * SRC_LEN + tb
            enc_ref[rf:rf + 1, 0:ENC_HID] = hf[b:b + 1, :]
            enc_ref[rb_:rb_ + 1, ENC_HID:2 * ENC_HID] = hb[b:b + 1, :]

    # Initial decoder hidden = tanh(fc([h_fwd_last | h_bwd_last]))  (fc split, no concat).
    hidden = jnp.tanh(
        jnp.dot(hf, fc_wf_ref[...], preferred_element_type=f32)
        + jnp.dot(hb, fc_wb_ref[...], preferred_element_type=f32)
        + fc_b_ref[...])                                             # [B, DEC_HID]

    # Hoisted, loop-invariant attention projection: one [SBP, 2H] @ [2H, Hd] matmul.
    enc_all = enc_ref[...]                                           # [SBP, 2H]
    proj = jnp.dot(enc_all, attn_we_ref[...],
                   preferred_element_type=f32) + attn_b_ref[...]     # [SBP, Hd]

    # ============================ decoder =====================================
    # Target one-hots + teacher-forced embeddings for all steps (one matmul).
    row_t = jax.lax.broadcasted_iota(jnp.int32, (TRG_LEN * BATCH, VPAD), 0)
    lane_t = jax.lax.broadcasted_iota(jnp.int32, (TRG_LEN * BATCH, VPAD), 1)
    trg_oh = jnp.zeros((TRG_LEN * BATCH, VPAD), f32)
    for t in range(TRG_LEN):
        for b in range(BATCH):
            tok = trg_ref[t, b]
            trg_oh = trg_oh + jnp.where(
                (row_t == t * BATCH + b) & (lane_t == tok), 1.0, 0.0)
    emb_tf_all = jnp.dot(trg_oh, dec_emb_ref[...],
                         preferred_element_type=f32)                 # [T*B, EMB]

    # Hoisted attention constants (block masks / selectors over batch-major rows).
    r_sb = jax.lax.broadcasted_iota(jnp.int32, (SBP, BATCH), 0)
    c_sb = jax.lax.broadcasted_iota(jnp.int32, (SBP, BATCH), 1)
    in_blk = (r_sb >= c_sb * SRC_LEN) & (r_sb < (c_sb + 1) * SRC_LEN)
    sel = in_blk.astype(f32)                                         # [SBP, B]
    bm_col = jnp.where(in_blk, 0.0, _NEG)                            # [SBP, B]
    r_bs = jax.lax.broadcasted_iota(jnp.int32, (BATCH, SBP), 0)
    c_bs = jax.lax.broadcasted_iota(jnp.int32, (BATCH, SBP), 1)
    selT = ((c_bs >= r_bs * SRC_LEN)
            & (c_bs < (r_bs + 1) * SRC_LEN)).astype(f32)             # [B, SBP]
    v_row = attn_v_ref[...]                                          # [1, Hd]
    lane_v = jax.lax.broadcasted_iota(jnp.int32, (BATCH, VPAD), 1)

    # Concatenated activation row scratch: [hidden | ctx_f | ctx_b | emb | pad].
    cat_ref[...] = jnp.zeros((BATCH, CAT_W), f32)

    out_ref[0] = jnp.zeros((BATCH, VPAD), f32)        # outputs[0] stays zeros (reference)
    emb_in = emb_tf_all[0:BATCH, :]                   # embedding of trg[0]

    for t in range(1, TRG_LEN):
        # ---- attention (fully batched; enc projection hoisted) ----
        hW = jnp.dot(hidden, attn_wh_ref[...],
                     preferred_element_type=f32)                     # [B, Hd]
        hw_rows = sel[:, 0:1] * hW[0:1, :]
        for b in range(1, BATCH):
            hw_rows = hw_rows + sel[:, b:b + 1] * hW[b:b + 1, :]     # [SBP, Hd]
        energy = jnp.tanh(hw_rows + proj)                            # [SBP, Hd]
        score = jnp.sum(energy * v_row, axis=1, keepdims=True)       # [SBP, 1]
        masked = score + bm_col                                      # [SBP, B]
        m = jnp.max(masked, axis=0, keepdims=True)                   # [1, B]
        e = jnp.exp(masked - m)
        a_col = e / jnp.sum(e, axis=0, keepdims=True)                # [SBP, B]
        a_own = jnp.sum(a_col, axis=1, keepdims=True)                # [SBP, 1]
        ctx = jnp.dot(selT, a_own * enc_all,
                      preferred_element_type=f32)                    # [B, 2H] = [ctx_f|ctx_b]

        # ---- GRU cell: one stacked input-side gate matmul on the cat row ----
        cat_ref[:, CAT_CTX:CAT_CTX + 2 * ENC_HID] = ctx
        cat_ref[:, CAT_EMB:CAT_EMB + EMB] = emb_in
        gi = (jnp.dot(cat_ref[...], dec_wgi_ref[...],
                      preferred_element_type=f32) + dec_bih_ref[...])
        hidden = _gru_from_gi(gi, hidden, dec_whh_ref, dec_bhh_ref, DEC_HID)

        # ---- output projection: one stacked matmul, lane-dense [B, VPAD] store ----
        cat_ref[:, CAT_HID:CAT_HID + DEC_HID] = hidden
        logits = (jnp.dot(cat_ref[...], out_w_ref[...],
                          preferred_element_type=f32) + out_b_ref[...])
        out_ref[t] = logits

        # ---- next input: teacher forcing vs argmax(pred), all in-kernel ----
        mx = jnp.max(logits, axis=1, keepdims=True)                  # [B, 1]
        cand = jnp.where(logits == mx, lane_v, VPAD)
        arg = jnp.min(cand, axis=1, keepdims=True)                   # first-max index
        pred_oh = (lane_v == arg).astype(f32)                        # [B, VPAD]
        emb_pred = jnp.dot(pred_oh, dec_emb_ref[...],
                           preferred_element_type=f32)               # [B, EMB]
        w = (tf_ref[t] > 0).astype(f32)                              # scalar 0/1 from SMEM
        emb_in = w * emb_tf_all[t * BATCH:(t + 1) * BATCH, :] + (1.0 - w) * emb_pred


def seq2seq_pallas(p, src, trg, tf_flags):
    return pl.pallas_call(
        _seq2seq_kernel,
        out_shape=jax.ShapeDtypeStruct((TRG_LEN, BATCH, VPAD), jnp.float32),
        in_specs=[_SMEM, _SMEM, _SMEM] + [_VMEM] * 23,
        out_specs=_VMEM,
        scratch_shapes=[
            pltpu.VMEM((SBP, 2 * ENC_HID), jnp.float32),   # encoder outputs (batch-major)
            pltpu.VMEM((BATCH, CAT_W), jnp.float32),       # concatenated decoder activation row
        ],
    )(src, trg, tf_flags,
      p["enc_emb_pad"],
      p["enc_wih_f"], p["enc_whh_f"], p["enc_bih_f"], p["enc_bhh_f"],
      p["enc_wih_b"], p["enc_whh_b"], p["enc_bih_b"], p["enc_bhh_b"],
      p["enc_fc_wf"], p["enc_fc_wb"], p["enc_fc_b"],
      p["attn_we"], p["attn_b"], p["attn_wh"], p["attn_v"],
      p["dec_emb_pad"], p["dec_wgi"], p["dec_whh"], p["dec_bih"], p["dec_bhh"],
      p["out_w"], p["out_b"])


# ---------------------------- parameters ---------------------------------------
def _u(key, shape):
    return jax.random.uniform(key, shape, minval=-0.08, maxval=0.08, dtype=jnp.float32)


def _pack_gates(w3):
    # [3, In, H] -> [In, GW] with gates r|z|n contiguous at lane offsets 0, H, 2H.
    n_in, h = w3.shape[1], w3.shape[2]
    out = jnp.zeros((n_in, GW), jnp.float32)
    for k in range(3):
        out = out.at[:, k * h:(k + 1) * h].set(w3[k])
    return out


def _pack_gate_bias(b3):
    h = b3.shape[-1]
    out = jnp.zeros((1, GW), jnp.float32)
    for k in range(3):
        out = out.at[:, k * h:(k + 1) * h].set(b3[k].reshape(1, h))
    return out


def init_params(key):
    keys = jax.random.split(key, 40)
    k = iter(keys)
    p = {}
    # encoder embedding (src vocab padded to SVPAD rows)
    p["enc_emb_pad"] = jnp.zeros((SVPAD, EMB), jnp.float32).at[:SRC_VOCAB].set(
        _u(next(k), (SRC_VOCAB, EMB)))
    # bidirectional encoder GRU
    for d in ("f", "b"):
        p[f"enc_wih_{d}"] = _pack_gates(_u(next(k), (3, EMB, ENC_HID)))
        p[f"enc_whh_{d}"] = _pack_gates(_u(next(k), (3, ENC_HID, ENC_HID)))
        p[f"enc_bih_{d}"] = _pack_gate_bias(_u(next(k), (3, 1, ENC_HID)))
        p[f"enc_bhh_{d}"] = _pack_gate_bias(_u(next(k), (3, 1, ENC_HID)))
    p["enc_fc_wf"] = _u(next(k), (ENC_HID, DEC_HID))     # fc split over [h_fwd | h_bwd]
    p["enc_fc_wb"] = _u(next(k), (ENC_HID, DEC_HID))
    p["enc_fc_b"] = _u(next(k), (1, DEC_HID))
    # attention
    p["attn_wh"] = _u(next(k), (DEC_HID, DEC_HID))
    p["attn_we"] = jnp.concatenate(                      # stacked over [enc_fwd | enc_bwd]
        [_u(next(k), (ENC_HID, DEC_HID)), _u(next(k), (ENC_HID, DEC_HID))], axis=0)
    p["attn_b"] = _u(next(k), (1, DEC_HID))
    p["attn_v"] = _u(next(k), (1, DEC_HID))
    # decoder embedding (trg vocab padded to VPAD rows)
    p["dec_emb_pad"] = jnp.zeros((VPAD, EMB), jnp.float32).at[:TRG_VOCAB].set(
        _u(next(k), (TRG_VOCAB, EMB)))
    # stacked decoder input-side gate weights over cat = [hidden|ctx_f|ctx_b|emb|pad]
    wih_cf = _pack_gates(_u(next(k), (3, ENC_HID, DEC_HID)))
    wih_cb = _pack_gates(_u(next(k), (3, ENC_HID, DEC_HID)))
    wih_e = _pack_gates(_u(next(k), (3, EMB, DEC_HID)))
    w_gi = jnp.zeros((CAT_W, GW), jnp.float32)
    w_gi = w_gi.at[CAT_CTX:CAT_CTX + ENC_HID].set(wih_cf)
    w_gi = w_gi.at[CAT_CTX + ENC_HID:CAT_CTX + 2 * ENC_HID].set(wih_cb)
    w_gi = w_gi.at[CAT_EMB:CAT_EMB + EMB].set(wih_e)
    p["dec_wgi"] = w_gi
    p["dec_whh"] = _pack_gates(_u(next(k), (3, DEC_HID, DEC_HID)))
    p["dec_bih"] = _pack_gate_bias(_u(next(k), (3, 1, DEC_HID)))
    p["dec_bhh"] = _pack_gate_bias(_u(next(k), (3, 1, DEC_HID)))

    # stacked output projection over cat; vocab lanes padded to VPAD, pad bias = -1e30
    def vpadw(kk, rows):
        return jnp.zeros((rows, VPAD), jnp.float32).at[:, :TRG_VOCAB].set(
            _u(kk, (rows, TRG_VOCAB)))

    w_out = jnp.zeros((CAT_W, VPAD), jnp.float32)
    w_out = w_out.at[CAT_HID:CAT_HID + DEC_HID].set(vpadw(next(k), DEC_HID))
    w_out = w_out.at[CAT_CTX:CAT_CTX + ENC_HID].set(vpadw(next(k), ENC_HID))
    w_out = w_out.at[CAT_CTX + ENC_HID:CAT_CTX + 2 * ENC_HID].set(vpadw(next(k), ENC_HID))
    w_out = w_out.at[CAT_EMB:CAT_EMB + EMB].set(vpadw(next(k), EMB))
    p["out_w"] = w_out
    p["out_b"] = jnp.full((1, VPAD), _NEG, jnp.float32).at[:, :TRG_VOCAB].set(
        _u(next(k), (1, TRG_VOCAB)))
    return p


# ---------------------------- model forward ------------------------------------
@jax.jit
def seq2seq_forward(p, src, trg, tf_flags):
    out_pad = seq2seq_pallas(p, src, trg, tf_flags)          # [T, B, VPAD]
    return out_pad[:, :, :TRG_VOCAB]                         # [T, B, TRG_VOCAB]


# ---------------------------- main ----------------------------------------------
if __name__ == "__main__":
    key = jax.random.PRNGKey(0)
    pkey, skey, tkey = jax.random.split(key, 3)
    params = init_params(pkey)
    src = jax.random.randint(skey, (SRC_LEN, BATCH), 0, SRC_VOCAB, dtype=jnp.int32)
    trg = jax.random.randint(tkey, (TRG_LEN, BATCH), 0, TRG_VOCAB, dtype=jnp.int32)

    # Teacher-forcing schedule drawn host-side (matches the reference's per-step
    # random.random() < ratio), passed as data so the jitted graph never retraces.
    # TODO(synk): Python RNG has no in-kernel equivalent; the draw itself stays on host.
    teacher_forcing_ratio = 0.5
    rng = random.Random(0)
    tf_flags = jnp.array(
        [0] + [1 if rng.random() < teacher_forcing_ratio else 0 for _ in range(1, TRG_LEN)],
        dtype=jnp.int32)

    out = seq2seq_forward(params, src, trg, tf_flags)
    out = jax.block_until_ready(out)
    assert out.shape == (TRG_LEN, BATCH, TRG_VOCAB)
    assert bool(jnp.all(jnp.isfinite(out)))
    print("KERNEL_OK")
</pallas_src>

<mosaic_0001>
module attributes {stable_mosaic.version = 11 : i64} {
  func.func @_seq2seq_kernel(%arg0: memref<7x2xi32, #tpu.memory_space<smem>>, %arg1: memref<8x2xi32, #tpu.memory_space<smem>>, %arg2: memref<8xi32, #tpu.memory_space<smem>>, %arg3: memref<32x16xf32, #tpu.memory_space<vmem>>, %arg4: memref<16x128xf32, #tpu.memory_space<vmem>>, %arg5: memref<32x128xf32, #tpu.memory_space<vmem>>, %arg6: memref<1x128xf32, #tpu.memory_space<vmem>>, %arg7: memref<1x128xf32, #tpu.memory_space<vmem>>, %arg8: memref<16x128xf32, #tpu.memory_space<vmem>>, %arg9: memref<32x128xf32, #tpu.memory_space<vmem>>, %arg10: memref<1x128xf32, #tpu.memory_space<vmem>>, %arg11: memref<1x128xf32, #tpu.memory_space<vmem>>, %arg12: memref<32x32xf32, #tpu.memory_space<vmem>>, %arg13: memref<32x32xf32, #tpu.memory_space<vmem>>, %arg14: memref<1x32xf32, #tpu.memory_space<vmem>>, %arg15: memref<64x32xf32, #tpu.memory_space<vmem>>, %arg16: memref<1x32xf32, #tpu.memory_space<vmem>>, %arg17: memref<32x32xf32, #tpu.memory_space<vmem>>, %arg18: memref<1x32xf32, #tpu.memory_space<vmem>>, %arg19: memref<128x16xf32, #tpu.memory_space<vmem>>, %arg20: memref<128x128xf32, #tpu.memory_space<vmem>>, %arg21: memref<32x128xf32, #tpu.memory_space<vmem>>, %arg22: memref<1x128xf32, #tpu.memory_space<vmem>>, %arg23: memref<1x128xf32, #tpu.memory_space<vmem>>, %arg24: memref<128x128xf32, #tpu.memory_space<vmem>>, %arg25: memref<1x128xf32, #tpu.memory_space<vmem>>, %arg26: memref<8x2x128xf32, #tpu.memory_space<vmem>>, %arg27: memref<16x64xf32, #tpu.memory_space<vmem>>, %arg28: memref<2x128xf32, #tpu.memory_space<vmem>>) attributes {dimension_semantics = [], scalar_prefetch = 0 : i64, scratch_operands = 2 : i64, tpu.core_type = #tpu.core_type<tc>} {
    %0 = tpu.iota {dimensions = array<i32: 0>} : vector<14x32xi32>
    %1 = tpu.iota {dimensions = array<i32: 1>} : vector<14x32xi32>
    %cst = arith.constant 0.000000e+00 : f32
    %2 = vector.broadcast %cst : f32 to vector<14x32xf32>
    %c0 = arith.constant 0 : index
    %c0_0 = arith.constant 0 : index
    %3 = memref.load %arg0[%c0, %c0_0] : memref<7x2xi32, #tpu.memory_space<smem>>
    %c0_i32 = arith.constant 0 : i32
    %4 = vector.broadcast %c0_i32 : i32 to vector<14x32xi32>
    %5 = arith.cmpi eq, %0, %4 : vector<14x32xi32>
    %6 = vector.broadcast %3 : i32 to vector<14x32xi32>
    %7 = arith.cmpi eq, %1, %6 : vector<14x32xi32>
    %8 = arith.andi %5, %7 : vector<14x32xi1>
    %cst_1 = arith.constant 1.000000e+00 : f32
    %cst_2 = arith.constant 0.000000e+00 : f32
    %9 = vector.broadcast %cst_1 : f32 to vector<14x32xf32>
    %10 = vector.broadcast %cst_2 : f32 to vector<14x32xf32>
    %11 = arith.select %8, %9, %10 : vector<14x32xi1>, vector<14x32xf32>
    %12 = arith.addf %2, %11 : vector<14x32xf32>
    %c0_3 = arith.constant 0 : index
    %c1 = arith.constant 1 : index
    %13 = memref.load %arg0[%c0_3, %c1] : memref<7x2xi32, #tpu.memory_space<smem>>
    %c1_i32 = arith.constant 1 : i32
    %14 = vector.broadcast %c1_i32 : i32 to vector<14x32xi32>
    %15 = arith.cmpi eq, %0, %14 : vector<14x32xi32>
    %16 = vector.broadcast %13 : i32 to vector<14x32xi32>
    %17 = arith.cmpi eq, %1, %16 : vector<14x32xi32>
    %18 = arith.andi %15, %17 : vector<14x32xi1>
    %cst_4 = arith.constant 1.000000e+00 : f32
    %cst_5 = arith.constant 0.000000e+00 : f32
    %19 = vector.broadcast %cst_4 : f32 to vector<14x32xf32>
    %20 = vector.broadcast %cst_5 : f32 to vector<14x32xf32>
    %21 = arith.select %18, %19, %20 : vector<14x32xi1>, vector<14x32xf32>
    %22 = arith.addf %12, %21 : vector<14x32xf32>
    %c1_6 = arith.constant 1 : index
    %c0_7 = arith.constant 0 : index
    %23 = memref.load %arg0[%c1_6, %c0_7] : memref<7x2xi32, #tpu.memory_space<smem>>
    %c2_i32 = arith.constant 2 : i32
    %24 = vector.broadcast %c2_i32 : i32 to vector<14x32xi32>
    %25 = arith.cmpi eq, %0, %24 : vector<14x32xi32>
    %26 = vector.broadcast %23 : i32 to vector<14x32xi32>
    %27 = arith.cmpi eq, %1, %26 : vector<14x32xi32>
    %28 = arith.andi %25, %27 : vector<14x32xi1>
    %cst_8 = arith.constant 1.000000e+00 : f32
    %cst_9 = arith.constant 0.000000e+00 : f32
    %29 = vector.broadcast %cst_8 : f32 to vector<14x32xf32>
    %30 = vector.broadcast %cst_9 : f32 to vector<14x32xf32>
    %31 = arith.select %28, %29, %30 : vector<14x32xi1>, vector<14x32xf32>
    %32 = arith.addf %22, %31 : vector<14x32xf32>
    %c1_10 = arith.constant 1 : index
    %c1_11 = arith.constant 1 : index
    %33 = memref.load %arg0[%c1_10, %c1_11] : memref<7x2xi32, #tpu.memory_space<smem>>
    %c3_i32 = arith.constant 3 : i32
    %34 = vector.broadcast %c3_i32 : i32 to vector<14x32xi32>
    %35 = arith.cmpi eq, %0, %34 : vector<14x32xi32>
    %36 = vector.broadcast %33 : i32 to vector<14x32xi32>
    %37 = arith.cmpi eq, %1, %36 : vector<14x32xi32>
    %38 = arith.andi %35, %37 : vector<14x32xi1>
    %cst_12 = arith.constant 1.000000e+00 : f32
    %cst_13 = arith.constant 0.000000e+00 : f32
    %39 = vector.broadcast %cst_12 : f32 to vector<14x32xf32>
    %40 = vector.broadcast %cst_13 : f32 to vector<14x32xf32>
    %41 = arith.select %38, %39, %40 : vector<14x32xi1>, vector<14x32xf32>
    %42 = arith.addf %32, %41 : vector<14x32xf32>
    %c2 = arith.constant 2 : index
    %c0_14 = arith.constant 0 : index
    %43 = memref.load %arg0[%c2, %c0_14] : memref<7x2xi32, #tpu.memory_space<smem>>
    %c4_i32 = arith.constant 4 : i32
    %44 = vector.broadcast %c4_i32 : i32 to vector<14x32xi32>
    %45 = arith.cmpi eq, %0, %44 : vector<14x32xi32>
    %46 = vector.broadcast %43 : i32 to vector<14x32xi32>
    %47 = arith.cmpi eq, %1, %46 : vector<14x32xi32>
    %48 = arith.andi %45, %47 : vector<14x32xi1>
    %cst_15 = arith.constant 1.000000e+00 : f32
    %cst_16 = arith.constant 0.000000e+00 : f32
    %49 = vector.broadcast %cst_15 : f32 to vector<14x32xf32>
    %50 = vector.broadcast %cst_16 : f32 to vector<14x32xf32>
    %51 = arith.select %48, %49, %50 : vector<14x32xi1>, vector<14x32xf32>
    %52 = arith.addf %42, %51 : vector<14x32xf32>
    %c2_17 = arith.constant 2 : index
    %c1_18 = arith.constant 1 : index
    %53 = memref.load %arg0[%c2_17, %c1_18] : memref<7x2xi32, #tpu.memory_space<smem>>
    %c5_i32 = arith.constant 5 : i32
    %54 = vector.broadcast %c5_i32 : i32 to vector<14x32xi32>
    %55 = arith.cmpi eq, %0, %54 : vector<14x32xi32>
    %56 = vector.broadcast %53 : i32 to vector<14x32xi32>
    %57 = arith.cmpi eq, %1, %56 : vector<14x32xi32>
    %58 = arith.andi %55, %57 : vector<14x32xi1>
    %cst_19 = arith.constant 1.000000e+00 : f32
    %cst_20 = arith.constant 0.000000e+00 : f32
    %59 = vector.broadcast %cst_19 : f32 to vector<14x32xf32>
    %60 = vector.broadcast %cst_20 : f32 to vector<14x32xf32>
    %61 = arith.select %58, %59, %60 : vector<14x32xi1>, vector<14x32xf32>
    %62 = arith.addf %52, %61 : vector<14x32xf32>
    %c3 = arith.constant 3 : index
    %c0_21 = arith.constant 0 : index
    %63 = memref.load %arg0[%c3, %c0_21] : memref<7x2xi32, #tpu.memory_space<smem>>
    %c6_i32 = arith.constant 6 : i32
    %64 = vector.broadcast %c6_i32 : i32 to vector<14x32xi32>
    %65 = arith.cmpi eq, %0, %64 : vector<14x32xi32>
    %66 = vector.broadcast %63 : i32 to vector<14x32xi32>
    %67 = arith.cmpi eq, %1, %66 : vector<14x32xi32>
    %68 = arith.andi %65, %67 : vector<14x32xi1>
    %cst_22 = arith.constant 1.000000e+00 : f32
    %cst_23 = arith.constant 0.000000e+00 : f32
    %69 = vector.broadcast %cst_22 : f32 to vector<14x32xf32>
    %70 = vector.broadcast %cst_23 : f32 to vector<14x32xf32>
    %71 = arith.select %68, %69, %70 : vector<14x32xi1>, vector<14x32xf32>
    %72 = arith.addf %62, %71 : vector<14x32xf32>
    %c3_24 = arith.constant 3 : index
    %c1_25 = arith.constant 1 : index
    %73 = memref.load %arg0[%c3_24, %c1_25] : memref<7x2xi32, #tpu.memory_space<smem>>
    %c7_i32 = arith.constant 7 : i32
    %74 = vector.broadcast %c7_i32 : i32 to vector<14x32xi32>
    %75 = arith.cmpi eq, %0, %74 : vector<14x32xi32>
    %76 = vector.broadcast %73 : i32 to vector<14x32xi32>
    %77 = arith.cmpi eq, %1, %76 : vector<14x32xi32>
    %78 = arith.andi %75, %77 : vector<14x32xi1>
    %cst_26 = arith.constant 1.000000e+00 : f32
    %cst_27 = arith.constant 0.000000e+00 : f32
    %79 = vector.broadcast %cst_26 : f32 to vector<14x32xf32>
    %80 = vector.broadcast %cst_27 : f32 to vector<14x32xf32>
    %81 = arith.select %78, %79, %80 : vector<14x32xi1>, vector<14x32xf32>
    %82 = arith.addf %72, %81 : vector<14x32xf32>
    %c4 = arith.constant 4 : index
    %c0_28 = arith.constant 0 : index
    %83 = memref.load %arg0[%c4, %c0_28] : memref<7x2xi32, #tpu.memory_space<smem>>
    %c8_i32 = arith.constant 8 : i32
    %84 = vector.broadcast %c8_i32 : i32 to vector<14x32xi32>
    %85 = arith.cmpi eq, %0, %84 : vector<14x32xi32>
    %86 = vector.broadcast %83 : i32 to vector<14x32xi32>
    %87 = arith.cmpi eq, %1, %86 : vector<14x32xi32>
    %88 = arith.andi %85, %87 : vector<14x32xi1>
    %cst_29 = arith.constant 1.000000e+00 : f32
    %cst_30 = arith.constant 0.000000e+00 : f32
    %89 = vector.broadcast %cst_29 : f32 to vector<14x32xf32>
    %90 = vector.broadcast %cst_30 : f32 to vector<14x32xf32>
    %91 = arith.select %88, %89, %90 : vector<14x32xi1>, vector<14x32xf32>
    %92 = arith.addf %82, %91 : vector<14x32xf32>
    %c4_31 = arith.constant 4 : index
    %c1_32 = arith.constant 1 : index
    %93 = memref.load %arg0[%c4_31, %c1_32] : memref<7x2xi32, #tpu.memory_space<smem>>
    %c9_i32 = arith.constant 9 : i32
    %94 = vector.broadcast %c9_i32 : i32 to vector<14x32xi32>
    %95 = arith.cmpi eq, %0, %94 : vector<14x32xi32>
    %96 = vector.broadcast %93 : i32 to vector<14x32xi32>
    %97 = arith.cmpi eq, %1, %96 : vector<14x32xi32>
    %98 = arith.andi %95, %97 : vector<14x32xi1>
    %cst_33 = arith.constant 1.000000e+00 : f32
    %cst_34 = arith.constant 0.000000e+00 : f32
    %99 = vector.broadcast %cst_33 : f32 to vector<14x32xf32>
    %100 = vector.broadcast %cst_34 : f32 to vector<14x32xf32>
    %101 = arith.select %98, %99, %100 : vector<14x32xi1>, vector<14x32xf32>
    %102 = arith.addf %92, %101 : vector<14x32xf32>
    %c5 = arith.constant 5 : index
    %c0_35 = arith.constant 0 : index
    %103 = memref.load %arg0[%c5, %c0_35] : memref<7x2xi32, #tpu.memory_space<smem>>
    %c10_i32 = arith.constant 10 : i32
    %104 = vector.broadcast %c10_i32 : i32 to vector<14x32xi32>
    %105 = arith.cmpi eq, %0, %104 : vector<14x32xi32>
    %106 = vector.broadcast %103 : i32 to vector<14x32xi32>
    %107 = arith.cmpi eq, %1, %106 : vector<14x32xi32>
    %108 = arith.andi %105, %107 : vector<14x32xi1>
    %cst_36 = arith.constant 1.000000e+00 : f32
    %cst_37 = arith.constant 0.000000e+00 : f32
    %109 = vector.broadcast %cst_36 : f32 to vector<14x32xf32>
    %110 = vector.broadcast %cst_37 : f32 to vector<14x32xf32>
    %111 = arith.select %108, %109, %110 : vector<14x32xi1>, vector<14x32xf32>
    %112 = arith.addf %102, %111 : vector<14x32xf32>
    %c5_38 = arith.constant 5 : index
    %c1_39 = arith.constant 1 : index
    %113 = memref.load %arg0[%c5_38, %c1_39] : memref<7x2xi32, #tpu.memory_space<smem>>
    %c11_i32 = arith.constant 11 : i32
    %114 = vector.broadcast %c11_i32 : i32 to vector<14x32xi32>
    %115 = arith.cmpi eq, %0, %114 : vector<14x32xi32>
    %116 = vector.broadcast %113 : i32 to vector<14x32xi32>
    %117 = arith.cmpi eq, %1, %116 : vector<14x32xi32>
    %118 = arith.andi %115, %117 : vector<14x32xi1>
    %cst_40 = arith.constant 1.000000e+00 : f32
    %cst_41 = arith.constant 0.000000e+00 : f32
    %119 = vector.broadcast %cst_40 : f32 to vector<14x32xf32>
    %120 = vector.broadcast %cst_41 : f32 to vector<14x32xf32>
    %121 = arith.select %118, %119, %120 : vector<14x32xi1>, vector<14x32xf32>
    %122 = arith.addf %112, %121 : vector<14x32xf32>
    %c6 = arith.constant 6 : index
    %c0_42 = arith.constant 0 : index
    %123 = memref.load %arg0[%c6, %c0_42] : memref<7x2xi32, #tpu.memory_space<smem>>
    %c12_i32 = arith.constant 12 : i32
    %124 = vector.broadcast %c12_i32 : i32 to vector<14x32xi32>
    %125 = arith.cmpi eq, %0, %124 : vector<14x32xi32>
    %126 = vector.broadcast %123 : i32 to vector<14x32xi32>
    %127 = arith.cmpi eq, %1, %126 : vector<14x32xi32>
    %128 = arith.andi %125, %127 : vector<14x32xi1>
    %cst_43 = arith.constant 1.000000e+00 : f32
    %cst_44 = arith.constant 0.000000e+00 : f32
    %129 = vector.broadcast %cst_43 : f32 to vector<14x32xf32>
    %130 = vector.broadcast %cst_44 : f32 to vector<14x32xf32>
    %131 = arith.select %128, %129, %130 : vector<14x32xi1>, vector<14x32xf32>
    %132 = arith.addf %122, %131 : vector<14x32xf32>
    %c6_45 = arith.constant 6 : index
    %c1_46 = arith.constant 1 : index
    %133 = memref.load %arg0[%c6_45, %c1_46] : memref<7x2xi32, #tpu.memory_space<smem>>
    %c13_i32 = arith.constant 13 : i32
    %134 = vector.broadcast %c13_i32 : i32 to vector<14x32xi32>
    %135 = arith.cmpi eq, %0, %134 : vector<14x32xi32>
    %136 = vector.broadcast %133 : i32 to vector<14x32xi32>
    %137 = arith.cmpi eq, %1, %136 : vector<14x32xi32>
    %138 = arith.andi %135, %137 : vector<14x32xi1>
    %cst_47 = arith.constant 1.000000e+00 : f32
    %cst_48 = arith.constant 0.000000e+00 : f32
    %139 = vector.broadcast %cst_47 : f32 to vector<14x32xf32>
    %140 = vector.broadcast %cst_48 : f32 to vector<14x32xf32>
    %141 = arith.select %138, %139, %140 : vector<14x32xi1>, vector<14x32xf32>
    %142 = arith.addf %132, %141 : vector<14x32xf32>
    %c0_49 = arith.constant 0 : index
    %c0_50 = arith.constant 0 : index
    %143 = vector.load %arg3[%c0_49, %c0_50] : memref<32x16xf32, #tpu.memory_space<vmem>>, vector<32x16xf32>
    %cst_51 = arith.constant dense<0.000000e+00> : vector<14x16xf32>
    %144 = tpu.matmul %142, %143, %cst_51 {dimension_numbers = #tpu.dot_dimension_numbers<[1], [0], [0], [1], [0, 0, 1, 1], [], []>} : vector<14x32xf32>, vector<32x16xf32>, vector<14x16xf32> -> vector<14x16xf32>
    %c0_52 = arith.constant 0 : index
    %c0_53 = arith.constant 0 : index
    %145 = vector.load %arg4[%c0_52, %c0_53] : memref<16x128xf32, #tpu.memory_space<vmem>>, vector<16x128xf32>
    %cst_54 = arith.constant dense<0.000000e+00> : vector<14x128xf32>
    %146 = tpu.matmul %144, %145, %cst_54 {dimension_numbers = #tpu.dot_dimension_numbers<[1], [0], [0], [1], [0, 0, 1, 1], [], []>} : vector<14x16xf32>, vector<16x128xf32>, vector<14x128xf32> -> vector<14x128xf32>
    %c0_55 = arith.constant 0 : index
    %c0_56 = arith.constant 0 : index
    %147 = vector.load %arg6[%c0_55, %c0_56] : memref<1x128xf32, #tpu.memory_space<vmem>>, vector<1x128xf32>
    %148 = vector.broadcast %147 : vector<1x128xf32> to vector<14x128xf32>
    %149 = arith.addf %146, %148 : vector<14x128xf32>
    %c0_57 = arith.constant 0 : index
    %c0_58 = arith.constant 0 : index
    %150 = vector.load %arg8[%c0_57, %c0_58] : memref<16x128xf32, #tpu.memory_space<vmem>>, vector<16x128xf32>
    %cst_59 = arith.constant dense<0.000000e+00> : vector<14x128xf32>
    %151 = tpu.matmul %144, %150, %cst_59 {dimension_numbers = #tpu.dot_dimension_numbers<[1], [0], [0], [1], [0, 0, 1, 1], [], []>} : vector<14x16xf32>, vector<16x128xf32>, vector<14x128xf32> -> vector<14x128xf32>
    %c0_60 = arith.constant 0 : index
    %c0_61 = arith.constant 0 : index
    %152 = vector.load %arg10[%c0_60, %c0_61] : memref<1x128xf32, #tpu.memory_space<vmem>>, vector<1x128xf32>
    %153 = vector.broadcast %152 : vector<1x128xf32> to vector<14x128xf32>
    %154 = arith.addf %151, %153 : vector<14x128xf32>
    %cst_62 = arith.constant 0.000000e+00 : f32
    %155 = vector.broadcast %cst_62 : f32 to vector<16x64xf32>
    %c0_63 = arith.constant 0 : index
    %c0_64 = arith.constant 0 : index
    %156 = vector.load %arg27[%c0_63, %c0_64] : memref<16x64xf32, #tpu.memory_space<vmem>>, vector<16x64xf32>
    tpu.vector_store %arg27[%c0_63, %c0_64], %155 {strides = array<i32>} : memref<16x64xf32, #tpu.memory_space<vmem>>, vector<16x64xf32>,
    %cst_65 = arith.constant 0.000000e+00 : f32
    %157 = vector.broadcast %cst_65 : f32 to vector<2x32xf32>
    %cst_66 = arith.constant 0.000000e+00 : f32
    %158 = vector.broadcast %cst_66 : f32 to vector<2x32xf32>
    %159 = vector.extract_strided_slice %149 {offsets = [0, 0], sizes = [2, 128], strides = [1, 1]} : vector<14x128xf32> to vector<2x128xf32>
    %c0_67 = arith.constant 0 : index
    %c0_68 = arith.constant 0 : index
    %160 = vector.load %arg5[%c0_67, %c0_68] : memref<32x128xf32, #tpu.memory_space<vmem>>, vector<32x128xf32>
    %cst_69 = arith.constant dense<0.000000e+00> : vector<2x128xf32>
    %161 = tpu.matmul %157, %160, %cst_69 {dimension_numbers = #tpu.dot_dimension_numbers<[1], [0], [0], [1], [0, 0, 1, 1], [], []>} : vector<2x32xf32>, vector<32x128xf32>, vector<2x128xf32> -> vector<2x128xf32>
    %c0_70 = arith.constant 0 : index
    %c0_71 = arith.constant 0 : index
    %162 = vector.load %arg7[%c0_70, %c0_71] : memref<1x128xf32, #tpu.memory_space<vmem>>, vector<1x128xf32>
    %163 = vector.broadcast %162 : vector<1x128xf32> to vector<2x128xf32>
    %164 = arith.addf %161, %163 : vector<2x128xf32>
    %165 = vector.extract_strided_slice %159 {offsets = [0, 0], sizes = [2, 32], strides = [1, 1]} : vector<2x128xf32> to vector<2x32xf32>
    %166 = vector.extract_strided_slice %164 {offsets = [0, 0], sizes = [2, 32], strides = [1, 1]} : vector<2x128xf32> to vector<2x32xf32>
    %167 = arith.addf %165, %166 : vector<2x32xf32>
    %168 = arith.negf %167 : vector<2x32xf32>
    %169 = math.exp %168 : vector<2x32xf32>
    %cst_72 = arith.constant 1.000000e+00 : f32
    %170 = vector.broadcast %cst_72 : f32 to vector<2x32xf32>
    %171 = arith.addf %170, %169 : vector<2x32xf32>
    %172 = arith.divf %170, %171 : vector<2x32xf32>
    %173 = vector.extract_strided_slice %159 {offsets = [0, 32], sizes = [2, 32], strides = [1, 1]} : vector<2x128xf32> to vector<2x32xf32>
    %174 = vector.extract_strided_slice %164 {offsets = [0, 32], sizes = [2, 32], strides = [1, 1]} : vector<2x128xf32> to vector<2x32xf32>
    %175 = arith.addf %173, %174 : vector<2x32xf32>
    %176 = arith.negf %175 : vector<2x32xf32>
    %177 = math.exp %176 : vector<2x32xf32>
    %cst_73 = arith.constant 1.000000e+00 : f32
    %178 = vector.broadcast %cst_73 : f32 to vector<2x32xf32>
    %179 = arith.addf %178, %177 : vector<2x32xf32>
    %180 = arith.divf %178, %179 : vector<2x32xf32>
    %181 = vector.extract_strided_slice %159 {offsets = [0, 64], sizes = [2, 32], strides = [1, 1]} : vector<2x128xf32> to vector<2x32xf32>
    %182 = vector.extract_strided_slice %164 {offsets = [0, 64], sizes = [2, 32], strides = [1, 1]} : vector<2x128xf32> to vector<2x32xf32>
    %183 = arith.mulf %172, %182 : vector<2x32xf32>
    %184 = arith.addf %181, %183 : vector<2x32xf32>
    %185 = math.tanh %184 : vector<2x32xf32>
    %cst_74 = arith.constant 1.000000e+00 : f32
    %186 = vector.broadcast %cst_74 : f32 to vector<2x32xf32>
    %187 = arith.subf %186, %180 : vector<2x32xf32>
    %188 = arith.mulf %187, %185 : vector<2x32xf32>
    %189 = arith.mulf %180, %157 : vector<2x32xf32>
    %190 = arith.addf %188, %189 : vector<2x32xf32>
    %191 = vector.extract_strided_slice %154 {offsets = [12, 0], sizes = [2, 128], strides = [1, 1]} : vector<14x128xf32> to vector<2x128xf32>
    %c0_75 = arith.constant 0 : index
    %c0_76 = arith.constant 0 : index
    %192 = vector.load %arg9[%c0_75, %c0_76] : memref<32x128xf32, #tpu.memory_space<vmem>>, vector<32x128xf32>
    %cst_77 = arith.constant dense<0.000000e+00> : vector<2x128xf32>
    %193 = tpu.matmul %158, %192, %cst_77 {dimension_numbers = #tpu.dot_dimension_numbers<[1], [0], [0], [1], [0, 0, 1, 1], [], []>} : vector<2x32xf32>, vector<32x128xf32>, vector<2x128xf32> -> vector<2x128xf32>
    %c0_78 = arith.constant 0 : index
    %c0_79 = arith.constant 0 : index
    %194 = vector.load %arg11[%c0_78, %c0_79] : memref<1x128xf32, #tpu.memory_space<vmem>>, vector<1x128xf32>
    %195 = vector.broadcast %194 : vector<1x128xf32> to vector<2x128xf32>
    %196 = arith.addf %193, %195 : vector<2x128xf32>
    %197 = vector.extract_strided_slice %191 {offsets = [0, 0], sizes = [2, 32], strides = [1, 1]} : vector<2x128xf32> to vector<2x32xf32>
    %198 = vector.extract_strided_slice %196 {offsets = [0, 0], sizes = [2, 32], strides = [1, 1]} : vector<2x128xf32> to vector<2x32xf32>
    %199 = arith.addf %197, %198 : vector<2x32xf32>
    %200 = arith.negf %199 : vector<2x32xf32>
    %201 = math.exp %200 : vector<2x32xf32>
    %cst_80 = arith.constant 1.000000e+00 : f32
    %202 = vector.broadcast %cst_80 : f32 to vector<2x32xf32>
    %203 = arith.addf %202, %201 : vector<2x32xf32>
    %204 = arith.divf %202, %203 : vector<2x32xf32>
    %205 = vector.extract_strided_slice %191 {offsets = [0, 32], sizes = [2, 32], strides = [1, 1]} : vector<2x128xf32> to vector<2x32xf32>
    %206 = vector.extract_strided_slice %196 {offsets = [0, 32], sizes = [2, 32], strides = [1, 1]} : vector<2x128xf32> to vector<2x32xf32>
    %207 = arith.addf %205, %206 : vector<2x32xf32>
    %208 = arith.negf %207 : vector<2x32xf32>
    %209 = math.exp %208 : vector<2x32xf32>
    %cst_81 = arith.constant 1.000000e+00 : f32
    %210 = vector.broadcast %cst_81 : f32 to vector<2x32xf32>
    %211 = arith.addf %210, %209 : vector<2x32xf32>
    %212 = arith.divf %210, %211 : vector<2x32xf32>
    %213 = vector.extract_strided_slice %191 {offsets = [0, 64], sizes = [2, 32], strides = [1, 1]} : vector<2x128xf32> to vector<2x32xf32>
    %214 = vector.extract_strided_slice %196 {offsets = [0, 64], sizes = [2, 32], strides = [1, 1]} : vector<2x128xf32> to vector<2x32xf32>
    %215 = arith.mulf %204, %214 : vector<2x32xf32>
    %216 = arith.addf %213, %215 : vector<2x32xf32>
    %217 = math.tanh %216 : vector<2x32xf32>
    %cst_82 = arith.constant 1.000000e+00 : f32
    %218 = vector.broadcast %cst_82 : f32 to vector<2x32xf32>
    %219 = arith.subf %218, %212 : vector<2x32xf32>
    %220 = arith.mulf %219, %217 : vector<2x32xf32>
    %221 = arith.mulf %212, %158 : vector<2x32xf32>
    %222 = arith.addf %220, %221 : vector<2x32xf32>
    %223 = vector.extract_strided_slice %190 {offsets = [0, 0], sizes = [1, 32], strides = [1, 1]} : vector<2x32xf32> to vector<1x32xf32>
    %c0_83 = arith.constant 0 : index
    %c0_84 = arith.constant 0 : index
    %224 = vector.load %arg27[%c0_83, %c0_84] : memref<16x64xf32, #tpu.memory_space<vmem>>, vector<1x32xf32>
    tpu.vector_store %arg27[%c0_83, %c0_84], %223 {strides = array<i32>} : memref<16x64xf32, #tpu.memory_space<vmem>>, vector<1x32xf32>,
    %225 = vector.extract_strided_slice %222 {offsets = [0, 0], sizes = [1, 32], strides = [1, 1]} : vector<2x32xf32> to vector<1x32xf32>
    %c6_85 = arith.constant 6 : index
    %c32 = arith.constant 32 : index
    %226 = vector.load %arg27[%c6_85, %c32] : memref<16x64xf32, #tpu.memory_space<vmem>>, vector<1x32xf32>
    tpu.vector_store %arg27[%c6_85, %c32], %225 {strides = array<i32>} : memref<16x64xf32, #tpu.memory_space<vmem>>, vector<1x32xf32>,
    %227 = vector.extract_strided_slice %190 {offsets = [1, 0], sizes = [1, 32], strides = [1, 1]} : vector<2x32xf32> to vector<1x32xf32>
    %c7 = arith.constant 7 : index
    %c0_86 = arith.constant 0 : index
    %228 = vector.load %arg27[%c7, %c0_86] : memref<16x64xf32, #tpu.memory_space<vmem>>, vector<1x32xf32>
    tpu.vector_store %arg27[%c7, %c0_86], %227 {strides = array<i32>} : memref<16x64xf32, #tpu.memory_space<vmem>>, vector<1x32xf32>,
    %229 = vector.extract_strided_slice %222 {offsets = [1, 0], sizes = [1, 32], strides = [1, 1]} : vector<2x32xf32> to vector<1x32xf32>
    %c13 = arith.constant 13 : index
    %c32_87 = arith.constant 32 : index
    %230 = vector.load %arg27[%c13, %c32_87] : memref<16x64xf32, #tpu.memory_space<vmem>>, vector<1x32xf32>
    tpu.vector_store %arg27[%c13, %c32_87], %229 {strides = array<i32>} : memref<16x64xf32, #tpu.memory_space<vmem>>, vector<1x32xf32>,
    %231 = vector.extract_strided_slice %149 {offsets = [2, 0], sizes = [2, 128], strides = [1, 1]} : vector<14x128xf32> to vector<2x128xf32>
    %c0_88 = arith.constant 0 : index
    %c0_89 = arith.constant 0 : index
    %232 = vector.load %arg5[%c0_88, %c0_89] : memref<32x128xf32, #tpu.memory_space<vmem>>, vector<32x128xf32>
    %cst_90 = arith.constant dense<0.000000e+00> : vector<2x128xf32>
    %233 = tpu.matmul %190, %232, %cst_90 {dimension_numbers = #tpu.dot_dimension_numbers<[1], [0], [0], [1], [0, 0, 1, 1], [], []>} : vector<2x32xf32>, vector<32x128xf32>, vector<2x128xf32> -> vector<2x128xf32>
    %c0_91 = arith.constant 0 : index
    %c0_92 = arith.constant 0 : index
    %234 = vector.load %arg7[%c0_91, %c0_92] : memref<1x128xf32, #tpu.memory_space<vmem>>, vector<1x128xf32>
    %235 = vector.broadcast %234 : vector<1x128xf32> to vector<2x128xf32>
    %236 = arith.addf %233, %235 : vector<2x128xf32>
    %237 = vector.extract_strided_slice %231 {offsets = [0, 0], sizes = [2, 32], strides = [1, 1]} : vector<2x128xf32> to vector<2x32xf32>
    %238 = vector.extract_strided_slice %236 {offsets = [0, 0], sizes = [2, 32], strides = [1, 1]} : vector<2x128xf32> to vector<2x32xf32>
    %239 = arith.addf %237, %238 : vector<2x32xf32>
    %240 = arith.negf %239 : vector<2x32xf32>
    %241 = math.exp %240 : vector<2x32xf32>
    %cst_93 = arith.constant 1.000000e+00 : f32
    %242 = vector.broadcast %cst_93 : f32 to vector<2x32xf32>
    %243 = arith.addf %242, %241 : vector<2x32xf32>
    %244 = arith.divf %242, %243 : vector<2x32xf32>
    %245 = vector.extract_strided_slice %231 {offsets = [0, 32], sizes = [2, 32], strides = [1, 1]} : vector<2x128xf32> to vector<2x32xf32>
    %246 = vector.extract_strided_slice %236 {offsets = [0, 32], sizes = [2, 32], strides = [1, 1]} : vector<2x128xf32> to vector<2x32xf32>
    %247 = arith.addf %245, %246 : vector<2x32xf32>
    %248 = arith.negf %247 : vector<2x32xf32>
    %249 = math.exp %248 : vector<2x32xf32>
    %cst_94 = arith.constant 1.000000e+00 : f32
    %250 = vector.broadcast %cst_94 : f32 to vector<2x32xf32>
    %251 = arith.addf %250, %249 : vector<2x32xf32>
    %252 = arith.divf %250, %251 : vector<2x32xf32>
    %253 = vector.extract_strided_slice %231 {offsets = [0, 64], sizes = [2, 32], strides = [1, 1]} : vector<2x128xf32> to vector<2x32xf32>
    %254 = vector.extract_strided_slice %236 {offsets = [0, 64], sizes = [2, 32], strides = [1, 1]} : vector<2x128xf32> to vector<2x32xf32>
    %255 = arith.mulf %244, %254 : vector<2x32xf32>
    %256 = arith.addf %253, %255 : vector<2x32xf32>
    %257 = math.tanh %256 : vector<2x32xf32>
    %cst_95 = arith.constant 1.000000e+00 : f32
    %258 = vector.broadcast %cst_95 : f32 to vector<2x32xf32>
    %259 = arith.subf %258, %252 : vector<2x32xf32>
    %260 = arith.mulf %259, %257 : vector<2x32xf32>
    %261 = arith.mulf %252, %190 : vector<2x32xf32>
    %262 = arith.addf %260, %261 : vector<2x32xf32>
    %263 = vector.extract_strided_slice %154 {offsets = [10, 0], sizes = [2, 128], strides = [1, 1]} : vector<14x128xf32> to vector<2x128xf32>
    %c0_96 = arith.constant 0 : index
    %c0_97 = arith.constant 0 : index
    %264 = vector.load %arg9[%c0_96, %c0_97] : memref<32x128xf32, #tpu.memory_space<vmem>>, vector<32x128xf32>
    %cst_98 = arith.constant dense<0.000000e+00> : vector<2x128xf32>
    %265 = tpu.matmul %222, %264, %cst_98 {dimension_numbers = #tpu.dot_dimension_numbers<[1], [0], [0], [1], [0, 0, 1, 1], [], []>} : vector<2x32xf32>, vector<32x128xf32>, vector<2x128xf32> -> vector<2x128xf32>
    %c0_99 = arith.constant 0 : index
    %c0_100 = arith.constant 0 : index
    %266 = vector.load %arg11[%c0_99, %c0_100] : memref<1x128xf32, #tpu.memory_space<vmem>>, vector<1x128xf32>
    %267 = vector.broadcast %266 : vector<1x128xf32> to vector<2x128xf32>
    %268 = arith.addf %265, %267 : vector<2x128xf32>
    %269 = vector.extract_strided_slice %263 {offsets = [0, 0], sizes = [2, 32], strides = [1, 1]} : vector<2x128xf32> to vector<2x32xf32>
    %270 = vector.extract_strided_slice %268 {offsets = [0, 0], sizes = [2, 32], strides = [1, 1]} : vector<2x128xf32> to vector<2x32xf32>
    %271 = arith.addf %269, %270 : vector<2x32xf32>
    %272 = arith.negf %271 : vector<2x32xf32>
    %273 = math.exp %272 : vector<2x32xf32>
    %cst_101 = arith.constant 1.000000e+00 : f32
    %274 = vector.broadcast %cst_101 : f32 to vector<2x32xf32>
    %275 = arith.addf %274, %273 : vector<2x32xf32>
    %276 = arith.divf %274, %275 : vector<2x32xf32>
    %277 = vector.extract_strided_slice %263 {offsets = [0, 32], sizes = [2, 32], strides = [1, 1]} : vector<2x128xf32> to vector<2x32xf32>
    %278 = vector.extract_strided_slice %268 {offsets = [0, 32], sizes = [2, 32], strides = [1, 1]} : vector<2x128xf32> to vector<2x32xf32>
    %279 = arith.addf %277, %278 : vector<2x32xf32>
    %280 = arith.negf %279 : vector<2x32xf32>
    %281 = math.exp %280 : vector<2x32xf32>
    %cst_102 = arith.constant 1.000000e+00 : f32
    %282 = vector.broadcast %cst_102 : f32 to vector<2x32xf32>
    %283 = arith.addf %282, %281 : vector<2x32xf32>
    %284 = arith.divf %282, %283 : vector<2x32xf32>
    %285 = vector.extract_strided_slice %263 {offsets = [0, 64], sizes = [2, 32], strides = [1, 1]} : vector<2x128xf32> to vector<2x32xf32>
    %286 = vector.extract_strided_slice %268 {offsets = [0, 64], sizes = [2, 32], strides = [1, 1]} : vector<2x128xf32> to vector<2x32xf32>
    %287 = arith.mulf %276, %286 : vector<2x32xf32>
    %288 = arith.addf %285, %287 : vector<2x32xf32>
    %289 = math.tanh %288 : vector<2x32xf32>
    %cst_103 = arith.constant 1.000000e+00 : f32
    %290 = vector.broadcast %cst_103 : f32 to vector<2x32xf32>
    %291 = arith.subf %290, %284 : vector<2x32xf32>
    %292 = arith.mulf %291, %289 : vector<2x32xf32>
    %293 = arith.mulf %284, %222 : vector<2x32xf32>
    %294 = arith.addf %292, %293 : vector<2x32xf32>
    %295 = vector.extract_strided_slice %262 {offsets = [0, 0], sizes = [1, 32], strides = [1, 1]} : vector<2x32xf32> to vector<1x32xf32>
    %c1_104 = arith.constant 1 : index
    %c0_105 = arith.constant 0 : index
    %296 = vector.load %arg27[%c1_104, %c0_105] : memref<16x64xf32, #tpu.memory_space<vmem>>, vector<1x32xf32>
    tpu.vector_store %arg27[%c1_104, %c0_105], %295 {strides = array<i32>} : memref<16x64xf32, #tpu.memory_space<vmem>>, vector<1x32xf32>,
    %297 = vector.extract_strided_slice %294 {offsets = [0, 0], sizes = [1, 32], strides = [1, 1]} : vector<2x32xf32> to vector<1x32xf32>
    %c5_106 = arith.constant 5 : index
    %c32_107 = arith.constant 32 : index
    %298 = vector.load %arg27[%c5_106, %c32_107] : memref<16x64xf32, #tpu.memory_space<vmem>>, vector<1x32xf32>
    tpu.vector_store %arg27[%c5_106, %c32_107], %297 {strides = array<i32>} : memref<16x64xf32, #tpu.memory_space<vmem>>, vector<1x32xf32>,
    %299 = vector.extract_strided_slice %262 {offsets = [1, 0], sizes = [1, 32], strides = [1, 1]} : vector<2x32xf32> to vector<1x32xf32>
    %c8 = arith.constant 8 : index
    %c0_108 = arith.constant 0 : index
    %300 = vector.load %arg27[%c8, %c0_108] : memref<16x64xf32, #tpu.memory_space<vmem>>, vector<1x32xf32>
    tpu.vector_store %arg27[%c8, %c0_108], %299 {strides = array<i32>} : memref<16x64xf32, #tpu.memory_space<vmem>>, vector<1x32xf32>,
    %301 = vector.extract_strided_slice %294 {offsets = [1, 0], sizes = [1, 32], strides = [1, 1]} : vector<2x32xf32> to vector<1x32xf32>
    %c12 = arith.constant 12 : index
    %c32_109 = arith.constant 32 : index
    %302 = vector.load %arg27[%c12, %c32_109] : memref<16x64xf32, #tpu.memory_space<vmem>>, vector<1x32xf32>
    tpu.vector_store %arg27[%c12, %c32_109], %301 {strides = array<i32>} : memref<16x64xf32, #tpu.memory_space<vmem>>, vector<1x32xf32>,
    %303 = vector.extract_strided_slice %149 {offsets = [4, 0], sizes = [2, 128], strides = [1, 1]} : vector<14x128xf32> to vector<2x128xf32>
    %c0_110 = arith.constant 0 : index
    %c0_111 = arith.constant 0 : index
    %304 = vector.load %arg5[%c0_110, %c0_111] : memref<32x128xf32, #tpu.memory_space<vmem>>, vector<32x128xf32>
    %cst_112 = arith.constant dense<0.000000e+00> : vector<2x128xf32>
    %305 = tpu.matmul %262, %304, %cst_112 {dimension_numbers = #tpu.dot_dimension_numbers<[1], [0], [0], [1], [0, 0, 1, 1], [], []>} : vector<2x32xf32>, vector<32x128xf32>, vector<2x128xf32> -> vector<2x128xf32>
    %c0_113 = arith.constant 0 : index
    %c0_114 = arith.constant 0 : index
    %306 = vector.load %arg7[%c0_113, %c0_114] : memref<1x128xf32, #tpu.memory_space<vmem>>, vector<1x128xf32>
    %307 = vector.broadcast %306 : vector<1x128xf32> to vector<2x128xf32>
    %308 = arith.addf %305, %307 : vector<2x128xf32>
    %309 = vector.extract_strided_slice %303 {offsets = [0, 0], sizes = [2, 32], strides = [1, 1]} : vector<2x128xf32> to vector<2x32xf32>
    %310 = vector.extract_strided_slice %308 {offsets = [0, 0], sizes = [2, 32], strides = [1, 1]} : vector<2x128xf32> to vector<2x32xf32>
    %311 = arith.addf %309, %310 : vector<2x32xf32>
    %312 = arith.negf %311 : vector<2x32xf32>
    %313 = math.exp %312 : vector<2x32xf32>
    %cst_115 = arith.constant 1.000000e+00 : f32
    %314 = vector.broadcast %cst_115 : f32 to vector<2x32xf32>
    %315 = arith.addf %314, %313 : vector<2x32xf32>
    %316 = arith.divf %314, %315 : vector<2x32xf32>
    %317 = vector.extract_strided_slice %303 {offsets = [0, 32], sizes = [2, 32], strides = [1, 1]} : vector<2x128xf32> to vector<2x32xf32>
    %318 = vector.extract_strided_slice %308 {offsets = [0, 32], sizes = [2, 32], strides = [1, 1]} : vector<2x128xf32> to vector<2x32xf32>
    %319 = arith.addf %317, %318 : vector<2x32xf32>
    %320 = arith.negf %319 : vector<2x32xf32>
    %321 = math.exp %320 : vector<2x32xf32>
    %cst_116 = arith.constant 1.000000e+00 : f32
    %322 = vector.broadcast %cst_116 : f32 to vector<2x32xf32>
    %323 = arith.addf %322, %321 : vector<2x32xf32>
    %324 = arith.divf %322, %323 : vector<2x32xf32>
    %325 = vector.extract_strided_slice %303 {offsets = [0, 64], sizes = [2, 32], strides = [1, 1]} : vector<2x128xf32> to vector<2x32xf32>
    %326 = vector.extract_strided_slice %308 {offsets = [0, 64], sizes = [2, 32], strides = [1, 1]} : vector<2x128xf32> to vector<2x32xf32>
    %327 = arith.mulf %316, %326 : vector<2x32xf32>
    %328 = arith.addf %325, %327 : vector<2x32xf32>
    %329 = math.tanh %328 : vector<2x32xf32>
    %cst_117 = arith.constant 1.000000e+00 : f32
    %330 = vector.broadcast %cst_117 : f32 to vector<2x32xf32>
    %331 = arith.subf %330, %324 : vector<2x32xf32>
    %332 = arith.mulf %331, %329 : vector<2x32xf32>
    %333 = arith.mulf %324, %262 : vector<2x32xf32>
    %334 = arith.addf %332, %333 : vector<2x32xf32>
    %335 = vector.extract_strided_slice %154 {offsets = [8, 0], sizes = [2, 128], strides = [1, 1]} : vector<14x128xf32> to vector<2x128xf32>
    %c0_118 = arith.constant 0 : index
    %c0_119 = arith.constant 0 : index
    %336 = vector.load %arg9[%c0_118, %c0_119] : memref<32x128xf32, #tpu.memory_space<vmem>>, vector<32x128xf32>
    %cst_120 = arith.constant dense<0.000000e+00> : vector<2x128xf32>
    %337 = tpu.matmul %294, %336, %cst_120 {dimension_numbers = #tpu.dot_dimension_numbers<[1], [0], [0], [1], [0, 0, 1, 1], [], []>} : vector<2x32xf32>, vector<32x128xf32>, vector<2x128xf32> -> vector<2x128xf32>
    %c0_121 = arith.constant 0 : index
    %c0_122 = arith.constant 0 : index
    %338 = vector.load %arg11[%c0_121, %c0_122] : memref<1x128xf32, #tpu.memory_space<vmem>>, vector<1x128xf32>
    %339 = vector.broadcast %338 : vector<1x128xf32> to vector<2x128xf32>
    %340 = arith.addf %337, %339 : vector<2x128xf32>
    %341 = vector.extract_strided_slice %335 {offsets = [0, 0], sizes = [2, 32], strides = [1, 1]} : vector<2x128xf32> to vector<2x32xf32>
    %342 = vector.extract_strided_slice %340 {offsets = [0, 0], sizes = [2, 32], strides = [1, 1]} : vector<2x128xf32> to vector<2x32xf32>
    %343 = arith.addf %341, %342 : vector<2x32xf32>
    %344 = arith.negf %343 : vector<2x32xf32>
    %345 = math.exp %344 : vector<2x32xf32>
    %cst_123 = arith.constant 1.000000e+00 : f32
    %346 = vector.broadcast %cst_123 : f32 to vector<2x32xf32>
    %347 = arith.addf %346, %345 : vector<2x32xf32>
    %348 = arith.divf %346, %347 : vector<2x32xf32>
    %349 = vector.extract_strided_slice %335 {offsets = [0, 32], sizes = [2, 32], strides = [1, 1]} : vector<2x128xf32> to vector<2x32xf32>
    %350 = vector.extract_strided_slice %340 {offsets = [0, 32], sizes = [2, 32], strides = [1, 1]} : vector<2x128xf32> to vector<2x32xf32>
    %351 = arith.addf %349, %350 : vector<2x32xf32>
    %352 = arith.negf %351 : vector<2x32xf32>
    %353 = math.exp %352 : vector<2x32xf32>
    %cst_124 = arith.constant 1.000000e+00 : f32
    %354 = vector.broadcast %cst_124 : f32 to vector<2x32xf32>
    %355 = arith.addf %354, %353 : vector<2x32xf32>
    %356 = arith.divf %354, %355 : vector<2x32xf32>
    %357 = vector.extract_strided_slice %335 {offsets = [0, 64], sizes = [2, 32], strides = [1, 1]} : vector<2x128xf32> to vector<2x32xf32>
    %358 = vector.extract_strided_slice %340 {offsets = [0, 64], sizes = [2, 32], strides = [1, 1]} : vector<2x128xf32> to vector<2x32xf32>
    %359 = arith.mulf %348, %358 : vector<2x32xf32>
    %360 = arith.addf %357, %359 : vector<2x32xf32>
    %361 = math.tanh %360 : vector<2x32xf32>
    %cst_125 = arith.constant 1.000000e+00 : f32
    %362 = vector.broadcast %cst_125 : f32 to vector<2x32xf32>
    %363 = arith.subf %362, %356 : vector<2x32xf32>
    %364 = arith.mulf %363, %361 : vector<2x32xf32>
    %365 = arith.mulf %356, %294 : vector<2x32xf32>
    %366 = arith.addf %364, %365 : vector<2x32xf32>
    %367 = vector.extract_strided_slice %334 {offsets = [0, 0], sizes = [1, 32], strides = [1, 1]} : vector<2x32xf32> to vector<1x32xf32>
    %c2_126 = arith.constant 2 : index
    %c0_127 = arith.constant 0 : index
    %368 = vector.load %arg27[%c2_126, %c0_127] : memref<16x64xf32, #tpu.memory_space<vmem>>, vector<1x32xf32>
    tpu.vector_store %arg27[%c2_126, %c0_127], %367 {strides = array<i32>} : memref<16x64xf32, #tpu.memory_space<vmem>>, vector<1x32xf32>,
    %369 = vector.extract_strided_slice %366 {offsets = [0, 0], sizes = [1, 32], strides = [1, 1]} : vector<2x32xf32> to vector<1x32xf32>
    %c4_128 = arith.constant 4 : index
    %c32_129 = arith.constant 32 : index
    %370 = vector.load %arg27[%c4_128, %c32_129] : memref<16x64xf32, #tpu.memory_space<vmem>>, vector<1x32xf32>
    tpu.vector_store %arg27[%c4_128, %c32_129], %369 {strides = array<i32>} : memref<16x64xf32, #tpu.memory_space<vmem>>, vector<1x32xf32>,
    %371 = vector.extract_strided_slice %334 {offsets = [1, 0], sizes = [1, 32], strides = [1, 1]} : vector<2x32xf32> to vector<1x32xf32>
    %c9 = arith.constant 9 : index
    %c0_130 = arith.constant 0 : index
    %372 = vector.load %arg27[%c9, %c0_130] : memref<16x64xf32, #tpu.memory_space<vmem>>, vector<1x32xf32>
    tpu.vector_store %arg27[%c9, %c0_130], %371 {strides = array<i32>} : memref<16x64xf32, #tpu.memory_space<vmem>>, vector<1x32xf32>,
    %373 = vector.extract_strided_slice %366 {offsets = [1, 0], sizes = [1, 32], strides = [1, 1]} : vector<2x32xf32> to vector<1x32xf32>
    %c11 = arith.constant 11 : index
    %c32_131 = arith.constant 32 : index
    %374 = vector.load %arg27[%c11, %c32_131] : memref<16x64xf32, #tpu.memory_space<vmem>>, vector<1x32xf32>
    tpu.vector_store %arg27[%c11, %c32_131], %373 {strides = array<i32>} : memref<16x64xf32, #tpu.memory_space<vmem>>, vector<1x32xf32>,
    %375 = vector.extract_strided_slice %149 {offsets = [6, 0], sizes = [2, 128], strides = [1, 1]} : vector<14x128xf32> to vector<2x128xf32>
    %c0_132 = arith.constant 0 : index
    %c0_133 = arith.constant 0 : index
    %376 = vector.load %arg5[%c0_132, %c0_133] : memref<32x128xf32, #tpu.memory_space<vmem>>, vector<32x128xf32>
    %cst_134 = arith.constant dense<0.000000e+00> : vector<2x128xf32>
    %377 = tpu.matmul %334, %376, %cst_134 {dimension_numbers = #tpu.dot_dimension_numbers<[1], [0], [0], [1], [0, 0, 1, 1], [], []>} : vector<2x32xf32>, vector<32x128xf32>, vector<2x128xf32> -> vector<2x128xf32>
    %c0_135 = arith.constant 0 : index
    %c0_136 = arith.constant 0 : index
    %378 = vector.load %arg7[%c0_135, %c0_136] : memref<1x128xf32, #tpu.memory_space<vmem>>, vector<1x128xf32>
    %379 = vector.broadcast %378 : vector<1x128xf32> to vector<2x128xf32>
    %380 = arith.addf %377, %379 : vector<2x128xf32>
    %381 = vector.extract_strided_slice %375 {offsets = [0, 0], sizes = [2, 32], strides = [1, 1]} : vector<2x128xf32> to vector<2x32xf32>
    %382 = vector.extract_strided_slice %380 {offsets = [0, 0], sizes = [2, 32], strides = [1, 1]} : vector<2x128xf32> to vector<2x32xf32>
    %383 = arith.addf %381, %382 : vector<2x32xf32>
    %384 = arith.negf %383 : vector<2x32xf32>
    %385 = math.exp %384 : vector<2x32xf32>
    %cst_137 = arith.constant 1.000000e+00 : f32
    %386 = vector.broadcast %cst_137 : f32 to vector<2x32xf32>
    %387 = arith.addf %386, %385 : vector<2x32xf32>
    %388 = arith.divf %386, %387 : vector<2x32xf32>
    %389 = vector.extract_strided_slice %375 {offsets = [0, 32], sizes = [2, 32], strides = [1, 1]} : vector<2x128xf32> to vector<2x32xf32>
    %390 = vector.extract_strided_slice %380 {offsets = [0, 32], sizes = [2, 32], strides = [1, 1]} : vector<2x128xf32> to vector<2x32xf32>
    %391 = arith.addf %389, %390 : vector<2x32xf32>
    %392 = arith.negf %391 : vector<2x32xf32>
    %393 = math.exp %392 : vector<2x32xf32>
    %cst_138 = arith.constant 1.000000e+00 : f32
    %394 = vector.broadcast %cst_138 : f32 to vector<2x32xf32>
    %395 = arith.addf %394, %393 : vector<2x32xf32>
    %396 = arith.divf %394, %395 : vector<2x32xf32>
    %397 = vector.extract_strided_slice %375 {offsets = [0, 64], sizes = [2, 32], strides = [1, 1]} : vector<2x128xf32> to vector<2x32xf32>
    %398 = vector.extract_strided_slice %380 {offsets = [0, 64], sizes = [2, 32], strides = [1, 1]} : vector<2x128xf32> to vector<2x32xf32>
    %399 = arith.mulf %388, %398 : vector<2x32xf32>
    %400 = arith.addf %397, %399 : vector<2x32xf32>
    %401 = math.tanh %400 : vector<2x32xf32>
    %cst_139 = arith.constant 1.000000e+00 : f32
    %402 = vector.broadcast %cst_139 : f32 to vector<2x32xf32>
    %403 = arith.subf %402, %396 : vector<2x32xf32>
    %404 = arith.mulf %403, %401 : vector<2x32xf32>
    %405 = arith.mulf %396, %334 : vector<2x32xf32>
    %406 = arith.addf %404, %405 : vector<2x32xf32>
    %407 = vector.extract_strided_slice %154 {offsets = [6, 0], sizes = [2, 128], strides = [1, 1]} : vector<14x128xf32> to vector<2x128xf32>
    %c0_140 = arith.constant 0 : index
    %c0_141 = arith.constant 0 : index
    %408 = vector.load %arg9[%c0_140, %c0_141] : memref<32x128xf32, #tpu.memory_space<vmem>>, vector<32x128xf32>
    %cst_142 = arith.constant dense<0.000000e+00> : vector<2x128xf32>
    %409 = tpu.matmul %366, %408, %cst_142 {dimension_numbers = #tpu.dot_dimension_numbers<[1], [0], [0], [1], [0, 0, 1, 1], [], []>} : vector<2x32xf32>, vector<32x128xf32>, vector<2x128xf32> -> vector<2x128xf32>
    %c0_143 = arith.constant 0 : index
    %c0_144 = arith.constant 0 : index
    %410 = vector.load %arg11[%c0_143, %c0_144] : memref<1x128xf32, #tpu.memory_space<vmem>>, vector<1x128xf32>
    %411 = vector.broadcast %410 : vector<1x128xf32> to vector<2x128xf32>
    %412 = arith.addf %409, %411 : vector<2x128xf32>
    %413 = vector.extract_strided_slice %407 {offsets = [0, 0], sizes = [2, 32], strides = [1, 1]} : vector<2x128xf32> to vector<2x32xf32>
    %414 = vector.extract_strided_slice %412 {offsets = [0, 0], sizes = [2, 32], strides = [1, 1]} : vector<2x128xf32> to vector<2x32xf32>
    %415 = arith.addf %413, %414 : vector<2x32xf32>
    %416 = arith.negf %415 : vector<2x32xf32>
    %417 = math.exp %416 : vector<2x32xf32>
    %cst_145 = arith.constant 1.000000e+00 : f32
    %418 = vector.broadcast %cst_145 : f32 to vector<2x32xf32>
    %419 = arith.addf %418, %417 : vector<2x32xf32>
    %420 = arith.divf %418, %419 : vector<2x32xf32>
    %421 = vector.extract_strided_slice %407 {offsets = [0, 32], sizes = [2, 32], strides = [1, 1]} : vector<2x128xf32> to vector<2x32xf32>
    %422 = vector.extract_strided_slice %412 {offsets = [0, 32], sizes = [2, 32], strides = [1, 1]} : vector<2x128xf32> to vector<2x32xf32>
    %423 = arith.addf %421, %422 : vector<2x32xf32>
    %424 = arith.negf %423 : vector<2x32xf32>
    %425 = math.exp %424 : vector<2x32xf32>
    %cst_146 = arith.constant 1.000000e+00 : f32
    %426 = vector.broadcast %cst_146 : f32 to vector<2x32xf32>
    %427 = arith.addf %426, %425 : vector<2x32xf32>
    %428 = arith.divf %426, %427 : vector<2x32xf32>
    %429 = vector.extract_strided_slice %407 {offsets = [0, 64], sizes = [2, 32], strides = [1, 1]} : vector<2x128xf32> to vector<2x32xf32>
    %430 = vector.extract_strided_slice %412 {offsets = [0, 64], sizes = [2, 32], strides = [1, 1]} : vector<2x128xf32> to vector<2x32xf32>
    %431 = arith.mulf %420, %430 : vector<2x32xf32>
    %432 = arith.addf %429, %431 : vector<2x32xf32>
    %433 = math.tanh %432 : vector<2x32xf32>
    %cst_147 = arith.constant 1.000000e+00 : f32
    %434 = vector.broadcast %cst_147 : f32 to vector<2x32xf32>
    %435 = arith.subf %434, %428 : vector<2x32xf32>
    %436 = arith.mulf %435, %433 : vector<2x32xf32>
    %437 = arith.mulf %428, %366 : vector<2x32xf32>
    %438 = arith.addf %436, %437 : vector<2x32xf32>
    %439 = vector.extract_strided_slice %406 {offsets = [0, 0], sizes = [1, 32], strides = [1, 1]} : vector<2x32xf32> to vector<1x32xf32>
    %c3_148 = arith.constant 3 : index
    %c0_149 = arith.constant 0 : index
    %440 = vector.load %arg27[%c3_148, %c0_149] : memref<16x64xf32, #tpu.memory_space<vmem>>, vector<1x32xf32>
    tpu.vector_store %arg27[%c3_148, %c0_149], %439 {strides = array<i32>} : memref<16x64xf32, #tpu.memory_space<vmem>>, vector<1x32xf32>,
    %441 = vector.extract_strided_slice %438 {offsets = [0, 0], sizes = [1, 32], strides = [1, 1]} : vector<2x32xf32> to vector<1x32xf32>
    %c3_150 = arith.constant 3 : index
    %c32_151 = arith.constant 32 : index
    %442 = vector.load %arg27[%c3_150, %c32_151] : memref<16x64xf32, #tpu.memory_space<vmem>>, vector<1x32xf32>
    tpu.vector_store %arg27[%c3_150, %c32_151], %441 {strides = array<i32>} : memref<16x64xf32, #tpu.memory_space<vmem>>, vector<1x32xf32>,
    %443 = vector.extract_strided_slice %406 {offsets = [1, 0], sizes = [1, 32], strides = [1, 1]} : vector<2x32xf32> to vector<1x32xf32>
    %c10 = arith.constant 10 : index
    %c0_152 = arith.constant 0 : index
    %444 = vector.load %arg27[%c10, %c0_152] : memref<16x64xf32, #tpu.memory_space<vmem>>, vector<1x32xf32>
    tpu.vector_store %arg27[%c10, %c0_152], %443 {strides = array<i32>} : memref<16x64xf32, #tpu.memory_space<vmem>>, vector<1x32xf32>,
    %445 = vector.extract_strided_slice %438 {offsets = [1, 0], sizes = [1, 32], strides = [1, 1]} : vector<2x32xf32> to vector<1x32xf32>
    %c10_153 = arith.constant 10 : index
    %c32_154 = arith.constant 32 : index
    %446 = vector.load %arg27[%c10_153, %c32_154] : memref<16x64xf32, #tpu.memory_space<vmem>>, vector<1x32xf32>
    tpu.vector_store %arg27[%c10_153, %c32_154], %445 {strides = array<i32>} : memref<16x64xf32, #tpu.memory_space<vmem>>, vector<1x32xf32>,
    %447 = vector.extract_strided_slice %149 {offsets = [8, 0], sizes = [2, 128], strides = [1, 1]} : vector<14x128xf32> to vector<2x128xf32>
    %c0_155 = arith.constant 0 : index
    %c0_156 = arith.constant 0 : index
    %448 = vector.load %arg5[%c0_155, %c0_156] : memref<32x128xf32, #tpu.memory_space<vmem>>, vector<32x128xf32>
    %cst_157 = arith.constant dense<0.000000e+00> : vector<2x128xf32>
    %449 = tpu.matmul %406, %448, %cst_157 {dimension_numbers = #tpu.dot_dimension_numbers<[1], [0], [0], [1], [0, 0, 1, 1], [], []>} : vector<2x32xf32>, vector<32x128xf32>, vector<2x128xf32> -> vector<2x128xf32>
    %c0_158 = arith.constant 0 : index
    %c0_159 = arith.constant 0 : index
    %450 = vector.load %arg7[%c0_158, %c0_159] : memref<1x128xf32, #tpu.memory_space<vmem>>, vector<1x128xf32>
    %451 = vector.broadcast %450 : vector<1x128xf32> to vector<2x128xf32>
    %452 = arith.addf %449, %451 : vector<2x128xf32>
    %453 = vector.extract_strided_slice %447 {offsets = [0, 0], sizes = [2, 32], strides = [1, 1]} : vector<2x128xf32> to vector<2x32xf32>
    %454 = vector.extract_strided_slice %452 {offsets = [0, 0], sizes = [2, 32], strides = [1, 1]} : vector<2x128xf32> to vector<2x32xf32>
    %455 = arith.addf %453, %454 : vector<2x32xf32>
    %456 = arith.negf %455 : vector<2x32xf32>
    %457 = math.exp %456 : vector<2x32xf32>
    %cst_160 = arith.constant 1.000000e+00 : f32
    %458 = vector.broadcast %cst_160 : f32 to vector<2x32xf32>
    %459 = arith.addf %458, %457 : vector<2x32xf32>
    %460 = arith.divf %458, %459 : vector<2x32xf32>
    %461 = vector.extract_strided_slice %447 {offsets = [0, 32], sizes = [2, 32], strides = [1, 1]} : vector<2x128xf32> to vector<2x32xf32>
    %462 = vector.extract_strided_slice %452 {offsets = [0, 32], sizes = [2, 32], strides = [1, 1]} : vector<2x128xf32> to vector<2x32xf32>
    %463 = arith.addf %461, %462 : vector<2x32xf32>
    %464 = arith.negf %463 : vector<2x32xf32>
    %465 = math.exp %464 : vector<2x32xf32>
    %cst_161 = arith.constant 1.000000e+00 : f32
    %466 = vector.broadcast %cst_161 : f32 to vector<2x32xf32>
    %467 = arith.addf %466, %465 : vector<2x32xf32>
    %468 = arith.divf %466, %467 : vector<2x32xf32>
    %469 = vector.extract_strided_slice %447 {offsets = [0, 64], sizes = [2, 32], strides = [1, 1]} : vector<2x128xf32> to vector<2x32xf32>
    %470 = vector.extract_strided_slice %452 {offsets = [0, 64], sizes = [2, 32], strides = [1, 1]} : vector<2x128xf32> to vector<2x32xf32>
    %471 = arith.mulf %460, %470 : vector<2x32xf32>
    %472 = arith.addf %469, %471 : vector<2x32xf32>
    %473 = math.tanh %472 : vector<2x32xf32>
    %cst_162 = arith.constant 1.000000e+00 : f32
    %474 = vector.broadcast %cst_162 : f32 to vector<2x32xf32>
    %475 = arith.subf %474, %468 : vector<2x32xf32>
    %476 = arith.mulf %475, %473 : vector<2x32xf32>
    %477 = arith.mulf %468, %406 : vector<2x32xf32>
    %478 = arith.addf %476, %477 : vector<2x32xf32>
    %479 = vector.extract_strided_slice %154 {offsets = [4, 0], sizes = [2, 128], strides = [1, 1]} : vector<14x128xf32> to vector<2x128xf32>
    %c0_163 = arith.constant 0 : index
    %c0_164 = arith.constant 0 : index
    %480 = vector.load %arg9[%c0_163, %c0_164] : memref<32x128xf32, #tpu.memory_space<vmem>>, vector<32x128xf32>
    %cst_165 = arith.constant dense<0.000000e+00> : vector<2x128xf32>
    %481 = tpu.matmul %438, %480, %cst_165 {dimension_numbers = #tpu.dot_dimension_numbers<[1], [0], [0], [1], [0, 0, 1, 1], [], []>} : vector<2x32xf32>, vector<32x128xf32>, vector<2x128xf32> -> vector<2x128xf32>
    %c0_166 = arith.constant 0 : index
    %c0_167 = arith.constant 0 : index
    %482 = vector.load %arg11[%c0_166, %c0_167] : memref<1x128xf32, #tpu.memory_space<vmem>>, vector<1x128xf32>
    %483 = vector.broadcast %482 : vector<1x128xf32> to vector<2x128xf32>
    %484 = arith.addf %481, %483 : vector<2x128xf32>
    %485 = vector.extract_strided_slice %479 {offsets = [0, 0], sizes = [2, 32], strides = [1, 1]} : vector<2x128xf32> to vector<2x32xf32>
    %486 = vector.extract_strided_slice %484 {offsets = [0, 0], sizes = [2, 32], strides = [1, 1]} : vector<2x128xf32> to vector<2x32xf32>
    %487 = arith.addf %485, %486 : vector<2x32xf32>
    %488 = arith.negf %487 : vector<2x32xf32>
    %489 = math.exp %488 : vector<2x32xf32>
    %cst_168 = arith.constant 1.000000e+00 : f32
    %490 = vector.broadcast %cst_168 : f32 to vector<2x32xf32>
    %491 = arith.addf %490, %489 : vector<2x32xf32>
    %492 = arith.divf %490, %491 : vector<2x32xf32>
    %493 = vector.extract_strided_slice %479 {offsets = [0, 32], sizes = [2, 32], strides = [1, 1]} : vector<2x128xf32> to vector<2x32xf32>
    %494 = vector.extract_strided_slice %484 {offsets = [0, 32], sizes = [2, 32], strides = [1, 1]} : vector<2x128xf32> to vector<2x32xf32>
    %495 = arith.addf %493, %494 : vector<2x32xf32>
    %496 = arith.negf %495 : vector<2x32xf32>
    %497 = math.exp %496 : vector<2x32xf32>
    %cst_169 = arith.constant 1.000000e+00 : f32
    %498 = vector.broadcast %cst_169 : f32 to vector<2x32xf32>
    %499 = arith.addf %498, %497 : vector<2x32xf32>
    %500 = arith.divf %498, %499 : vector<2x32xf32>
    %501 = vector.extract_strided_slice %479 {offsets = [0, 64], sizes = [2, 32], strides = [1, 1]} : vector<2x128xf32> to vector<2x32xf32>
    %502 = vector.extract_strided_slice %484 {offsets = [0, 64], sizes = [2, 32], strides = [1, 1]} : vector<2x128xf32> to vector<2x32xf32>
    %503 = arith.mulf %492, %502 : vector<2x32xf32>
    %504 = arith.addf %501, %503 : vector<2x32xf32>
    %505 = math.tanh %504 : vector<2x32xf32>
    %cst_170 = arith.constant 1.000000e+00 : f32
    %506 = vector.broadcast %cst_170 : f32 to vector<2x32xf32>
    %507 = arith.subf %506, %500 : vector<2x32xf32>
    %508 = arith.mulf %507, %505 : vector<2x32xf32>
    %509 = arith.mulf %500, %438 : vector<2x32xf32>
    %510 = arith.addf %508, %509 : vector<2x32xf32>
    %511 = vector.extract_strided_slice %478 {offsets = [0, 0], sizes = [1, 32], strides = [1, 1]} : vector<2x32xf32> to vector<1x32xf32>
    %c4_171 = arith.constant 4 : index
    %c0_172 = arith.constant 0 : index
    %512 = vector.load %arg27[%c4_171, %c0_172] : memref<16x64xf32, #tpu.memory_space<vmem>>, vector<1x32xf32>
    tpu.vector_store %arg27[%c4_171, %c0_172], %511 {strides = array<i32>} : memref<16x64xf32, #tpu.memory_space<vmem>>, vector<1x32xf32>,
    %513 = vector.extract_strided_slice %510 {offsets = [0, 0], sizes = [1, 32], strides = [1, 1]} : vector<2x32xf32> to vector<1x32xf32>
    %c2_173 = arith.constant 2 : index
    %c32_174 = arith.constant 32 : index
    %514 = vector.load %arg27[%c2_173, %c32_174] : memref<16x64xf32, #tpu.memory_space<vmem>>, vector<1x32xf32>
    tpu.vector_store %arg27[%c2_173, %c32_174], %513 {strides = array<i32>} : memref<16x64xf32, #tpu.memory_space<vmem>>, vector<1x32xf32>,
    %515 = vector.extract_strided_slice %478 {offsets = [1, 0], sizes = [1, 32], strides = [1, 1]} : vector<2x32xf32> to vector<1x32xf32>
    %c11_175 = arith.constant 11 : index
    %c0_176 = arith.constant 0 : index
    %516 = vector.load %arg27[%c11_175, %c0_176] : memref<16x64xf32, #tpu.memory_space<vmem>>, vector<1x32xf32>
    tpu.vector_store %arg27[%c11_175, %c0_176], %515 {strides = array<i32>} : memref<16x64xf32, #tpu.memory_space<vmem>>, vector<1x32xf32>,
    %517 = vector.extract_strided_slice %510 {offsets = [1, 0], sizes = [1, 32], strides = [1, 1]} : vector<2x32xf32> to vector<1x32xf32>
    %c9_177 = arith.constant 9 : index
    %c32_178 = arith.constant 32 : index
    %518 = vector.load %arg27[%c9_177, %c32_178] : memref<16x64xf32, #tpu.memory_space<vmem>>, vector<1x32xf32>
    tpu.vector_store %arg27[%c9_177, %c32_178], %517 {strides = array<i32>} : memref<16x64xf32, #tpu.memory_space<vmem>>, vector<1x32xf32>,
    %519 = vector.extract_strided_slice %149 {offsets = [10, 0], sizes = [2, 128], strides = [1, 1]} : vector<14x128xf32> to vector<2x128xf32>
    %c0_179 = arith.constant 0 : index
    %c0_180 = arith.constant 0 : index
    %520 = vector.load %arg5[%c0_179, %c0_180] : memref<32x128xf32, #tpu.memory_space<vmem>>, vector<32x128xf32>
    %cst_181 = arith.constant dense<0.000000e+00> : vector<2x128xf32>
    %521 = tpu.matmul %478, %520, %cst_181 {dimension_numbers = #tpu.dot_dimension_numbers<[1], [0], [0], [1], [0, 0, 1, 1], [], []>} : vector<2x32xf32>, vector<32x128xf32>, vector<2x128xf32> -> vector<2x128xf32>
    %c0_182 = arith.constant 0 : index
    %c0_183 = arith.constant 0 : index
    %522 = vector.load %arg7[%c0_182, %c0_183] : memref<1x128xf32, #tpu.memory_space<vmem>>, vector<1x128xf32>
    %523 = vector.broadcast %522 : vector<1x128xf32> to vector<2x128xf32>
    %524 = arith.addf %521, %523 : vector<2x128xf32>
    %525 = vector.extract_strided_slice %519 {offsets = [0, 0], sizes = [2, 32], strides = [1, 1]} : vector<2x128xf32> to vector<2x32xf32>
    %526 = vector.extract_strided_slice %524 {offsets = [0, 0], sizes = [2, 32], strides = [1, 1]} : vector<2x128xf32> to vector<2x32xf32>
    %527 = arith.addf %525, %526 : vector<2x32xf32>
    %528 = arith.negf %527 : vector<2x32xf32>
    %529 = math.exp %528 : vector<2x32xf32>
    %cst_184 = arith.constant 1.000000e+00 : f32
    %530 = vector.broadcast %cst_184 : f32 to vector<2x32xf32>
    %531 = arith.addf %530, %529 : vector<2x32xf32>
    %532 = arith.divf %530, %531 : vector<2x32xf32>
    %533 = vector.extract_strided_slice %519 {offsets = [0, 32], sizes = [2, 32], strides = [1, 1]} : vector<2x128xf32> to vector<2x32xf32>
    %534 = vector.extract_strided_slice %524 {offsets = [0, 32], sizes = [2, 32], strides = [1, 1]} : vector<2x128xf32> to vector<2x32xf32>
    %535 = arith.addf %533, %534 : vector<2x32xf32>
    %536 = arith.negf %535 : vector<2x32xf32>
    %537 = math.exp %536 : vector<2x32xf32>
    %cst_185 = arith.constant 1.000000e+00 : f32
    %538 = vector.broadcast %cst_185 : f32 to vector<2x32xf32>
    %539 = arith.addf %538, %537 : vector<2x32xf32>
    %540 = arith.divf %538, %539 : vector<2x32xf32>
    %541 = vector.extract_strided_slice %519 {offsets = [0, 64], sizes = [2, 32], strides = [1, 1]} : vector<2x128xf32> to vector<2x32xf32>
    %542 = vector.extract_strided_slice %524 {offsets = [0, 64], sizes = [2, 32], strides = [1, 1]} : vector<2x128xf32> to vector<2x32xf32>
    %543 = arith.mulf %532, %542 : vector<2x32xf32>
    %544 = arith.addf %541, %543 : vector<2x32xf32>
    %545 = math.tanh %544 : vector<2x32xf32>
    %cst_186 = arith.constant 1.000000e+00 : f32
    %546 = vector.broadcast %cst_186 : f32 to vector<2x32xf32>
    %547 = arith.subf %546, %540 : vector<2x32xf32>
    %548 = arith.mulf %547, %545 : vector<2x32xf32>
    %549 = arith.mulf %540, %478 : vector<2x32xf32>
    %550 = arith.addf %548, %549 : vector<2x32xf32>
    %551 = vector.extract_strided_slice %154 {offsets = [2, 0], sizes = [2, 128], strides = [1, 1]} : vector<14x128xf32> to vector<2x128xf32>
    %c0_187 = arith.constant 0 : index
    %c0_188 = arith.constant 0 : index
    %552 = vector.load %arg9[%c0_187, %c0_188] : memref<32x128xf32, #tpu.memory_space<vmem>>, vector<32x128xf32>
    %cst_189 = arith.constant dense<0.000000e+00> : vector<2x128xf32>
    %553 = tpu.matmul %510, %552, %cst_189 {dimension_numbers = #tpu.dot_dimension_numbers<[1], [0], [0], [1], [0, 0, 1, 1], [], []>} : vector<2x32xf32>, vector<32x128xf32>, vector<2x128xf32> -> vector<2x128xf32>
    %c0_190 = arith.constant 0 : index
    %c0_191 = arith.constant 0 : index
    %554 = vector.load %arg11[%c0_190, %c0_191] : memref<1x128xf32, #tpu.memory_space<vmem>>, vector<1x128xf32>
    %555 = vector.broadcast %554 : vector<1x128xf32> to vector<2x128xf32>
    %556 = arith.addf %553, %555 : vector<2x128xf32>
    %557 = vector.extract_strided_slice %551 {offsets = [0, 0], sizes = [2, 32], strides = [1, 1]} : vector<2x128xf32> to vector<2x32xf32>
    %558 = vector.extract_strided_slice %556 {offsets = [0, 0], sizes = [2, 32], strides = [1, 1]} : vector<2x128xf32> to vector<2x32xf32>
    %559 = arith.addf %557, %558 : vector<2x32xf32>
    %560 = arith.negf %559 : vector<2x32xf32>
    %561 = math.exp %560 : vector<2x32xf32>
    %cst_192 = arith.constant 1.000000e+00 : f32
    %562 = vector.broadcast %cst_192 : f32 to vector<2x32xf32>
    %563 = arith.addf %562, %561 : vector<2x32xf32>
    %564 = arith.divf %562, %563 : vector<2x32xf32>
    %565 = vector.extract_strided_slice %551 {offsets = [0, 32], sizes = [2, 32], strides = [1, 1]} : vector<2x128xf32> to vector<2x32xf32>
    %566 = vector.extract_strided_slice %556 {offsets = [0, 32], sizes = [2, 32], strides = [1, 1]} : vector<2x128xf32> to vector<2x32xf32>
    %567 = arith.addf %565, %566 : vector<2x32xf32>
    %568 = arith.negf %567 : vector<2x32xf32>
    %569 = math.exp %568 : vector<2x32xf32>
    %cst_193 = arith.constant 1.000000e+00 : f32
    %570 = vector.broadcast %cst_193 : f32 to vector<2x32xf32>
    %571 = arith.addf %570, %569 : vector<2x32xf32>
    %572 = arith.divf %570, %571 : vector<2x32xf32>
    %573 = vector.extract_strided_slice %551 {offsets = [0, 64], sizes = [2, 32], strides = [1, 1]} : vector<2x128xf32> to vector<2x32xf32>
    %574 = vector.extract_strided_slice %556 {offsets = [0, 64], sizes = [2, 32], strides = [1, 1]} : vector<2x128xf32> to vector<2x32xf32>
    %575 = arith.mulf %564, %574 : vector<2x32xf32>
    %576 = arith.addf %573, %575 : vector<2x32xf32>
    %577 = math.tanh %576 : vector<2x32xf32>
    %cst_194 = arith.constant 1.000000e+00 : f32
    %578 = vector.broadcast %cst_194 : f32 to vector<2x32xf32>
    %579 = arith.subf %578, %572 : vector<2x32xf32>
    %580 = arith.mulf %579, %577 : vector<2x32xf32>
    %581 = arith.mulf %572, %510 : vector<2x32xf32>
    %582 = arith.addf %580, %581 : vector<2x32xf32>
    %583 = vector.extract_strided_slice %550 {offsets = [0, 0], sizes = [1, 32], strides = [1, 1]} : vector<2x32xf32> to vector<1x32xf32>
    %c5_195 = arith.constant 5 : index
    %c0_196 = arith.constant 0 : index
    %584 = vector.load %arg27[%c5_195, %c0_196] : memref<16x64xf32, #tpu.memory_space<vmem>>, vector<1x32xf32>
    tpu.vector_store %arg27[%c5_195, %c0_196], %583 {strides = array<i32>} : memref<16x64xf32, #tpu.memory_space<vmem>>, vector<1x32xf32>,
    %585 = vector.extract_strided_slice %582 {offsets = [0, 0], sizes = [1, 32], strides = [1, 1]} : vector<2x32xf32> to vector<1x32xf32>
    %c1_197 = arith.constant 1 : index
    %c32_198 = arith.constant 32 : index
    %586 = vector.load %arg27[%c1_197, %c32_198] : memref<16x64xf32, #tpu.memory_space<vmem>>, vector<1x32xf32>
    tpu.vector_store %arg27[%c1_197, %c32_198], %585 {strides = array<i32>} : memref<16x64xf32, #tpu.memory_space<vmem>>, vector<1x32xf32>,
    %587 = vector.extract_strided_slice %550 {offsets = [1, 0], sizes = [1, 32], strides = [1, 1]} : vector<2x32xf32> to vector<1x32xf32>
    %c12_199 = arith.constant 12 : index
    %c0_200 = arith.constant 0 : index
    %588 = vector.load %arg27[%c12_199, %c0_200] : memref<16x64xf32, #tpu.memory_space<vmem>>, vector<1x32xf32>
    tpu.vector_store %arg27[%c12_199, %c0_200], %587 {strides = array<i32>} : memref<16x64xf32, #tpu.memory_space<vmem>>, vector<1x32xf32>,
    %589 = vector.extract_strided_slice %582 {offsets = [1, 0], sizes = [1, 32], strides = [1, 1]} : vector<2x32xf32> to vector<1x32xf32>
    %c8_201 = arith.constant 8 : index
    %c32_202 = arith.constant 32 : index
    %590 = vector.load %arg27[%c8_201, %c32_202] : memref<16x64xf32, #tpu.memory_space<vmem>>, vector<1x32xf32>
    tpu.vector_store %arg27[%c8_201, %c32_202], %589 {strides = array<i32>} : memref<16x64xf32, #tpu.memory_space<vmem>>, vector<1x32xf32>,
    %591 = vector.extract_strided_slice %149 {offsets = [12, 0], sizes = [2, 128], strides = [1, 1]} : vector<14x128xf32> to vector<2x128xf32>
    %c0_203 = arith.constant 0 : index
    %c0_204 = arith.constant 0 : index
    %592 = vector.load %arg5[%c0_203, %c0_204] : memref<32x128xf32, #tpu.memory_space<vmem>>, vector<32x128xf32>
    %cst_205 = arith.constant dense<0.000000e+00> : vector<2x128xf32>
    %593 = tpu.matmul %550, %592, %cst_205 {dimension_numbers = #tpu.dot_dimension_numbers<[1], [0], [0], [1], [0, 0, 1, 1], [], []>} : vector<2x32xf32>, vector<32x128xf32>, vector<2x128xf32> -> vector<2x128xf32>
    %c0_206 = arith.constant 0 : index
    %c0_207 = arith.constant 0 : index
    %594 = vector.load %arg7[%c0_206, %c0_207] : memref<1x128xf32, #tpu.memory_space<vmem>>, vector<1x128xf32>
    %595 = vector.broadcast %594 : vector<1x128xf32> to vector<2x128xf32>
    %596 = arith.addf %593, %595 : vector<2x128xf32>
    %597 = vector.extract_strided_slice %591 {offsets = [0, 0], sizes = [2, 32], strides = [1, 1]} : vector<2x128xf32> to vector<2x32xf32>
    %598 = vector.extract_strided_slice %596 {offsets = [0, 0], sizes = [2, 32], strides = [1, 1]} : vector<2x128xf32> to vector<2x32xf32>
    %599 = arith.addf %597, %598 : vector<2x32xf32>
    %600 = arith.negf %599 : vector<2x32xf32>
    %601 = math.exp %600 : vector<2x32xf32>
    %cst_208 = arith.constant 1.000000e+00 : f32
    %602 = vector.broadcast %cst_208 : f32 to vector<2x32xf32>
    %603 = arith.addf %602, %601 : vector<2x32xf32>
    %604 = arith.divf %602, %603 : vector<2x32xf32>
    %605 = vector.extract_strided_slice %591 {offsets = [0, 32], sizes = [2, 32], strides = [1, 1]} : vector<2x128xf32> to vector<2x32xf32>
    %606 = vector.extract_strided_slice %596 {offsets = [0, 32], sizes = [2, 32], strides = [1, 1]} : vector<2x128xf32> to vector<2x32xf32>
    %607 = arith.addf %605, %606 : vector<2x32xf32>
    %608 = arith.negf %607 : vector<2x32xf32>
    %609 = math.exp %608 : vector<2x32xf32>
    %cst_209 = arith.constant 1.000000e+00 : f32
    %610 = vector.broadcast %cst_209 : f32 to vector<2x32xf32>
    %611 = arith.addf %610, %609 : vector<2x32xf32>
    %612 = arith.divf %610, %611 : vector<2x32xf32>
    %613 = vector.extract_strided_slice %591 {offsets = [0, 64], sizes = [2, 32], strides = [1, 1]} : vector<2x128xf32> to vector<2x32xf32>
    %614 = vector.extract_strided_slice %596 {offsets = [0, 64], sizes = [2, 32], strides = [1, 1]} : vector<2x128xf32> to vector<2x32xf32>
    %615 = arith.mulf %604, %614 : vector<2x32xf32>
    %616 = arith.addf %613, %615 : vector<2x32xf32>
    %617 = math.tanh %616 : vector<2x32xf32>
    %cst_210 = arith.constant 1.000000e+00 : f32
    %618 = vector.broadcast %cst_210 : f32 to vector<2x32xf32>
    %619 = arith.subf %618, %612 : vector<2x32xf32>
    %620 = arith.mulf %619, %617 : vector<2x32xf32>
    %621 = arith.mulf %612, %550 : vector<2x32xf32>
    %622 = arith.addf %620, %621 : vector<2x32xf32>
    %623 = vector.extract_strided_slice %154 {offsets = [0, 0], sizes = [2, 128], strides = [1, 1]} : vector<14x128xf32> to vector<2x128xf32>
    %c0_211 = arith.constant 0 : index
    %c0_212 = arith.constant 0 : index
    %624 = vector.load %arg9[%c0_211, %c0_212] : memref<32x128xf32, #tpu.memory_space<vmem>>, vector<32x128xf32>
    %cst_213 = arith.constant dense<0.000000e+00> : vector<2x128xf32>
    %625 = tpu.matmul %582, %624, %cst_213 {dimension_numbers = #tpu.dot_dimension_numbers<[1], [0], [0], [1], [0, 0, 1, 1], [], []>} : vector<2x32xf32>, vector<32x128xf32>, vector<2x128xf32> -> vector<2x128xf32>
    %c0_214 = arith.constant 0 : index
    %c0_215 = arith.constant 0 : index
    %626 = vector.load %arg11[%c0_214, %c0_215] : memref<1x128xf32, #tpu.memory_space<vmem>>, vector<1x128xf32>
    %627 = vector.broadcast %626 : vector<1x128xf32> to vector<2x128xf32>
    %628 = arith.addf %625, %627 : vector<2x128xf32>
    %629 = vector.extract_strided_slice %623 {offsets = [0, 0], sizes = [2, 32], strides = [1, 1]} : vector<2x128xf32> to vector<2x32xf32>
    %630 = vector.extract_strided_slice %628 {offsets = [0, 0], sizes = [2, 32], strides = [1, 1]} : vector<2x128xf32> to vector<2x32xf32>
    %631 = arith.addf %629, %630 : vector<2x32xf32>
    %632 = arith.negf %631 : vector<2x32xf32>
    %633 = math.exp %632 : vector<2x32xf32>
    %cst_216 = arith.constant 1.000000e+00 : f32
    %634 = vector.broadcast %cst_216 : f32 to vector<2x32xf32>
    %635 = arith.addf %634, %633 : vector<2x32xf32>
    %636 = arith.divf %634, %635 : vector<2x32xf32>
    %637 = vector.extract_strided_slice %623 {offsets = [0, 32], sizes = [2, 32], strides = [1, 1]} : vector<2x128xf32> to vector<2x32xf32>
    %638 = vector.extract_strided_slice %628 {offsets = [0, 32], sizes = [2, 32], strides = [1, 1]} : vector<2x128xf32> to vector<2x32xf32>
    %639 = arith.addf %637, %638 : vector<2x32xf32>
    %640 = arith.negf %639 : vector<2x32xf32>
    %641 = math.exp %640 : vector<2x32xf32>
    %cst_217 = arith.constant 1.000000e+00 : f32
    %642 = vector.broadcast %cst_217 : f32 to vector<2x32xf32>
    %643 = arith.addf %642, %641 : vector<2x32xf32>
    %644 = arith.divf %642, %643 : vector<2x32xf32>
    %645 = vector.extract_strided_slice %623 {offsets = [0, 64], sizes = [2, 32], strides = [1, 1]} : vector<2x128xf32> to vector<2x32xf32>
    %646 = vector.extract_strided_slice %628 {offsets = [0, 64], sizes = [2, 32], strides = [1, 1]} : vector<2x128xf32> to vector<2x32xf32>
    %647 = arith.mulf %636, %646 : vector<2x32xf32>
    %648 = arith.addf %645, %647 : vector<2x32xf32>
    %649 = math.tanh %648 : vector<2x32xf32>
    %cst_218 = arith.constant 1.000000e+00 : f32
    %650 = vector.broadcast %cst_218 : f32 to vector<2x32xf32>
    %651 = arith.subf %650, %644 : vector<2x32xf32>
    %652 = arith.mulf %651, %649 : vector<2x32xf32>
    %653 = arith.mulf %644, %582 : vector<2x32xf32>
    %654 = arith.addf %652, %653 : vector<2x32xf32>
    %655 = vector.extract_strided_slice %622 {offsets = [0, 0], sizes = [1, 32], strides = [1, 1]} : vector<2x32xf32> to vector<1x32xf32>
    %c6_219 = arith.constant 6 : index
    %c0_220 = arith.constant 0 : index
    %656 = vector.load %arg27[%c6_219, %c0_220] : memref<16x64xf32, #tpu.memory_space<vmem>>, vector<1x32xf32>
    tpu.vector_store %arg27[%c6_219, %c0_220], %655 {strides = array<i32>} : memref<16x64xf32, #tpu.memory_space<vmem>>, vector<1x32xf32>,
    %657 = vector.extract_strided_slice %654 {offsets = [0, 0], sizes = [1, 32], strides = [1, 1]} : vector<2x32xf32> to vector<1x32xf32>
    %c0_221 = arith.constant 0 : index
    %c32_222 = arith.constant 32 : index
    %658 = vector.load %arg27[%c0_221, %c32_222] : memref<16x64xf32, #tpu.memory_space<vmem>>, vector<1x32xf32>
    tpu.vector_store %arg27[%c0_221, %c32_222], %657 {strides = array<i32>} : memref<16x64xf32, #tpu.memory_space<vmem>>, vector<1x32xf32>,
    %659 = vector.extract_strided_slice %622 {offsets = [1, 0], sizes = [1, 32], strides = [1, 1]} : vector<2x32xf32> to vector<1x32xf32>
    %c13_223 = arith.constant 13 : index
    %c0_224 = arith.constant 0 : index
    %660 = vector.load %arg27[%c13_223, %c0_224] : memref<16x64xf32, #tpu.memory_space<vmem>>, vector<1x32xf32>
    tpu.vector_store %arg27[%c13_223, %c0_224], %659 {strides = array<i32>} : memref<16x64xf32, #tpu.memory_space<vmem>>, vector<1x32xf32>,
    %661 = vector.extract_strided_slice %654 {offsets = [1, 0], sizes = [1, 32], strides = [1, 1]} : vector<2x32xf32> to vector<1x32xf32>
    %c7_225 = arith.constant 7 : index
    %c32_226 = arith.constant 32 : index
    %662 = vector.load %arg27[%c7_225, %c32_226] : memref<16x64xf32, #tpu.memory_space<vmem>>, vector<1x32xf32>
    tpu.vector_store %arg27[%c7_225, %c32_226], %661 {strides = array<i32>} : memref<16x64xf32, #tpu.memory_space<vmem>>, vector<1x32xf32>,
    %c0_227 = arith.constant 0 : index
    %c0_228 = arith.constant 0 : index
    %663 = vector.load %arg12[%c0_227, %c0_228] : memref<32x32xf32, #tpu.memory_space<vmem>>, vector<32x32xf32>
    %cst_229 = arith.constant dense<0.000000e+00> : vector<2x32xf32>
    %664 = tpu.matmul %622, %663, %cst_229 {dimension_numbers = #tpu.dot_dimension_numbers<[1], [0], [0], [1], [0, 0, 1, 1], [], []>} : vector<2x32xf32>, vector<32x32xf32>, vector<2x32xf32> -> vector<2x32xf32>
    %c0_230 = arith.constant 0 : index
    %c0_231 = arith.constant 0 : index
    %665 = vector.load %arg13[%c0_230, %c0_231] : memref<32x32xf32, #tpu.memory_space<vmem>>, vector<32x32xf32>
    %cst_232 = arith.constant dense<0.000000e+00> : vector<2x32xf32>
    %666 = tpu.matmul %654, %665, %cst_232 {dimension_numbers = #tpu.dot_dimension_numbers<[1], [0], [0], [1], [0, 0, 1, 1], [], []>} : vector<2x32xf32>, vector<32x32xf32>, vector<2x32xf32> -> vector<2x32xf32>
    %667 = arith.addf %664, %666 : vector<2x32xf32>
    %c0_233 = arith.constant 0 : index
    %c0_234 = arith.constant 0 : index
    %668 = vector.load %arg14[%c0_233, %c0_234] : memref<1x32xf32, #tpu.memory_space<vmem>>, vector<1x32xf32>
    %669 = vector.broadcast %668 : vector<1x32xf32> to vector<2x32xf32>
    %670 = arith.addf %667, %669 : vector<2x32xf32>
    %671 = math.tanh %670 : vector<2x32xf32>
    %c0_235 = arith.constant 0 : index
    %c0_236 = arith.constant 0 : index
    %672 = vector.load %arg27[%c0_235, %c0_236] : memref<16x64xf32, #tpu.memory_space<vmem>>, vector<16x64xf32>
    %c0_237 = arith.constant 0 : index
    %c0_238 = arith.constant 0 : index
    %673 = vector.load %arg15[%c0_237, %c0_238] : memref<64x32xf32, #tpu.memory_space<vmem>>, vector<64x32xf32>
    %cst_239 = arith.constant dense<0.000000e+00> : vector<16x32xf32>
    %674 = tpu.matmul %672, %673, %cst_239 {dimension_numbers = #tpu.dot_dimension_numbers<[1], [0], [0], [1], [0, 0, 1, 1], [], []>} : vector<16x64xf32>, vector<64x32xf32>, vector<16x32xf32> -> vector<16x32xf32>
    %c0_240 = arith.constant 0 : index
    %c0_241 = arith.constant 0 : index
    %675 = vector.load %arg16[%c0_240, %c0_241] : memref<1x32xf32, #tpu.memory_space<vmem>>, vector<1x32xf32>
    %676 = vector.broadcast %675 : vector<1x32xf32> to vector<16x32xf32>
    %677 = arith.addf %674, %676 : vector<16x32xf32>
    %678 = tpu.iota {dimensions = array<i32: 0>} : vector<16x128xi32>
    %679 = tpu.iota {dimensions = array<i32: 1>} : vector<16x128xi32>
    %cst_242 = arith.constant 0.000000e+00 : f32
    %680 = vector.broadcast %cst_242 : f32 to vector<16x128xf32>
    %c0_243 = arith.constant 0 : index
    %c0_244 = arith.constant 0 : index
    %681 = memref.load %arg1[%c0_243, %c0_244] : memref<8x2xi32, #tpu.memory_space<smem>>
    %c0_i32_245 = arith.constant 0 : i32
    %682 = vector.broadcast %c0_i32_245 : i32 to vector<16x128xi32>
    %683 = arith.cmpi eq, %678, %682 : vector<16x128xi32>
    %684 = vector.broadcast %681 : i32 to vector<16x128xi32>
    %685 = arith.cmpi eq, %679, %684 : vector<16x128xi32>
    %686 = arith.andi %683, %685 : vector<16x128xi1>
    %cst_246 = arith.constant 1.000000e+00 : f32
    %cst_247 = arith.constant 0.000000e+00 : f32
    %687 = vector.broadcast %cst_246 : f32 to vector<16x128xf32>
    %688 = vector.broadcast %cst_247 : f32 to vector<16x128xf32>
    %689 = arith.select %686, %687, %688 : vector<16x128xi1>, vector<16x128xf32>
    %690 = arith.addf %680, %689 : vector<16x128xf32>
    %c0_248 = arith.constant 0 : index
    %c1_249 = arith.constant 1 : index
    %691 = memref.load %arg1[%c0_248, %c1_249] : memref<8x2xi32, #tpu.memory_space<smem>>
    %c1_i32_250 = arith.constant 1 : i32
    %692 = vector.broadcast %c1_i32_250 : i32 to vector<16x128xi32>
    %693 = arith.cmpi eq, %678, %692 : vector<16x128xi32>
    %694 = vector.broadcast %691 : i32 to vector<16x128xi32>
    %695 = arith.cmpi eq, %679, %694 : vector<16x128xi32>
    %696 = arith.andi %693, %695 : vector<16x128xi1>
    %cst_251 = arith.constant 1.000000e+00 : f32
    %cst_252 = arith.constant 0.000000e+00 : f32
    %697 = vector.broadcast %cst_251 : f32 to vector<16x128xf32>
    %698 = vector.broadcast %cst_252 : f32 to vector<16x128xf32>
    %699 = arith.select %696, %697, %698 : vector<16x128xi1>, vector<16x128xf32>
    %700 = arith.addf %690, %699 : vector<16x128xf32>
    %c1_253 = arith.constant 1 : index
    %c0_254 = arith.constant 0 : index
    %701 = memref.load %arg1[%c1_253, %c0_254] : memref<8x2xi32, #tpu.memory_space<smem>>
    %c2_i32_255 = arith.constant 2 : i32
    %702 = vector.broadcast %c2_i32_255 : i32 to vector<16x128xi32>
    %703 = arith.cmpi eq, %678, %702 : vector<16x128xi32>
    %704 = vector.broadcast %701 : i32 to vector<16x128xi32>
    %705 = arith.cmpi eq, %679, %704 : vector<16x128xi32>
    %706 = arith.andi %703, %705 : vector<16x128xi1>
    %cst_256 = arith.constant 1.000000e+00 : f32
    %cst_257 = arith.constant 0.000000e+00 : f32
    %707 = vector.broadcast %cst_256 : f32 to vector<16x128xf32>
    %708 = vector.broadcast %cst_257 : f32 to vector<16x128xf32>
    %709 = arith.select %706, %707, %708 : vector<16x128xi1>, vector<16x128xf32>
    %710 = arith.addf %700, %709 : vector<16x128xf32>
    %c1_258 = arith.constant 1 : index
    %c1_259 = arith.constant 1 : index
    %711 = memref.load %arg1[%c1_258, %c1_259] : memref<8x2xi32, #tpu.memory_space<smem>>
    %c3_i32_260 = arith.constant 3 : i32
    %712 = vector.broadcast %c3_i32_260 : i32 to vector<16x128xi32>
    %713 = arith.cmpi eq, %678, %712 : vector<16x128xi32>
    %714 = vector.broadcast %711 : i32 to vector<16x128xi32>
    %715 = arith.cmpi eq, %679, %714 : vector<16x128xi32>
    %716 = arith.andi %713, %715 : vector<16x128xi1>
    %cst_261 = arith.constant 1.000000e+00 : f32
    %cst_262 = arith.constant 0.000000e+00 : f32
    %717 = vector.broadcast %cst_261 : f32 to vector<16x128xf32>
    %718 = vector.broadcast %cst_262 : f32 to vector<16x128xf32>
    %719 = arith.select %716, %717, %718 : vector<16x128xi1>, vector<16x128xf32>
    %720 = arith.addf %710, %719 : vector<16x128xf32>
    %c2_263 = arith.constant 2 : index
    %c0_264 = arith.constant 0 : index
    %721 = memref.load %arg1[%c2_263, %c0_264] : memref<8x2xi32, #tpu.memory_space<smem>>
    %c4_i32_265 = arith.constant 4 : i32
    %722 = vector.broadcast %c4_i32_265 : i32 to vector<16x128xi32>
    %723 = arith.cmpi eq, %678, %722 : vector<16x128xi32>
    %724 = vector.broadcast %721 : i32 to vector<16x128xi32>
    %725 = arith.cmpi eq, %679, %724 : vector<16x128xi32>
    %726 = arith.andi %723, %725 : vector<16x128xi1>
    %cst_266 = arith.constant 1.000000e+00 : f32
    %cst_267 = arith.constant 0.000000e+00 : f32
    %727 = vector.broadcast %cst_266 : f32 to vector<16x128xf32>
    %728 = vector.broadcast %cst_267 : f32 to vector<16x128xf32>
    %729 = arith.select %726, %727, %728 : vector<16x128xi1>, vector<16x128xf32>
    %730 = arith.addf %720, %729 : vector<16x128xf32>
    %c2_268 = arith.constant 2 : index
    %c1_269 = arith.constant 1 : index
    %731 = memref.load %arg1[%c2_268, %c1_269] : memref<8x2xi32, #tpu.memory_space<smem>>
    %c5_i32_270 = arith.constant 5 : i32
    %732 = vector.broadcast %c5_i32_270 : i32 to vector<16x128xi32>
    %733 = arith.cmpi eq, %678, %732 : vector<16x128xi32>
    %734 = vector.broadcast %731 : i32 to vector<16x128xi32>
    %735 = arith.cmpi eq, %679, %734 : vector<16x128xi32>
    %736 = arith.andi %733, %735 : vector<16x128xi1>
    %cst_271 = arith.constant 1.000000e+00 : f32
    %cst_272 = arith.constant 0.000000e+00 : f32
    %737 = vector.broadcast %cst_271 : f32 to vector<16x128xf32>
    %738 = vector.broadcast %cst_272 : f32 to vector<16x128xf32>
    %739 = arith.select %736, %737, %738 : vector<16x128xi1>, vector<16x128xf32>
    %740 = arith.addf %730, %739 : vector<16x128xf32>
    %c3_273 = arith.constant 3 : index
    %c0_274 = arith.constant 0 : index
    %741 = memref.load %arg1[%c3_273, %c0_274] : memref<8x2xi32, #tpu.memory_space<smem>>
    %c6_i32_275 = arith.constant 6 : i32
    %742 = vector.broadcast %c6_i32_275 : i32 to vector<16x128xi32>
    %743 = arith.cmpi eq, %678, %742 : vector<16x128xi32>
    %744 = vector.broadcast %741 : i32 to vector<16x128xi32>
    %745 = arith.cmpi eq, %679, %744 : vector<16x128xi32>
    %746 = arith.andi %743, %745 : vector<16x128xi1>
    %cst_276 = arith.constant 1.000000e+00 : f32
    %cst_277 = arith.constant 0.000000e+00 : f32
    %747 = vector.broadcast %cst_276 : f32 to vector<16x128xf32>
    %748 = vector.broadcast %cst_277 : f32 to vector<16x128xf32>
    %749 = arith.select %746, %747, %748 : vector<16x128xi1>, vector<16x128xf32>
    %750 = arith.addf %740, %749 : vector<16x128xf32>
    %c3_278 = arith.constant 3 : index
    %c1_279 = arith.constant 1 : index
    %751 = memref.load %arg1[%c3_278, %c1_279] : memref<8x2xi32, #tpu.memory_space<smem>>
    %c7_i32_280 = arith.constant 7 : i32
    %752 = vector.broadcast %c7_i32_280 : i32 to vector<16x128xi32>
    %753 = arith.cmpi eq, %678, %752 : vector<16x128xi32>
    %754 = vector.broadcast %751 : i32 to vector<16x128xi32>
    %755 = arith.cmpi eq, %679, %754 : vector<16x128xi32>
    %756 = arith.andi %753, %755 : vector<16x128xi1>
    %cst_281 = arith.constant 1.000000e+00 : f32
    %cst_282 = arith.constant 0.000000e+00 : f32
    %757 = vector.broadcast %cst_281 : f32 to vector<16x128xf32>
    %758 = vector.broadcast %cst_282 : f32 to vector<16x128xf32>
    %759 = arith.select %756, %757, %758 : vector<16x128xi1>, vector<16x128xf32>
    %760 = arith.addf %750, %759 : vector<16x128xf32>
    %c4_283 = arith.constant 4 : index
    %c0_284 = arith.constant 0 : index
    %761 = memref.load %arg1[%c4_283, %c0_284] : memref<8x2xi32, #tpu.memory_space<smem>>
    %c8_i32_285 = arith.constant 8 : i32
    %762 = vector.broadcast %c8_i32_285 : i32 to vector<16x128xi32>
    %763 = arith.cmpi eq, %678, %762 : vector<16x128xi32>
    %764 = vector.broadcast %761 : i32 to vector<16x128xi32>
    %765 = arith.cmpi eq, %679, %764 : vector<16x128xi32>
    %766 = arith.andi %763, %765 : vector<16x128xi1>
    %cst_286 = arith.constant 1.000000e+00 : f32
    %cst_287 = arith.constant 0.000000e+00 : f32
    %767 = vector.broadcast %cst_286 : f32 to vector<16x128xf32>
    %768 = vector.broadcast %cst_287 : f32 to vector<16x128xf32>
    %769 = arith.select %766, %767, %768 : vector<16x128xi1>, vector<16x128xf32>
    %770 = arith.addf %760, %769 : vector<16x128xf32>
    %c4_288 = arith.constant 4 : index
    %c1_289 = arith.constant 1 : index
    %771 = memref.load %arg1[%c4_288, %c1_289] : memref<8x2xi32, #tpu.memory_space<smem>>
    %c9_i32_290 = arith.constant 9 : i32
    %772 = vector.broadcast %c9_i32_290 : i32 to vector<16x128xi32>
    %773 = arith.cmpi eq, %678, %772 : vector<16x128xi32>
    %774 = vector.broadcast %771 : i32 to vector<16x128xi32>
    %775 = arith.cmpi eq, %679, %774 : vector<16x128xi32>
    %776 = arith.andi %773, %775 : vector<16x128xi1>
    %cst_291 = arith.constant 1.000000e+00 : f32
    %cst_292 = arith.constant 0.000000e+00 : f32
    %777 = vector.broadcast %cst_291 : f32 to vector<16x128xf32>
    %778 = vector.broadcast %cst_292 : f32 to vector<16x128xf32>
    %779 = arith.select %776, %777, %778 : vector<16x128xi1>, vector<16x128xf32>
    %780 = arith.addf %770, %779 : vector<16x128xf32>
    %c5_293 = arith.constant 5 : index
    %c0_294 = arith.constant 0 : index
    %781 = memref.load %arg1[%c5_293, %c0_294] : memref<8x2xi32, #tpu.memory_space<smem>>
    %c10_i32_295 = arith.constant 10 : i32
    %782 = vector.broadcast %c10_i32_295 : i32 to vector<16x128xi32>
    %783 = arith.cmpi eq, %678, %782 : vector<16x128xi32>
    %784 = vector.broadcast %781 : i32 to vector<16x128xi32>
    %785 = arith.cmpi eq, %679, %784 : vector<16x128xi32>
    %786 = arith.andi %783, %785 : vector<16x128xi1>
    %cst_296 = arith.constant 1.000000e+00 : f32
    %cst_297 = arith.constant 0.000000e+00 : f32
    %787 = vector.broadcast %cst_296 : f32 to vector<16x128xf32>
    %788 = vector.broadcast %cst_297 : f32 to vector<16x128xf32>
    %789 = arith.select %786, %787, %788 : vector<16x128xi1>, vector<16x128xf32>
    %790 = arith.addf %780, %789 : vector<16x128xf32>
    %c5_298 = arith.constant 5 : index
    %c1_299 = arith.constant 1 : index
    %791 = memref.load %arg1[%c5_298, %c1_299] : memref<8x2xi32, #tpu.memory_space<smem>>
    %c11_i32_300 = arith.constant 11 : i32
    %792 = vector.broadcast %c11_i32_300 : i32 to vector<16x128xi32>
    %793 = arith.cmpi eq, %678, %792 : vector<16x128xi32>
    %794 = vector.broadcast %791 : i32 to vector<16x128xi32>
    %795 = arith.cmpi eq, %679, %794 : vector<16x128xi32>
    %796 = arith.andi %793, %795 : vector<16x128xi1>
    %cst_301 = arith.constant 1.000000e+00 : f32
    %cst_302 = arith.constant 0.000000e+00 : f32
    %797 = vector.broadcast %cst_301 : f32 to vector<16x128xf32>
    %798 = vector.broadcast %cst_302 : f32 to vector<16x128xf32>
    %799 = arith.select %796, %797, %798 : vector<16x128xi1>, vector<16x128xf32>
    %800 = arith.addf %790, %799 : vector<16x128xf32>
    %c6_303 = arith.constant 6 : index
    %c0_304 = arith.constant 0 : index
    %801 = memref.load %arg1[%c6_303, %c0_304] : memref<8x2xi32, #tpu.memory_space<smem>>
    %c12_i32_305 = arith.constant 12 : i32
    %802 = vector.broadcast %c12_i32_305 : i32 to vector<16x128xi32>
    %803 = arith.cmpi eq, %678, %802 : vector<16x128xi32>
    %804 = vector.broadcast %801 : i32 to vector<16x128xi32>
    %805 = arith.cmpi eq, %679, %804 : vector<16x128xi32>
    %806 = arith.andi %803, %805 : vector<16x128xi1>
    %cst_306 = arith.constant 1.000000e+00 : f32
    %cst_307 = arith.constant 0.000000e+00 : f32
    %807 = vector.broadcast %cst_306 : f32 to vector<16x128xf32>
    %808 = vector.broadcast %cst_307 : f32 to vector<16x128xf32>
    %809 = arith.select %806, %807, %808 : vector<16x128xi1>, vector<16x128xf32>
    %810 = arith.addf %800, %809 : vector<16x128xf32>
    %c6_308 = arith.constant 6 : index
    %c1_309 = arith.constant 1 : index
    %811 = memref.load %arg1[%c6_308, %c1_309] : memref<8x2xi32, #tpu.memory_space<smem>>
    %c13_i32_310 = arith.constant 13 : i32
    %812 = vector.broadcast %c13_i32_310 : i32 to vector<16x128xi32>
    %813 = arith.cmpi eq, %678, %812 : vector<16x128xi32>
    %814 = vector.broadcast %811 : i32 to vector<16x128xi32>
    %815 = arith.cmpi eq, %679, %814 : vector<16x128xi32>
    %816 = arith.andi %813, %815 : vector<16x128xi1>
    %cst_311 = arith.constant 1.000000e+00 : f32
    %cst_312 = arith.constant 0.000000e+00 : f32
    %817 = vector.broadcast %cst_311 : f32 to vector<16x128xf32>
    %818 = vector.broadcast %cst_312 : f32 to vector<16x128xf32>
    %819 = arith.select %816, %817, %818 : vector<16x128xi1>, vector<16x128xf32>
    %820 = arith.addf %810, %819 : vector<16x128xf32>
    %c7_313 = arith.constant 7 : index
    %c0_314 = arith.constant 0 : index
    %821 = memref.load %arg1[%c7_313, %c0_314] : memref<8x2xi32, #tpu.memory_space<smem>>
    %c14_i32 = arith.constant 14 : i32
    %822 = vector.broadcast %c14_i32 : i32 to vector<16x128xi32>
    %823 = arith.cmpi eq, %678, %822 : vector<16x128xi32>
    %824 = vector.broadcast %821 : i32 to vector<16x128xi32>
    %825 = arith.cmpi eq, %679, %824 : vector<16x128xi32>
    %826 = arith.andi %823, %825 : vector<16x128xi1>
    %cst_315 = arith.constant 1.000000e+00 : f32
    %cst_316 = arith.constant 0.000000e+00 : f32
    %827 = vector.broadcast %cst_315 : f32 to vector<16x128xf32>
    %828 = vector.broadcast %cst_316 : f32 to vector<16x128xf32>
    %829 = arith.select %826, %827, %828 : vector<16x128xi1>, vector<16x128xf32>
    %830 = arith.addf %820, %829 : vector<16x128xf32>
    %c7_317 = arith.constant 7 : index
    %c1_318 = arith.constant 1 : index
    %831 = memref.load %arg1[%c7_317, %c1_318] : memref<8x2xi32, #tpu.memory_space<smem>>
    %c15_i32 = arith.constant 15 : i32
    %832 = vector.broadcast %c15_i32 : i32 to vector<16x128xi32>
    %833 = arith.cmpi eq, %678, %832 : vector<16x128xi32>
    %834 = vector.broadcast %831 : i32 to vector<16x128xi32>
    %835 = arith.cmpi eq, %679, %834 : vector<16x128xi32>
    %836 = arith.andi %833, %835 : vector<16x128xi1>
    %cst_319 = arith.constant 1.000000e+00 : f32
    %cst_320 = arith.constant 0.000000e+00 : f32
    %837 = vector.broadcast %cst_319 : f32 to vector<16x128xf32>
    %838 = vector.broadcast %cst_320 : f32 to vector<16x128xf32>
    %839 = arith.select %836, %837, %838 : vector<16x128xi1>, vector<16x128xf32>
    %840 = arith.addf %830, %839 : vector<16x128xf32>
    %c0_321 = arith.constant 0 : index
    %c0_322 = arith.constant 0 : index
    %841 = vector.load %arg19[%c0_321, %c0_322] : memref<128x16xf32, #tpu.memory_space<vmem>>, vector<128x16xf32>
    %cst_323 = arith.constant dense<0.000000e+00> : vector<16x16xf32>
    %842 = tpu.matmul %840, %841, %cst_323 {dimension_numbers = #tpu.dot_dimension_numbers<[1], [0], [0], [1], [0, 0, 1, 1], [], []>} : vector<16x128xf32>, vector<128x16xf32>, vector<16x16xf32> -> vector<16x16xf32>
    %843 = tpu.iota {dimensions = array<i32: 0>} : vector<16x2xi32>
    %844 = tpu.iota {dimensions = array<i32: 1>} : vector<16x2xi32>
    %c7_i32_324 = arith.constant 7 : i32
    %845 = vector.broadcast %c7_i32_324 : i32 to vector<16x2xi32>
    %846 = arith.muli %844, %845 : vector<16x2xi32>
    %847 = arith.cmpi sge, %843, %846 : vector<16x2xi32>
    %c1_i32_325 = arith.constant 1 : i32
    %848 = vector.broadcast %c1_i32_325 : i32 to vector<16x2xi32>
    %849 = arith.addi %844, %848 : vector<16x2xi32>
    %c7_i32_326 = arith.constant 7 : i32
    %850 = vector.broadcast %c7_i32_326 : i32 to vector<16x2xi32>
    %851 = arith.muli %849, %850 : vector<16x2xi32>
    %852 = arith.cmpi slt, %843, %851 : vector<16x2xi32>
    %853 = arith.andi %847, %852 : vector<16x2xi1>
    %854 = arith.extui %853 : vector<16x2xi1> to vector<16x2xi32>
    %855 = arith.sitofp %854 : vector<16x2xi32> to vector<16x2xf32>
    %cst_327 = arith.constant 0.000000e+00 : f32
    %cst_328 = arith.constant -1.000000e+30 : f32
    %856 = vector.broadcast %cst_327 : f32 to vector<16x2xf32>
    %857 = vector.broadcast %cst_328 : f32 to vector<16x2xf32>
    %858 = arith.select %853, %856, %857 : vector<16x2xi1>, vector<16x2xf32>
    %859 = tpu.iota {dimensions = array<i32: 0>} : vector<2x16xi32>
    %860 = tpu.iota {dimensions = array<i32: 1>} : vector<2x16xi32>
    %c7_i32_329 = arith.constant 7 : i32
    %861 = vector.broadcast %c7_i32_329 : i32 to vector<2x16xi32>
    %862 = arith.muli %859, %861 : vector<2x16xi32>
    %863 = arith.cmpi sge, %860, %862 : vector<2x16xi32>
    %c1_i32_330 = arith.constant 1 : i32
    %864 = vector.broadcast %c1_i32_330 : i32 to vector<2x16xi32>
    %865 = arith.addi %859, %864 : vector<2x16xi32>
    %c7_i32_331 = arith.constant 7 : i32
    %866 = vector.broadcast %c7_i32_331 : i32 to vector<2x16xi32>
    %867 = arith.muli %865, %866 : vector<2x16xi32>
    %868 = arith.cmpi slt, %860, %867 : vector<2x16xi32>
    %869 = arith.andi %863, %868 : vector<2x16xi1>
    %870 = arith.extui %869 : vector<2x16xi1> to vector<2x16xi32>
    %871 = arith.sitofp %870 : vector<2x16xi32> to vector<2x16xf32>
    %c0_332 = arith.constant 0 : index
    %c0_333 = arith.constant 0 : index
    %872 = vector.load %arg18[%c0_332, %c0_333] : memref<1x32xf32, #tpu.memory_space<vmem>>, vector<1x32xf32>
    %873 = tpu.iota {dimensions = array<i32: 1>} : vector<2x128xi32>
    %cst_334 = arith.constant 0.000000e+00 : f32
    %874 = vector.broadcast %cst_334 : f32 to vector<2x128xf32>
    %c0_335 = arith.constant 0 : index
    %c0_336 = arith.constant 0 : index
    %875 = vector.load %arg28[%c0_335, %c0_336] : memref<2x128xf32, #tpu.memory_space<vmem>>, vector<2x128xf32>
    tpu.vector_store %arg28[%c0_335, %c0_336], %874 {strides = array<i32>} : memref<2x128xf32, #tpu.memory_space<vmem>>, vector<2x128xf32>,
    %cst_337 = arith.constant 0.000000e+00 : f32
    %876 = vector.broadcast %cst_337 : f32 to vector<2x128xf32>
    %c0_338 = arith.constant 0 : index
    %c0_339 = arith.constant 0 : index
    %c0_340 = arith.constant 0 : index
    %877 = vector.load %arg26[%c0_338, %c0_339, %c0_340] : memref<8x2x128xf32, #tpu.memory_space<vmem>>, vector<1x2x128xf32>
    %878 = vector.shape_cast %877 : vector<1x2x128xf32> to vector<2x128xf32>
    %879 = vector.shape_cast %876 : vector<2x128xf32> to vector<1x2x128xf32>
    tpu.vector_store %arg26[%c0_338, %c0_339, %c0_340], %879 {strides = array<i32>} : memref<8x2x128xf32, #tpu.memory_space<vmem>>, vector<1x2x128xf32>,
    %880 = vector.extract_strided_slice %842 {offsets = [0, 0], sizes = [2, 16], strides = [1, 1]} : vector<16x16xf32> to vector<2x16xf32>
    %c0_341 = arith.constant 0 : index
    %c0_342 = arith.constant 0 : index
    %881 = vector.load %arg17[%c0_341, %c0_342] : memref<32x32xf32, #tpu.memory_space<vmem>>, vector<32x32xf32>
    %cst_343 = arith.constant dense<0.000000e+00> : vector<2x32xf32>
    %882 = tpu.matmul %671, %881, %cst_343 {dimension_numbers = #tpu.dot_dimension_numbers<[1], [0], [0], [1], [0, 0, 1, 1], [], []>} : vector<2x32xf32>, vector<32x32xf32>, vector<2x32xf32> -> vector<2x32xf32>
    %883 = vector.extract_strided_slice %855 {offsets = [0, 0], sizes = [16, 1], strides = [1, 1]} : vector<16x2xf32> to vector<16x1xf32>
    %884 = vector.extract_strided_slice %882 {offsets = [0, 0], sizes = [1, 32], strides = [1, 1]} : vector<2x32xf32> to vector<1x32xf32>
    %885 = vector.broadcast %883 : vector<16x1xf32> to vector<16x32xf32>
    %886 = vector.broadcast %884 : vector<1x32xf32> to vector<16x32xf32>
    %887 = arith.mulf %885, %886 : vector<16x32xf32>
    %888 = vector.extract_strided_slice %855 {offsets = [0, 1], sizes = [16, 1], strides = [1, 1]} : vector<16x2xf32> to vector<16x1xf32>
    %889 = vector.extract_strided_slice %882 {offsets = [1, 0], sizes = [1, 32], strides = [1, 1]} : vector<2x32xf32> to vector<1x32xf32>
    %890 = vector.broadcast %888 : vector<16x1xf32> to vector<16x32xf32>
    %891 = vector.broadcast %889 : vector<1x32xf32> to vector<16x32xf32>
    %892 = arith.mulf %890, %891 : vector<16x32xf32>
    %893 = arith.addf %887, %892 : vector<16x32xf32>
    %894 = arith.addf %893, %677 : vector<16x32xf32>
    %895 = math.tanh %894 : vector<16x32xf32>
    %896 = vector.broadcast %872 : vector<1x32xf32> to vector<16x32xf32>
    %897 = arith.mulf %895, %896 : vector<16x32xf32>
    %cst_344 = arith.constant dense<0.000000e+00> : vector<16xf32>
    %898 = vector.multi_reduction <add>, %897, %cst_344 [1] : vector<16x32xf32> to vector<16xf32>
    %899 = vector.shape_cast %898 : vector<16xf32> to vector<16x1xf32>
    %900 = vector.broadcast %899 : vector<16x1xf32> to vector<16x2xf32>
    %901 = arith.addf %900, %858 : vector<16x2xf32>
    %cst_345 = arith.constant dense<0xFF800000> : vector<2xf32>
    %902 = vector.multi_reduction <maximumf>, %901, %cst_345 [0] : vector<16x2xf32> to vector<2xf32>
    %903 = vector.shape_cast %902 : vector<2xf32> to vector<1x2xf32>
    %904 = vector.broadcast %903 : vector<1x2xf32> to vector<16x2xf32>
    %905 = arith.subf %901, %904 : vector<16x2xf32>
    %906 = math.exp %905 : vector<16x2xf32>
    %cst_346 = arith.constant dense<0.000000e+00> : vector<2xf32>
    %907 = vector.multi_reduction <add>, %906, %cst_346 [0] : vector<16x2xf32> to vector<2xf32>
    %908 = vector.shape_cast %907 : vector<2xf32> to vector<1x2xf32>
    %909 = vector.broadcast %908 : vector<1x2xf32> to vector<16x2xf32>
    %910 = arith.divf %906, %909 : vector<16x2xf32>
    %cst_347 = arith.constant dense<0.000000e+00> : vector<16xf32>
    %911 = vector.multi_reduction <add>, %910, %cst_347 [1] : vector<16x2xf32> to vector<16xf32>
    %912 = vector.shape_cast %911 : vector<16xf32> to vector<16x1xf32>
    %913 = vector.broadcast %912 : vector<16x1xf32> to vector<16x64xf32>
    %914 = arith.mulf %913, %672 : vector<16x64xf32>
    %cst_348 = arith.constant dense<0.000000e+00> : vector<2x64xf32>
    %915 = tpu.matmul %871, %914, %cst_348 {dimension_numbers = #tpu.dot_dimension_numbers<[1], [0], [0], [1], [0, 0, 1, 1], [], []>} : vector<2x16xf32>, vector<16x64xf32>, vector<2x64xf32> -> vector<2x64xf32>
    %c0_349 = arith.constant 0 : index
    %c32_350 = arith.constant 32 : index
    %916 = vector.load %arg28[%c0_349, %c32_350] : memref<2x128xf32, #tpu.memory_space<vmem>>, vector<2x64xf32>
    tpu.vector_store %arg28[%c0_349, %c32_350], %915 {strides = array<i32>} : memref<2x128xf32, #tpu.memory_space<vmem>>, vector<2x64xf32>,
    %c0_351 = arith.constant 0 : index
    %c96 = arith.constant 96 : index
    %917 = vector.load %arg28[%c0_351, %c96] : memref<2x128xf32, #tpu.memory_space<vmem>>, vector<2x16xf32>
    tpu.vector_store %arg28[%c0_351, %c96], %880 {strides = array<i32>} : memref<2x128xf32, #tpu.memory_space<vmem>>, vector<2x16xf32>,
    %c0_352 = arith.constant 0 : index
    %c0_353 = arith.constant 0 : index
    %918 = vector.load %arg28[%c0_352, %c0_353] : memref<2x128xf32, #tpu.memory_space<vmem>>, vector<2x128xf32>
    %c0_354 = arith.constant 0 : index
    %c0_355 = arith.constant 0 : index
    %919 = vector.load %arg20[%c0_354, %c0_355] : memref<128x128xf32, #tpu.memory_space<vmem>>, vector<128x128xf32>
    %cst_356 = arith.constant dense<0.000000e+00> : vector<2x128xf32>
    %920 = tpu.matmul %918, %919, %cst_356 {dimension_numbers = #tpu.dot_dimension_numbers<[1], [0], [0], [1], [0, 0, 1, 1], [], []>} : vector<2x128xf32>, vector<128x128xf32>, vector<2x128xf32> -> vector<2x128xf32>
    %c0_357 = arith.constant 0 : index
    %c0_358 = arith.constant 0 : index
    %921 = vector.load %arg22[%c0_357, %c0_358] : memref<1x128xf32, #tpu.memory_space<vmem>>, vector<1x128xf32>
    %922 = vector.broadcast %921 : vector<1x128xf32> to vector<2x128xf32>
    %923 = arith.addf %920, %922 : vector<2x128xf32>
    %c0_359 = arith.constant 0 : index
    %c0_360 = arith.constant 0 : index
    %924 = vector.load %arg21[%c0_359, %c0_360] : memref<32x128xf32, #tpu.memory_space<vmem>>, vector<32x128xf32>
    %cst_361 = arith.constant dense<0.000000e+00> : vector<2x128xf32>
    %925 = tpu.matmul %671, %924, %cst_361 {dimension_numbers = #tpu.dot_dimension_numbers<[1], [0], [0], [1], [0, 0, 1, 1], [], []>} : vector<2x32xf32>, vector<32x128xf32>, vector<2x128xf32> -> vector<2x128xf32>
    %c0_362 = arith.constant 0 : index
    %c0_363 = arith.constant 0 : index
    %926 = vector.load %arg23[%c0_362, %c0_363] : memref<1x128xf32, #tpu.memory_space<vmem>>, vector<1x128xf32>
    %927 = vector.broadcast %926 : vector<1x128xf32> to vector<2x128xf32>
    %928 = arith.addf %925, %927 : vector<2x128xf32>
    %929 = vector.extract_strided_slice %923 {offsets = [0, 0], sizes = [2, 32], strides = [1, 1]} : vector<2x128xf32> to vector<2x32xf32>
    %930 = vector.extract_strided_slice %928 {offsets = [0, 0], sizes = [2, 32], strides = [1, 1]} : vector<2x128xf32> to vector<2x32xf32>
    %931 = arith.addf %929, %930 : vector<2x32xf32>
    %932 = arith.negf %931 : vector<2x32xf32>
    %933 = math.exp %932 : vector<2x32xf32>
    %cst_364 = arith.constant 1.000000e+00 : f32
    %934 = vector.broadcast %cst_364 : f32 to vector<2x32xf32>
    %935 = arith.addf %934, %933 : vector<2x32xf32>
    %936 = arith.divf %934, %935 : vector<2x32xf32>
    %937 = vector.extract_strided_slice %923 {offsets = [0, 32], sizes = [2, 32], strides = [1, 1]} : vector<2x128xf32> to vector<2x32xf32>
    %938 = vector.extract_strided_slice %928 {offsets = [0, 32], sizes = [2, 32], strides = [1, 1]} : vector<2x128xf32> to vector<2x32xf32>
    %939 = arith.addf %937, %938 : vector<2x32xf32>
    %940 = arith.negf %939 : vector<2x32xf32>
    %941 = math.exp %940 : vector<2x32xf32>
    %cst_365 = arith.constant 1.000000e+00 : f32
    %942 = vector.broadcast %cst_365 : f32 to vector<2x32xf32>
    %943 = arith.addf %942, %941 : vector<2x32xf32>
    %944 = arith.divf %942, %943 : vector<2x32xf32>
    %945 = vector.extract_strided_slice %923 {offsets = [0, 64], sizes = [2, 32], strides = [1, 1]} : vector<2x128xf32> to vector<2x32xf32>
    %946 = vector.extract_strided_slice %928 {offsets = [0, 64], sizes = [2, 32], strides = [1, 1]} : vector<2x128xf32> to vector<2x32xf32>
    %947 = arith.mulf %936, %946 : vector<2x32xf32>
    %948 = arith.addf %945, %947 : vector<2x32xf32>
    %949 = math.tanh %948 : vector<2x32xf32>
    %cst_366 = arith.constant 1.000000e+00 : f32
    %950 = vector.broadcast %cst_366 : f32 to vector<2x32xf32>
    %951 = arith.subf %950, %944 : vector<2x32xf32>
    %952 = arith.mulf %951, %949 : vector<2x32xf32>
    %953 = arith.mulf %944, %671 : vector<2x32xf32>
    %954 = arith.addf %952, %953 : vector<2x32xf32>
    %c0_367 = arith.constant 0 : index
    %c0_368 = arith.constant 0 : index
    %955 = vector.load %arg28[%c0_367, %c0_368] : memref<2x128xf32, #tpu.memory_space<vmem>>, vector<2x32xf32>
    tpu.vector_store %arg28[%c0_367, %c0_368], %954 {strides = array<i32>} : memref<2x128xf32, #tpu.memory_space<vmem>>, vector<2x32xf32>,
    %c0_369 = arith.constant 0 : index
    %c0_370 = arith.constant 0 : index
    %956 = vector.load %arg28[%c0_369, %c0_370] : memref<2x128xf32, #tpu.memory_space<vmem>>, vector<2x128xf32>
    %c0_371 = arith.constant 0 : index
    %c0_372 = arith.constant 0 : index
    %957 = vector.load %arg24[%c0_371, %c0_372] : memref<128x128xf32, #tpu.memory_space<vmem>>, vector<128x128xf32>
    %cst_373 = arith.constant dense<0.000000e+00> : vector<2x128xf32>
    %958 = tpu.matmul %956, %957, %cst_373 {dimension_numbers = #tpu.dot_dimension_numbers<[1], [0], [0], [1], [0, 0, 1, 1], [], []>} : vector<2x128xf32>, vector<128x128xf32>, vector<2x128xf32> -> vector<2x128xf32>
    %c0_374 = arith.constant 0 : index
    %c0_375 = arith.constant 0 : index
    %959 = vector.load %arg25[%c0_374, %c0_375] : memref<1x128xf32, #tpu.memory_space<vmem>>, vector<1x128xf32>
    %960 = vector.broadcast %959 : vector<1x128xf32> to vector<2x128xf32>
    %961 = arith.addf %958, %960 : vector<2x128xf32>
    %c1_376 = arith.constant 1 : index
    %c0_377 = arith.constant 0 : index
    %c0_378 = arith.constant 0 : index
    %962 = vector.load %arg26[%c1_376, %c0_377, %c0_378] : memref<8x2x128xf32, #tpu.memory_space<vmem>>, vector<1x2x128xf32>
    %963 = vector.shape_cast %962 : vector<1x2x128xf32> to vector<2x128xf32>
    %964 = vector.shape_cast %961 : vector<2x128xf32> to vector<1x2x128xf32>
    tpu.vector_store %arg26[%c1_376, %c0_377, %c0_378], %964 {strides = array<i32>} : memref<8x2x128xf32, #tpu.memory_space<vmem>>, vector<1x2x128xf32>,
    %cst_379 = arith.constant dense<0xFF800000> : vector<2xf32>
    %965 = vector.multi_reduction <maximumf>, %961, %cst_379 [1] : vector<2x128xf32> to vector<2xf32>
    %966 = vector.shape_cast %965 : vector<2xf32> to vector<2x1xf32>
    %967 = vector.broadcast %966 : vector<2x1xf32> to vector<2x128xf32>
    %968 = arith.cmpf oeq, %961, %967 : vector<2x128xf32>
    %c128_i32 = arith.constant 128 : i32
    %969 = vector.broadcast %c128_i32 : i32 to vector<2x128xi32>
    %970 = arith.select %968, %873, %969 : vector<2x128xi1>, vector<2x128xi32>
    %cst_380 = arith.constant dense<2147483647> : vector<2xi32>
    %971 = vector.multi_reduction <minsi>, %970, %cst_380 [1] : vector<2x128xi32> to vector<2xi32>
    %972 = vector.shape_cast %971 : vector<2xi32> to vector<2x1xi32>
    %973 = vector.broadcast %972 : vector<2x1xi32> to vector<2x128xi32>
    %974 = arith.cmpi eq, %873, %973 : vector<2x128xi32>
    %975 = arith.extui %974 : vector<2x128xi1> to vector<2x128xi32>
    %976 = arith.sitofp %975 : vector<2x128xi32> to vector<2x128xf32>
    %c0_381 = arith.constant 0 : index
    %c0_382 = arith.constant 0 : index
    %977 = vector.load %arg19[%c0_381, %c0_382] : memref<128x16xf32, #tpu.memory_space<vmem>>, vector<128x16xf32>
    %cst_383 = arith.constant dense<0.000000e+00> : vector<2x16xf32>
    %978 = tpu.matmul %976, %977, %cst_383 {dimension_numbers = #tpu.dot_dimension_numbers<[1], [0], [0], [1], [0, 0, 1, 1], [], []>} : vector<2x128xf32>, vector<128x16xf32>, vector<2x16xf32> -> vector<2x16xf32>
    %c1_384 = arith.constant 1 : index
    %979 = memref.load %arg2[%c1_384] : memref<8xi32, #tpu.memory_space<smem>>
    %c0_i32_385 = arith.constant 0 : i32
    %980 = arith.cmpi sgt, %979, %c0_i32_385 : i32
    %981 = arith.extui %980 : i1 to i32
    %982 = arith.sitofp %981 : i32 to f32
    %983 = vector.extract_strided_slice %842 {offsets = [2, 0], sizes = [2, 16], strides = [1, 1]} : vector<16x16xf32> to vector<2x16xf32>
    %984 = vector.broadcast %982 : f32 to vector<2x16xf32>
    %985 = arith.mulf %984, %983 : vector<2x16xf32>
    %cst_386 = arith.constant 1.000000e+00 : f32
    %986 = arith.subf %cst_386, %982 : f32
    %987 = vector.broadcast %986 : f32 to vector<2x16xf32>
    %988 = arith.mulf %987, %978 : vector<2x16xf32>
    %989 = arith.addf %985, %988 : vector<2x16xf32>
    %c0_387 = arith.constant 0 : index
    %c0_388 = arith.constant 0 : index
    %990 = vector.load %arg17[%c0_387, %c0_388] : memref<32x32xf32, #tpu.memory_space<vmem>>, vector<32x32xf32>
    %cst_389 = arith.constant dense<0.000000e+00> : vector<2x32xf32>
    %991 = tpu.matmul %954, %990, %cst_389 {dimension_numbers = #tpu.dot_dimension_numbers<[1], [0], [0], [1], [0, 0, 1, 1], [], []>} : vector<2x32xf32>, vector<32x32xf32>, vector<2x32xf32> -> vector<2x32xf32>
    %992 = vector.extract_strided_slice %855 {offsets = [0, 0], sizes = [16, 1], strides = [1, 1]} : vector<16x2xf32> to vector<16x1xf32>
    %993 = vector.extract_strided_slice %991 {offsets = [0, 0], sizes = [1, 32], strides = [1, 1]} : vector<2x32xf32> to vector<1x32xf32>
    %994 = vector.broadcast %992 : vector<16x1xf32> to vector<16x32xf32>
    %995 = vector.broadcast %993 : vector<1x32xf32> to vector<16x32xf32>
    %996 = arith.mulf %994, %995 : vector<16x32xf32>
    %997 = vector.extract_strided_slice %855 {offsets = [0, 1], sizes = [16, 1], strides = [1, 1]} : vector<16x2xf32> to vector<16x1xf32>
    %998 = vector.extract_strided_slice %991 {offsets = [1, 0], sizes = [1, 32], strides = [1, 1]} : vector<2x32xf32> to vector<1x32xf32>
    %999 = vector.broadcast %997 : vector<16x1xf32> to vector<16x32xf32>
    %1000 = vector.broadcast %998 : vector<1x32xf32> to vector<16x32xf32>
    %1001 = arith.mulf %999, %1000 : vector<16x32xf32>
    %1002 = arith.addf %996, %1001 : vector<16x32xf32>
    %1003 = arith.addf %1002, %677 : vector<16x32xf32>
    %1004 = math.tanh %1003 : vector<16x32xf32>
    %1005 = vector.broadcast %872 : vector<1x32xf32> to vector<16x32xf32>
    %1006 = arith.mulf %1004, %1005 : vector<16x32xf32>
    %cst_390 = arith.constant dense<0.000000e+00> : vector<16xf32>
    %1007 = vector.multi_reduction <add>, %1006, %cst_390 [1] : vector<16x32xf32> to vector<16xf32>
    %1008 = vector.shape_cast %1007 : vector<16xf32> to vector<16x1xf32>
    %1009 = vector.broadcast %1008 : vector<16x1xf32> to vector<16x2xf32>
    %1010 = arith.addf %1009, %858 : vector<16x2xf32>
    %cst_391 = arith.constant dense<0xFF800000> : vector<2xf32>
    %1011 = vector.multi_reduction <maximumf>, %1010, %cst_391 [0] : vector<16x2xf32> to vector<2xf32>
    %1012 = vector.shape_cast %1011 : vector<2xf32> to vector<1x2xf32>
    %1013 = vector.broadcast %1012 : vector<1x2xf32> to vector<16x2xf32>
    %1014 = arith.subf %1010, %1013 : vector<16x2xf32>
    %1015 = math.exp %1014 : vector<16x2xf32>
    %cst_392 = arith.constant dense<0.000000e+00> : vector<2xf32>
    %1016 = vector.multi_reduction <add>, %1015, %cst_392 [0] : vector<16x2xf32> to vector<2xf32>
    %1017 = vector.shape_cast %1016 : vector<2xf32> to vector<1x2xf32>
    %1018 = vector.broadcast %1017 : vector<1x2xf32> to vector<16x2xf32>
    %1019 = arith.divf %1015, %1018 : vector<16x2xf32>
    %cst_393 = arith.constant dense<0.000000e+00> : vector<16xf32>
    %1020 = vector.multi_reduction <add>, %1019, %cst_393 [1] : vector<16x2xf32> to vector<16xf32>
    %1021 = vector.shape_cast %1020 : vector<16xf32> to vector<16x1xf32>
    %1022 = vector.broadcast %1021 : vector<16x1xf32> to vector<16x64xf32>
    %1023 = arith.mulf %1022, %672 : vector<16x64xf32>
    %cst_394 = arith.constant dense<0.000000e+00> : vector<2x64xf32>
    %1024 = tpu.matmul %871, %1023, %cst_394 {dimension_numbers = #tpu.dot_dimension_numbers<[1], [0], [0], [1], [0, 0, 1, 1], [], []>} : vector<2x16xf32>, vector<16x64xf32>, vector<2x64xf32> -> vector<2x64xf32>
    %c0_395 = arith.constant 0 : index
    %c32_396 = arith.constant 32 : index
    %1025 = vector.load %arg28[%c0_395, %c32_396] : memref<2x128xf32, #tpu.memory_space<vmem>>, vector<2x64xf32>
    tpu.vector_store %arg28[%c0_395, %c32_396], %1024 {strides = array<i32>} : memref<2x128xf32, #tpu.memory_space<vmem>>, vector<2x64xf32>,
    %c0_397 = arith.constant 0 : index
    %c96_398 = arith.constant 96 : index
    %1026 = vector.load %arg28[%c0_397, %c96_398] : memref<2x128xf32, #tpu.memory_space<vmem>>, vector<2x16xf32>
    tpu.vector_store %arg28[%c0_397, %c96_398], %989 {strides = array<i32>} : memref<2x128xf32, #tpu.memory_space<vmem>>, vector<2x16xf32>,
    %c0_399 = arith.constant 0 : index
    %c0_400 = arith.constant 0 : index
    %1027 = vector.load %arg28[%c0_399, %c0_400] : memref<2x128xf32, #tpu.memory_space<vmem>>, vector<2x128xf32>
    %c0_401 = arith.constant 0 : index
    %c0_402 = arith.constant 0 : index
    %1028 = vector.load %arg20[%c0_401, %c0_402] : memref<128x128xf32, #tpu.memory_space<vmem>>, vector<128x128xf32>
    %cst_403 = arith.constant dense<0.000000e+00> : vector<2x128xf32>
    %1029 = tpu.matmul %1027, %1028, %cst_403 {dimension_numbers = #tpu.dot_dimension_numbers<[1], [0], [0], [1], [0, 0, 1, 1], [], []>} : vector<2x128xf32>, vector<128x128xf32>, vector<2x128xf32> -> vector<2x128xf32>
    %c0_404 = arith.constant 0 : index
    %c0_405 = arith.constant 0 : index
    %1030 = vector.load %arg22[%c0_404, %c0_405] : memref<1x128xf32, #tpu.memory_space<vmem>>, vector<1x128xf32>
    %1031 = vector.broadcast %1030 : vector<1x128xf32> to vector<2x128xf32>
    %1032 = arith.addf %1029, %1031 : vector<2x128xf32>
    %c0_406 = arith.constant 0 : index
    %c0_407 = arith.constant 0 : index
    %1033 = vector.load %arg21[%c0_406, %c0_407] : memref<32x128xf32, #tpu.memory_space<vmem>>, vector<32x128xf32>
    %cst_408 = arith.constant dense<0.000000e+00> : vector<2x128xf32>
    %1034 = tpu.matmul %954, %1033, %cst_408 {dimension_numbers = #tpu.dot_dimension_numbers<[1], [0], [0], [1], [0, 0, 1, 1], [], []>} : vector<2x32xf32>, vector<32x128xf32>, vector<2x128xf32> -> vector<2x128xf32>
    %c0_409 = arith.constant 0 : index
    %c0_410 = arith.constant 0 : index
    %1035 = vector.load %arg23[%c0_409, %c0_410] : memref<1x128xf32, #tpu.memory_space<vmem>>, vector<1x128xf32>
    %1036 = vector.broadcast %1035 : vector<1x128xf32> to vector<2x128xf32>
    %1037 = arith.addf %1034, %1036 : vector<2x128xf32>
    %1038 = vector.extract_strided_slice %1032 {offsets = [0, 0], sizes = [2, 32], strides = [1, 1]} : vector<2x128xf32> to vector<2x32xf32>
    %1039 = vector.extract_strided_slice %1037 {offsets = [0, 0], sizes = [2, 32], strides = [1, 1]} : vector<2x128xf32> to vector<2x32xf32>
    %1040 = arith.addf %1038, %1039 : vector<2x32xf32>
    %1041 = arith.negf %1040 : vector<2x32xf32>
    %1042 = math.exp %1041 : vector<2x32xf32>
    %cst_411 = arith.constant 1.000000e+00 : f32
    %1043 = vector.broadcast %cst_411 : f32 to vector<2x32xf32>
    %1044 = arith.addf %1043, %1042 : vector<2x32xf32>
    %1045 = arith.divf %1043, %1044 : vector<2x32xf32>
    %1046 = vector.extract_strided_slice %1032 {offsets = [0, 32], sizes = [2, 32], strides = [1, 1]} : vector<2x128xf32> to vector<2x32xf32>
    %1047 = vector.extract_strided_slice %1037 {offsets = [0, 32], sizes = [2, 32], strides = [1, 1]} : vector<2x128xf32> to vector<2x32xf32>
    %1048 = arith.addf %1046, %1047 : vector<2x32xf32>
    %1049 = arith.negf %1048 : vector<2x32xf32>
    %1050 = math.exp %1049 : vector<2x32xf32>
    %cst_412 = arith.constant 1.000000e+00 : f32
    %1051 = vector.broadcast %cst_412 : f32 to vector<2x32xf32>
    %1052 = arith.addf %1051, %1050 : vector<2x32xf32>
    %1053 = arith.divf %1051, %1052 : vector<2x32xf32>
    %1054 = vector.extract_strided_slice %1032 {offsets = [0, 64], sizes = [2, 32], strides = [1, 1]} : vector<2x128xf32> to vector<2x32xf32>
    %1055 = vector.extract_strided_slice %1037 {offsets = [0, 64], sizes = [2, 32], strides = [1, 1]} : vector<2x128xf32> to vector<2x32xf32>
    %1056 = arith.mulf %1045, %1055 : vector<2x32xf32>
    %1057 = arith.addf %1054, %1056 : vector<2x32xf32>
    %1058 = math.tanh %1057 : vector<2x32xf32>
    %cst_413 = arith.constant 1.000000e+00 : f32
    %1059 = vector.broadcast %cst_413 : f32 to vector<2x32xf32>
    %1060 = arith.subf %1059, %1053 : vector<2x32xf32>
    %1061 = arith.mulf %1060, %1058 : vector<2x32xf32>
    %1062 = arith.mulf %1053, %954 : vector<2x32xf32>
    %1063 = arith.addf %1061, %1062 : vector<2x32xf32>
    %c0_414 = arith.constant 0 : index
    %c0_415 = arith.constant 0 : index
    %1064 = vector.load %arg28[%c0_414, %c0_415] : memref<2x128xf32, #tpu.memory_space<vmem>>, vector<2x32xf32>
    tpu.vector_store %arg28[%c0_414, %c0_415], %1063 {strides = array<i32>} : memref<2x128xf32, #tpu.memory_space<vmem>>, vector<2x32xf32>,
    %c0_416 = arith.constant 0 : index
    %c0_417 = arith.constant 0 : index
    %1065 = vector.load %arg28[%c0_416, %c0_417] : memref<2x128xf32, #tpu.memory_space<vmem>>, vector<2x128xf32>
    %c0_418 = arith.constant 0 : index
    %c0_419 = arith.constant 0 : index
    %1066 = vector.load %arg24[%c0_418, %c0_419] : memref<128x128xf32, #tpu.memory_space<vmem>>, vector<128x128xf32>
    %cst_420 = arith.constant dense<0.000000e+00> : vector<2x128xf32>
    %1067 = tpu.matmul %1065, %1066, %cst_420 {dimension_numbers = #tpu.dot_dimension_numbers<[1], [0], [0], [1], [0, 0, 1, 1], [], []>} : vector<2x128xf32>, vector<128x128xf32>, vector<2x128xf32> -> vector<2x128xf32>
    %c0_421 = arith.constant 0 : index
    %c0_422 = arith.constant 0 : index
    %1068 = vector.load %arg25[%c0_421, %c0_422] : memref<1x128xf32, #tpu.memory_space<vmem>>, vector<1x128xf32>
    %1069 = vector.broadcast %1068 : vector<1x128xf32> to vector<2x128xf32>
    %1070 = arith.addf %1067, %1069 : vector<2x128xf32>
    %c2_423 = arith.constant 2 : index
    %c0_424 = arith.constant 0 : index
    %c0_425 = arith.constant 0 : index
    %1071 = vector.load %arg26[%c2_423, %c0_424, %c0_425] : memref<8x2x128xf32, #tpu.memory_space<vmem>>, vector<1x2x128xf32>
    %1072 = vector.shape_cast %1071 : vector<1x2x128xf32> to vector<2x128xf32>
    %1073 = vector.shape_cast %1070 : vector<2x128xf32> to vector<1x2x128xf32>
    tpu.vector_store %arg26[%c2_423, %c0_424, %c0_425], %1073 {strides = array<i32>} : memref<8x2x128xf32, #tpu.memory_space<vmem>>, vector<1x2x128xf32>,
    %cst_426 = arith.constant dense<0xFF800000> : vector<2xf32>
    %1074 = vector.multi_reduction <maximumf>, %1070, %cst_426 [1] : vector<2x128xf32> to vector<2xf32>
    %1075 = vector.shape_cast %1074 : vector<2xf32> to vector<2x1xf32>
    %1076 = vector.broadcast %1075 : vector<2x1xf32> to vector<2x128xf32>
    %1077 = arith.cmpf oeq, %1070, %1076 : vector<2x128xf32>
    %c128_i32_427 = arith.constant 128 : i32
    %1078 = vector.broadcast %c128_i32_427 : i32 to vector<2x128xi32>
    %1079 = arith.select %1077, %873, %1078 : vector<2x128xi1>, vector<2x128xi32>
    %cst_428 = arith.constant dense<2147483647> : vector<2xi32>
    %1080 = vector.multi_reduction <minsi>, %1079, %cst_428 [1] : vector<2x128xi32> to vector<2xi32>
    %1081 = vector.shape_cast %1080 : vector<2xi32> to vector<2x1xi32>
    %1082 = vector.broadcast %1081 : vector<2x1xi32> to vector<2x128xi32>
    %1083 = arith.cmpi eq, %873, %1082 : vector<2x128xi32>
    %1084 = arith.extui %1083 : vector<2x128xi1> to vector<2x128xi32>
    %1085 = arith.sitofp %1084 : vector<2x128xi32> to vector<2x128xf32>
    %c0_429 = arith.constant 0 : index
    %c0_430 = arith.constant 0 : index
    %1086 = vector.load %arg19[%c0_429, %c0_430] : memref<128x16xf32, #tpu.memory_space<vmem>>, vector<128x16xf32>
    %cst_431 = arith.constant dense<0.000000e+00> : vector<2x16xf32>
    %1087 = tpu.matmul %1085, %1086, %cst_431 {dimension_numbers = #tpu.dot_dimension_numbers<[1], [0], [0], [1], [0, 0, 1, 1], [], []>} : vector<2x128xf32>, vector<128x16xf32>, vector<2x16xf32> -> vector<2x16xf32>
    %c2_432 = arith.constant 2 : index
    %1088 = memref.load %arg2[%c2_432] : memref<8xi32, #tpu.memory_space<smem>>
    %c0_i32_433 = arith.constant 0 : i32
    %1089 = arith.cmpi sgt, %1088, %c0_i32_433 : i32
    %1090 = arith.extui %1089 : i1 to i32
    %1091 = arith.sitofp %1090 : i32 to f32
    %1092 = vector.extract_strided_slice %842 {offsets = [4, 0], sizes = [2, 16], strides = [1, 1]} : vector<16x16xf32> to vector<2x16xf32>
    %1093 = vector.broadcast %1091 : f32 to vector<2x16xf32>
    %1094 = arith.mulf %1093, %1092 : vector<2x16xf32>
    %cst_434 = arith.constant 1.000000e+00 : f32
    %1095 = arith.subf %cst_434, %1091 : f32
    %1096 = vector.broadcast %1095 : f32 to vector<2x16xf32>
    %1097 = arith.mulf %1096, %1087 : vector<2x16xf32>
    %1098 = arith.addf %1094, %1097 : vector<2x16xf32>
    %c0_435 = arith.constant 0 : index
    %c0_436 = arith.constant 0 : index
    %1099 = vector.load %arg17[%c0_435, %c0_436] : memref<32x32xf32, #tpu.memory_space<vmem>>, vector<32x32xf32>
    %cst_437 = arith.constant dense<0.000000e+00> : vector<2x32xf32>
    %1100 = tpu.matmul %1063, %1099, %cst_437 {dimension_numbers = #tpu.dot_dimension_numbers<[1], [0], [0], [1], [0, 0, 1, 1], [], []>} : vector<2x32xf32>, vector<32x32xf32>, vector<2x32xf32> -> vector<2x32xf32>
    %1101 = vector.extract_strided_slice %855 {offsets = [0, 0], sizes = [16, 1], strides = [1, 1]} : vector<16x2xf32> to vector<16x1xf32>
    %1102 = vector.extract_strided_slice %1100 {offsets = [0, 0], sizes = [1, 32], strides = [1, 1]} : vector<2x32xf32> to vector<1x32xf32>
    %1103 = vector.broadcast %1101 : vector<16x1xf32> to vector<16x32xf32>
    %1104 = vector.broadcast %1102 : vector<1x32xf32> to vector<16x32xf32>
    %1105 = arith.mulf %1103, %1104 : vector<16x32xf32>
    %1106 = vector.extract_strided_slice %855 {offsets = [0, 1], sizes = [16, 1], strides = [1, 1]} : vector<16x2xf32> to vector<16x1xf32>
    %1107 = vector.extract_strided_slice %1100 {offsets = [1, 0], sizes = [1, 32], strides = [1, 1]} : vector<2x32xf32> to vector<1x32xf32>
    %1108 = vector.broadcast %1106 : vector<16x1xf32> to vector<16x32xf32>
    %1109 = vector.broadcast %1107 : vector<1x32xf32> to vector<16x32xf32>
    %1110 = arith.mulf %1108, %1109 : vector<16x32xf32>
    %1111 = arith.addf %1105, %1110 : vector<16x32xf32>
    %1112 = arith.addf %1111, %677 : vector<16x32xf32>
    %1113 = math.tanh %1112 : vector<16x32xf32>
    %1114 = vector.broadcast %872 : vector<1x32xf32> to vector<16x32xf32>
    %1115 = arith.mulf %1113, %1114 : vector<16x32xf32>
    %cst_438 = arith.constant dense<0.000000e+00> : vector<16xf32>
    %1116 = vector.multi_reduction <add>, %1115, %cst_438 [1] : vector<16x32xf32> to vector<16xf32>
    %1117 = vector.shape_cast %1116 : vector<16xf32> to vector<16x1xf32>
    %1118 = vector.broadcast %1117 : vector<16x1xf32> to vector<16x2xf32>
    %1119 = arith.addf %1118, %858 : vector<16x2xf32>
    %cst_439 = arith.constant dense<0xFF800000> : vector<2xf32>
    %1120 = vector.multi_reduction <maximumf>, %1119, %cst_439 [0] : vector<16x2xf32> to vector<2xf32>
    %1121 = vector.shape_cast %1120 : vector<2xf32> to vector<1x2xf32>
    %1122 = vector.broadcast %1121 : vector<1x2xf32> to vector<16x2xf32>
    %1123 = arith.subf %1119, %1122 : vector<16x2xf32>
    %1124 = math.exp %1123 : vector<16x2xf32>
    %cst_440 = arith.constant dense<0.000000e+00> : vector<2xf32>
    %1125 = vector.multi_reduction <add>, %1124, %cst_440 [0] : vector<16x2xf32> to vector<2xf32>
    %1126 = vector.shape_cast %1125 : vector<2xf32> to vector<1x2xf32>
    %1127 = vector.broadcast %1126 : vector<1x2xf32> to vector<16x2xf32>
    %1128 = arith.divf %1124, %1127 : vector<16x2xf32>
    %cst_441 = arith.constant dense<0.000000e+00> : vector<16xf32>
    %1129 = vector.multi_reduction <add>, %1128, %cst_441 [1] : vector<16x2xf32> to vector<16xf32>
    %1130 = vector.shape_cast %1129 : vector<16xf32> to vector<16x1xf32>
    %1131 = vector.broadcast %1130 : vector<16x1xf32> to vector<16x64xf32>
    %1132 = arith.mulf %1131, %672 : vector<16x64xf32>
    %cst_442 = arith.constant dense<0.000000e+00> : vector<2x64xf32>
    %1133 = tpu.matmul %871, %1132, %cst_442 {dimension_numbers = #tpu.dot_dimension_numbers<[1], [0], [0], [1], [0, 0, 1, 1], [], []>} : vector<2x16xf32>, vector<16x64xf32>, vector<2x64xf32> -> vector<2x64xf32>
    %c0_443 = arith.constant 0 : index
    %c32_444 = arith.constant 32 : index
    %1134 = vector.load %arg28[%c0_443, %c32_444] : memref<2x128xf32, #tpu.memory_space<vmem>>, vector<2x64xf32>
    tpu.vector_store %arg28[%c0_443, %c32_444], %1133 {strides = array<i32>} : memref<2x128xf32, #tpu.memory_space<vmem>>, vector<2x64xf32>,
    %c0_445 = arith.constant 0 : index
    %c96_446 = arith.constant 96 : index
    %1135 = vector.load %arg28[%c0_445, %c96_446] : memref<2x128xf32, #tpu.memory_space<vmem>>, vector<2x16xf32>
    tpu.vector_store %arg28[%c0_445, %c96_446], %1098 {strides = array<i32>} : memref<2x128xf32, #tpu.memory_space<vmem>>, vector<2x16xf32>,
    %c0_447 = arith.constant 0 : index
    %c0_448 = arith.constant 0 : index
    %1136 = vector.load %arg28[%c0_447, %c0_448] : memref<2x128xf32, #tpu.memory_space<vmem>>, vector<2x128xf32>
    %c0_449 = arith.constant 0 : index
    %c0_450 = arith.constant 0 : index
    %1137 = vector.load %arg20[%c0_449, %c0_450] : memref<128x128xf32, #tpu.memory_space<vmem>>, vector<128x128xf32>
    %cst_451 = arith.constant dense<0.000000e+00> : vector<2x128xf32>
    %1138 = tpu.matmul %1136, %1137, %cst_451 {dimension_numbers = #tpu.dot_dimension_numbers<[1], [0], [0], [1], [0, 0, 1, 1], [], []>} : vector<2x128xf32>, vector<128x128xf32>, vector<2x128xf32> -> vector<2x128xf32>
    %c0_452 = arith.constant 0 : index
    %c0_453 = arith.constant 0 : index
    %1139 = vector.load %arg22[%c0_452, %c0_453] : memref<1x128xf32, #tpu.memory_space<vmem>>, vector<1x128xf32>
    %1140 = vector.broadcast %1139 : vector<1x128xf32> to vector<2x128xf32>
    %1141 = arith.addf %1138, %1140 : vector<2x128xf32>
    %c0_454 = arith.constant 0 : index
    %c0_455 = arith.constant 0 : index
    %1142 = vector.load %arg21[%c0_454, %c0_455] : memref<32x128xf32, #tpu.memory_space<vmem>>, vector<32x128xf32>
    %cst_456 = arith.constant dense<0.000000e+00> : vector<2x128xf32>
    %1143 = tpu.matmul %1063, %1142, %cst_456 {dimension_numbers = #tpu.dot_dimension_numbers<[1], [0], [0], [1], [0, 0, 1, 1], [], []>} : vector<2x32xf32>, vector<32x128xf32>, vector<2x128xf32> -> vector<2x128xf32>
    %c0_457 = arith.constant 0 : index
    %c0_458 = arith.constant 0 : index
    %1144 = vector.load %arg23[%c0_457, %c0_458] : memref<1x128xf32, #tpu.memory_space<vmem>>, vector<1x128xf32>
    %1145 = vector.broadcast %1144 : vector<1x128xf32> to vector<2x128xf32>
    %1146 = arith.addf %1143, %1145 : vector<2x128xf32>
    %1147 = vector.extract_strided_slice %1141 {offsets = [0, 0], sizes = [2, 32], strides = [1, 1]} : vector<2x128xf32> to vector<2x32xf32>
    %1148 = vector.extract_strided_slice %1146 {offsets = [0, 0], sizes = [2, 32], strides = [1, 1]} : vector<2x128xf32> to vector<2x32xf32>
    %1149 = arith.addf %1147, %1148 : vector<2x32xf32>
    %1150 = arith.negf %1149 : vector<2x32xf32>
    %1151 = math.exp %1150 : vector<2x32xf32>
    %cst_459 = arith.constant 1.000000e+00 : f32
    %1152 = vector.broadcast %cst_459 : f32 to vector<2x32xf32>
    %1153 = arith.addf %1152, %1151 : vector<2x32xf32>
    %1154 = arith.divf %1152, %1153 : vector<2x32xf32>
    %1155 = vector.extract_strided_slice %1141 {offsets = [0, 32], sizes = [2, 32], strides = [1, 1]} : vector<2x128xf32> to vector<2x32xf32>
    %1156 = vector.extract_strided_slice %1146 {offsets = [0, 32], sizes = [2, 32], strides = [1, 1]} : vector<2x128xf32> to vector<2x32xf32>
    %1157 = arith.addf %1155, %1156 : vector<2x32xf32>
    %1158 = arith.negf %1157 : vector<2x32xf32>
    %1159 = math.exp %1158 : vector<2x32xf32>
    %cst_460 = arith.constant 1.000000e+00 : f32
    %1160 = vector.broadcast %cst_460 : f32 to vector<2x32xf32>
    %1161 = arith.addf %1160, %1159 : vector<2x32xf32>
    %1162 = arith.divf %1160, %1161 : vector<2x32xf32>
    %1163 = vector.extract_strided_slice %1141 {offsets = [0, 64], sizes = [2, 32], strides = [1, 1]} : vector<2x128xf32> to vector<2x32xf32>
    %1164 = vector.extract_strided_slice %1146 {offsets = [0, 64], sizes = [2, 32], strides = [1, 1]} : vector<2x128xf32> to vector<2x32xf32>
    %1165 = arith.mulf %1154, %1164 : vector<2x32xf32>
    %1166 = arith.addf %1163, %1165 : vector<2x32xf32>
    %1167 = math.tanh %1166 : vector<2x32xf32>
    %cst_461 = arith.constant 1.000000e+00 : f32
    %1168 = vector.broadcast %cst_461 : f32 to vector<2x32xf32>
    %1169 = arith.subf %1168, %1162 : vector<2x32xf32>
    %1170 = arith.mulf %1169, %1167 : vector<2x32xf32>
    %1171 = arith.mulf %1162, %1063 : vector<2x32xf32>
    %1172 = arith.addf %1170, %1171 : vector<2x32xf32>
    %c0_462 = arith.constant 0 : index
    %c0_463 = arith.constant 0 : index
    %1173 = vector.load %arg28[%c0_462, %c0_463] : memref<2x128xf32, #tpu.memory_space<vmem>>, vector<2x32xf32>
    tpu.vector_store %arg28[%c0_462, %c0_463], %1172 {strides = array<i32>} : memref<2x128xf32, #tpu.memory_space<vmem>>, vector<2x32xf32>,
    %c0_464 = arith.constant 0 : index
    %c0_465 = arith.constant 0 : index
    %1174 = vector.load %arg28[%c0_464, %c0_465] : memref<2x128xf32, #tpu.memory_space<vmem>>, vector<2x128xf32>
    %c0_466 = arith.constant 0 : index
    %c0_467 = arith.constant 0 : index
    %1175 = vector.load %arg24[%c0_466, %c0_467] : memref<128x128xf32, #tpu.memory_space<vmem>>, vector<128x128xf32>
    %cst_468 = arith.constant dense<0.000000e+00> : vector<2x128xf32>
    %1176 = tpu.matmul %1174, %1175, %cst_468 {dimension_numbers = #tpu.dot_dimension_numbers<[1], [0], [0], [1], [0, 0, 1, 1], [], []>} : vector<2x128xf32>, vector<128x128xf32>, vector<2x128xf32> -> vector<2x128xf32>
    %c0_469 = arith.constant 0 : index
    %c0_470 = arith.constant 0 : index
    %1177 = vector.load %arg25[%c0_469, %c0_470] : memref<1x128xf32, #tpu.memory_space<vmem>>, vector<1x128xf32>
    %1178 = vector.broadcast %1177 : vector<1x128xf32> to vector<2x128xf32>
    %1179 = arith.addf %1176, %1178 : vector<2x128xf32>
    %c3_471 = arith.constant 3 : index
    %c0_472 = arith.constant 0 : index
    %c0_473 = arith.constant 0 : index
    %1180 = vector.load %arg26[%c3_471, %c0_472, %c0_473] : memref<8x2x128xf32, #tpu.memory_space<vmem>>, vector<1x2x128xf32>
    %1181 = vector.shape_cast %1180 : vector<1x2x128xf32> to vector<2x128xf32>
    %1182 = vector.shape_cast %1179 : vector<2x128xf32> to vector<1x2x128xf32>
    tpu.vector_store %arg26[%c3_471, %c0_472, %c0_473], %1182 {strides = array<i32>} : memref<8x2x128xf32, #tpu.memory_space<vmem>>, vector<1x2x128xf32>,
    %cst_474 = arith.constant dense<0xFF800000> : vector<2xf32>
    %1183 = vector.multi_reduction <maximumf>, %1179, %cst_474 [1] : vector<2x128xf32> to vector<2xf32>
    %1184 = vector.shape_cast %1183 : vector<2xf32> to vector<2x1xf32>
    %1185 = vector.broadcast %1184 : vector<2x1xf32> to vector<2x128xf32>
    %1186 = arith.cmpf oeq, %1179, %1185 : vector<2x128xf32>
    %c128_i32_475 = arith.constant 128 : i32
    %1187 = vector.broadcast %c128_i32_475 : i32 to vector<2x128xi32>
    %1188 = arith.select %1186, %873, %1187 : vector<2x128xi1>, vector<2x128xi32>
    %cst_476 = arith.constant dense<2147483647> : vector<2xi32>
    %1189 = vector.multi_reduction <minsi>, %1188, %cst_476 [1] : vector<2x128xi32> to vector<2xi32>
    %1190 = vector.shape_cast %1189 : vector<2xi32> to vector<2x1xi32>
    %1191 = vector.broadcast %1190 : vector<2x1xi32> to vector<2x128xi32>
    %1192 = arith.cmpi eq, %873, %1191 : vector<2x128xi32>
    %1193 = arith.extui %1192 : vector<2x128xi1> to vector<2x128xi32>
    %1194 = arith.sitofp %1193 : vector<2x128xi32> to vector<2x128xf32>
    %c0_477 = arith.constant 0 : index
    %c0_478 = arith.constant 0 : index
    %1195 = vector.load %arg19[%c0_477, %c0_478] : memref<128x16xf32, #tpu.memory_space<vmem>>, vector<128x16xf32>
    %cst_479 = arith.constant dense<0.000000e+00> : vector<2x16xf32>
    %1196 = tpu.matmul %1194, %1195, %cst_479 {dimension_numbers = #tpu.dot_dimension_numbers<[1], [0], [0], [1], [0, 0, 1, 1], [], []>} : vector<2x128xf32>, vector<128x16xf32>, vector<2x16xf32> -> vector<2x16xf32>
    %c3_480 = arith.constant 3 : index
    %1197 = memref.load %arg2[%c3_480] : memref<8xi32, #tpu.memory_space<smem>>
    %c0_i32_481 = arith.constant 0 : i32
    %1198 = arith.cmpi sgt, %1197, %c0_i32_481 : i32
    %1199 = arith.extui %1198 : i1 to i32
    %1200 = arith.sitofp %1199 : i32 to f32
    %1201 = vector.extract_strided_slice %842 {offsets = [6, 0], sizes = [2, 16], strides = [1, 1]} : vector<16x16xf32> to vector<2x16xf32>
    %1202 = vector.broadcast %1200 : f32 to vector<2x16xf32>
    %1203 = arith.mulf %1202, %1201 : vector<2x16xf32>
    %cst_482 = arith.constant 1.000000e+00 : f32
    %1204 = arith.subf %cst_482, %1200 : f32
    %1205 = vector.broadcast %1204 : f32 to vector<2x16xf32>
    %1206 = arith.mulf %1205, %1196 : vector<2x16xf32>
    %1207 = arith.addf %1203, %1206 : vector<2x16xf32>
    %c0_483 = arith.constant 0 : index
    %c0_484 = arith.constant 0 : index
    %1208 = vector.load %arg17[%c0_483, %c0_484] : memref<32x32xf32, #tpu.memory_space<vmem>>, vector<32x32xf32>
    %cst_485 = arith.constant dense<0.000000e+00> : vector<2x32xf32>
    %1209 = tpu.matmul %1172, %1208, %cst_485 {dimension_numbers = #tpu.dot_dimension_numbers<[1], [0], [0], [1], [0, 0, 1, 1], [], []>} : vector<2x32xf32>, vector<32x32xf32>, vector<2x32xf32> -> vector<2x32xf32>
    %1210 = vector.extract_strided_slice %855 {offsets = [0, 0], sizes = [16, 1], strides = [1, 1]} : vector<16x2xf32> to vector<16x1xf32>
    %1211 = vector.extract_strided_slice %1209 {offsets = [0, 0], sizes = [1, 32], strides = [1, 1]} : vector<2x32xf32> to vector<1x32xf32>
    %1212 = vector.broadcast %1210 : vector<16x1xf32> to vector<16x32xf32>
    %1213 = vector.broadcast %1211 : vector<1x32xf32> to vector<16x32xf32>
    %1214 = arith.mulf %1212, %1213 : vector<16x32xf32>
    %1215 = vector.extract_strided_slice %855 {offsets = [0, 1], sizes = [16, 1], strides = [1, 1]} : vector<16x2xf32> to vector<16x1xf32>
    %1216 = vector.extract_strided_slice %1209 {offsets = [1, 0], sizes = [1, 32], strides = [1, 1]} : vector<2x32xf32> to vector<1x32xf32>
    %1217 = vector.broadcast %1215 : vector<16x1xf32> to vector<16x32xf32>
    %1218 = vector.broadcast %1216 : vector<1x32xf32> to vector<16x32xf32>
    %1219 = arith.mulf %1217, %1218 : vector<16x32xf32>
    %1220 = arith.addf %1214, %1219 : vector<16x32xf32>
    %1221 = arith.addf %1220, %677 : vector<16x32xf32>
    %1222 = math.tanh %1221 : vector<16x32xf32>
    %1223 = vector.broadcast %872 : vector<1x32xf32> to vector<16x32xf32>
    %1224 = arith.mulf %1222, %1223 : vector<16x32xf32>
    %cst_486 = arith.constant dense<0.000000e+00> : vector<16xf32>
    %1225 = vector.multi_reduction <add>, %1224, %cst_486 [1] : vector<16x32xf32> to vector<16xf32>
    %1226 = vector.shape_cast %1225 : vector<16xf32> to vector<16x1xf32>
    %1227 = vector.broadcast %1226 : vector<16x1xf32> to vector<16x2xf32>
    %1228 = arith.addf %1227, %858 : vector<16x2xf32>
    %cst_487 = arith.constant dense<0xFF800000> : vector<2xf32>
    %1229 = vector.multi_reduction <maximumf>, %1228, %cst_487 [0] : vector<16x2xf32> to vector<2xf32>
    %1230 = vector.shape_cast %1229 : vector<2xf32> to vector<1x2xf32>
    %1231 = vector.broadcast %1230 : vector<1x2xf32> to vector<16x2xf32>
    %1232 = arith.subf %1228, %1231 : vector<16x2xf32>
    %1233 = math.exp %1232 : vector<16x2xf32>
    %cst_488 = arith.constant dense<0.000000e+00> : vector<2xf32>
    %1234 = vector.multi_reduction <add>, %1233, %cst_488 [0] : vector<16x2xf32> to vector<2xf32>
    %1235 = vector.shape_cast %1234 : vector<2xf32> to vector<1x2xf32>
    %1236 = vector.broadcast %1235 : vector<1x2xf32> to vector<16x2xf32>
    %1237 = arith.divf %1233, %1236 : vector<16x2xf32>
    %cst_489 = arith.constant dense<0.000000e+00> : vector<16xf32>
    %1238 = vector.multi_reduction <add>, %1237, %cst_489 [1] : vector<16x2xf32> to vector<16xf32>
    %1239 = vector.shape_cast %1238 : vector<16xf32> to vector<16x1xf32>
    %1240 = vector.broadcast %1239 : vector<16x1xf32> to vector<16x64xf32>
    %1241 = arith.mulf %1240, %672 : vector<16x64xf32>
    %cst_490 = arith.constant dense<0.000000e+00> : vector<2x64xf32>
    %1242 = tpu.matmul %871, %1241, %cst_490 {dimension_numbers = #tpu.dot_dimension_numbers<[1], [0], [0], [1], [0, 0, 1, 1], [], []>} : vector<2x16xf32>, vector<16x64xf32>, vector<2x64xf32> -> vector<2x64xf32>
    %c0_491 = arith.constant 0 : index
    %c32_492 = arith.constant 32 : index
    %1243 = vector.load %arg28[%c0_491, %c32_492] : memref<2x128xf32, #tpu.memory_space<vmem>>, vector<2x64xf32>
    tpu.vector_store %arg28[%c0_491, %c32_492], %1242 {strides = array<i32>} : memref<2x128xf32, #tpu.memory_space<vmem>>, vector<2x64xf32>,
    %c0_493 = arith.constant 0 : index
    %c96_494 = arith.constant 96 : index
    %1244 = vector.load %arg28[%c0_493, %c96_494] : memref<2x128xf32, #tpu.memory_space<vmem>>, vector<2x16xf32>
    tpu.vector_store %arg28[%c0_493, %c96_494], %1207 {strides = array<i32>} : memref<2x128xf32, #tpu.memory_space<vmem>>, vector<2x16xf32>,
    %c0_495 = arith.constant 0 : index
    %c0_496 = arith.constant 0 : index
    %1245 = vector.load %arg28[%c0_495, %c0_496] : memref<2x128xf32, #tpu.memory_space<vmem>>, vector<2x128xf32>
    %c0_497 = arith.constant 0 : index
    %c0_498 = arith.constant 0 : index
    %1246 = vector.load %arg20[%c0_497, %c0_498] : memref<128x128xf32, #tpu.memory_space<vmem>>, vector<128x128xf32>
    %cst_499 = arith.constant dense<0.000000e+00> : vector<2x128xf32>
    %1247 = tpu.matmul %1245, %1246, %cst_499 {dimension_numbers = #tpu.dot_dimension_numbers<[1], [0], [0], [1], [0, 0, 1, 1], [], []>} : vector<2x128xf32>, vector<128x128xf32>, vector<2x128xf32> -> vector<2x128xf32>
    %c0_500 = arith.constant 0 : index
    %c0_501 = arith.constant 0 : index
    %1248 = vector.load %arg22[%c0_500, %c0_501] : memref<1x128xf32, #tpu.memory_space<vmem>>, vector<1x128xf32>
    %1249 = vector.broadcast %1248 : vector<1x128xf32> to vector<2x128xf32>
    %1250 = arith.addf %1247, %1249 : vector<2x128xf32>
    %c0_502 = arith.constant 0 : index
    %c0_503 = arith.constant 0 : index
    %1251 = vector.load %arg21[%c0_502, %c0_503] : memref<32x128xf32, #tpu.memory_space<vmem>>, vector<32x128xf32>
    %cst_504 = arith.constant dense<0.000000e+00> : vector<2x128xf32>
    %1252 = tpu.matmul %1172, %1251, %cst_504 {dimension_numbers = #tpu.dot_dimension_numbers<[1], [0], [0], [1], [0, 0, 1, 1], [], []>} : vector<2x32xf32>, vector<32x128xf32>, vector<2x128xf32> -> vector<2x128xf32>
    %c0_505 = arith.constant 0 : index
    %c0_506 = arith.constant 0 : index
    %1253 = vector.load %arg23[%c0_505, %c0_506] : memref<1x128xf32, #tpu.memory_space<vmem>>, vector<1x128xf32>
    %1254 = vector.broadcast %1253 : vector<1x128xf32> to vector<2x128xf32>
    %1255 = arith.addf %1252, %1254 : vector<2x128xf32>
    %1256 = vector.extract_strided_slice %1250 {offsets = [0, 0], sizes = [2, 32], strides = [1, 1]} : vector<2x128xf32> to vector<2x32xf32>
    %1257 = vector.extract_strided_slice %1255 {offsets = [0, 0], sizes = [2, 32], strides = [1, 1]} : vector<2x128xf32> to vector<2x32xf32>
    %1258 = arith.addf %1256, %1257 : vector<2x32xf32>
    %1259 = arith.negf %1258 : vector<2x32xf32>
    %1260 = math.exp %1259 : vector<2x32xf32>
    %cst_507 = arith.constant 1.000000e+00 : f32
    %1261 = vector.broadcast %cst_507 : f32 to vector<2x32xf32>
    %1262 = arith.addf %1261, %1260 : vector<2x32xf32>
    %1263 = arith.divf %1261, %1262 : vector<2x32xf32>
    %1264 = vector.extract_strided_slice %1250 {offsets = [0, 32], sizes = [2, 32], strides = [1, 1]} : vector<2x128xf32> to vector<2x32xf32>
    %1265 = vector.extract_strided_slice %1255 {offsets = [0, 32], sizes = [2, 32], strides = [1, 1]} : vector<2x128xf32> to vector<2x32xf32>
    %1266 = arith.addf %1264, %1265 : vector<2x32xf32>
    %1267 = arith.negf %1266 : vector<2x32xf32>
    %1268 = math.exp %1267 : vector<2x32xf32>
    %cst_508 = arith.constant 1.000000e+00 : f32
    %1269 = vector.broadcast %cst_508 : f32 to vector<2x32xf32>
    %1270 = arith.addf %1269, %1268 : vector<2x32xf32>
    %1271 = arith.divf %1269, %1270 : vector<2x32xf32>
    %1272 = vector.extract_strided_slice %1250 {offsets = [0, 64], sizes = [2, 32], strides = [1, 1]} : vector<2x128xf32> to vector<2x32xf32>
    %1273 = vector.extract_strided_slice %1255 {offsets = [0, 64], sizes = [2, 32], strides = [1, 1]} : vector<2x128xf32> to vector<2x32xf32>
    %1274 = arith.mulf %1263, %1273 : vector<2x32xf32>
    %1275 = arith.addf %1272, %1274 : vector<2x32xf32>
    %1276 = math.tanh %1275 : vector<2x32xf32>
    %cst_509 = arith.constant 1.000000e+00 : f32
    %1277 = vector.broadcast %cst_509 : f32 to vector<2x32xf32>
    %1278 = arith.subf %1277, %1271 : vector<2x32xf32>
    %1279 = arith.mulf %1278, %1276 : vector<2x32xf32>
    %1280 = arith.mulf %1271, %1172 : vector<2x32xf32>
    %1281 = arith.addf %1279, %1280 : vector<2x32xf32>
    %c0_510 = arith.constant 0 : index
    %c0_511 = arith.constant 0 : index
    %1282 = vector.load %arg28[%c0_510, %c0_511] : memref<2x128xf32, #tpu.memory_space<vmem>>, vector<2x32xf32>
    tpu.vector_store %arg28[%c0_510, %c0_511], %1281 {strides = array<i32>} : memref<2x128xf32, #tpu.memory_space<vmem>>, vector<2x32xf32>,
    %c0_512 = arith.constant 0 : index
    %c0_513 = arith.constant 0 : index
    %1283 = vector.load %arg28[%c0_512, %c0_513] : memref<2x128xf32, #tpu.memory_space<vmem>>, vector<2x128xf32>
    %c0_514 = arith.constant 0 : index
    %c0_515 = arith.constant 0 : index
    %1284 = vector.load %arg24[%c0_514, %c0_515] : memref<128x128xf32, #tpu.memory_space<vmem>>, vector<128x128xf32>
    %cst_516 = arith.constant dense<0.000000e+00> : vector<2x128xf32>
    %1285 = tpu.matmul %1283, %1284, %cst_516 {dimension_numbers = #tpu.dot_dimension_numbers<[1], [0], [0], [1], [0, 0, 1, 1], [], []>} : vector<2x128xf32>, vector<128x128xf32>, vector<2x128xf32> -> vector<2x128xf32>
    %c0_517 = arith.constant 0 : index
    %c0_518 = arith.constant 0 : index
    %1286 = vector.load %arg25[%c0_517, %c0_518] : memref<1x128xf32, #tpu.memory_space<vmem>>, vector<1x128xf32>
    %1287 = vector.broadcast %1286 : vector<1x128xf32> to vector<2x128xf32>
    %1288 = arith.addf %1285, %1287 : vector<2x128xf32>
    %c4_519 = arith.constant 4 : index
    %c0_520 = arith.constant 0 : index
    %c0_521 = arith.constant 0 : index
    %1289 = vector.load %arg26[%c4_519, %c0_520, %c0_521] : memref<8x2x128xf32, #tpu.memory_space<vmem>>, vector<1x2x128xf32>
    %1290 = vector.shape_cast %1289 : vector<1x2x128xf32> to vector<2x128xf32>
    %1291 = vector.shape_cast %1288 : vector<2x128xf32> to vector<1x2x128xf32>
    tpu.vector_store %arg26[%c4_519, %c0_520, %c0_521], %1291 {strides = array<i32>} : memref<8x2x128xf32, #tpu.memory_space<vmem>>, vector<1x2x128xf32>,
    %cst_522 = arith.constant dense<0xFF800000> : vector<2xf32>
    %1292 = vector.multi_reduction <maximumf>, %1288, %cst_522 [1] : vector<2x128xf32> to vector<2xf32>
    %1293 = vector.shape_cast %1292 : vector<2xf32> to vector<2x1xf32>
    %1294 = vector.broadcast %1293 : vector<2x1xf32> to vector<2x128xf32>
    %1295 = arith.cmpf oeq, %1288, %1294 : vector<2x128xf32>
    %c128_i32_523 = arith.constant 128 : i32
    %1296 = vector.broadcast %c128_i32_523 : i32 to vector<2x128xi32>
    %1297 = arith.select %1295, %873, %1296 : vector<2x128xi1>, vector<2x128xi32>
    %cst_524 = arith.constant dense<2147483647> : vector<2xi32>
    %1298 = vector.multi_reduction <minsi>, %1297, %cst_524 [1] : vector<2x128xi32> to vector<2xi32>
    %1299 = vector.shape_cast %1298 : vector<2xi32> to vector<2x1xi32>
    %1300 = vector.broadcast %1299 : vector<2x1xi32> to vector<2x128xi32>
    %1301 = arith.cmpi eq, %873, %1300 : vector<2x128xi32>
    %1302 = arith.extui %1301 : vector<2x128xi1> to vector<2x128xi32>
    %1303 = arith.sitofp %1302 : vector<2x128xi32> to vector<2x128xf32>
    %c0_525 = arith.constant 0 : index
    %c0_526 = arith.constant 0 : index
    %1304 = vector.load %arg19[%c0_525, %c0_526] : memref<128x16xf32, #tpu.memory_space<vmem>>, vector<128x16xf32>
    %cst_527 = arith.constant dense<0.000000e+00> : vector<2x16xf32>
    %1305 = tpu.matmul %1303, %1304, %cst_527 {dimension_numbers = #tpu.dot_dimension_numbers<[1], [0], [0], [1], [0, 0, 1, 1], [], []>} : vector<2x128xf32>, vector<128x16xf32>, vector<2x16xf32> -> vector<2x16xf32>
    %c4_528 = arith.constant 4 : index
    %1306 = memref.load %arg2[%c4_528] : memref<8xi32, #tpu.memory_space<smem>>
    %c0_i32_529 = arith.constant 0 : i32
    %1307 = arith.cmpi sgt, %1306, %c0_i32_529 : i32
    %1308 = arith.extui %1307 : i1 to i32
    %1309 = arith.sitofp %1308 : i32 to f32
    %1310 = vector.extract_strided_slice %842 {offsets = [8, 0], sizes = [2, 16], strides = [1, 1]} : vector<16x16xf32> to vector<2x16xf32>
    %1311 = vector.broadcast %1309 : f32 to vector<2x16xf32>
    %1312 = arith.mulf %1311, %1310 : vector<2x16xf32>
    %cst_530 = arith.constant 1.000000e+00 : f32
    %1313 = arith.subf %cst_530, %1309 : f32
    %1314 = vector.broadcast %1313 : f32 to vector<2x16xf32>
    %1315 = arith.mulf %1314, %1305 : vector<2x16xf32>
    %1316 = arith.addf %1312, %1315 : vector<2x16xf32>
    %c0_531 = arith.constant 0 : index
    %c0_532 = arith.constant 0 : index
    %1317 = vector.load %arg17[%c0_531, %c0_532] : memref<32x32xf32, #tpu.memory_space<vmem>>, vector<32x32xf32>
    %cst_533 = arith.constant dense<0.000000e+00> : vector<2x32xf32>
    %1318 = tpu.matmul %1281, %1317, %cst_533 {dimension_numbers = #tpu.dot_dimension_numbers<[1], [0], [0], [1], [0, 0, 1, 1], [], []>} : vector<2x32xf32>, vector<32x32xf32>, vector<2x32xf32> -> vector<2x32xf32>
    %1319 = vector.extract_strided_slice %855 {offsets = [0, 0], sizes = [16, 1], strides = [1, 1]} : vector<16x2xf32> to vector<16x1xf32>
    %1320 = vector.extract_strided_slice %1318 {offsets = [0, 0], sizes = [1, 32], strides = [1, 1]} : vector<2x32xf32> to vector<1x32xf32>
    %1321 = vector.broadcast %1319 : vector<16x1xf32> to vector<16x32xf32>
    %1322 = vector.broadcast %1320 : vector<1x32xf32> to vector<16x32xf32>
    %1323 = arith.mulf %1321, %1322 : vector<16x32xf32>
    %1324 = vector.extract_strided_slice %855 {offsets = [0, 1], sizes = [16, 1], strides = [1, 1]} : vector<16x2xf32> to vector<16x1xf32>
    %1325 = vector.extract_strided_slice %1318 {offsets = [1, 0], sizes = [1, 32], strides = [1, 1]} : vector<2x32xf32> to vector<1x32xf32>
    %1326 = vector.broadcast %1324 : vector<16x1xf32> to vector<16x32xf32>
    %1327 = vector.broadcast %1325 : vector<1x32xf32> to vector<16x32xf32>
    %1328 = arith.mulf %1326, %1327 : vector<16x32xf32>
    %1329 = arith.addf %1323, %1328 : vector<16x32xf32>
    %1330 = arith.addf %1329, %677 : vector<16x32xf32>
    %1331 = math.tanh %1330 : vector<16x32xf32>
    %1332 = vector.broadcast %872 : vector<1x32xf32> to vector<16x32xf32>
    %1333 = arith.mulf %1331, %1332 : vector<16x32xf32>
    %cst_534 = arith.constant dense<0.000000e+00> : vector<16xf32>
    %1334 = vector.multi_reduction <add>, %1333, %cst_534 [1] : vector<16x32xf32> to vector<16xf32>
    %1335 = vector.shape_cast %1334 : vector<16xf32> to vector<16x1xf32>
    %1336 = vector.broadcast %1335 : vector<16x1xf32> to vector<16x2xf32>
    %1337 = arith.addf %1336, %858 : vector<16x2xf32>
    %cst_535 = arith.constant dense<0xFF800000> : vector<2xf32>
    %1338 = vector.multi_reduction <maximumf>, %1337, %cst_535 [0] : vector<16x2xf32> to vector<2xf32>
    %1339 = vector.shape_cast %1338 : vector<2xf32> to vector<1x2xf32>
    %1340 = vector.broadcast %1339 : vector<1x2xf32> to vector<16x2xf32>
    %1341 = arith.subf %1337, %1340 : vector<16x2xf32>
    %1342 = math.exp %1341 : vector<16x2xf32>
    %cst_536 = arith.constant dense<0.000000e+00> : vector<2xf32>
    %1343 = vector.multi_reduction <add>, %1342, %cst_536 [0] : vector<16x2xf32> to vector<2xf32>
    %1344 = vector.shape_cast %1343 : vector<2xf32> to vector<1x2xf32>
    %1345 = vector.broadcast %1344 : vector<1x2xf32> to vector<16x2xf32>
    %1346 = arith.divf %1342, %1345 : vector<16x2xf32>
    %cst_537 = arith.constant dense<0.000000e+00> : vector<16xf32>
    %1347 = vector.multi_reduction <add>, %1346, %cst_537 [1] : vector<16x2xf32> to vector<16xf32>
    %1348 = vector.shape_cast %1347 : vector<16xf32> to vector<16x1xf32>
    %1349 = vector.broadcast %1348 : vector<16x1xf32> to vector<16x64xf32>
    %1350 = arith.mulf %1349, %672 : vector<16x64xf32>
    %cst_538 = arith.constant dense<0.000000e+00> : vector<2x64xf32>
    %1351 = tpu.matmul %871, %1350, %cst_538 {dimension_numbers = #tpu.dot_dimension_numbers<[1], [0], [0], [1], [0, 0, 1, 1], [], []>} : vector<2x16xf32>, vector<16x64xf32>, vector<2x64xf32> -> vector<2x64xf32>
    %c0_539 = arith.constant 0 : index
    %c32_540 = arith.constant 32 : index
    %1352 = vector.load %arg28[%c0_539, %c32_540] : memref<2x128xf32, #tpu.memory_space<vmem>>, vector<2x64xf32>
    tpu.vector_store %arg28[%c0_539, %c32_540], %1351 {strides = array<i32>} : memref<2x128xf32, #tpu.memory_space<vmem>>, vector<2x64xf32>,
    %c0_541 = arith.constant 0 : index
    %c96_542 = arith.constant 96 : index
    %1353 = vector.load %arg28[%c0_541, %c96_542] : memref<2x128xf32, #tpu.memory_space<vmem>>, vector<2x16xf32>
    tpu.vector_store %arg28[%c0_541, %c96_542], %1316 {strides = array<i32>} : memref<2x128xf32, #tpu.memory_space<vmem>>, vector<2x16xf32>,
    %c0_543 = arith.constant 0 : index
    %c0_544 = arith.constant 0 : index
    %1354 = vector.load %arg28[%c0_543, %c0_544] : memref<2x128xf32, #tpu.memory_space<vmem>>, vector<2x128xf32>
    %c0_545 = arith.constant 0 : index
    %c0_546 = arith.constant 0 : index
    %1355 = vector.load %arg20[%c0_545, %c0_546] : memref<128x128xf32, #tpu.memory_space<vmem>>, vector<128x128xf32>
    %cst_547 = arith.constant dense<0.000000e+00> : vector<2x128xf32>
    %1356 = tpu.matmul %1354, %1355, %cst_547 {dimension_numbers = #tpu.dot_dimension_numbers<[1], [0], [0], [1], [0, 0, 1, 1], [], []>} : vector<2x128xf32>, vector<128x128xf32>, vector<2x128xf32> -> vector<2x128xf32>
    %c0_548 = arith.constant 0 : index
    %c0_549 = arith.constant 0 : index
    %1357 = vector.load %arg22[%c0_548, %c0_549] : memref<1x128xf32, #tpu.memory_space<vmem>>, vector<1x128xf32>
    %1358 = vector.broadcast %1357 : vector<1x128xf32> to vector<2x128xf32>
    %1359 = arith.addf %1356, %1358 : vector<2x128xf32>
    %c0_550 = arith.constant 0 : index
    %c0_551 = arith.constant 0 : index
    %1360 = vector.load %arg21[%c0_550, %c0_551] : memref<32x128xf32, #tpu.memory_space<vmem>>, vector<32x128xf32>
    %cst_552 = arith.constant dense<0.000000e+00> : vector<2x128xf32>
    %1361 = tpu.matmul %1281, %1360, %cst_552 {dimension_numbers = #tpu.dot_dimension_numbers<[1], [0], [0], [1], [0, 0, 1, 1], [], []>} : vector<2x32xf32>, vector<32x128xf32>, vector<2x128xf32> -> vector<2x128xf32>
    %c0_553 = arith.constant 0 : index
    %c0_554 = arith.constant 0 : index
    %1362 = vector.load %arg23[%c0_553, %c0_554] : memref<1x128xf32, #tpu.memory_space<vmem>>, vector<1x128xf32>
    %1363 = vector.broadcast %1362 : vector<1x128xf32> to vector<2x128xf32>
    %1364 = arith.addf %1361, %1363 : vector<2x128xf32>
    %1365 = vector.extract_strided_slice %1359 {offsets = [0, 0], sizes = [2, 32], strides = [1, 1]} : vector<2x128xf32> to vector<2x32xf32>
    %1366 = vector.extract_strided_slice %1364 {offsets = [0, 0], sizes = [2, 32], strides = [1, 1]} : vector<2x128xf32> to vector<2x32xf32>
    %1367 = arith.addf %1365, %1366 : vector<2x32xf32>
    %1368 = arith.negf %1367 : vector<2x32xf32>
    %1369 = math.exp %1368 : vector<2x32xf32>
    %cst_555 = arith.constant 1.000000e+00 : f32
    %1370 = vector.broadcast %cst_555 : f32 to vector<2x32xf32>
    %1371 = arith.addf %1370, %1369 : vector<2x32xf32>
    %1372 = arith.divf %1370, %1371 : vector<2x32xf32>
    %1373 = vector.extract_strided_slice %1359 {offsets = [0, 32], sizes = [2, 32], strides = [1, 1]} : vector<2x128xf32> to vector<2x32xf32>
    %1374 = vector.extract_strided_slice %1364 {offsets = [0, 32], sizes = [2, 32], strides = [1, 1]} : vector<2x128xf32> to vector<2x32xf32>
    %1375 = arith.addf %1373, %1374 : vector<2x32xf32>
    %1376 = arith.negf %1375 : vector<2x32xf32>
    %1377 = math.exp %1376 : vector<2x32xf32>
    %cst_556 = arith.constant 1.000000e+00 : f32
    %1378 = vector.broadcast %cst_556 : f32 to vector<2x32xf32>
    %1379 = arith.addf %1378, %1377 : vector<2x32xf32>
    %1380 = arith.divf %1378, %1379 : vector<2x32xf32>
    %1381 = vector.extract_strided_slice %1359 {offsets = [0, 64], sizes = [2, 32], strides = [1, 1]} : vector<2x128xf32> to vector<2x32xf32>
    %1382 = vector.extract_strided_slice %1364 {offsets = [0, 64], sizes = [2, 32], strides = [1, 1]} : vector<2x128xf32> to vector<2x32xf32>
    %1383 = arith.mulf %1372, %1382 : vector<2x32xf32>
    %1384 = arith.addf %1381, %1383 : vector<2x32xf32>
    %1385 = math.tanh %1384 : vector<2x32xf32>
    %cst_557 = arith.constant 1.000000e+00 : f32
    %1386 = vector.broadcast %cst_557 : f32 to vector<2x32xf32>
    %1387 = arith.subf %1386, %1380 : vector<2x32xf32>
    %1388 = arith.mulf %1387, %1385 : vector<2x32xf32>
    %1389 = arith.mulf %1380, %1281 : vector<2x32xf32>
    %1390 = arith.addf %1388, %1389 : vector<2x32xf32>
    %c0_558 = arith.constant 0 : index
    %c0_559 = arith.constant 0 : index
    %1391 = vector.load %arg28[%c0_558, %c0_559] : memref<2x128xf32, #tpu.memory_space<vmem>>, vector<2x32xf32>
    tpu.vector_store %arg28[%c0_558, %c0_559], %1390 {strides = array<i32>} : memref<2x128xf32, #tpu.memory_space<vmem>>, vector<2x32xf32>,
    %c0_560 = arith.constant 0 : index
    %c0_561 = arith.constant 0 : index
    %1392 = vector.load %arg28[%c0_560, %c0_561] : memref<2x128xf32, #tpu.memory_space<vmem>>, vector<2x128xf32>
    %c0_562 = arith.constant 0 : index
    %c0_563 = arith.constant 0 : index
    %1393 = vector.load %arg24[%c0_562, %c0_563] : memref<128x128xf32, #tpu.memory_space<vmem>>, vector<128x128xf32>
    %cst_564 = arith.constant dense<0.000000e+00> : vector<2x128xf32>
    %1394 = tpu.matmul %1392, %1393, %cst_564 {dimension_numbers = #tpu.dot_dimension_numbers<[1], [0], [0], [1], [0, 0, 1, 1], [], []>} : vector<2x128xf32>, vector<128x128xf32>, vector<2x128xf32> -> vector<2x128xf32>
    %c0_565 = arith.constant 0 : index
    %c0_566 = arith.constant 0 : index
    %1395 = vector.load %arg25[%c0_565, %c0_566] : memref<1x128xf32, #tpu.memory_space<vmem>>, vector<1x128xf32>
    %1396 = vector.broadcast %1395 : vector<1x128xf32> to vector<2x128xf32>
    %1397 = arith.addf %1394, %1396 : vector<2x128xf32>
    %c5_567 = arith.constant 5 : index
    %c0_568 = arith.constant 0 : index
    %c0_569 = arith.constant 0 : index
    %1398 = vector.load %arg26[%c5_567, %c0_568, %c0_569] : memref<8x2x128xf32, #tpu.memory_space<vmem>>, vector<1x2x128xf32>
    %1399 = vector.shape_cast %1398 : vector<1x2x128xf32> to vector<2x128xf32>
    %1400 = vector.shape_cast %1397 : vector<2x128xf32> to vector<1x2x128xf32>
    tpu.vector_store %arg26[%c5_567, %c0_568, %c0_569], %1400 {strides = array<i32>} : memref<8x2x128xf32, #tpu.memory_space<vmem>>, vector<1x2x128xf32>,
    %cst_570 = arith.constant dense<0xFF800000> : vector<2xf32>
    %1401 = vector.multi_reduction <maximumf>, %1397, %cst_570 [1] : vector<2x128xf32> to vector<2xf32>
    %1402 = vector.shape_cast %1401 : vector<2xf32> to vector<2x1xf32>
    %1403 = vector.broadcast %1402 : vector<2x1xf32> to vector<2x128xf32>
    %1404 = arith.cmpf oeq, %1397, %1403 : vector<2x128xf32>
    %c128_i32_571 = arith.constant 128 : i32
    %1405 = vector.broadcast %c128_i32_571 : i32 to vector<2x128xi32>
    %1406 = arith.select %1404, %873, %1405 : vector<2x128xi1>, vector<2x128xi32>
    %cst_572 = arith.constant dense<2147483647> : vector<2xi32>
    %1407 = vector.multi_reduction <minsi>, %1406, %cst_572 [1] : vector<2x128xi32> to vector<2xi32>
    %1408 = vector.shape_cast %1407 : vector<2xi32> to vector<2x1xi32>
    %1409 = vector.broadcast %1408 : vector<2x1xi32> to vector<2x128xi32>
    %1410 = arith.cmpi eq, %873, %1409 : vector<2x128xi32>
    %1411 = arith.extui %1410 : vector<2x128xi1> to vector<2x128xi32>
    %1412 = arith.sitofp %1411 : vector<2x128xi32> to vector<2x128xf32>
    %c0_573 = arith.constant 0 : index
    %c0_574 = arith.constant 0 : index
    %1413 = vector.load %arg19[%c0_573, %c0_574] : memref<128x16xf32, #tpu.memory_space<vmem>>, vector<128x16xf32>
    %cst_575 = arith.constant dense<0.000000e+00> : vector<2x16xf32>
    %1414 = tpu.matmul %1412, %1413, %cst_575 {dimension_numbers = #tpu.dot_dimension_numbers<[1], [0], [0], [1], [0, 0, 1, 1], [], []>} : vector<2x128xf32>, vector<128x16xf32>, vector<2x16xf32> -> vector<2x16xf32>
    %c5_576 = arith.constant 5 : index
    %1415 = memref.load %arg2[%c5_576] : memref<8xi32, #tpu.memory_space<smem>>
    %c0_i32_577 = arith.constant 0 : i32
    %1416 = arith.cmpi sgt, %1415, %c0_i32_577 : i32
    %1417 = arith.extui %1416 : i1 to i32
    %1418 = arith.sitofp %1417 : i32 to f32
    %1419 = vector.extract_strided_slice %842 {offsets = [10, 0], sizes = [2, 16], strides = [1, 1]} : vector<16x16xf32> to vector<2x16xf32>
    %1420 = vector.broadcast %1418 : f32 to vector<2x16xf32>
    %1421 = arith.mulf %1420, %1419 : vector<2x16xf32>
    %cst_578 = arith.constant 1.000000e+00 : f32
    %1422 = arith.subf %cst_578, %1418 : f32
    %1423 = vector.broadcast %1422 : f32 to vector<2x16xf32>
    %1424 = arith.mulf %1423, %1414 : vector<2x16xf32>
    %1425 = arith.addf %1421, %1424 : vector<2x16xf32>
    %c0_579 = arith.constant 0 : index
    %c0_580 = arith.constant 0 : index
    %1426 = vector.load %arg17[%c0_579, %c0_580] : memref<32x32xf32, #tpu.memory_space<vmem>>, vector<32x32xf32>
    %cst_581 = arith.constant dense<0.000000e+00> : vector<2x32xf32>
    %1427 = tpu.matmul %1390, %1426, %cst_581 {dimension_numbers = #tpu.dot_dimension_numbers<[1], [0], [0], [1], [0, 0, 1, 1], [], []>} : vector<2x32xf32>, vector<32x32xf32>, vector<2x32xf32> -> vector<2x32xf32>
    %1428 = vector.extract_strided_slice %855 {offsets = [0, 0], sizes = [16, 1], strides = [1, 1]} : vector<16x2xf32> to vector<16x1xf32>
    %1429 = vector.extract_strided_slice %1427 {offsets = [0, 0], sizes = [1, 32], strides = [1, 1]} : vector<2x32xf32> to vector<1x32xf32>
    %1430 = vector.broadcast %1428 : vector<16x1xf32> to vector<16x32xf32>
    %1431 = vector.broadcast %1429 : vector<1x32xf32> to vector<16x32xf32>
    %1432 = arith.mulf %1430, %1431 : vector<16x32xf32>
    %1433 = vector.extract_strided_slice %855 {offsets = [0, 1], sizes = [16, 1], strides = [1, 1]} : vector<16x2xf32> to vector<16x1xf32>
    %1434 = vector.extract_strided_slice %1427 {offsets = [1, 0], sizes = [1, 32], strides = [1, 1]} : vector<2x32xf32> to vector<1x32xf32>
    %1435 = vector.broadcast %1433 : vector<16x1xf32> to vector<16x32xf32>
    %1436 = vector.broadcast %1434 : vector<1x32xf32> to vector<16x32xf32>
    %1437 = arith.mulf %1435, %1436 : vector<16x32xf32>
    %1438 = arith.addf %1432, %1437 : vector<16x32xf32>
    %1439 = arith.addf %1438, %677 : vector<16x32xf32>
    %1440 = math.tanh %1439 : vector<16x32xf32>
    %1441 = vector.broadcast %872 : vector<1x32xf32> to vector<16x32xf32>
    %1442 = arith.mulf %1440, %1441 : vector<16x32xf32>
    %cst_582 = arith.constant dense<0.000000e+00> : vector<16xf32>
    %1443 = vector.multi_reduction <add>, %1442, %cst_582 [1] : vector<16x32xf32> to vector<16xf32>
    %1444 = vector.shape_cast %1443 : vector<16xf32> to vector<16x1xf32>
    %1445 = vector.broadcast %1444 : vector<16x1xf32> to vector<16x2xf32>
    %1446 = arith.addf %1445, %858 : vector<16x2xf32>
    %cst_583 = arith.constant dense<0xFF800000> : vector<2xf32>
    %1447 = vector.multi_reduction <maximumf>, %1446, %cst_583 [0] : vector<16x2xf32> to vector<2xf32>
    %1448 = vector.shape_cast %1447 : vector<2xf32> to vector<1x2xf32>
    %1449 = vector.broadcast %1448 : vector<1x2xf32> to vector<16x2xf32>
    %1450 = arith.subf %1446, %1449 : vector<16x2xf32>
    %1451 = math.exp %1450 : vector<16x2xf32>
    %cst_584 = arith.constant dense<0.000000e+00> : vector<2xf32>
    %1452 = vector.multi_reduction <add>, %1451, %cst_584 [0] : vector<16x2xf32> to vector<2xf32>
    %1453 = vector.shape_cast %1452 : vector<2xf32> to vector<1x2xf32>
    %1454 = vector.broadcast %1453 : vector<1x2xf32> to vector<16x2xf32>
    %1455 = arith.divf %1451, %1454 : vector<16x2xf32>
    %cst_585 = arith.constant dense<0.000000e+00> : vector<16xf32>
    %1456 = vector.multi_reduction <add>, %1455, %cst_585 [1] : vector<16x2xf32> to vector<16xf32>
    %1457 = vector.shape_cast %1456 : vector<16xf32> to vector<16x1xf32>
    %1458 = vector.broadcast %1457 : vector<16x1xf32> to vector<16x64xf32>
    %1459 = arith.mulf %1458, %672 : vector<16x64xf32>
    %cst_586 = arith.constant dense<0.000000e+00> : vector<2x64xf32>
    %1460 = tpu.matmul %871, %1459, %cst_586 {dimension_numbers = #tpu.dot_dimension_numbers<[1], [0], [0], [1], [0, 0, 1, 1], [], []>} : vector<2x16xf32>, vector<16x64xf32>, vector<2x64xf32> -> vector<2x64xf32>
    %c0_587 = arith.constant 0 : index
    %c32_588 = arith.constant 32 : index
    %1461 = vector.load %arg28[%c0_587, %c32_588] : memref<2x128xf32, #tpu.memory_space<vmem>>, vector<2x64xf32>
    tpu.vector_store %arg28[%c0_587, %c32_588], %1460 {strides = array<i32>} : memref<2x128xf32, #tpu.memory_space<vmem>>, vector<2x64xf32>,
    %c0_589 = arith.constant 0 : index
    %c96_590 = arith.constant 96 : index
    %1462 = vector.load %arg28[%c0_589, %c96_590] : memref<2x128xf32, #tpu.memory_space<vmem>>, vector<2x16xf32>
    tpu.vector_store %arg28[%c0_589, %c96_590], %1425 {strides = array<i32>} : memref<2x128xf32, #tpu.memory_space<vmem>>, vector<2x16xf32>,
    %c0_591 = arith.constant 0 : index
    %c0_592 = arith.constant 0 : index
    %1463 = vector.load %arg28[%c0_591, %c0_592] : memref<2x128xf32, #tpu.memory_space<vmem>>, vector<2x128xf32>
    %c0_593 = arith.constant 0 : index
    %c0_594 = arith.constant 0 : index
    %1464 = vector.load %arg20[%c0_593, %c0_594] : memref<128x128xf32, #tpu.memory_space<vmem>>, vector<128x128xf32>
    %cst_595 = arith.constant dense<0.000000e+00> : vector<2x128xf32>
    %1465 = tpu.matmul %1463, %1464, %cst_595 {dimension_numbers = #tpu.dot_dimension_numbers<[1], [0], [0], [1], [0, 0, 1, 1], [], []>} : vector<2x128xf32>, vector<128x128xf32>, vector<2x128xf32> -> vector<2x128xf32>
    %c0_596 = arith.constant 0 : index
    %c0_597 = arith.constant 0 : index
    %1466 = vector.load %arg22[%c0_596, %c0_597] : memref<1x128xf32, #tpu.memory_space<vmem>>, vector<1x128xf32>
    %1467 = vector.broadcast %1466 : vector<1x128xf32> to vector<2x128xf32>
    %1468 = arith.addf %1465, %1467 : vector<2x128xf32>
    %c0_598 = arith.constant 0 : index
    %c0_599 = arith.constant 0 : index
    %1469 = vector.load %arg21[%c0_598, %c0_599] : memref<32x128xf32, #tpu.memory_space<vmem>>, vector<32x128xf32>
    %cst_600 = arith.constant dense<0.000000e+00> : vector<2x128xf32>
    %1470 = tpu.matmul %1390, %1469, %cst_600 {dimension_numbers = #tpu.dot_dimension_numbers<[1], [0], [0], [1], [0, 0, 1, 1], [], []>} : vector<2x32xf32>, vector<32x128xf32>, vector<2x128xf32> -> vector<2x128xf32>
    %c0_601 = arith.constant 0 : index
    %c0_602 = arith.constant 0 : index
    %1471 = vector.load %arg23[%c0_601, %c0_602] : memref<1x128xf32, #tpu.memory_space<vmem>>, vector<1x128xf32>
    %1472 = vector.broadcast %1471 : vector<1x128xf32> to vector<2x128xf32>
    %1473 = arith.addf %1470, %1472 : vector<2x128xf32>
    %1474 = vector.extract_strided_slice %1468 {offsets = [0, 0], sizes = [2, 32], strides = [1, 1]} : vector<2x128xf32> to vector<2x32xf32>
    %1475 = vector.extract_strided_slice %1473 {offsets = [0, 0], sizes = [2, 32], strides = [1, 1]} : vector<2x128xf32> to vector<2x32xf32>
    %1476 = arith.addf %1474, %1475 : vector<2x32xf32>
    %1477 = arith.negf %1476 : vector<2x32xf32>
    %1478 = math.exp %1477 : vector<2x32xf32>
    %cst_603 = arith.constant 1.000000e+00 : f32
    %1479 = vector.broadcast %cst_603 : f32 to vector<2x32xf32>
    %1480 = arith.addf %1479, %1478 : vector<2x32xf32>
    %1481 = arith.divf %1479, %1480 : vector<2x32xf32>
    %1482 = vector.extract_strided_slice %1468 {offsets = [0, 32], sizes = [2, 32], strides = [1, 1]} : vector<2x128xf32> to vector<2x32xf32>
    %1483 = vector.extract_strided_slice %1473 {offsets = [0, 32], sizes = [2, 32], strides = [1, 1]} : vector<2x128xf32> to vector<2x32xf32>
    %1484 = arith.addf %1482, %1483 : vector<2x32xf32>
    %1485 = arith.negf %1484 : vector<2x32xf32>
    %1486 = math.exp %1485 : vector<2x32xf32>
    %cst_604 = arith.constant 1.000000e+00 : f32
    %1487 = vector.broadcast %cst_604 : f32 to vector<2x32xf32>
    %1488 = arith.addf %1487, %1486 : vector<2x32xf32>
    %1489 = arith.divf %1487, %1488 : vector<2x32xf32>
    %1490 = vector.extract_strided_slice %1468 {offsets = [0, 64], sizes = [2, 32], strides = [1, 1]} : vector<2x128xf32> to vector<2x32xf32>
    %1491 = vector.extract_strided_slice %1473 {offsets = [0, 64], sizes = [2, 32], strides = [1, 1]} : vector<2x128xf32> to vector<2x32xf32>
    %1492 = arith.mulf %1481, %1491 : vector<2x32xf32>
    %1493 = arith.addf %1490, %1492 : vector<2x32xf32>
    %1494 = math.tanh %1493 : vector<2x32xf32>
    %cst_605 = arith.constant 1.000000e+00 : f32
    %1495 = vector.broadcast %cst_605 : f32 to vector<2x32xf32>
    %1496 = arith.subf %1495, %1489 : vector<2x32xf32>
    %1497 = arith.mulf %1496, %1494 : vector<2x32xf32>
    %1498 = arith.mulf %1489, %1390 : vector<2x32xf32>
    %1499 = arith.addf %1497, %1498 : vector<2x32xf32>
    %c0_606 = arith.constant 0 : index
    %c0_607 = arith.constant 0 : index
    %1500 = vector.load %arg28[%c0_606, %c0_607] : memref<2x128xf32, #tpu.memory_space<vmem>>, vector<2x32xf32>
    tpu.vector_store %arg28[%c0_606, %c0_607], %1499 {strides = array<i32>} : memref<2x128xf32, #tpu.memory_space<vmem>>, vector<2x32xf32>,
    %c0_608 = arith.constant 0 : index
    %c0_609 = arith.constant 0 : index
    %1501 = vector.load %arg28[%c0_608, %c0_609] : memref<2x128xf32, #tpu.memory_space<vmem>>, vector<2x128xf32>
    %c0_610 = arith.constant 0 : index
    %c0_611 = arith.constant 0 : index
    %1502 = vector.load %arg24[%c0_610, %c0_611] : memref<128x128xf32, #tpu.memory_space<vmem>>, vector<128x128xf32>
    %cst_612 = arith.constant dense<0.000000e+00> : vector<2x128xf32>
    %1503 = tpu.matmul %1501, %1502, %cst_612 {dimension_numbers = #tpu.dot_dimension_numbers<[1], [0], [0], [1], [0, 0, 1, 1], [], []>} : vector<2x128xf32>, vector<128x128xf32>, vector<2x128xf32> -> vector<2x128xf32>
    %c0_613 = arith.constant 0 : index
    %c0_614 = arith.constant 0 : index
    %1504 = vector.load %arg25[%c0_613, %c0_614] : memref<1x128xf32, #tpu.memory_space<vmem>>, vector<1x128xf32>
    %1505 = vector.broadcast %1504 : vector<1x128xf32> to vector<2x128xf32>
    %1506 = arith.addf %1503, %1505 : vector<2x128xf32>
    %c6_615 = arith.constant 6 : index
    %c0_616 = arith.constant 0 : index
    %c0_617 = arith.constant 0 : index
    %1507 = vector.load %arg26[%c6_615, %c0_616, %c0_617] : memref<8x2x128xf32, #tpu.memory_space<vmem>>, vector<1x2x128xf32>
    %1508 = vector.shape_cast %1507 : vector<1x2x128xf32> to vector<2x128xf32>
    %1509 = vector.shape_cast %1506 : vector<2x128xf32> to vector<1x2x128xf32>
    tpu.vector_store %arg26[%c6_615, %c0_616, %c0_617], %1509 {strides = array<i32>} : memref<8x2x128xf32, #tpu.memory_space<vmem>>, vector<1x2x128xf32>,
    %cst_618 = arith.constant dense<0xFF800000> : vector<2xf32>
    %1510 = vector.multi_reduction <maximumf>, %1506, %cst_618 [1] : vector<2x128xf32> to vector<2xf32>
    %1511 = vector.shape_cast %1510 : vector<2xf32> to vector<2x1xf32>
    %1512 = vector.broadcast %1511 : vector<2x1xf32> to vector<2x128xf32>
    %1513 = arith.cmpf oeq, %1506, %1512 : vector<2x128xf32>
    %c128_i32_619 = arith.constant 128 : i32
    %1514 = vector.broadcast %c128_i32_619 : i32 to vector<2x128xi32>
    %1515 = arith.select %1513, %873, %1514 : vector<2x128xi1>, vector<2x128xi32>
    %cst_620 = arith.constant dense<2147483647> : vector<2xi32>
    %1516 = vector.multi_reduction <minsi>, %1515, %cst_620 [1] : vector<2x128xi32> to vector<2xi32>
    %1517 = vector.shape_cast %1516 : vector<2xi32> to vector<2x1xi32>
    %1518 = vector.broadcast %1517 : vector<2x1xi32> to vector<2x128xi32>
    %1519 = arith.cmpi eq, %873, %1518 : vector<2x128xi32>
    %1520 = arith.extui %1519 : vector<2x128xi1> to vector<2x128xi32>
    %1521 = arith.sitofp %1520 : vector<2x128xi32> to vector<2x128xf32>
    %c0_621 = arith.constant 0 : index
    %c0_622 = arith.constant 0 : index
    %1522 = vector.load %arg19[%c0_621, %c0_622] : memref<128x16xf32, #tpu.memory_space<vmem>>, vector<128x16xf32>
    %cst_623 = arith.constant dense<0.000000e+00> : vector<2x16xf32>
    %1523 = tpu.matmul %1521, %1522, %cst_623 {dimension_numbers = #tpu.dot_dimension_numbers<[1], [0], [0], [1], [0, 0, 1, 1], [], []>} : vector<2x128xf32>, vector<128x16xf32>, vector<2x16xf32> -> vector<2x16xf32>
    %c6_624 = arith.constant 6 : index
    %1524 = memref.load %arg2[%c6_624] : memref<8xi32, #tpu.memory_space<smem>>
    %c0_i32_625 = arith.constant 0 : i32
    %1525 = arith.cmpi sgt, %1524, %c0_i32_625 : i32
    %1526 = arith.extui %1525 : i1 to i32
    %1527 = arith.sitofp %1526 : i32 to f32
    %1528 = vector.extract_strided_slice %842 {offsets = [12, 0], sizes = [2, 16], strides = [1, 1]} : vector<16x16xf32> to vector<2x16xf32>
    %1529 = vector.broadcast %1527 : f32 to vector<2x16xf32>
    %1530 = arith.mulf %1529, %1528 : vector<2x16xf32>
    %cst_626 = arith.constant 1.000000e+00 : f32
    %1531 = arith.subf %cst_626, %1527 : f32
    %1532 = vector.broadcast %1531 : f32 to vector<2x16xf32>
    %1533 = arith.mulf %1532, %1523 : vector<2x16xf32>
    %1534 = arith.addf %1530, %1533 : vector<2x16xf32>
    %c0_627 = arith.constant 0 : index
    %c0_628 = arith.constant 0 : index
    %1535 = vector.load %arg17[%c0_627, %c0_628] : memref<32x32xf32, #tpu.memory_space<vmem>>, vector<32x32xf32>
    %cst_629 = arith.constant dense<0.000000e+00> : vector<2x32xf32>
    %1536 = tpu.matmul %1499, %1535, %cst_629 {dimension_numbers = #tpu.dot_dimension_numbers<[1], [0], [0], [1], [0, 0, 1, 1], [], []>} : vector<2x32xf32>, vector<32x32xf32>, vector<2x32xf32> -> vector<2x32xf32>
    %1537 = vector.extract_strided_slice %855 {offsets = [0, 0], sizes = [16, 1], strides = [1, 1]} : vector<16x2xf32> to vector<16x1xf32>
    %1538 = vector.extract_strided_slice %1536 {offsets = [0, 0], sizes = [1, 32], strides = [1, 1]} : vector<2x32xf32> to vector<1x32xf32>
    %1539 = vector.broadcast %1537 : vector<16x1xf32> to vector<16x32xf32>
    %1540 = vector.broadcast %1538 : vector<1x32xf32> to vector<16x32xf32>
    %1541 = arith.mulf %1539, %1540 : vector<16x32xf32>
    %1542 = vector.extract_strided_slice %855 {offsets = [0, 1], sizes = [16, 1], strides = [1, 1]} : vector<16x2xf32> to vector<16x1xf32>
    %1543 = vector.extract_strided_slice %1536 {offsets = [1, 0], sizes = [1, 32], strides = [1, 1]} : vector<2x32xf32> to vector<1x32xf32>
    %1544 = vector.broadcast %1542 : vector<16x1xf32> to vector<16x32xf32>
    %1545 = vector.broadcast %1543 : vector<1x32xf32> to vector<16x32xf32>
    %1546 = arith.mulf %1544, %1545 : vector<16x32xf32>
    %1547 = arith.addf %1541, %1546 : vector<16x32xf32>
    %1548 = arith.addf %1547, %677 : vector<16x32xf32>
    %1549 = math.tanh %1548 : vector<16x32xf32>
    %1550 = vector.broadcast %872 : vector<1x32xf32> to vector<16x32xf32>
    %1551 = arith.mulf %1549, %1550 : vector<16x32xf32>
    %cst_630 = arith.constant dense<0.000000e+00> : vector<16xf32>
    %1552 = vector.multi_reduction <add>, %1551, %cst_630 [1] : vector<16x32xf32> to vector<16xf32>
    %1553 = vector.shape_cast %1552 : vector<16xf32> to vector<16x1xf32>
    %1554 = vector.broadcast %1553 : vector<16x1xf32> to vector<16x2xf32>
    %1555 = arith.addf %1554, %858 : vector<16x2xf32>
    %cst_631 = arith.constant dense<0xFF800000> : vector<2xf32>
    %1556 = vector.multi_reduction <maximumf>, %1555, %cst_631 [0] : vector<16x2xf32> to vector<2xf32>
    %1557 = vector.shape_cast %1556 : vector<2xf32> to vector<1x2xf32>
    %1558 = vector.broadcast %1557 : vector<1x2xf32> to vector<16x2xf32>
    %1559 = arith.subf %1555, %1558 : vector<16x2xf32>
    %1560 = math.exp %1559 : vector<16x2xf32>
    %cst_632 = arith.constant dense<0.000000e+00> : vector<2xf32>
    %1561 = vector.multi_reduction <add>, %1560, %cst_632 [0] : vector<16x2xf32> to vector<2xf32>
    %1562 = vector.shape_cast %1561 : vector<2xf32> to vector<1x2xf32>
    %1563 = vector.broadcast %1562 : vector<1x2xf32> to vector<16x2xf32>
    %1564 = arith.divf %1560, %1563 : vector<16x2xf32>
    %cst_633 = arith.constant dense<0.000000e+00> : vector<16xf32>
    %1565 = vector.multi_reduction <add>, %1564, %cst_633 [1] : vector<16x2xf32> to vector<16xf32>
    %1566 = vector.shape_cast %1565 : vector<16xf32> to vector<16x1xf32>
    %1567 = vector.broadcast %1566 : vector<16x1xf32> to vector<16x64xf32>
    %1568 = arith.mulf %1567, %672 : vector<16x64xf32>
    %cst_634 = arith.constant dense<0.000000e+00> : vector<2x64xf32>
    %1569 = tpu.matmul %871, %1568, %cst_634 {dimension_numbers = #tpu.dot_dimension_numbers<[1], [0], [0], [1], [0, 0, 1, 1], [], []>} : vector<2x16xf32>, vector<16x64xf32>, vector<2x64xf32> -> vector<2x64xf32>
    %c0_635 = arith.constant 0 : index
    %c32_636 = arith.constant 32 : index
    %1570 = vector.load %arg28[%c0_635, %c32_636] : memref<2x128xf32, #tpu.memory_space<vmem>>, vector<2x64xf32>
    tpu.vector_store %arg28[%c0_635, %c32_636], %1569 {strides = array<i32>} : memref<2x128xf32, #tpu.memory_space<vmem>>, vector<2x64xf32>,
    %c0_637 = arith.constant 0 : index
    %c96_638 = arith.constant 96 : index
    %1571 = vector.load %arg28[%c0_637, %c96_638] : memref<2x128xf32, #tpu.memory_space<vmem>>, vector<2x16xf32>
    tpu.vector_store %arg28[%c0_637, %c96_638], %1534 {strides = array<i32>} : memref<2x128xf32, #tpu.memory_space<vmem>>, vector<2x16xf32>,
    %c0_639 = arith.constant 0 : index
    %c0_640 = arith.constant 0 : index
    %1572 = vector.load %arg28[%c0_639, %c0_640] : memref<2x128xf32, #tpu.memory_space<vmem>>, vector<2x128xf32>
    %c0_641 = arith.constant 0 : index
    %c0_642 = arith.constant 0 : index
    %1573 = vector.load %arg20[%c0_641, %c0_642] : memref<128x128xf32, #tpu.memory_space<vmem>>, vector<128x128xf32>
    %cst_643 = arith.constant dense<0.000000e+00> : vector<2x128xf32>
    %1574 = tpu.matmul %1572, %1573, %cst_643 {dimension_numbers = #tpu.dot_dimension_numbers<[1], [0], [0], [1], [0, 0, 1, 1], [], []>} : vector<2x128xf32>, vector<128x128xf32>, vector<2x128xf32> -> vector<2x128xf32>
    %c0_644 = arith.constant 0 : index
    %c0_645 = arith.constant 0 : index
    %1575 = vector.load %arg22[%c0_644, %c0_645] : memref<1x128xf32, #tpu.memory_space<vmem>>, vector<1x128xf32>
    %1576 = vector.broadcast %1575 : vector<1x128xf32> to vector<2x128xf32>
    %1577 = arith.addf %1574, %1576 : vector<2x128xf32>
    %c0_646 = arith.constant 0 : index
    %c0_647 = arith.constant 0 : index
    %1578 = vector.load %arg21[%c0_646, %c0_647] : memref<32x128xf32, #tpu.memory_space<vmem>>, vector<32x128xf32>
    %cst_648 = arith.constant dense<0.000000e+00> : vector<2x128xf32>
    %1579 = tpu.matmul %1499, %1578, %cst_648 {dimension_numbers = #tpu.dot_dimension_numbers<[1], [0], [0], [1], [0, 0, 1, 1], [], []>} : vector<2x32xf32>, vector<32x128xf32>, vector<2x128xf32> -> vector<2x128xf32>
    %c0_649 = arith.constant 0 : index
    %c0_650 = arith.constant 0 : index
    %1580 = vector.load %arg23[%c0_649, %c0_650] : memref<1x128xf32, #tpu.memory_space<vmem>>, vector<1x128xf32>
    %1581 = vector.broadcast %1580 : vector<1x128xf32> to vector<2x128xf32>
    %1582 = arith.addf %1579, %1581 : vector<2x128xf32>
    %1583 = vector.extract_strided_slice %1577 {offsets = [0, 0], sizes = [2, 32], strides = [1, 1]} : vector<2x128xf32> to vector<2x32xf32>
    %1584 = vector.extract_strided_slice %1582 {offsets = [0, 0], sizes = [2, 32], strides = [1, 1]} : vector<2x128xf32> to vector<2x32xf32>
    %1585 = arith.addf %1583, %1584 : vector<2x32xf32>
    %1586 = arith.negf %1585 : vector<2x32xf32>
    %1587 = math.exp %1586 : vector<2x32xf32>
    %cst_651 = arith.constant 1.000000e+00 : f32
    %1588 = vector.broadcast %cst_651 : f32 to vector<2x32xf32>
    %1589 = arith.addf %1588, %1587 : vector<2x32xf32>
    %1590 = arith.divf %1588, %1589 : vector<2x32xf32>
    %1591 = vector.extract_strided_slice %1577 {offsets = [0, 32], sizes = [2, 32], strides = [1, 1]} : vector<2x128xf32> to vector<2x32xf32>
    %1592 = vector.extract_strided_slice %1582 {offsets = [0, 32], sizes = [2, 32], strides = [1, 1]} : vector<2x128xf32> to vector<2x32xf32>
    %1593 = arith.addf %1591, %1592 : vector<2x32xf32>
    %1594 = arith.negf %1593 : vector<2x32xf32>
    %1595 = math.exp %1594 : vector<2x32xf32>
    %cst_652 = arith.constant 1.000000e+00 : f32
    %1596 = vector.broadcast %cst_652 : f32 to vector<2x32xf32>
    %1597 = arith.addf %1596, %1595 : vector<2x32xf32>
    %1598 = arith.divf %1596, %1597 : vector<2x32xf32>
    %1599 = vector.extract_strided_slice %1577 {offsets = [0, 64], sizes = [2, 32], strides = [1, 1]} : vector<2x128xf32> to vector<2x32xf32>
    %1600 = vector.extract_strided_slice %1582 {offsets = [0, 64], sizes = [2, 32], strides = [1, 1]} : vector<2x128xf32> to vector<2x32xf32>
    %1601 = arith.mulf %1590, %1600 : vector<2x32xf32>
    %1602 = arith.addf %1599, %1601 : vector<2x32xf32>
    %1603 = math.tanh %1602 : vector<2x32xf32>
    %cst_653 = arith.constant 1.000000e+00 : f32
    %1604 = vector.broadcast %cst_653 : f32 to vector<2x32xf32>
    %1605 = arith.subf %1604, %1598 : vector<2x32xf32>
    %1606 = arith.mulf %1605, %1603 : vector<2x32xf32>
    %1607 = arith.mulf %1598, %1499 : vector<2x32xf32>
    %1608 = arith.addf %1606, %1607 : vector<2x32xf32>
    %c0_654 = arith.constant 0 : index
    %c0_655 = arith.constant 0 : index
    %1609 = vector.load %arg28[%c0_654, %c0_655] : memref<2x128xf32, #tpu.memory_space<vmem>>, vector<2x32xf32>
    tpu.vector_store %arg28[%c0_654, %c0_655], %1608 {strides = array<i32>} : memref<2x128xf32, #tpu.memory_space<vmem>>, vector<2x32xf32>,
    %c0_656 = arith.constant 0 : index
    %c0_657 = arith.constant 0 : index
    %1610 = vector.load %arg28[%c0_656, %c0_657] : memref<2x128xf32, #tpu.memory_space<vmem>>, vector<2x128xf32>
    %c0_658 = arith.constant 0 : index
    %c0_659 = arith.constant 0 : index
    %1611 = vector.load %arg24[%c0_658, %c0_659] : memref<128x128xf32, #tpu.memory_space<vmem>>, vector<128x128xf32>
    %cst_660 = arith.constant dense<0.000000e+00> : vector<2x128xf32>
    %1612 = tpu.matmul %1610, %1611, %cst_660 {dimension_numbers = #tpu.dot_dimension_numbers<[1], [0], [0], [1], [0, 0, 1, 1], [], []>} : vector<2x128xf32>, vector<128x128xf32>, vector<2x128xf32> -> vector<2x128xf32>
    %c0_661 = arith.constant 0 : index
    %c0_662 = arith.constant 0 : index
    %1613 = vector.load %arg25[%c0_661, %c0_662] : memref<1x128xf32, #tpu.memory_space<vmem>>, vector<1x128xf32>
    %1614 = vector.broadcast %1613 : vector<1x128xf32> to vector<2x128xf32>
    %1615 = arith.addf %1612, %1614 : vector<2x128xf32>
    %c7_663 = arith.constant 7 : index
    %c0_664 = arith.constant 0 : index
    %c0_665 = arith.constant 0 : index
    %1616 = vector.load %arg26[%c7_663, %c0_664, %c0_665] : memref<8x2x128xf32, #tpu.memory_space<vmem>>, vector<1x2x128xf32>
    %1617 = vector.shape_cast %1616 : vector<1x2x128xf32> to vector<2x128xf32>
    %1618 = vector.shape_cast %1615 : vector<2x128xf32> to vector<1x2x128xf32>
    tpu.vector_store %arg26[%c7_663, %c0_664, %c0_665], %1618 {strides = array<i32>} : memref<8x2x128xf32, #tpu.memory_space<vmem>>, vector<1x2x128xf32>,
    return
  }
}

</mosaic_0001>

<bundles_post_ra>
// kernel: seq2seq_forward.1
= control target key start
LH: loop header
LB: loop body
LE: loop exit
PB: predicated region body
PF: predicated region fallthrough
CT: control target
= control target key end

     0   :  { %s7023_s0 = inlined_call_operand.vmem [shape: s32[7,2], index: 0, kind: input, shape index: {}]   ;;  %s7024_s1 = inlined_call_operand.vmem [shape: s32[8,2], index: 1, kind: input, shape index: {}]   ;;  %s7025_s2 = inlined_call_operand.vmem [shape: s32[8], index: 2, kind: input, shape index: {}]   ;;  %s7026_s3 = inlined_call_operand.vmem [shape: f32[32,16], index: 3, kind: input, shape index: {}]   ;;  %s7027_s4 = inlined_call_operand.vmem [shape: f32[16,128], index: 4, kind: input, shape index: {}]   ;;  %s7028_s5 = inlined_call_operand.vmem [shape: f32[32,128], index: 5, kind: input, shape index: {}]   ;;  %s7029_s6 = inlined_call_operand.vmem [shape: f32[1,128], index: 6, kind: input, shape index: {}]   ;;  %s7030_s7 = inlined_call_operand.vmem [shape: f32[1,128], index: 7, kind: input, shape index: {}]   ;;  %s7031_s8 = inlined_call_operand.hbm [shape: f32[16,128], index: 8, kind: input, shape index: {}]   ;;  %s7032_s9 = inlined_call_operand.vmem [shape: f32[32,128], index: 9, kind: input, shape index: {}]   ;;  %s7033_s10 = inlined_call_operand.vmem [shape: f32[1,128], index: 10, kind: input, shape index: {}]   ;;  %s7034_s11 = inlined_call_operand.vmem [shape: f32[1,128], index: 11, kind: input, shape index: {}]   ;;  %s7035_s12 = inlined_call_operand.vmem [shape: f32[32,32], index: 12, kind: input, shape index: {}]   ;;  %s7036_s13 = inlined_call_operand.hbm [shape: f32[32,32], index: 13, kind: input, shape index: {}]   ;;  %s7037_s14 = inlined_call_operand.vmem [shape: f32[1,32], index: 14, kind: input, shape index: {}]   ;;  %s7038_s15 = inlined_call_operand.vmem [shape: f32[64,32], index: 15, kind: input, shape index: {}]   ;;  %s7039_s16 = inlined_call_operand.vmem [shape: f32[1,32], index: 16, kind: input, shape index: {}]   ;;  %s7040_s17 = inlined_call_operand.hbm [shape: f32[32,32], index: 17, kind: input, shape index: {}]   ;;  %s7041_s18 = inlined_call_operand.vmem [shape: f32[1,32], index: 18, kind: input, shape index: {}]   ;;  %s7042_s19 = inlined_call_operand.vmem [shape: f32[128,16], index: 19, kind: input, shape index: {}]   ;;  %s7043_s20 = inlined_call_operand.vmem [shape: f32[128,128], index: 20, kind: input, shape index: {}]   ;;  %s7044_s21 = inlined_call_operand.hbm [shape: f32[32,128], index: 21, kind: input, shape index: {}]   ;;  %s7045_s22 = inlined_call_operand.vmem [shape: f32[1,128], index: 22, kind: input, shape index: {}]   ;;  %s7046_s23 = inlined_call_operand.vmem [shape: f32[1,128], index: 23, kind: input, shape index: {}]   ;;  %s7047_s24 = inlined_call_operand.hbm [shape: f32[128,128], index: 24, kind: input, shape index: {}]   ;;  %s7048_s25 = inlined_call_operand.vmem [shape: f32[1,128], index: 25, kind: input, shape index: {}]   ;;  %s7049_s26 = inlined_call_operand.hbm [shape: f32[8,2,128], index: 26, kind: output, shape index: {}]  }
   0x1   :  { %7073 = sst [smem:[#allocation25_spill]] %s7023_s0 }
   0x2   :  { %7074 = sst [smem:[#allocation26_spill]] %s7024_s1 }
   0x3   :  { %7075 = sst [smem:[#allocation27_spill]] %s7025_s2 }
   0x4   :  { %7076 = sst [smem:[#allocation28_spill]] %s7026_s3 }
   0x5   :  { %7077 = sst [smem:[#allocation29_spill]] %s7027_s4 }
   0x6   :  { %7078 = sst [smem:[#allocation30_spill]] %s7028_s5 }
   0x7   :  { %7079 = sst [smem:[#allocation31_spill]] %s7029_s6 }
   0x8   :  { %7080 = sst [smem:[#allocation32_spill]] %s7030_s7 }
   0x9   :  { %7081 = sst [smem:[#allocation33_spill]] %s7031_s8 }
   0xa   :  { %7082 = sst [smem:[#allocation34_spill]] %s7032_s9 }
   0xb   :  { %7083 = sst [smem:[#allocation35_spill]] %s7033_s10 }
   0xc   :  { %7084 = sst [smem:[#allocation36_spill]] %s7048_s25 }
   0xd   :  { %7085 = sst [smem:[#allocation37_spill]] %s7049_s26 }
   0xe   :  { %31 = vsyncpa [#allocation7], 0 }
   0xf   :  { %32 = vsyncpa [#allocation9], 0 }
  0x10   :  { %33 = vsyncpa [#allocation5], 0 }
  0x11   :  { %34 = vsyncpa [#allocation13], 0 }
  0x12   :  { %35 = vsyncpa [#allocation16], 0  ;;  %s7086_s7 = sld [smem:[#allocation26_spill]] }
  0x18   :  { %s51_s28 = sshll.u32 %s7086_s7, 4  ;;  %s52_s28 = int_to_ptr.vmem [resolvable:$true] %s51_s28 }
  0x19   :  { %36 = vsyncpa [#allocation6], 0  ;;  %s4939_s8 = smov [#allocation8]   ;;  %s99_s0 = sshll.u32 %s7036_s13, 4  ;;  %s100_s0 = int_to_ptr.hbm [resolvable:$true] %s99_s0 }
  0x1a   :  { %54 = dma.vmem_to_smem %s52_s28, 128, %s4939_s8, [#allocation9]  }
  0x1b   :  { %s4940_s9 = smov [#allocation12]   ;;  %s137_s10 = sshll.u32 %s7044_s21, 4  ;;  %s138_s10 = int_to_ptr.hbm [resolvable:$true] %s137_s10 }
  0x1c   :  { %s101_s30 = sshll.u32 %s4940_s9, 4  ;;  %s4941_s6 = smov 128   ;;  %s102_s30 = int_to_ptr.vmem [resolvable:$true] %s101_s30 }
  0x1d   :  { %s4942_s1 = smov 8   ;;  %s7087_s7 = sld [smem:[#allocation25_spill]] }
  0x1e   :  { %107 = dma.hbm_to_vmem [thread:$0]  %s100_s0, 512, %s102_s30, [#allocation13], %s4941_s6, %s4941_s6, %s4942_s1  }
  0x1f   :  { %s4943_s13 = smov [#allocation15]   ;;  %s4944_s21 = smov [#allocation4]  }
  0x20   :  { %s139_s8 = sshll.u32 %s4943_s13, 4  ;;  %s7088_s9 = sld [smem:[#allocation27_spill]]  ;;  %s140_s8 = int_to_ptr.vmem [resolvable:$true] %s139_s8 }
  0x21   :  { %145 = dma.hbm_to_vmem [thread:$0]  %s138_s10, 512, %s140_s8, [#allocation16], %s4941_s6, %s4941_s6, %s4942_s1  }
  0x22   :  { %s7089_s5 = sld [smem:[#allocation33_spill]]  ;;  %s4945_s3 = smov [#allocation10]  }
  0x23   :  { %s42_s28 = sshll.u32 %s7087_s7, 4  ;;  %s4946_s7 = smov [#allocation11]   ;;  %s43_s28 = int_to_ptr.vmem [resolvable:$true] %s42_s28 }
  0x24   :  { %45 = dma.vmem_to_smem %s43_s28, 128, %s4944_s21, [#allocation7]  }
  0x25   :  { %s80_s13 = sshll.u32 %s4946_s7, 4  ;;  %s118_s10 = sshll.u32 %s7040_s17, 4  ;;  %s81_s13 = int_to_ptr.vmem [resolvable:$true] %s80_s13  ;;  %s119_s10 = int_to_ptr.hbm [resolvable:$true] %s118_s10 }
  0x26   :  { %s60_s2 = sshll.u32 %s7088_s9, 4  ;;  %s154_s21 = sshll.u32 %s7047_s24, 4  ;;  %s61_s2 = int_to_ptr.vmem [resolvable:$true] %s60_s2  ;;  %s155_s21 = int_to_ptr.hbm [resolvable:$true] %s154_s21 }
  0x27   :  { %63 = dma.vmem_to_smem %s61_s2, 16, %s4945_s3, [#allocation9]  }
  0x28   :  { %s78_s27 = sshll.u32 %s7089_s5, 4  ;;  %s4947_s4 = smov [#allocation14]   ;;  %s79_s27 = int_to_ptr.hbm [resolvable:$true] %s78_s27 }
  0x29   :  { %86 = dma.hbm_to_vmem [thread:$0]  %s79_s27, 256, %s81_s13, [#allocation5], %s4941_s6, %s4941_s6, %s4942_s1  }
  0x2a   :  { %s120_s29 = sshll.u32 %s4947_s4, 4  ;;  %s4948_s25 = smov [#allocation17]   ;;  %s121_s29 = int_to_ptr.vmem [resolvable:$true] %s120_s29 }
  0x2b   :  { %126 = dma.hbm_to_vmem [thread:$0]  %s119_s10, 512, %s121_s29, [#allocation13], %s4941_s6, %s4941_s6, %s4942_s1  }
  0x2c   :  { %s156_s17 = sshll.u32 %s4948_s25, 4  ;;  %s157_s17 = int_to_ptr.vmem [resolvable:$true] %s156_s17 }
  0x2d   :  { %162 = dma.hbm_to_vmem [thread:$0]  %s155_s21, 2048, %s157_s17, [#allocation16], %s4941_s6, %s4941_s6, %s4942_s1  }
  0x2e   :  { %4927 = dma.done.wait [#allocation7], 128  }
  0x2f   :  { %4928 = vsyncadd [#allocation7], 4294967168 }
  0x30   :  { %4929 = dma.done.wait [#allocation9], 144  }
  0x31   :  { %4930 = vsyncadd [#allocation9], 4294967152 }
  0x32   :  { %4931 = dma.done.wait [#allocation5], 256  }
  0x33   :  { %4932 = vsyncadd [#allocation5], 4294967040 }
  0x34   :  { %4933 = dma.done.wait [#allocation13], 1024  }
  0x35   :  { %4934 = vsyncadd [#allocation13], 4294966272 }
  0x36   :  { %4935 = dma.done.wait [#allocation16], 2560  }
  0x37   :  { %4936 = vsyncadd [#allocation16], 4294964736 }
  0x38   :  { %197 = sfence }
  0x39   :  { %s7090_s9 = sld [smem:[#allocation28_spill]]  ;;  %v198_v2 = vlaneseq  ;;  %v4949_v4 = vmov 0.0   ;;  %v428_v59 = vld [vmem:[#allocation11 + $0x8] sm:$0xff]  ;;  %v427_v60 = vld [vmem:[#allocation11] sm:$0xff]  ;;  %s4950_s7 = smov 64  }
  0x3a   :  { %s203_s6 = sld [smem:[#allocation4]]  ;;  %1890 = vst [vmem:[#allocation3] sm:$0x3] %v4949_v4  ;;  %v4501_v63 = vld [vmem:[%s7034_s11] ss:$0 sm:$0xff] }
  0x3b   :  { %s4354_s5 = sld [smem:[#allocation4 + $0x1]]  ;;  %v5143_v5 = vshrl.u32 %v198_v2, 7  ;;  %v5145_v6 = vand.u32 127, %v198_v2  ;;  %1891 = vst [vmem:[#allocation18] sm:$0x3] %v4949_v4 }
  0x3c   :  { %s5147_s27 = sld [smem:[#allocation4 + $0x80]] }
  0x3d   :  { %s5150_s3 = sld [smem:[#allocation4 + $0x81]]  ;;  %vm7070_vm0 = vcmp.eq.s32.totalorder %v5143_v5, 0  ;;  %vm7069_vm1 = vcmp.eq.s32.totalorder %v5143_v5, 1  ;;  %vm7068_vm3 = vcmp.eq.s32.totalorder %v5143_v5, 2  ;;  %vm7067_vm4 = vcmp.eq.s32.totalorder %v5143_v5, 3 }
  0x3e   :  { %s5155_s10 = sld [smem:[#allocation4 + $0x100]]  ;;  %vm7066_vm7 = vcmp.eq.s32.totalorder %v5143_v5, 4  ;;  %vm7058_vm8 = vcmp.eq.s32.totalorder %v5143_v5, 5  ;;  %vm7057_vm11 = vcmp.eq.s32.totalorder %v5143_v5, 6  ;;  %v5208_v19 = vadd.s32 8, %v5143_v5 }
  0x3f   :  { %v360_v0 = vld [vmem:[%s7090_s9 + $0x18] sm:$0xff]  ;;  %v359_v1 = vld [vmem:[%s7090_s9 + $0x10] sm:$0xff]  ;;  %v358_v3 = vld [vmem:[%s7090_s9 + $0x8] sm:$0xff]  ;;  %s5158_s28 = sld [smem:[#allocation4 + $0x101]] }
  0x40   :  { %380 = vmatpush.msra.mxu0 %v360_v0  ;;  %v357_v7 = vld [vmem:[%s7090_s9] sm:$0xff]  ;;  %v206_v8 = vstv %s203_s6  ;;  %s5161_s8 = sld [smem:[#allocation4 + $0x180]] }
  0x41   :  { %s7091_s29 = sld [smem:[#allocation30_spill]]  ;;  %vm207_vm2 = vcmp.eq.s32.totalorder %v5145_v6, %v206_v8  ;;  %v217_v11 = vstv %s4354_s5 }
  0x42   :  { %381 = vmatpush.msra.mxu0 %v359_v1  ;;  %s5176_s24 = sld [smem:[#allocation4 + $0x181]]  ;;  %vm208_vm5 = vmand %vm7070_vm0, %vm207_vm2  ;;  %vm218_vm6 = vcmp.eq.s32.totalorder %v5145_v6, %v217_v11  ;;  %v228_v12 = vstv %s5147_s27 }
  0x43   :  { %v210_v14 = vsel %vm208_vm5, 1.0, %v4949_v4  ;;  %vm219_vm9 = vmand %vm7069_vm1, %vm218_vm6  ;;  %vm229_vm10 = vcmp.eq.s32.totalorder %v5145_v6, %v228_v12  ;;  %v239_v15 = vstv %s5150_s3  ;;  %s7092_s6 = sld [smem:[#allocation29_spill]]  ;;  %vm7056_vm6 = vcmp.eq.s32.totalorder %v5143_v5, 7 }
  0x44   :  { %382 = vmatpush.msra.mxu0 %v358_v3  ;;  %v221_v17 = vsel %vm219_vm9, 1.0, %v4949_v4  ;;  %vm230_vm12 = vmand %vm7068_vm3, %vm229_vm10  ;;  %vm240_vm13 = vcmp.eq.s32.totalorder %v5145_v6, %v239_v15  ;;  %v250_v18 = vstv %s5155_s10  ;;  %s7093_s3 = sld [smem:[#allocation34_spill]] }
  0x45   :  { %v223_v21 = vadd.f32 %v221_v17, %v210_v14  ;;  %v232_v22 = vsel %vm230_vm12, 1.0, %v4949_v4  ;;  %vm241_vm14 = vmand %vm7067_vm4, %vm240_vm13  ;;  %vm251_vm15 = vcmp.eq.s32.totalorder %v5145_v6, %v250_v18  ;;  %v261_v23 = vstv %s5158_s28  ;;  %s4362_s25 = sld [smem:[#allocation4 + $0x201]] }
  0x46   :  { %383 = vmatpush.msra.mxu0 %v357_v7  ;;  %v243_v24 = vsel %vm241_vm14, 1.0, %v4949_v4  ;;  %vm252_vm2 = vmand %vm7066_vm7, %vm251_vm15  ;;  %vm262_vm5 = vcmp.eq.s32.totalorder %v5145_v6, %v261_v23  ;;  %v272_v25 = vstv %s5161_s8  ;;  %vm7059_vm15 = vcmp.eq.s32.totalorder %v5208_v19, 8  ;;  %s4361_s8 = sld [smem:[#allocation4 + $0x200]] }
  0x47   :  { %v5166_v9 = vld [vmem:[%s7091_s29 + $0x18] sm:$0xff]  ;;  %v5171_v10 = vld [vmem:[%s7091_s29 + $0x10] sm:$0xff]  ;;  %v5188_v13 = vld [vmem:[%s7091_s29 + $0x8] sm:$0xff]  ;;  %v234_v27 = vadd.f32 %v232_v22, %v223_v21  ;;  %vm273_vm10 = vcmp.eq.s32.totalorder %v5145_v6, %v272_v25  ;;  %v254_v29 = vsel %vm252_vm2, 1.0, %v4949_v4  ;;  %s4363_s17 = sld [smem:[#allocation4 + $0x280]]  ;;  %vm361_vm2 = vcmask 261120  }
  0x48   :  { %482 = vmatpush.msra.mxu3 %v5166_v9  ;;  %632 = vmatpush.msrb.mxu0 %v5166_v9  ;;  %v5213_v20 = vld [vmem:[%s7091_s29] sm:$0xff]  ;;  %vm263_vm9 = vmand %vm7058_vm8, %vm262_vm5  ;;  %v283_v28 = vstv %s5176_s24  ;;  %s4364_s24 = sld [smem:[#allocation4 + $0x281]]  ;;  %vm7060_vm5 = vcmp.eq.s32.totalorder %v5208_v19, 9  ;;  %vm7062_vm8 = vcmp.eq.s32.totalorder %v5208_v19, 12 }
  0x49   :  { %959 = vmatpush.msra.mxu1 %v5166_v9  ;;  %v392_v16 = vld [vmem:[%s7092_s6 + $0x8] sm:$0xff]  ;;  %vm274_vm12 = vmand %vm7057_vm11, %vm273_vm10  ;;  %vm284_vm13 = vcmp.eq.s32.totalorder %v5145_v6, %v283_v28  ;;  %v245_v31 = vadd.f32 %v243_v24, %v234_v27  ;;  %v265_v32 = vsel %vm263_vm9, 1.0, %v4949_v4  ;;  %s5272_s26 = sld [smem:[#allocation4 + $0x300]]  ;;  %vm7064_vm10 = vcmp.eq.s32.totalorder %v5208_v19, 10  ;;  %v391_v58 = vld [vmem:[%s7092_s6] sm:$0xff] }
  0x4a   :  { %483 = vmatpush.msra.mxu3 %v5171_v10  ;;  %418 = vmatpush.msra.mxu2 %v392_v16  ;;  %v5232_v26 = vld [vmem:[%s7093_s3 + $0x18] sm:$0xff]  ;;  %v5249_v30 = vld [vmem:[%s7093_s3 + $0x10] sm:$0xff]  ;;  %vm285_vm14 = vmand %vm7056_vm6, %vm284_vm13  ;;  %v276_v34 = vsel %vm274_vm12, 1.0, %v4949_v4  ;;  %s5274_s9 = sld [smem:[#allocation4 + $0x301]] }
  0x4b   :  { %633 = vmatpush.msrb.mxu0 %v5171_v10  ;;  %960 = vmatpush.msra.mxu1 %v5171_v10  ;;  %v5260_v33 = vld [vmem:[%s7093_s3 + $0x8] sm:$0xff]  ;;  %v287_v35 = vsel %vm285_vm14, 1.0, %v4949_v4  ;;  %v5268_v36 = vld [vmem:[%s7093_s3] sm:$0xff]  ;;  %v256_v37 = vadd.f32 %v254_v29, %v245_v31  ;;  %v305_v42 = vstv %s4362_s25  ;;  %vm7063_vm14 = vcmp.eq.s32.totalorder %v5208_v19, 11  ;;  %s7094_s27 = sld [smem:[#allocation32_spill]]  ;;  %s4951_s25 = smov 96  }
  0x4c   :  { %484 = vmatpush.msra.mxu3 %v5188_v13  ;;  %v294_v40 = vstv %s4361_s8  ;;  %vm306_vm13 = vcmp.eq.s32.totalorder %v5145_v6, %v305_v42  ;;  %419 = vmatpush.msra.mxu2 %v391_v58  ;;  %s7095_s28 = sld [smem:[#allocation31_spill]] }
  0x4d   :  { %634 = vmatpush.msrb.mxu0 %v5188_v13  ;;  %961 = vmatpush.msra.mxu1 %v5188_v13  ;;  %v267_v38 = vadd.f32 %v265_v32, %v256_v37  ;;  %vm295_vm9 = vcmp.eq.s32.totalorder %v5145_v6, %v294_v40  ;;  %v316_v43 = vstv %s4363_s17  ;;  %vm308_vm6 = vmand %vm7060_vm5, %vm306_vm13  ;;  %s7096_s4 = sld [smem:[#allocation35_spill]] }
  0x4e   :  { %485 = vmatpush.msra.mxu3 %v5213_v20  ;;  %vm297_vm12 = vmand %vm7059_vm15, %vm295_vm9  ;;  %vm317_vm11 = vcmp.eq.s32.totalorder %v5145_v6, %v316_v43  ;;  %v327_v45 = vstv %s4364_s24  ;;  %v310_v46 = vsel %vm308_vm6, 1.0, %v4949_v4  ;;  %447 = vmatpush.msrb.mxu2 %v428_v59  ;;  %s4403_s6 = sld [smem:[#allocation8 + $0x1]] }
  0x4f   :  { %486 = vmatmul.f32.vlgmr.msra.gmra.mxu3 %v4949_v4  ;;  %635 = vmatpush.msrb.mxu0 %v5213_v20  ;;  %v278_v39 = vadd.f32 %v276_v34, %v267_v38  ;;  %v299_v44 = vsel %vm297_vm12, 1.0, %v4949_v4  ;;  %vm319_vm9 = vmand %vm7064_vm10, %vm317_vm11  ;;  %vm328_vm15 = vcmp.eq.s32.totalorder %v5145_v6, %v327_v45  ;;  %v338_v47 = vstv %s5272_s26  ;;  %s4405_s5 = sld [smem:[#allocation8 + $0x81]] }
  0x50   :  { %549 = vmatpush.msrb.mxu3 %v5232_v26  ;;  %962 = vmatpush.msra.mxu1 %v5213_v20  ;;  %vm7061_vm12 = vcmp.eq.s32.totalorder %v5208_v19, 13  ;;  %v312_v48 = vadd.f32 %v310_v46, %v299_v44  ;;  %v321_v49 = vsel %vm319_vm9, 1.0, %v4949_v4  ;;  %vm330_vm13 = vmand %vm7063_vm14, %vm328_vm15  ;;  %vm339_vm5 = vcmp.eq.s32.totalorder %v5145_v6, %v338_v47  ;;  %s4406_s13 = sld [smem:[#allocation8 + $0x100]] }
  0x51   :  { %v289_v41 = vadd.f32 %v287_v35, %v278_v39  ;;  %v349_v50 = vstv %s5274_s9  ;;  %v332_v51 = vsel %vm330_vm13, 1.0, %v4949_v4  ;;  %vm341_vm11 = vmand %vm7062_vm8, %vm339_vm5  ;;  %448 = vmatpush.msrb.mxu2 %v427_v60  ;;  %vm7065_vm15 = vcmask 130048   ;;  %v4500_v3 = vld [vmem:[%s7094_s27] ss:$0 sm:$0xff]  ;;  %s4408_s10 = sld [smem:[#allocation8 + $0x180]] }
  0x52   :  { %550 = vmatpush.msrb.mxu3 %v5249_v30  ;;  %vm350_vm6 = vcmp.eq.s32.totalorder %v5145_v6, %v349_v50  ;;  %v323_v52 = vadd.f32 %v321_v49, %v312_v48  ;;  %v343_v53 = vsel %vm341_vm11, 1.0, %v4949_v4  ;;  %v4502_v12 = vld [vmem:[%s7095_s28] ss:$0 sm:$0xff]  ;;  %s4409_s28 = sld [smem:[#allocation8 + $0x181]] }
  0x53   :  { %4367 = vmatmul.msk.f32.vlgmr.msra.gmra.mxu0 %vm361_vm2, %v289_v41  ;;  %vm352_vm9 = vmand %vm7061_vm12, %vm350_vm6  ;;  %v4503_v17 = vld [vmem:[%s7096_s4] ss:$0 sm:$0xff]  ;;  %s4410_s4 = sld [smem:[#allocation8 + $0x200]] }
  0x54   :  { %551 = vmatpush.msrb.mxu3 %v5260_v33  ;;  %797 = vmatpush.msra.mxu0 %v5166_v9  ;;  %v334_v54 = vadd.f32 %v332_v51, %v323_v52  ;;  %v354_v55 = vsel %vm352_vm9, 1.0, %v4949_v4  ;;  %s4411_s17 = sld [smem:[#allocation8 + $0x201]] }
  0x55   :  { %s4413_s24 = sld [smem:[#allocation8 + $0x281]] }
  0x56   :  { %552 = vmatpush.msrb.mxu3 %v5268_v36  ;;  %798 = vmatpush.msra.mxu0 %v5171_v10  ;;  %v345_v56 = vadd.f32 %v343_v53, %v334_v54  ;;  %s4414_s26 = sld [smem:[#allocation8 + $0x300]] }
  0x57   :  { %553 = vmatmul.f32.vlgmr.msrb.gmra.mxu3 %v4949_v4  ;;  %s6057_s9 = sld [smem:[#allocation8 + $0x380]] }
  0x58   :  { %874 = vmatpush.msra.mxu3 %v5232_v26  ;;  %799 = vmatpush.msra.mxu0 %v5188_v13  ;;  %v356_v57 = vadd.f32 %v354_v55, %v345_v56  ;;  %s6059_s2 = sld [smem:[#allocation8 + $0x381]] }
  0x59   :  { %s4427_s30 = sld [smem:[#allocation10 + $0x1]] }
  0x5a   :  { %875 = vmatpush.msra.mxu3 %v5249_v30  ;;  %800 = vmatpush.msra.mxu0 %v5213_v20  ;;  %s4441_s1 = sld [smem:[#allocation10 + $0x3]] }
  0x5b   :  { %4368 = vmatmul.msk.f32.gmra.mxu0 %vm361_vm2, %v356_v57  ;;  %s4455_s0 = sld [smem:[#allocation10 + $0x5]] }
  0x5c   :  { %876 = vmatpush.msra.mxu3 %v5260_v33 }
  0x5e   :  { %877 = vmatpush.msra.mxu3 %v5268_v36 }
  0x5f   :  { %p2267_p0 = scmp.gt.s32.totalorder %s4427_s30, 0 }
  0x60   :  { %1197 = vmatpush.msrb.mxu3 %v5232_v26  ;;  %p2977_p2 = scmp.gt.s32.totalorder %s4441_s1, 0 }
  0x61   :  { %p3683_p4 = scmp.gt.s32.totalorder %s4455_s0, 0 }
  0x62   :  { %1198 = vmatpush.msrb.mxu3 %v5249_v30 }
  0x64   :  { %1199 = vmatpush.msrb.mxu3 %v5260_v33 }
  0x66   :  { %1200 = vmatpush.msrb.mxu3 %v5268_v36 }
  0xd0   :  { %v385_v62 = vpop.f32.mrf.mxu0 }
  0xd1   :  { %4369 = vmatmul.msk.f32.vlgmr.msra.gmra.mxu2 %vm7065_vm15, %v385_v62 }
  0xd2   :  { %v487_v61 = vpop.f32.mrf.mxu3  ;;  %709 = vmatpush.msra.mxu2 %v5232_v26 }
  0xd3   :  { %v488_v8 = vadd.f32 %v4500_v3, %v487_v61 }
  0xd4   :  { %710 = vmatpush.msra.mxu2 %v5249_v30 }
  0xd6   :  { %711 = vmatpush.msra.mxu2 %v5260_v33 }
  0xd8   :  { %712 = vmatpush.msra.mxu2 %v5268_v36  ;;  %v388_v7 = vpop.f32.mrf.mxu0 }
  0xd9   :  { %4370 = vmatmul.msk.f32.gmra.mxu2 %vm7065_vm15, %v388_v7 }
  0xda   :  { %v554_v0 = vpop.f32.mrf.mxu3 }
  0xdb   :  { %v555_v1 = vadd.f32 %v4501_v63, %v554_v0 }
  0xdd   :  { %v558_v2 = vrot.slane %v555_v1, 4 }
  0xdf   :  { %580 = vrot.lane.b32.xlu0 %v558_v2, %s4950_s7 }
  0xe1   :  { %4371 = vmatmul.msk.f32.vlgmr.msrb.gmra.mxu2 %vm7065_vm15, %v385_v62 }
  0xe2   :  { %1035 = vmatpush.msrb.mxu2 %v5232_v26 }
  0xe4   :  { %1036 = vmatpush.msrb.mxu2 %v5249_v30 }
  0xe6   :  { %1037 = vmatpush.msrb.mxu2 %v5260_v33 }
  0xe7   :  { %511 = vrot.lane.b32.xlu0 %v488_v8, %s4950_s7 }
  0xe8   :  { %1038 = vmatpush.msrb.mxu2 %v5268_v36 }
  0xe9   :  { %4372 = vmatmul.msk.f32.gmra.mxu2 %vm7065_vm15, %v388_v7 }
 0x151   :  { %v581_v46 = vpop.permute.xlu0 %580 }
 0x154   :  { %v421_v11 = vpop.f32.mrf.mxu2 }
 0x155   :  { %v5349_v15 = vadd.f32 %v4502_v12, %v421_v11 }
 0x157   :  { %v490_v18 = vadd.f32 %v488_v8, %v5349_v15 }
 0x159   :  { %v4373_v23 = vmul.f32 -1.442695, %v490_v18  ;;  %v512_v57 = vpop.permute.xlu0 %511 }
 0x15b   :  { %4540 = vpow2.f32 %v4373_v23 }
 0x15c   :  { %v424_v14 = vpop.f32.mrf.mxu2 }
 0x15d   :  { %v5351_v16 = vadd.f32 %v4502_v12, %v424_v14 }
 0x161   :  { %v4541_v27 = vpop.eup %4540 }
 0x162   :  { %v494_v31 = vadd.f32 1.0, %v4541_v27 }
 0x164   :  { %v450_v21 = vpop.f32.mrf.mxu2  ;;  %v506_v51 = vand.u32 2147483648, %v494_v31  ;;  %vm500_vm12 = vweird.f32 %v494_v31  ;;  %v504_v53 = vand.u32 2147483647, %v494_v31 }
 0x165   :  { %v5357_v22 = vadd.f32 %v4503_v17, %v450_v21 }
 0x166   :  { %v507_v56 = vor.u32 1.1754944e-38, %v506_v51  ;;  %vm505_vm14 = vcmp.eq.f32.partialorder %v504_v53, 8.507059e+37 }
 0x16c   :  { %v453_v24 = vpop.f32.mrf.mxu2 }
 0x16d   :  { %v5359_v25 = vadd.f32 %v4503_v17, %v453_v24 }
 0x16f   :  { %v560_v28 = vadd.f32 %v558_v2, %v5359_v25 }
 0x171   :  { %v4374_v29 = vmul.f32 -1.442695, %v560_v28 }
 0x173   :  { %4542 = vpow2.f32 %v4374_v29 }
 0x174   :  { %4544 = vrcp.f32 %v494_v31 }
 0x179   :  { %v4543_v32 = vpop.eup %4542 }
 0x17a   :  { %v564_v34 = vadd.f32 1.0, %v4543_v32  ;;  %v4545_v35 = vpop.eup %4544 }
 0x17b   :  { %v496_v37 = vmul.f32 %v4545_v35, %v494_v31  ;;  %vm501_vm6 = vweird.f32 %v4545_v35 }
 0x17c   :  { %4546 = vrcp.f32 %v564_v34  ;;  %v576_v42 = vand.u32 2147483648, %v564_v34  ;;  %v574_v45 = vand.u32 2147483647, %v564_v34  ;;  %vm570_vm13 = vweird.f32 %v564_v34  ;;  %vm502_vm8 = vmor %vm500_vm12, %vm501_vm6 }
 0x17d   :  { %v497_v39 = vsub.f32 1.0, %v496_v37  ;;  %vm7072_vm12 = vcmask 521477  }
 0x17e   :  { %v577_v48 = vor.u32 1.1754944e-38, %v576_v42  ;;  %vm575_vm9 = vcmp.eq.f32.partialorder %v574_v45, 8.507059e+37 }
 0x17f   :  { %v498_v43 = vmul.f32 %v4545_v35, %v497_v39 }
 0x181   :  { %v499_v49 = vadd.f32 %v4545_v35, %v498_v43 }
 0x182   :  { %v4547_v38 = vpop.eup %4546 }
 0x183   :  { %v566_v40 = vmul.f32 %v4547_v38, %v564_v34  ;;  %vm571_vm5 = vweird.f32 %v4547_v38  ;;  %v503_v55 = vsel %vm502_vm8, %v4545_v35, %v499_v49  ;;  %vm7071_vm8 = vcmask 523264  }
 0x184   :  { %vm572_vm11 = vmor %vm570_vm13, %vm571_vm5  ;;  %v508_v58 = vsel %vm505_vm14, %v507_v56, %v503_v55  ;;  %457 = vst.msk [vmem:[#allocation2] sm:$0xff] %vm7071_vm8, %v4949_v4  ;;  %vm604_vm14 = vcmask 520452   ;;  %vm602_vm5 = vcmask 253952   ;;  %vm606_vm13 = vcmask 254977  }
 0x185   :  { %v567_v41 = vsub.f32 1.0, %v566_v40  ;;  %v514_v59 = vmul.f32 %v512_v57, %v508_v58  ;;  %458 = vst.msk [vmem:[#allocation2 + $0x8] sm:$0xff] %vm7071_vm8, %v4949_v4  ;;  %v521_v14 = vsub.f32 1.0, %v508_v58  ;;  %v527_v18 = vmul.f32 0.0, %v508_v58 }
 0x187   :  { %v568_v44 = vmul.f32 %v4547_v38, %v567_v41 }
 0x189   :  { %v569_v47 = vadd.f32 %v4547_v38, %v568_v44 }
 0x18b   :  { %v573_v50 = vsel %vm572_vm11, %v4547_v38, %v569_v47 }
 0x18c   :  { %v578_v52 = vsel %vm575_vm9, %v577_v48, %v573_v50 }
 0x18d   :  { %v583_v54 = vmul.f32 %v581_v46, %v578_v52  ;;  %v590_v2 = vsub.f32 1.0, %v578_v52  ;;  %v596_v7 = vmul.f32 0.0, %v578_v52 }
 0x18f   :  { %585 = vrot.lane.b32.xlu1 %v583_v54, %s4950_s7 }
 0x197   :  { %516 = vrot.lane.b32.xlu1 %v514_v59, %s4950_s7 }
 0x201   :  { %v586_v60 = vpop.permute.xlu1 %585 }
 0x202   :  { %v588_v61 = vadd.f32 %v586_v60, %v5359_v25 }
 0x204   :  { %4548 = vtanh.f32 %v588_v61 }
 0x209   :  { %v517_v62 = vpop.permute.xlu1 %516 }
 0x20a   :  { %v4549_v63 = vpop.eup %4548  ;;  %v519_v0 = vadd.f32 %v517_v62, %v5349_v15 }
 0x20b   :  { %592 = vrot.lane.b32.xlu2 %v4549_v63, %s4951_s25 }
 0x20c   :  { %4550 = vtanh.f32 %v519_v0 }
 0x212   :  { %v4551_v1 = vpop.eup %4550 }
 0x213   :  { %523 = vrot.lane.b32.xlu2 %v4551_v1, %s4951_s25 }
 0x265   :  { %v593_v3 = vpop.permute.xlu2 %592 }
 0x266   :  { %v595_v8 = vmul.f32 %v593_v3, %v590_v2 }
 0x268   :  { %v597_v11 = vadd.f32 %v596_v7, %v595_v8 }
 0x26a   :  { %v692_v12 = vrot.slane %v597_v11, 4  ;;  %605 = vst.msk [vmem:[#allocation2 + $0x2] sm:$0x10] %vm604_vm14, %v597_v11  ;;  %v756_v44 = vrot.slane %v597_v11, 2 }
 0x26b   :  { %609 = vst.msk [vmem:[#allocation2 + $0x8] sm:$0x20] %vm7072_vm12, %v597_v11 }
 0x26c   :  { %693 = vrot.lane.b32.xlu0 %v692_v12, %s4951_s25 }
 0x26d   :  { %v524_v17 = vpop.permute.xlu2 %523 }
 0x26e   :  { %v526_v21 = vmul.f32 %v524_v17, %v521_v14 }
 0x270   :  { %v5375_v23 = vadd.f32 %v527_v18, %v526_v21 }
 0x272   :  { %599 = vrot.lane.b32.xlu1 %v5375_v23, %s4951_s25  ;;  %v679_v14 = vrot.slane %v5375_v23, 6 }
 0x2de   :  { %v694_v24 = vpop.permute.xlu0 %693 }
 0x2df   :  { %4377 = vmatmul.msk.f32.vlgmr.msra.gmra.mxu2 %vm361_vm2, %v694_v24 }
 0x2e0   :  { %1355 = vmatpush.msra.mxu2 %v5232_v26  ;;  %v4504_v26 = vld [vmem:[%s7094_s27] ss:$0 sm:$0xff] }
 0x2e2   :  { %1356 = vmatpush.msra.mxu2 %v5249_v30  ;;  %v4505_v30 = vld [vmem:[%s7034_s11] ss:$0 sm:$0xff] }
 0x2e4   :  { %v600_v27 = vpop.permute.xlu1 %599  ;;  %1357 = vmatpush.msra.mxu2 %v5260_v33 }
 0x2e5   :  { %603 = vst.msk [vmem:[#allocation2] sm:$0x1] %vm602_vm5, %v600_v27  ;;  %4375 = vmatmul.msk.f32.vlgmr.msrb.gmra.mxu0 %vm361_vm2, %v600_v27 }
 0x2e6   :  { %607 = vst.msk [vmem:[#allocation2 + $0x6] sm:$0x2] %vm606_vm13, %v600_v27  ;;  %1123 = vmatpush.msrb.mxu0 %v5166_v9  ;;  %1358 = vmatpush.msra.mxu2 %v5268_v36 }
 0x2e8   :  { %1124 = vmatpush.msrb.mxu0 %v5171_v10 }
 0x2ea   :  { %1125 = vmatpush.msrb.mxu0 %v5188_v13 }
 0x2ec   :  { %1126 = vmatpush.msrb.mxu0 %v5213_v20 }
 0x362   :  { %v637_v33 = vpop.f32.mrf.mxu0  ;;  %v714_v28 = vpop.f32.mrf.mxu2 }
 0x363   :  { %v638_v29 = vadd.f32 %v4504_v26, %v637_v33  ;;  %v715_v9 = vadd.f32 %v4505_v30, %v714_v28 }
 0x365   :  { %v641_v31 = vrot.slane %v638_v29, 6  ;;  %v718_v36 = vrot.slane %v715_v9, 6 }
 0x367   :  { %v720_v10 = vadd.f32 %v718_v36, %v5359_v25  ;;  %740 = vrot.lane.b32.xlu2 %v718_v36, %s4950_s7  ;;  %663 = vrot.lane.b32.xlu0 %v641_v31, %s4950_s7  ;;  %v643_v47 = vadd.f32 %v641_v31, %v5349_v15  ;;  %v4506_v31 = vld [vmem:[%s7034_s11] ss:$0 sm:$0xff] }
 0x369   :  { %v4378_v13 = vmul.f32 -1.442695, %v720_v10  ;;  %v4376_v48 = vmul.f32 -1.442695, %v643_v47 }
 0x36b   :  { %4552 = vpow2.f32 %v4378_v13  ;;  %v4507_v13 = vld [vmem:[%s7094_s27] ss:$0 sm:$0xff] }
 0x371   :  { %v4553_v20 = vpop.eup %4552 }
 0x372   :  { %v724_v32 = vadd.f32 1.0, %v4553_v20 }
 0x374   :  { %4554 = vrcp.f32 %v724_v32  ;;  %v736_v38 = vand.u32 2147483648, %v724_v32  ;;  %v734_v40 = vand.u32 2147483647, %v724_v32  ;;  %vm730_vm6 = vweird.f32 %v724_v32 }
 0x375   :  { %4556 = vpow2.f32 %v4376_v48 }
 0x376   :  { %v737_v42 = vor.u32 1.1754944e-38, %v736_v38  ;;  %vm735_vm10 = vcmp.eq.f32.partialorder %v734_v40, 8.507059e+37 }
 0x37a   :  { %v4555_v34 = vpop.eup %4554 }
 0x37b   :  { %v726_v35 = vmul.f32 %v4555_v34, %v724_v32  ;;  %vm731_vm11 = vweird.f32 %v4555_v34  ;;  %v4557_v49 = vpop.eup %4556 }
 0x37c   :  { %vm732_vm9 = vmor %vm730_vm6, %vm731_vm11  ;;  %v647_v50 = vadd.f32 1.0, %v4557_v49 }
 0x37d   :  { %v727_v37 = vsub.f32 1.0, %v726_v35 }
 0x37e   :  { %4558 = vrcp.f32 %v647_v50  ;;  %v659_v58 = vand.u32 2147483648, %v647_v50  ;;  %v657_v59 = vand.u32 2147483647, %v647_v50 }
 0x37f   :  { %v728_v39 = vmul.f32 %v4555_v34, %v727_v37 }
 0x380   :  { %v660_v61 = vor.u32 1.1754944e-38, %v659_v58 }
 0x381   :  { %v729_v41 = vadd.f32 %v4555_v34, %v728_v39 }
 0x383   :  { %v733_v43 = vsel %vm732_vm9, %v4555_v34, %v729_v41  ;;  %vm658_vm9 = vcmp.eq.f32.partialorder %v657_v59, 8.507059e+37 }
 0x384   :  { %v738_v45 = vsel %vm735_vm10, %v737_v42, %v733_v43  ;;  %v4559_v53 = vpop.eup %4558  ;;  %vm653_vm10 = vweird.f32 %v647_v50 }
 0x385   :  { %v758_v46 = vmul.f32 %v756_v44, %v738_v45  ;;  %v649_v54 = vmul.f32 %v4559_v53, %v647_v50  ;;  %vm654_vm11 = vweird.f32 %v4559_v53  ;;  %v750_v12 = vsub.f32 1.0, %v738_v45 }
 0x386   :  { %vm655_vm6 = vmor %vm653_vm10, %vm654_vm11  ;;  %vm766_vm11 = vcmask 518402   ;;  %vm770_vm10 = vcmask 519427  }
 0x387   :  { %v650_v55 = vsub.f32 1.0, %v649_v54 }
 0x389   :  { %v651_v56 = vmul.f32 %v4559_v53, %v650_v55 }
 0x38b   :  { %v652_v57 = vadd.f32 %v4559_v53, %v651_v56 }
 0x38d   :  { %v656_v60 = vsel %vm655_vm6, %v4559_v53, %v652_v57 }
 0x38e   :  { %v661_v63 = vsel %vm658_vm9, %v660_v61, %v656_v60 }
 0x38f   :  { %v673_v18 = vsub.f32 1.0, %v661_v63  ;;  %v681_v27 = vmul.f32 %v679_v14, %v661_v63 }
 0x3c1   :  { %v741_v51 = vpop.permute.xlu2 %740 }
 0x3c2   :  { %v743_v52 = vmul.f32 %v741_v51, %v738_v45 }
 0x3c4   :  { %745 = vrot.lane.b32.xlu1 %v743_v52, %s4950_s7 }
 0x3d9   :  { %v664_v62 = vpop.permute.xlu0 %663 }
 0x3da   :  { %v666_v0 = vmul.f32 %v664_v62, %v661_v63 }
 0x3dc   :  { %668 = vrot.lane.b32.xlu2 %v666_v0, %s4950_s7 }
 0x436   :  { %v746_v1 = vpop.permute.xlu1 %745  ;;  %v669_v2 = vpop.permute.xlu2 %668 }
 0x437   :  { %v748_v3 = vadd.f32 %v746_v1, %v5359_v25  ;;  %v671_v7 = vadd.f32 %v669_v2, %v5349_v15 }
 0x439   :  { %4560 = vtanh.f32 %v748_v3 }
 0x43a   :  { %4562 = vtanh.f32 %v671_v7 }
 0x43f   :  { %v4561_v8 = vpop.eup %4560 }
 0x440   :  { %v4563_v11 = vpop.eup %4562  ;;  %752 = vrot.lane.b32.xlu0 %v4561_v8, %s4951_s25 }
 0x441   :  { %675 = vrot.lane.b32.xlu1 %v4563_v11, %s4951_s25 }
 0x4b2   :  { %v753_v17 = vpop.permute.xlu0 %752 }
 0x4b3   :  { %v755_v21 = vmul.f32 %v753_v17, %v750_v12  ;;  %v676_v24 = vpop.permute.xlu1 %675 }
 0x4b4   :  { %v678_v26 = vmul.f32 %v676_v24, %v673_v18 }
 0x4b5   :  { %v5408_v30 = vadd.f32 %v758_v46, %v755_v21 }
 0x4b6   :  { %v5410_v33 = vadd.f32 %v681_v27, %v678_v26 }
 0x4b7   :  { %v857_v28 = vrot.slane %v5408_v30, 2  ;;  %767 = vst.msk [vmem:[#allocation2 + $0x3] sm:$0x4] %vm766_vm11, %v5408_v30 }
 0x4b8   :  { %v780_v29 = vrot.slane %v5410_v33, 2  ;;  %771 = vst.msk [vmem:[#allocation2 + $0x9] sm:$0x8] %vm770_vm10, %v5408_v30 }
 0x4b9   :  { %858 = vrot.lane.b32.xlu2 %v857_v28, %s4951_s25 }
 0x4ba   :  { %781 = vrot.lane.b32.xlu0 %v780_v29, %s4951_s25  ;;  %v844_v29 = vrot.slane %v5410_v33, 6 }
 0x513   :  { %v859_v23 = vpop.permute.xlu2 %858 }
 0x514   :  { %4381 = vmatmul.msk.f32.vlgmr.msra.gmra.mxu3 %vm361_vm2, %v859_v23 }
 0x52c   :  { %v782_v9 = vpop.permute.xlu0 %781 }
 0x52d   :  { %4379 = vmatmul.msk.f32.vlgmr.msra.gmra.mxu0 %vm361_vm2, %v782_v9 }
 0x597   :  { %v879_v36 = vpop.f32.mrf.mxu3 }
 0x598   :  { %v880_v10 = vadd.f32 %v4506_v31, %v879_v36 }
 0x59a   :  { %903 = vrot.lane.b32.xlu1 %v880_v10, %s4950_s7  ;;  %v882_v37 = vadd.f32 %v880_v10, %v5359_v25 }
 0x59c   :  { %v4382_v39 = vmul.f32 -1.442695, %v882_v37 }
 0x5aa   :  { %v802_v20 = vpop.f32.mrf.mxu0 }
 0x5ab   :  { %v803_v32 = vadd.f32 %v4507_v13, %v802_v20  ;;  %v4508_v13 = vld [vmem:[%s7094_s27] ss:$0 sm:$0xff] }
 0x5ad   :  { %v806_v34 = vrot.slane %v803_v32, 4 }
 0x5af   :  { %828 = vrot.lane.b32.xlu2 %v806_v34, %s4950_s7  ;;  %v808_v35 = vadd.f32 %v806_v34, %v5349_v15 }
 0x5b1   :  { %v4380_v38 = vmul.f32 -1.442695, %v808_v35  ;;  %v4509_v35 = vld [vmem:[%s7034_s11] ss:$0 sm:$0xff] }
 0x5b3   :  { %4564 = vpow2.f32 %v4380_v38 }
 0x5b4   :  { %4566 = vpow2.f32 %v4382_v39 }
 0x5b9   :  { %v4565_v40 = vpop.eup %4564 }
 0x5ba   :  { %v4567_v41 = vpop.eup %4566  ;;  %v812_v42 = vadd.f32 1.0, %v4565_v40 }
 0x5bb   :  { %v886_v43 = vadd.f32 1.0, %v4567_v41 }
 0x5bc   :  { %4568 = vrcp.f32 %v812_v42  ;;  %v824_v53 = vand.u32 2147483648, %v812_v42  ;;  %vm818_vm9 = vweird.f32 %v812_v42  ;;  %v822_v54 = vand.u32 2147483647, %v812_v42 }
 0x5bd   :  { %4570 = vrcp.f32 %v886_v43  ;;  %v898_v57 = vand.u32 2147483648, %v886_v43  ;;  %vm892_vm4 = vweird.f32 %v886_v43  ;;  %v896_v59 = vand.u32 2147483647, %v886_v43 }
 0x5be   :  { %v825_v58 = vor.u32 1.1754944e-38, %v824_v53  ;;  %vm823_vm3 = vcmp.eq.f32.partialorder %v822_v54, 8.507059e+37 }
 0x5bf   :  { %v899_v0 = vor.u32 1.1754944e-38, %v898_v57  ;;  %vm897_vm0 = vcmp.eq.f32.partialorder %v896_v59, 8.507059e+37 }
 0x5c2   :  { %v4569_v44 = vpop.eup %4568 }
 0x5c3   :  { %v4571_v45 = vpop.eup %4570  ;;  %v814_v46 = vmul.f32 %v4569_v44, %v812_v42  ;;  %vm819_vm6 = vweird.f32 %v4569_v44 }
 0x5c4   :  { %v888_v47 = vmul.f32 %v4571_v45, %v886_v43  ;;  %vm820_vm15 = vmor %vm818_vm9, %vm819_vm6  ;;  %vm893_vm7 = vweird.f32 %v4571_v45 }
 0x5c5   :  { %v815_v48 = vsub.f32 1.0, %v814_v46  ;;  %vm894_vm1 = vmor %vm892_vm4, %vm893_vm7 }
 0x5c6   :  { %v889_v49 = vsub.f32 1.0, %v888_v47 }
 0x5c7   :  { %v816_v50 = vmul.f32 %v4569_v44, %v815_v48 }
 0x5c8   :  { %v890_v51 = vmul.f32 %v4571_v45, %v889_v49 }
 0x5c9   :  { %v817_v52 = vadd.f32 %v4569_v44, %v816_v50 }
 0x5ca   :  { %v891_v55 = vadd.f32 %v4571_v45, %v890_v51 }
 0x5cb   :  { %v821_v56 = vsel %vm820_vm15, %v4569_v44, %v817_v52 }
 0x5cc   :  { %v826_v60 = vsel %vm823_vm3, %v825_v58, %v821_v56  ;;  %v895_v62 = vsel %vm894_vm1, %v4571_v45, %v891_v55  ;;  %vm932_vm1 = vcmask 517377  }
 0x5cd   :  { %v900_v2 = vsel %vm897_vm0, %v899_v0, %v895_v62  ;;  %vm928_vm0 = vcmask 516352   ;;  %v846_v30 = vmul.f32 %v844_v29, %v826_v60 }
 0x5ce   :  { %v913_v18 = vsub.f32 1.0, %v900_v2  ;;  %v920_v24 = vmul.f32 %v900_v2, %v857_v28 }
 0x609   :  { %v829_v61 = vpop.permute.xlu2 %828 }
 0x60a   :  { %v831_v63 = vmul.f32 %v829_v61, %v826_v60 }
 0x60c   :  { %833 = vrot.lane.b32.xlu1 %v831_v63, %s4950_s7  ;;  %v904_v1 = vpop.permute.xlu1 %903 }
 0x60d   :  { %v906_v3 = vmul.f32 %v904_v1, %v900_v2 }
 0x60f   :  { %908 = vrot.lane.b32.xlu0 %v906_v3, %s4950_s7 }
 0x67e   :  { %v834_v7 = vpop.permute.xlu1 %833 }
 0x67f   :  { %v836_v8 = vadd.f32 %v834_v7, %v5349_v15 }
 0x681   :  { %4572 = vtanh.f32 %v836_v8  ;;  %v909_v11 = vpop.permute.xlu0 %908 }
 0x682   :  { %v911_v12 = vadd.f32 %v909_v11, %v5359_v25  ;;  %v838_v25 = vsub.f32 1.0, %v826_v60 }
 0x684   :  { %4574 = vtanh.f32 %v911_v12 }
 0x687   :  { %v4573_v14 = vpop.eup %4572 }
 0x688   :  { %840 = vrot.lane.b32.xlu0 %v4573_v14, %s4951_s25 }
 0x68a   :  { %v4575_v17 = vpop.eup %4574 }
 0x68b   :  { %915 = vrot.lane.b32.xlu2 %v4575_v17, %s4951_s25 }
 0x6e5   :  { %v916_v21 = vpop.permute.xlu2 %915 }
 0x6e6   :  { %v918_v27 = vmul.f32 %v916_v21, %v913_v18 }
 0x6e8   :  { %v5442_v26 = vadd.f32 %v920_v24, %v918_v27 }
 0x6ea   :  { %1019 = vrot.lane.b32.xlu1 %v5442_v26, %s4951_s25  ;;  %929 = vst.msk [vmem:[#allocation2 + $0x4] sm:$0x1] %vm928_vm0, %v5442_v26 }
 0x6eb   :  { %933 = vst.msk [vmem:[#allocation2 + $0xa] sm:$0x2] %vm932_vm1, %v5442_v26 }
 0x6fa   :  { %v841_v23 = vpop.permute.xlu0 %840 }
 0x6fb   :  { %v843_v28 = vmul.f32 %v841_v23, %v838_v25 }
 0x6fd   :  { %v5451_v9 = vadd.f32 %v846_v30, %v843_v28 }
 0x6ff   :  { %v942_v31 = vrot.slane %v5451_v9, 4  ;;  %v1006_v29 = vrot.slane %v5451_v9, 6 }
 0x701   :  { %943 = vrot.lane.b32.xlu2 %v942_v31, %s4951_s25 }
 0x75b   :  { %v944_v36 = vpop.permute.xlu2 %943 }
 0x75c   :  { %4383 = vmatmul.msk.f32.vlgmr.msra.gmra.mxu1 %vm361_vm2, %v944_v36  ;;  %v1020_v10 = vpop.permute.xlu1 %1019 }
 0x75d   :  { %4385 = vmatmul.msk.f32.vlgmr.msrb.gmra.mxu2 %vm361_vm2, %v1020_v10 }
 0x7d9   :  { %v964_v20 = vpop.f32.mrf.mxu1 }
 0x7da   :  { %v965_v32 = vadd.f32 %v4508_v13, %v964_v20  ;;  %v1082_v13 = vrot.slane %v5442_v26, 2  ;;  %v4510_v26 = vld [vmem:[%s7094_s27] ss:$0 sm:$0xff] }
 0x7dc   :  { %v968_v34 = vrot.slane %v965_v32, 2 }
 0x7de   :  { %990 = vrot.lane.b32.xlu1 %v968_v34, %s4950_s7  ;;  %v970_v40 = vadd.f32 %v968_v34, %v5349_v15 }
 0x7e0   :  { %v1040_v37 = vpop.f32.mrf.mxu2  ;;  %v4384_v41 = vmul.f32 -1.442695, %v970_v40 }
 0x7e1   :  { %v1041_v38 = vadd.f32 %v4509_v35, %v1040_v37 }
 0x7e2   :  { %4576 = vpow2.f32 %v4384_v41  ;;  %v4511_v41 = vld [vmem:[%s7034_s11] ss:$0 sm:$0xff] }
 0x7e3   :  { %v1044_v39 = vrot.slane %v1041_v38, 2 }
 0x7e5   :  { %1066 = vrot.lane.b32.xlu0 %v1044_v39, %s4950_s7  ;;  %v1046_v42 = vadd.f32 %v1044_v39, %v5357_v22 }
 0x7e7   :  { %v4386_v43 = vmul.f32 -1.442695, %v1046_v42 }
 0x7e8   :  { %v4577_v44 = vpop.eup %4576 }
 0x7e9   :  { %4578 = vpow2.f32 %v4386_v43  ;;  %v974_v45 = vadd.f32 1.0, %v4577_v44 }
 0x7eb   :  { %4580 = vrcp.f32 %v974_v45  ;;  %v986_v56 = vand.u32 2147483648, %v974_v45  ;;  %vm980_vm4 = vweird.f32 %v974_v45  ;;  %v984_v57 = vand.u32 2147483647, %v974_v45 }
 0x7ed   :  { %v987_v60 = vor.u32 1.1754944e-38, %v986_v56  ;;  %vm985_vm15 = vcmp.eq.f32.partialorder %v984_v57, 8.507059e+37 }
 0x7ef   :  { %v4579_v46 = vpop.eup %4578 }
 0x7f0   :  { %v1050_v47 = vadd.f32 1.0, %v4579_v46 }
 0x7f1   :  { %v4581_v48 = vpop.eup %4580 }
 0x7f2   :  { %4582 = vrcp.f32 %v1050_v47  ;;  %v976_v49 = vmul.f32 %v4581_v48, %v974_v45  ;;  %vm981_vm3 = vweird.f32 %v4581_v48  ;;  %v1062_v1 = vand.u32 2147483648, %v1050_v47 }
 0x7f3   :  { %vm982_vm7 = vmor %vm980_vm4, %vm981_vm3  ;;  %vm1056_vm9 = vweird.f32 %v1050_v47  ;;  %v1060_v2 = vand.u32 2147483647, %v1050_v47 }
 0x7f4   :  { %v977_v51 = vsub.f32 1.0, %v976_v49  ;;  %v1063_v7 = vor.u32 1.1754944e-38, %v1062_v1 }
 0x7f5   :  { %vm1061_vm12 = vcmp.eq.f32.partialorder %v1060_v2, 8.507059e+37 }
 0x7f6   :  { %v978_v53 = vmul.f32 %v4581_v48, %v977_v51 }
 0x7f8   :  { %v4583_v50 = vpop.eup %4582  ;;  %v979_v55 = vadd.f32 %v4581_v48, %v978_v53 }
 0x7f9   :  { %v1052_v52 = vmul.f32 %v4583_v50, %v1050_v47  ;;  %vm1057_vm6 = vweird.f32 %v4583_v50 }
 0x7fa   :  { %v983_v59 = vsel %vm982_vm7, %v4581_v48, %v979_v55  ;;  %vm1058_vm8 = vmor %vm1056_vm9, %vm1057_vm6 }
 0x7fb   :  { %v1053_v54 = vsub.f32 1.0, %v1052_v52  ;;  %v988_v62 = vsel %vm985_vm15, %v987_v60, %v983_v59 }
 0x7fc   :  { %v1000_v25 = vsub.f32 1.0, %v988_v62  ;;  %v1008_v30 = vmul.f32 %v1006_v29, %v988_v62 }
 0x7fd   :  { %v1054_v58 = vmul.f32 %v4583_v50, %v1053_v54 }
 0x7ff   :  { %v1055_v63 = vadd.f32 %v4583_v50, %v1054_v58 }
 0x801   :  { %v1059_v3 = vsel %vm1058_vm8, %v4583_v50, %v1055_v63 }
 0x802   :  { %v1064_v11 = vsel %vm1061_vm12, %v1063_v7, %v1059_v3 }
 0x803   :  { %v1076_v10 = vsub.f32 1.0, %v1064_v11  ;;  %v1084_v20 = vmul.f32 %v1082_v13, %v1064_v11 }
 0x850   :  { %v991_v61 = vpop.permute.xlu1 %990 }
 0x851   :  { %v993_v0 = vmul.f32 %v991_v61, %v988_v62 }
 0x853   :  { %995 = vrot.lane.b32.xlu0 %v993_v0, %s4950_s7 }
 0x857   :  { %v1067_v8 = vpop.permute.xlu0 %1066 }
 0x858   :  { %v1069_v12 = vmul.f32 %v1067_v8, %v1064_v11 }
 0x85a   :  { %1071 = vrot.lane.b32.xlu2 %v1069_v12, %s4950_s7 }
 0x8b4   :  { %v1072_v14 = vpop.permute.xlu2 %1071 }
 0x8b5   :  { %v1074_v17 = vadd.f32 %v1072_v14, %v5357_v22 }
 0x8b7   :  { %4584 = vtanh.f32 %v1074_v17 }
 0x8bd   :  { %v4585_v18 = vpop.eup %4584 }
 0x8be   :  { %1078 = vrot.lane.b32.xlu1 %v4585_v18, %s4951_s25 }
 0x8c5   :  { %v996_v21 = vpop.permute.xlu0 %995 }
 0x8c6   :  { %v998_v24 = vadd.f32 %v996_v21, %v5349_v15 }
 0x8c8   :  { %4586 = vtanh.f32 %v998_v24 }
 0x8ce   :  { %v4587_v27 = vpop.eup %4586 }
 0x8cf   :  { %1002 = vrot.lane.b32.xlu2 %v4587_v27, %s4951_s25 }
 0x929   :  { %v1003_v23 = vpop.permute.xlu2 %1002 }
 0x92a   :  { %v1005_v28 = vmul.f32 %v1003_v23, %v1000_v25 }
 0x92c   :  { %v5474_v31 = vadd.f32 %v1008_v30, %v1005_v28 }
 0x92e   :  { %v1106_v36 = vrot.slane %v5474_v31, 6 }
 0x930   :  { %1107 = vrot.lane.b32.xlu1 %v1106_v36, %s4951_s25  ;;  %v1079_v15 = vpop.permute.xlu1 %1078 }
 0x931   :  { %v1081_v32 = vmul.f32 %v1079_v15, %v1076_v10  ;;  %v1259_v10 = vld [vmem:[%s7091_s29 + $0x18] sm:$0xff] }
 0x932   :  { %1278 = vmatpush.msrb.mxu1 %v1259_v10  ;;  %1439 = vmatpush.msra.mxu0 %v1259_v10 }
 0x933   :  { %v5481_v34 = vadd.f32 %v1084_v20, %v1081_v32 }
 0x935   :  { %v1180_v35 = vrot.slane %v5481_v34, 6 }
 0x937   :  { %1181 = vrot.lane.b32.xlu0 %v1180_v35, %s4951_s25 }
 0x9a2   :  { %v1108_v37 = vpop.permute.xlu1 %1107 }
 0x9a3   :  { %4387 = vmatmul.msk.f32.vlgmr.msrb.gmra.mxu0 %vm361_vm2, %v1108_v37 }
 0x9a9   :  { %v1182_v38 = vpop.permute.xlu0 %1181 }
 0x9aa   :  { %4389 = vmatmul.msk.f32.vlgmr.msrb.gmra.mxu3 %vm361_vm2, %v1182_v38  ;;  %v1244_v38 = vrot.slane %v5481_v34, 2 }
 0xa20   :  { %v1128_v39 = vpop.f32.mrf.mxu0 }
 0xa21   :  { %v1129_v40 = vadd.f32 %v4510_v26, %v1128_v39 }
 0xa23   :  { %1152 = vrot.lane.b32.xlu0 %v1129_v40, %s4950_s7  ;;  %v1131_v47 = vadd.f32 %v1129_v40, %v5351_v16 }
 0xa25   :  { %v4388_v48 = vmul.f32 -1.442695, %v1131_v47  ;;  %v4513_v47 = vld [vmem:[%s7034_s11] ss:$0 sm:$0xff] }
 0xa2d   :  { %v1202_v42 = vpop.f32.mrf.mxu3 }
 0xa2e   :  { %v1203_v43 = vadd.f32 %v4511_v41, %v1202_v42 }
 0xa30   :  { %v1206_v44 = vrot.slane %v1203_v43, 4  ;;  %v1257_v43 = vld [vmem:[%s7091_s29 + $0x8] sm:$0xff] }
 0xa32   :  { %1228 = vrot.lane.b32.xlu2 %v1206_v44, %s4950_s7  ;;  %v1208_v45 = vadd.f32 %v1206_v44, %v5357_v22  ;;  %v1256_v44 = vld [vmem:[%s7091_s29] sm:$0xff] }
 0xa34   :  { %v4390_v46 = vmul.f32 -1.442695, %v1208_v45 }
 0xa36   :  { %4588 = vpow2.f32 %v4390_v46 }
 0xa37   :  { %4590 = vpow2.f32 %v4388_v48  ;;  %v4512_v48 = vld [vmem:[%s7094_s27] ss:$0 sm:$0xff] }
 0xa3c   :  { %v4589_v49 = vpop.eup %4588 }
 0xa3d   :  { %v1212_v50 = vadd.f32 1.0, %v4589_v49  ;;  %v4591_v51 = vpop.eup %4590 }
 0xa3e   :  { %v1135_v52 = vadd.f32 1.0, %v4591_v51 }
 0xa3f   :  { %4592 = vrcp.f32 %v1212_v50  ;;  %v1224_v60 = vand.u32 2147483648, %v1212_v50  ;;  %vm1218_vm12 = vweird.f32 %v1212_v50  ;;  %v1222_v62 = vand.u32 2147483647, %v1212_v50 }
 0xa40   :  { %4594 = vrcp.f32 %v1135_v52  ;;  %v1147_v11 = vand.u32 2147483648, %v1135_v52  ;;  %vm1141_vm15 = vweird.f32 %v1135_v52  ;;  %v1145_v12 = vand.u32 2147483647, %v1135_v52 }
 0xa41   :  { %v1225_v0 = vor.u32 1.1754944e-38, %v1224_v60  ;;  %vm1223_vm4 = vcmp.eq.f32.partialorder %v1222_v62, 8.507059e+37 }
 0xa42   :  { %v1148_v17 = vor.u32 1.1754944e-38, %v1147_v11  ;;  %vm1146_vm9 = vcmp.eq.f32.partialorder %v1145_v12, 8.507059e+37 }
 0xa45   :  { %v4593_v53 = vpop.eup %4592 }
 0xa46   :  { %v1214_v54 = vmul.f32 %v4593_v53, %v1212_v50  ;;  %v4595_v56 = vpop.eup %4594  ;;  %vm1219_vm8 = vweird.f32 %v4593_v53 }
 0xa47   :  { %v1137_v58 = vmul.f32 %v4595_v56, %v1135_v52  ;;  %vm1220_vm3 = vmor %vm1218_vm12, %vm1219_vm8  ;;  %vm1142_vm7 = vweird.f32 %v4595_v56 }
 0xa48   :  { %v1215_v55 = vsub.f32 1.0, %v1214_v54  ;;  %vm1143_vm6 = vmor %vm1141_vm15, %vm1142_vm7 }
 0xa49   :  { %v1138_v61 = vsub.f32 1.0, %v1137_v58 }
 0xa4a   :  { %v1216_v57 = vmul.f32 %v4593_v53, %v1215_v55 }
 0xa4b   :  { %v1139_v1 = vmul.f32 %v4595_v56, %v1138_v61 }
 0xa4c   :  { %v1217_v59 = vadd.f32 %v4593_v53, %v1216_v57 }
 0xa4d   :  { %v1140_v8 = vadd.f32 %v4595_v56, %v1139_v1 }
 0xa4e   :  { %v1221_v63 = vsel %vm1220_vm3, %v4593_v53, %v1217_v59 }
 0xa4f   :  { %v1226_v2 = vsel %vm1223_vm4, %v1225_v0, %v1221_v63  ;;  %v1144_v14 = vsel %vm1143_vm6, %v4595_v56, %v1140_v8 }
 0xa50   :  { %v1149_v21 = vsel %vm1146_vm9, %v1148_v17, %v1144_v14  ;;  %v1238_v37 = vsub.f32 1.0, %v1226_v2  ;;  %v1246_v39 = vmul.f32 %v1244_v38, %v1226_v2 }
 0xa51   :  { %v1162_v13 = vsub.f32 1.0, %v1149_v21  ;;  %v1169_v20 = vmul.f32 %v1149_v21, %v1106_v36  ;;  %v1258_v36 = vld [vmem:[%s7091_s29 + $0x10] sm:$0xff]  ;;  %s4407_s29 = sld [smem:[#allocation8 + $0x101]] }
 0xa52   :  { %1279 = vmatpush.msrb.mxu1 %v1258_v36  ;;  %1440 = vmatpush.msra.mxu0 %v1258_v36  ;;  %v1492_v36 = vld [vmem:[%s7093_s3 + $0x10] sm:$0xff] }
 0xa54   :  { %1280 = vmatpush.msrb.mxu1 %v1257_v43  ;;  %1441 = vmatpush.msra.mxu0 %v1257_v43  ;;  %v1491_v43 = vld [vmem:[%s7093_s3 + $0x8] sm:$0xff] }
 0xa56   :  { %1281 = vmatpush.msrb.mxu1 %v1256_v44  ;;  %1442 = vmatpush.msra.mxu0 %v1256_v44  ;;  %v1490_v44 = vld [vmem:[%s7093_s3] sm:$0xff] }
 0xa8c   :  { %v1229_v3 = vpop.permute.xlu2 %1228 }
 0xa8d   :  { %v1231_v7 = vmul.f32 %v1229_v3, %v1226_v2 }
 0xa8f   :  { %1233 = vrot.lane.b32.xlu1 %v1231_v7, %s4950_s7 }
 0xa95   :  { %v1153_v18 = vpop.permute.xlu0 %1152 }
 0xa96   :  { %v1155_v24 = vmul.f32 %v1153_v18, %v1149_v21 }
 0xa98   :  { %1157 = vrot.lane.b32.xlu2 %v1155_v24, %s4950_s7 }
 0xaf2   :  { %v1158_v27 = vpop.permute.xlu2 %1157 }
 0xaf3   :  { %v1160_v25 = vadd.f32 %v1158_v27, %v5351_v16 }
 0xaf5   :  { %4596 = vtanh.f32 %v1160_v25 }
 0xafb   :  { %v4597_v29 = vpop.eup %4596 }
 0xafc   :  { %1164 = vrot.lane.b32.xlu1 %v4597_v29, %s4951_s25 }
 0xb01   :  { %v1234_v23 = vpop.permute.xlu1 %1233 }
 0xb02   :  { %v1236_v30 = vadd.f32 %v1234_v23, %v5357_v22 }
 0xb04   :  { %4598 = vtanh.f32 %v1236_v30 }
 0xb0a   :  { %v4599_v28 = vpop.eup %4598 }
 0xb0b   :  { %1240 = vrot.lane.b32.xlu0 %v4599_v28, %s4951_s25 }
 0xb6e   :  { %v1165_v15 = vpop.permute.xlu1 %1164 }
 0xb6f   :  { %v1167_v32 = vmul.f32 %v1165_v15, %v1162_v13 }
 0xb71   :  { %v5508_v35 = vadd.f32 %v1169_v20, %v1167_v32 }
 0xb73   :  { %1249 = vrot.lane.b32.xlu0 %v5508_v35, %s4951_s25 }
 0xb7d   :  { %v1241_v26 = vpop.permute.xlu0 %1240 }
 0xb7e   :  { %v1243_v40 = vmul.f32 %v1241_v26, %v1238_v37 }
 0xb80   :  { %v5513_v41 = vadd.f32 %v1246_v39, %v1243_v40 }
 0xb82   :  { %v1338_v42 = vrot.slane %v5513_v41, 4 }
 0xb84   :  { %1339 = vrot.lane.b32.xlu2 %v1338_v42, %s4951_s25  ;;  %v1493_v42 = vld [vmem:[%s7093_s3 + $0x18] sm:$0xff]  ;;  %s4415_s3 = sld [smem:[#allocation8 + $0x301]] }
 0xb85   :  { %1516 = vmatpush.msra.mxu3 %v1493_v42 }
 0xb87   :  { %1517 = vmatpush.msra.mxu3 %v1492_v36 }
 0xb89   :  { %1518 = vmatpush.msra.mxu3 %v1491_v43 }
 0xb8b   :  { %1519 = vmatpush.msra.mxu3 %v1490_v44 }
 0xbde   :  { %v1340_v45 = vpop.permute.xlu2 %1339 }
 0xbdf   :  { %4393 = vmatmul.msk.f32.vlgmr.msra.gmra.mxu2 %vm361_vm2, %v1340_v45 }
 0xbe5   :  { %v1250_v46 = vpop.permute.xlu0 %1249 }
 0xbe6   :  { %1252 = vst.msk [vmem:[#allocation2 + $0x4] sm:$0x1] %vm602_vm5, %v1250_v46  ;;  %4391 = vmatmul.msk.f32.vlgmr.msrb.gmra.mxu1 %vm361_vm2, %v1250_v46 }
 0xbe7   :  { %1254 = vst.msk [vmem:[#allocation2 + $0xa] sm:$0x2] %vm606_vm13, %v1250_v46  ;;  %v1402_v46 = vrot.slane %v5513_v41, 2 }
 0xc62   :  { %v1360_v49 = vpop.f32.mrf.mxu2 }
 0xc63   :  { %v1283_v50 = vpop.f32.mrf.mxu1  ;;  %v1361_v51 = vadd.f32 %v4513_v47, %v1360_v49  ;;  %v1325_v47 = vrot.slane %v5508_v35, 6 }
 0xc64   :  { %v1284_v52 = vadd.f32 %v4512_v48, %v1283_v50 }
 0xc65   :  { %v1364_v53 = vrot.slane %v1361_v51, 6 }
 0xc66   :  { %v1287_v54 = vrot.slane %v1284_v52, 6 }
 0xc67   :  { %1386 = vrot.lane.b32.xlu2 %v1364_v53, %s4950_s7  ;;  %v1366_v55 = vadd.f32 %v1364_v53, %v5357_v22 }
 0xc68   :  { %1309 = vrot.lane.b32.xlu1 %v1287_v54, %s4950_s7  ;;  %v1289_v59 = vadd.f32 %v1287_v54, %v5351_v16 }
 0xc69   :  { %v4394_v56 = vmul.f32 -1.442695, %v1366_v55 }
 0xc6a   :  { %v4392_v61 = vmul.f32 -1.442695, %v1289_v59 }
 0xc6b   :  { %4600 = vpow2.f32 %v4394_v56 }
 0xc71   :  { %v4601_v57 = vpop.eup %4600 }
 0xc72   :  { %v1370_v58 = vadd.f32 1.0, %v4601_v57 }
 0xc74   :  { %4602 = vrcp.f32 %v1370_v58  ;;  %v1382_v7 = vand.u32 2147483648, %v1370_v58  ;;  %vm1376_vm13 = vweird.f32 %v1370_v58  ;;  %v1380_v8 = vand.u32 2147483647, %v1370_v58 }
 0xc75   :  { %4604 = vpow2.f32 %v4392_v61 }
 0xc76   :  { %v1383_v12 = vor.u32 1.1754944e-38, %v1382_v7  ;;  %vm1381_vm12 = vcmp.eq.f32.partialorder %v1380_v8, 8.507059e+37 }
 0xc7a   :  { %v4603_v60 = vpop.eup %4602 }
 0xc7b   :  { %v1372_v62 = vmul.f32 %v4603_v60, %v1370_v58  ;;  %v4605_v1 = vpop.eup %4604  ;;  %vm1377_vm5 = vweird.f32 %v4603_v60 }
 0xc7c   :  { %v1293_v2 = vadd.f32 1.0, %v4605_v1  ;;  %vm1378_vm8 = vmor %vm1376_vm13, %vm1377_vm5 }
 0xc7d   :  { %v1373_v63 = vsub.f32 1.0, %v1372_v62 }
 0xc7e   :  { %4606 = vrcp.f32 %v1293_v2  ;;  %v1305_v23 = vand.u32 2147483648, %v1293_v2  ;;  %vm1299_vm4 = vweird.f32 %v1293_v2  ;;  %v1303_v30 = vand.u32 2147483647, %v1293_v2 }
 0xc7f   :  { %v1374_v0 = vmul.f32 %v4603_v60, %v1373_v63  ;;  %v4515_v63 = vld [vmem:[%s7094_s27] ss:$0 sm:$0xff]  ;;  %s7125_s27 = sld [smem:[#allocation36_spill]] }
 0xc80   :  { %v1306_v10 = vor.u32 1.1754944e-38, %v1305_v23  ;;  %vm1304_vm15 = vcmp.eq.f32.partialorder %v1303_v30, 8.507059e+37 }
 0xc81   :  { %v1375_v3 = vadd.f32 %v4603_v60, %v1374_v0 }
 0xc83   :  { %v1379_v11 = vsel %vm1378_vm8, %v4603_v60, %v1375_v3  ;;  %v4514_v60 = vld [vmem:[%s7034_s11] ss:$0 sm:$0xff]  ;;  %s3684_s11 = scalar_select %p3683_p4, 1, 0 }
 0xc84   :  { %v1384_v17 = vsel %vm1381_vm12, %v1383_v12, %v1379_v11  ;;  %v4607_v21 = vpop.eup %4606 }
 0xc85   :  { %v1295_v24 = vmul.f32 %v4607_v21, %v1293_v2  ;;  %vm1300_vm3 = vweird.f32 %v4607_v21  ;;  %v1396_v45 = vsub.f32 1.0, %v1384_v17  ;;  %v1404_v51 = vmul.f32 %v1402_v46, %v1384_v17  ;;  %s3685_s1 = scvt.s32.f32 %s3684_s11 }
 0xc86   :  { %vm1301_vm7 = vmor %vm1299_vm4, %vm1300_vm3 }
 0xc87   :  { %v1296_v27 = vsub.f32 1.0, %v1295_v24 }
 0xc89   :  { %v1297_v25 = vmul.f32 %v4607_v21, %v1296_v27 }
 0xc8b   :  { %v1298_v29 = vadd.f32 %v4607_v21, %v1297_v25 }
 0xc8d   :  { %v1302_v28 = vsel %vm1301_vm7, %v4607_v21, %v1298_v29  ;;  %vm764_vm7 = vcmask 256002  }
 0xc8e   :  { %v1307_v15 = vsel %vm1304_vm15, %v1306_v10, %v1302_v28  ;;  %vm768_vm15 = vcmask 257027  }
 0xc8f   :  { %v1319_v48 = vsub.f32 1.0, %v1307_v15  ;;  %v1327_v53 = vmul.f32 %v1325_v47, %v1307_v15 }
 0xcc1   :  { %v1387_v14 = vpop.permute.xlu2 %1386 }
 0xcc2   :  { %v1389_v18 = vmul.f32 %v1387_v14, %v1384_v17 }
 0xcc4   :  { %1391 = vrot.lane.b32.xlu1 %v1389_v18, %s4950_s7 }
 0xcda   :  { %v1310_v13 = vpop.permute.xlu1 %1309 }
 0xcdb   :  { %v1312_v20 = vmul.f32 %v1310_v13, %v1307_v15 }
 0xcdd   :  { %1314 = vrot.lane.b32.xlu0 %v1312_v20, %s4950_s7 }
 0xd36   :  { %v1392_v32 = vpop.permute.xlu1 %1391 }
 0xd37   :  { %v1394_v37 = vadd.f32 %v1392_v32, %v5357_v22 }
 0xd39   :  { %4608 = vtanh.f32 %v1394_v37 }
 0xd3f   :  { %v4609_v38 = vpop.eup %4608 }
 0xd40   :  { %1398 = vrot.lane.b32.xlu0 %v4609_v38, %s4951_s25 }
 0xd4f   :  { %v1315_v26 = vpop.permute.xlu0 %1314 }
 0xd50   :  { %v1317_v39 = vadd.f32 %v1315_v26, %v5351_v16 }
 0xd52   :  { %4610 = vtanh.f32 %v1317_v39 }
 0xd58   :  { %v4611_v40 = vpop.eup %4610 }
 0xd59   :  { %1321 = vrot.lane.b32.xlu2 %v4611_v40, %s4951_s25 }
 0xdb2   :  { %v1399_v49 = vpop.permute.xlu0 %1398 }
 0xdb3   :  { %v1322_v50 = vpop.permute.xlu2 %1321  ;;  %v1401_v52 = vmul.f32 %v1399_v49, %v1396_v45 }
 0xdb4   :  { %v1324_v54 = vmul.f32 %v1322_v50, %v1319_v48 }
 0xdb5   :  { %v5560_v55 = vadd.f32 %v1404_v51, %v1401_v52 }
 0xdb6   :  { %v5562_v56 = vadd.f32 %v1327_v53, %v1324_v54 }
 0xdb7   :  { %v1499_v57 = vrot.slane %v5560_v55, 2 }
 0xdb8   :  { %v1422_v58 = vrot.slane %v5562_v56, 2 }
 0xdb9   :  { %1500 = vrot.lane.b32.xlu2 %v1499_v57, %s4951_s25 }
 0xdba   :  { %1423 = vrot.lane.b32.xlu1 %v1422_v58, %s4951_s25 }
 0xe13   :  { %v1501_v35 = vpop.permute.xlu2 %1500 }
 0xe14   :  { %4397 = vmatmul.msk.f32.vlgmr.msra.gmra.mxu3 %vm361_vm2, %v1501_v35 }
 0xe2c   :  { %v1424_v59 = vpop.permute.xlu1 %1423 }
 0xe2d   :  { %4395 = vmatmul.msk.f32.vlgmr.msra.gmra.mxu0 %vm361_vm2, %v1424_v59  ;;  %v1577_v59 = vld [vmem:[#allocation12 + $0x8] sm:$0xff] }
 0xe97   :  { %v1521_v61 = vpop.f32.mrf.mxu3 }
 0xe98   :  { %v1522_v62 = vadd.f32 %v4514_v60, %v1521_v61  ;;  %v1576_v61 = vld [vmem:[#allocation12] sm:$0xff] }
 0xe9a   :  { %1545 = vrot.lane.b32.xlu1 %v1522_v62, %s4950_s7  ;;  %v1524_v3 = vadd.f32 %v1522_v62, %v5357_v22 }
 0xe9c   :  { %v4398_v7 = vmul.f32 -1.442695, %v1524_v3 }
 0xe9e   :  { %4612 = vpow2.f32 %v4398_v7  ;;  %v1573_v7 = vld [vmem:[%s7035_s12 + $0x8] sm:$0xff] }
 0xea4   :  { %v4613_v8 = vpop.eup %4612 }
 0xea5   :  { %v1528_v11 = vadd.f32 1.0, %v4613_v8 }
 0xea7   :  { %4614 = vrcp.f32 %v1528_v11  ;;  %v1540_v23 = vand.u32 2147483648, %v1528_v11  ;;  %vm1534_vm9 = vweird.f32 %v1528_v11  ;;  %v1538_v30 = vand.u32 2147483647, %v1528_v11 }
 0xea9   :  { %v1541_v10 = vor.u32 1.1754944e-38, %v1540_v23  ;;  %vm1539_vm13 = vcmp.eq.f32.partialorder %v1538_v30, 8.507059e+37 }
 0xeaa   :  { %v1444_v0 = vpop.f32.mrf.mxu0 }
 0xeab   :  { %v1445_v1 = vadd.f32 %v4515_v63, %v1444_v0  ;;  %v1486_v63 = vrot.slane %v5562_v56, 6 }
 0xead   :  { %v1448_v2 = vrot.slane %v1445_v1, 4  ;;  %v4615_v17 = vpop.eup %4614 }
 0xeae   :  { %v1530_v18 = vmul.f32 %v4615_v17, %v1528_v11  ;;  %vm1535_vm6 = vweird.f32 %v4615_v17  ;;  %v1645_v11 = vld [vmem:[%s7038_s15 + $0x38] sm:$0xff] }
 0xeaf   :  { %1470 = vrot.lane.b32.xlu0 %v1448_v2, %s4950_s7  ;;  %v1450_v12 = vadd.f32 %v1448_v2, %v5351_v16  ;;  %vm1536_vm5 = vmor %vm1534_vm9, %vm1535_vm6  ;;  %1664 = vmatpush.msrb.mxu0 %v1645_v11  ;;  %vm926_vm6 = vcmask 258052   ;;  %vm930_vm9 = vcmask 259077  }
 0xeb0   :  { %v1531_v21 = vsub.f32 1.0, %v1530_v18 }
 0xeb1   :  { %v4396_v14 = vmul.f32 -1.442695, %v1450_v12  ;;  %v1644_v12 = vld [vmem:[%s7038_s15 + $0x30] sm:$0xff] }
 0xeb2   :  { %v1532_v25 = vmul.f32 %v4615_v17, %v1531_v21  ;;  %1665 = vmatpush.msrb.mxu0 %v1644_v12  ;;  %v1641_v21 = vld [vmem:[%s7038_s15 + $0x18] sm:$0xff] }
 0xeb3   :  { %4616 = vpow2.f32 %v4396_v14  ;;  %v1643_v14 = vld [vmem:[%s7038_s15 + $0x28] sm:$0xff] }
 0xeb4   :  { %v1533_v29 = vadd.f32 %v4615_v17, %v1532_v25  ;;  %1666 = vmatpush.msrb.mxu0 %v1643_v14  ;;  %v1638_v25 = vld [vmem:[%s7038_s15] sm:$0xff] }
 0xeb6   :  { %v1537_v28 = vsel %vm1536_vm5, %v4615_v17, %v1533_v29  ;;  %v1642_v17 = vld [vmem:[%s7038_s15 + $0x20] sm:$0xff]  ;;  %vm7097_vm5 = vcmask 521477  }
 0xeb7   :  { %v1542_v15 = vsel %vm1539_vm13, %v1541_v10, %v1537_v28  ;;  %1667 = vmatpush.msrb.mxu0 %v1642_v17  ;;  %vm7098_vm13 = vcmask 523264   ;;  %v5662_v10 = vld [vmem:[#allocation14 + $0x18] sm:$0xff] }
 0xeb8   :  { %v1555_v53 = vsub.f32 1.0, %v1542_v15 }
 0xeb9   :  { %v4617_v24 = vpop.eup %4616  ;;  %1668 = vmatpush.msrb.mxu0 %v1641_v21  ;;  %v4954_v21 = vmov -1e+30  }
 0xeba   :  { %v1454_v27 = vadd.f32 1.0, %v4617_v24  ;;  %v1640_v24 = vld [vmem:[%s7038_s15 + $0x10] sm:$0xff] }
 0xebb   :  { %1669 = vmatpush.msrb.mxu0 %v1640_v24 }
 0xebc   :  { %4618 = vrcp.f32 %v1454_v27  ;;  %v1466_v40 = vand.u32 2147483648, %v1454_v27  ;;  %vm1460_vm12 = vweird.f32 %v1454_v27  ;;  %v1464_v42 = vand.u32 2147483647, %v1454_v27 }
 0xebe   :  { %v1467_v43 = vor.u32 1.1754944e-38, %v1466_v40  ;;  %vm1465_vm4 = vcmp.eq.f32.partialorder %v1464_v42, 8.507059e+37 }
 0xec2   :  { %v4619_v13 = vpop.eup %4618 }
 0xec3   :  { %v1456_v37 = vmul.f32 %v4619_v13, %v1454_v27  ;;  %vm1461_vm8 = vweird.f32 %v4619_v13  ;;  %v1639_v27 = vld [vmem:[%s7038_s15 + $0x8] sm:$0xff]  ;;  %s2978_s15 = scalar_select %p2977_p2, 1, 0 }
 0xec4   :  { %vm1462_vm3 = vmor %vm1460_vm12, %vm1461_vm8  ;;  %1670 = vmatpush.msrb.mxu0 %v1639_v27 }
 0xec5   :  { %v1457_v38 = vsub.f32 1.0, %v1456_v37  ;;  %vm7099_vm8 = vmmov %vm7098_vm13 }
 0xec6   :  { %1671 = vmatpush.msrb.mxu0 %v1638_v25 }
 0xec7   :  { %v1458_v26 = vmul.f32 %v4619_v13, %v1457_v38  ;;  %v4952_v38 = vmov 0  }
 0xec8   :  { %4487 = vset.pattern.permute.xlu1 %v4952_v38 }
 0xec9   :  { %v1459_v39 = vadd.f32 %v4619_v13, %v1458_v26 }
 0xecb   :  { %v1463_v36 = vsel %vm1462_vm3, %v4619_v13, %v1459_v39  ;;  %v5664_v13 = vld [vmem:[#allocation14 + $0x10] sm:$0xff] }
 0xecc   :  { %v1468_v45 = vsel %vm1465_vm4, %v1467_v43, %v1463_v36 }
 0xecd   :  { %v1480_v62 = vsub.f32 1.0, %v1468_v45 }
 0xf0c   :  { %v1546_v20 = vpop.permute.xlu1 %1545 }
 0xf0d   :  { %v1548_v32 = vmul.f32 %v1546_v20, %v1542_v15  ;;  %v1869_v20 = vadd.s32 1, %v5145_v6 }
 0xf0f   :  { %1550 = vrot.lane.b32.xlu0 %v1548_v32, %s4950_s7  ;;  %v1866_v32 = vmul.u32 7, %v5145_v6  ;;  %v1870_v37 = vmul.u32 7, %v1869_v20 }
 0xf11   :  { %vm5682_vm12 = vcmp.ge.s32.totalorder %v5208_v19, %v1866_v32  ;;  %vm5687_vm3 = vcmp.lt.s32.totalorder %v5143_v5, %v1870_v37  ;;  %vm5692_vm4 = vcmp.lt.s32.totalorder %v5208_v19, %v1870_v37 }
 0xf21   :  { %v1471_v44 = vpop.permute.xlu0 %1470 }
 0xf22   :  { %v1473_v46 = vmul.f32 %v1471_v44, %v1468_v45 }
 0xf24   :  { %1475 = vrot.lane.b32.xlu2 %v1473_v46, %s4950_s7  ;;  %v4516_v46 = vld [vmem:[%s7037_s14] ss:$0 sm:$0xff]  ;;  %s1679_s14 = sld [smem:[#allocation8]] }
 0xf7e   :  { %v1476_v47 = vpop.permute.xlu2 %1475 }
 0xf7f   :  { %v1478_v48 = vadd.f32 %v1476_v47, %v5351_v16  ;;  %v1562_v16 = vmul.f32 %v1542_v15, %v1499_v57  ;;  %v1578_v57 = vld [vmem:[#allocation12 + $0x10] sm:$0xff]  ;;  %v5670_v15 = vld [vmem:[#allocation14] sm:$0xff] }
 0xf81   :  { %4620 = vtanh.f32 %v1478_v48  ;;  %v1551_v49 = vpop.permute.xlu0 %1550 }
 0xf82   :  { %v1553_v50 = vadd.f32 %v1551_v49, %v5357_v22 }
 0xf84   :  { %4622 = vtanh.f32 %v1553_v50 }
 0xf87   :  { %v4621_v51 = vpop.eup %4620 }
 0xf88   :  { %1482 = vrot.lane.b32.xlu1 %v4621_v51, %s4951_s25 }
 0xf8a   :  { %v4623_v52 = vpop.eup %4622 }
 0xf8b   :  { %1557 = vrot.lane.b32.xlu2 %v4623_v52, %s4951_s25 }
 0xf93   :  { %761 = vrot.lane.b32.xlu2 %v5410_v33, %s4951_s25  ;;  %v1579_v33 = vld [vmem:[#allocation12 + $0x18] sm:$0xff] }
 0xf94   :  { %1597 = vmatpush.msra.mxu1 %v1579_v33 }
 0xf96   :  { %1598 = vmatpush.msra.mxu1 %v1578_v57  ;;  %v4517_v57 = vld [vmem:[%s7039_s16] ss:$0 sm:$0xff]  ;;  %s4404_s16 = sld [smem:[#allocation8 + $0x80]] }
 0xf98   :  { %1599 = vmatpush.msra.mxu1 %v1577_v59 }
 0xf9a   :  { %1600 = vmatpush.msra.mxu1 %v1576_v61 }
 0xf9b   :  { %1407 = vrot.lane.b32.xlu2 %v5562_v56, %s4951_s25  ;;  %v1574_v56 = vld [vmem:[%s7035_s12 + $0x10] sm:$0xff] }
 0xf9c   :  { %1911 = vmatpush.msrb.mxu1 %v5662_v10 }
 0xf9e   :  { %1912 = vmatpush.msrb.mxu1 %v5664_v13 }
 0xfe5   :  { %v1558_v54 = vpop.permute.xlu2 %1557 }
 0xfe6   :  { %v1560_v58 = vmul.f32 %v1558_v54, %v1555_v53 }
 0xfe8   :  { %v1563_v22 = vadd.f32 %v1562_v16, %v1560_v58 }
 0xfea   :  { %1569 = vst.msk [vmem:[#allocation2] sm:$0x1] %vm928_vm0, %v1563_v22  ;;  %1581 = vrot.lane.b32.xlu1 %v1563_v22, %s4951_s25  ;;  %vm1094_vm0 = vcmask 261127  }
 0xfeb   :  { %1571 = vst.msk [vmem:[#allocation2 + $0x6] sm:$0x2] %vm932_vm1, %v1563_v22  ;;  %vm1096_vm1 = vcmask 523527  }
 0xfed   :  { %v762_v35 = vpop.permute.xlu2 %761 }
 0xfee   :  { %765 = vst.msk [vmem:[#allocation2 - $0x1] sm:$0x4] %vm764_vm7, %v762_v35 }
 0xfef   :  { %769 = vst.msk [vmem:[#allocation2 + $0x5] sm:$0x8] %vm768_vm15, %v762_v35 }
 0xff0   :  { %1411 = vst.msk [vmem:[#allocation2 - $0x1] sm:$0x4] %vm766_vm11, %v5560_v55  ;;  %vm1090_vm11 = vcmask 260102  }
 0xff1   :  { %1413 = vst.msk [vmem:[#allocation2 + $0x5] sm:$0x8] %vm770_vm10, %v5560_v55  ;;  %v1488_v55 = vmul.f32 %v1486_v63, %v1468_v45  ;;  %vm1092_vm10 = vcmask 522502   ;;  %v4953_v45 = vmov 1  }
 0xff2   :  { %1087 = vrot.lane.b32.xlu1 %v5474_v31, %s4951_s25  ;;  %v1575_v31 = vld [vmem:[%s7035_s12 + $0x18] sm:$0xff]  ;;  %4493 = vset.pattern.permute.xlu2 %v4953_v45 }
 0xff3   :  { %1622 = vmatpush.msrb.mxu2 %v1575_v31  ;;  %4499 = vset.pattern.permute.xlu0 %v4953_v45 }
 0xff5   :  { %v1408_v60 = vpop.permute.xlu2 %1407  ;;  %1623 = vmatpush.msrb.mxu2 %v1574_v56 }
 0xff6   :  { %1410 = vst.msk [vmem:[#allocation2 + $0x3] sm:$0x4] %vm764_vm7, %v1408_v60 }
 0xff7   :  { %1412 = vst.msk [vmem:[#allocation2 + $0x9] sm:$0x8] %vm768_vm15, %v1408_v60  ;;  %1624 = vmatpush.msrb.mxu2 %v1573_v7  ;;  %vm1874_vm15 = vmand %vm5682_vm12, %vm5692_vm4  ;;  %vm7109_vm12 = vcmp.eq.s32.totalorder %v5143_v5, 1 }
 0xff8   :  { %v4419_v43 = vsel %vm1874_vm15, 1.0, %v4949_v4  ;;  %v5758_v24 = vsel %vm1874_vm15, 0.0, %v4954_v21 }
 0xffa   :  { %v1483_v0 = vpop.permute.xlu1 %1482 }
 0xffb   :  { %v1485_v1 = vmul.f32 %v1483_v0, %v1480_v62 }
 0xffd   :  { %v1489_v2 = vadd.f32 %v1488_v55, %v1485_v1 }
 0xfff   :  { %v1605_v3 = vrot.slane %v1489_v2, 4 }
0x1001   :  { %1606 = vrot.lane.b32.xlu0 %v1605_v3, %s4951_s25 }
0x1009   :  { %923 = vrot.lane.b32.xlu0 %v5451_v9, %s4951_s25  ;;  %v1572_v9 = vld [vmem:[%s7035_s12] sm:$0xff]  ;;  %s4412_s12 = sld [smem:[#allocation8 + $0x280]] }
0x100a   :  { %1625 = vmatpush.msrb.mxu2 %v1572_v9  ;;  %v5747_v9 = vld [vmem:[%s7041_s18] ss:$0 sm:$0xff] }
0x1011   :  { %1565 = vrot.lane.b32.xlu0 %v1489_v2, %s4951_s25 }
0x105c   :  { %v1582_v8 = vpop.permute.xlu1 %1581 }
0x105d   :  { %4399 = vmatmul.msk.f32.vlgmr.msra.gmra.mxu1 %vm361_vm2, %v1582_v8 }
0x1064   :  { %v1088_v18 = vpop.permute.xlu1 %1087 }
0x1065   :  { %1091 = vst.msk [vmem:[#allocation2 - $0x3] sm:$0x40] %vm1090_vm11, %v1088_v18  ;;  %vm1962_vm11 = vcmask 15360  }
0x1066   :  { %1093 = vst.msk [vmem:[#allocation2 - $0x3] sm:$0x40] %vm1092_vm10, %v5481_v34 }
0x1067   :  { %1095 = vst.msk [vmem:[#allocation2 + $0x3] sm:$0x80] %vm1094_vm0, %v1088_v18 }
0x1068   :  { %1097 = vst.msk [vmem:[#allocation2 + $0x3] sm:$0x80] %vm1096_vm1, %v5481_v34 }
0x1073   :  { %v1607_v29 = vpop.permute.xlu0 %1606 }
0x1074   :  { %4400 = vmatmul.msk.f32.vlgmr.msrb.gmra.mxu2 %vm361_vm2, %v1607_v29 }
0x107b   :  { %v924_v23 = vpop.permute.xlu0 %923 }
0x107c   :  { %927 = vst.msk [vmem:[#allocation2 - $0x2] sm:$0x10] %vm926_vm6, %v924_v23 }
0x107d   :  { %931 = vst.msk [vmem:[#allocation2 + $0x4] sm:$0x20] %vm930_vm9, %v924_v23 }
0x107e   :  { %1253 = vst.msk [vmem:[#allocation2 - $0x2] sm:$0x10] %vm604_vm14, %v5513_v41  ;;  %vm5677_vm14 = vcmp.ge.s32.totalorder %v5143_v5, %v1866_v32 }
0x107f   :  { %1255 = vst.msk [vmem:[#allocation2 + $0x4] sm:$0x20] %vm7097_vm5, %v5513_v41  ;;  %v5667_v41 = vld [vmem:[#allocation14 + $0x8] sm:$0xff]  ;;  %vm1873_vm7 = vmand %vm5677_vm14, %vm5687_vm3 }
0x1080   :  { %1913 = vmatpush.msrb.mxu1 %v5667_v41  ;;  %v4418_v36 = vsel %vm1873_vm7, 1.0, %v4949_v4  ;;  %v5765_v27 = vsel %vm1873_vm7, 0.0, %v4954_v21  ;;  %v5829_v21 = vld [vmem:[%s7042_s19 + $0x30] sm:$0xff]  ;;  %vm7110_vm7 = vcmp.eq.s32.totalorder %v5143_v5, 2 }
0x1081   :  { %v4488_v44 = vpack.i.bf16 %v4419_v43, %v4418_v36 }
0x1082   :  { %1914 = vmatpush.msrb.mxu1 %v5670_v15 }
0x1083   :  { %v1566_v34 = vpop.permute.xlu0 %1565  ;;  %4489 = vperm.xlu1 %4487, %v4488_v44   ;;  %4495 = vperm.xlu2 %4493, %v4488_v44  }
0x1084   :  { %1568 = vst.msk [vmem:[#allocation2 + $0x2] sm:$0x10] %vm926_vm6, %v1566_v34 }
0x1085   :  { %1570 = vst.msk [vmem:[#allocation2 + $0x8] sm:$0x20] %vm930_vm9, %v1566_v34 }
0x108b   :  { %v5654_v30 = vld [vmem:[#allocation2] sm:$0xff] }
0x108c   :  { %4401 = vmatmul.msk.f32.vlgmr.msrb.gmra.mxu0 %vm7098_vm13, %v5654_v30  ;;  %v5658_v28 = vld [vmem:[#allocation2 + $0x8] sm:$0xff]  ;;  %vm7108_vm13 = vcmp.eq.s32.totalorder %v5143_v5, 0 }
0x1094   :  { %4402 = vmatmul.msk.f32.gmra.mxu0 %vm7099_vm8, %v5658_v28 }
0x10da   :  { %v1602_v47 = vpop.f32.mrf.mxu1 }
0x10dd   :  { %v4496_v53 = vpop.permute.xlu2 %4495 }
0x10de   :  { %v5723_v16 = vunpack.i.h.bf16 %v4496_v53  ;;  %v5725_v58 = vunpack.i.l.bf16 %v4496_v53 }
0x10f5   :  { %v4490_v54 = vpop.permute.xlu1 %4489 }
0x10f6   :  { %v5727_v22 = vunpack.i.h.bf16 %v4490_v54  ;;  %v5729_v35 = vunpack.i.l.bf16 %v4490_v54 }
0x10f7   :  { %v1627_v48 = vpop.f32.mrf.mxu2 }
0x10f8   :  { %v1628_v49 = vadd.f32 %v1627_v48, %v1602_v47 }
0x10fa   :  { %v1634_v50 = vadd.f32 %v4516_v46, %v1628_v49 }
0x10fc   :  { %4624 = vtanh.f32 %v1634_v50 }
0x1102   :  { %v5719_v51 = vpop.eup %4624 }
0x1103   :  { %4421 = vmatmul.msk.f32.vlgmr.msrb.gmra.mxu1 %vm361_vm2, %v5719_v51 }
0x1109   :  { %v1673_v52 = vpop.f32.mrf.mxu0 }
0x110a   :  { %v5738_v1 = vadd.f32 %v4517_v57, %v1673_v52 }
0x1111   :  { %v1676_v61 = vpop.f32.mrf.mxu0 }
0x1112   :  { %v5740_v2 = vadd.f32 %v4517_v57, %v1676_v61  ;;  %v5781_v61 = vld [vmem:[%s7042_s19 + $0x70] sm:$0xff] }
0x1180   :  { %v1916_v33 = vpop.f32.mrf.mxu1 }
0x1181   :  { %v1929_v59 = vperm.slane %v1916_v33, 0  ;;  %v1940_v60 = vperm.slane %v1916_v33, 1 }
0x1183   :  { %v1941_v62 = vmul.f32 %v5725_v58, %v1940_v60  ;;  %v1942_v63 = vmul.f32 %v5723_v16, %v1940_v60  ;;  %v1931_v0 = vmul.f32 %v5727_v22, %v1929_v59  ;;  %v1930_v55 = vmul.f32 %v5729_v35, %v1929_v59  ;;  %v5776_v60 = vld [vmem:[%s7042_s19 + $0x78] sm:$0xff] }
0x1184   :  { %1843 = vmatpush.msrb.mxu3 %v5776_v60 }
0x1185   :  { %v1944_v3 = vadd.f32 %v1942_v63, %v1931_v0  ;;  %v1943_v31 = vadd.f32 %v1941_v62, %v1930_v55  ;;  %v5787_v63 = vld [vmem:[%s7042_s19 + $0x68] sm:$0xff]  ;;  %v5793_v0 = vld [vmem:[%s7042_s19 + $0x60] sm:$0xff]  ;;  %v5799_v55 = vld [vmem:[%s7042_s19 + $0x58] sm:$0xff] }
0x1186   :  { %1844 = vmatpush.msrb.mxu3 %v5781_v61 }
0x1187   :  { %v1946_v56 = vadd.f32 %v1944_v3, %v5740_v2  ;;  %v1945_v7 = vadd.f32 %v1943_v31, %v5738_v1  ;;  %v5805_v3 = vld [vmem:[%s7042_s19 + $0x50] sm:$0xff] }
0x1188   :  { %1845 = vmatpush.msrb.mxu3 %v5787_v63 }
0x1189   :  { %4626 = vtanh.f32 %v1946_v56  ;;  %v5811_v56 = vld [vmem:[%s7042_s19 + $0x48] sm:$0xff] }
0x118a   :  { %4628 = vtanh.f32 %v1945_v7  ;;  %1846 = vmatpush.msrb.mxu3 %v5793_v0 }
0x118c   :  { %1847 = vmatpush.msrb.mxu3 %v5799_v55 }
0x118e   :  { %1848 = vmatpush.msrb.mxu3 %v5805_v3 }
0x118f   :  { %v4627_v8 = vpop.eup %4626 }
0x1190   :  { %v4629_v11 = vpop.eup %4628  ;;  %v1953_v12 = vmul.f32 %v4627_v8, %v5747_v9  ;;  %v5817_v8 = vld [vmem:[%s7042_s19 + $0x40] sm:$0xff]  ;;  %1849 = vmatpush.msrb.mxu3 %v5811_v56 }
0x1191   :  { %v1952_v14 = vmul.f32 %v4629_v11, %v5747_v9 }
0x1192   :  { %v1957_v17 = vsel %vm361_vm2, %v1953_v12, 0.0  ;;  %1850 = vmatpush.msrb.mxu3 %v5817_v8 }
0x1193   :  { %1958 = vadd.xlane.f32.xlu1 %v1957_v17  ;;  %v1954_v18 = vsel %vm361_vm2, %v1952_v14, 0.0  ;;  %v5823_v14 = vld [vmem:[%s7042_s19 + $0x38] sm:$0xff] }
0x1194   :  { %1955 = vadd.xlane.f32.xlu0 %v1954_v18  ;;  %1851 = vmatpush.msrb.mxu3 %v5823_v14 }
0x1196   :  { %1852 = vmatpush.msrb.mxu3 %v5829_v21 }
0x1206   :  { %v1959_v25 = vpop.xlane.xlu1 %1958 }
0x1207   :  { %v1961_v29 = vadd.f32 %v1959_v25, %v5758_v24  ;;  %v1956_v23 = vpop.xlane.xlu0 %1955 }
0x1208   :  { %v1960_v34 = vadd.f32 %v1956_v23, %v5765_v27 }
0x1209   :  { %v1964_v20 = vsel %vm1962_vm11, %v1961_v29, -inf }
0x120a   :  { %v1963_v32 = vsel %vm1962_vm11, %v1960_v34, -inf }
0x120b   :  { %v1965_v37 = vmax.f32 %v1963_v32, %v1964_v20 }
0x120d   :  { %v1966_v38 = vrot.slane %v1965_v37, 4 }
0x120f   :  { %v1967_v39 = vmax.f32 %v1965_v37, %v1966_v38 }
0x1211   :  { %v1968_v26 = vrot.slane %v1967_v39, 2 }
0x1213   :  { %v1969_v42 = vmax.f32 %v1967_v39, %v1968_v26  ;;  %v1680_v39 = vstv %s1679_s14  ;;  %v1689_v26 = vstv %s4403_s6  ;;  %s2268_s14 = scalar_select %p2267_p0, 1, 0 }
0x1214   :  { %vm1681_vm9 = vcmp.eq.s32.totalorder %v5145_v6, %v1680_v39  ;;  %vm1690_vm5 = vcmp.eq.s32.totalorder %v5145_v6, %v1689_v26 }
0x1215   :  { %v1970_v40 = vrot.slane %v1969_v42, 1  ;;  %vm1682_vm8 = vmand %vm7108_vm13, %vm1681_vm9  ;;  %vm7112_vm9 = vcmp.eq.s32.totalorder %v5143_v5, 4  ;;  %s2269_s6 = scvt.s32.f32 %s2268_s14 }
0x1216   :  { %vm1691_vm3 = vmand %vm7109_vm12, %vm1690_vm5 }
0x1217   :  { %v1971_v36 = vmax.f32 %v1969_v42, %v1970_v40  ;;  %v1698_v42 = vstv %s4404_s16  ;;  %v1707_v40 = vstv %s4405_s5  ;;  %s2272_s16 = ssub.f32 1.0, %s2269_s6 }
0x1218   :  { %vm1699_vm14 = vcmp.eq.s32.totalorder %v5145_v6, %v1698_v42  ;;  %vm1708_vm4 = vcmp.eq.s32.totalorder %v5145_v6, %v1707_v40  ;;  %v5999_v40 = vld [vmem:[%s7043_s20 + $0x38] sm:$0xff]  ;;  %s4434_s5 = sld [smem:[#allocation10 + $0x2]] }
0x1219   :  { %v1972_v43 = vsub.f32 %v1960_v34, %v1971_v36  ;;  %v1973_v44 = vsub.f32 %v1961_v29, %v1971_v36  ;;  %v1716_v36 = vstv %s4406_s13  ;;  %vm1700_vm15 = vmand %vm7110_vm7, %vm1699_vm14  ;;  %vm7115_vm7 = vcmp.eq.s32.totalorder %v5143_v5, 7  ;;  %s4955_s13 = smov 32  }
0x121b   :  { %v1974_v45 = vmul.f32 1.442695, %v1972_v43  ;;  %v1976_v46 = vmul.f32 1.442695, %v1973_v44  ;;  %v1725_v43 = vstv %s4407_s29  ;;  %v1684_v44 = vsel %vm1682_vm8, 1.0, %v4949_v4 }
0x121c   :  { %vm7113_vm8 = vcmp.eq.s32.totalorder %v5143_v5, 5 }
0x121d   :  { %4630 = vpow2.f32 %v1974_v45  ;;  %v1693_v45 = vsel %vm1691_vm3, 1.0, %v4949_v4  ;;  %vm7114_vm3 = vcmp.eq.s32.totalorder %v5143_v5, 6 }
0x121e   :  { %4632 = vpow2.f32 %v1976_v46  ;;  %v1734_v46 = vstv %s4408_s10  ;;  %p2622_p1 = scmp.gt.s32.totalorder %s4434_s5, 0  ;;  %s4448_s5 = sld [smem:[#allocation10 + $0x4]] }
0x121f   :  { %vm1735_vm13 = vcmp.eq.s32.totalorder %v5145_v6, %v1734_v46  ;;  %v6030_v46 = vld [vmem:[%s7043_s20 + $0x10] sm:$0xff] }
0x1223   :  { %v4631_v47 = vpop.eup %4630 }
0x1224   :  { %v4633_v48 = vpop.eup %4632  ;;  %v1978_v49 = vsel %vm1962_vm11, %v4631_v47, 0.0  ;;  %p3332_p3 = scmp.gt.s32.totalorder %s4448_s5, 0 }
0x1225   :  { %v1979_v50 = vsel %vm1962_vm11, %v4633_v48, 0.0 }
0x1226   :  { %v1980_v52 = vadd.f32 %v1979_v50, %v1978_v49  ;;  %v1743_v49 = vstv %s4409_s28  ;;  %v5857_v50 = vld [vmem:[%s7042_s19 + $0x28] sm:$0xff] }
0x1227   :  { %1853 = vmatpush.msrb.mxu3 %v5857_v50  ;;  %vm1744_vm12 = vcmp.eq.s32.totalorder %v5145_v6, %v1743_v49 }
0x1228   :  { %v1981_v53 = vrot.slane %v1980_v52, 4 }
0x122a   :  { %v1982_v54 = vadd.f32 %v1981_v53, %v1980_v52 }
0x122c   :  { %v1983_v33 = vrot.slane %v1982_v54, 2 }
0x122e   :  { %v1984_v57 = vadd.f32 %v1983_v33, %v1982_v54  ;;  %v5867_v54 = vld [vmem:[%s7042_s19 + $0x20] sm:$0xff]  ;;  %v5872_v33 = vld [vmem:[%s7042_s19 + $0x18] sm:$0xff] }
0x122f   :  { %1854 = vmatpush.msrb.mxu3 %v5867_v54 }
0x1230   :  { %v1985_v59 = vrot.slane %v1984_v57, 1 }
0x1231   :  { %1855 = vmatpush.msrb.mxu3 %v5872_v33 }
0x1232   :  { %v1986_v62 = vadd.f32 %v1985_v59, %v1984_v57 }
0x1234   :  { %4634 = vrcp.f32 %v1986_v62  ;;  %v1998_v12 = vand.u32 2147483648, %v1986_v62  ;;  %v1996_v18 = vand.u32 2147483647, %v1986_v62  ;;  %vm1992_vm0 = vweird.f32 %v1986_v62 }
0x1236   :  { %v1999_v29 = vor.u32 1.1754944e-38, %v1998_v12  ;;  %vm1997_vm6 = vcmp.eq.f32.partialorder %v1996_v18, 8.507059e+37 }
0x123a   :  { %v4635_v31 = vpop.eup %4634 }
0x123b   :  { %v1988_v7 = vmul.f32 %v4635_v31, %v1986_v62  ;;  %vm1993_vm10 = vweird.f32 %v4635_v31  ;;  %v1829_v62 = vld [vmem:[%s7042_s19 + $0x10] sm:$0xff] }
0x123c   :  { %vm1994_vm1 = vmor %vm1992_vm0, %vm1993_vm10  ;;  %vm1717_vm10 = vcmp.eq.s32.totalorder %v5145_v6, %v1716_v36  ;;  %vm7111_vm0 = vcmp.eq.s32.totalorder %v5143_v5, 3  ;;  %1856 = vmatpush.msrb.mxu3 %v1829_v62  ;;  %v6005_v36 = vld [vmem:[%s7043_s20 + $0x30] sm:$0xff] }
0x123d   :  { %v1989_v11 = vsub.f32 1.0, %v1988_v7  ;;  %vm1718_vm5 = vmand %vm7112_vm9, %vm1717_vm10  ;;  %vm2038_vm9 = vcmask 779520  }
0x123e   :  { %v1720_v59 = vsel %vm1718_vm5, 1.0, %v4949_v4  ;;  %vm2044_vm5 = vcmask 911104  }
0x123f   :  { %v1990_v17 = vmul.f32 %v4635_v31, %v1989_v11 }
0x1241   :  { %v1991_v25 = vadd.f32 %v4635_v31, %v1990_v17  ;;  %v1828_v17 = vld [vmem:[%s7042_s19 + $0x8] sm:$0xff] }
0x1242   :  { %1857 = vmatpush.msrb.mxu3 %v1828_v17 }
0x1243   :  { %v1995_v23 = vsel %vm1994_vm1, %v4635_v31, %v1991_v25  ;;  %vm1709_vm1 = vmand %vm7111_vm0, %vm1708_vm4 }
0x1244   :  { %v2000_v34 = vsel %vm1997_vm6, %v1999_v29, %v1995_v23  ;;  %vm1726_vm6 = vcmp.eq.s32.totalorder %v5145_v6, %v1725_v43  ;;  %v1711_v53 = vsel %vm1709_vm1, 1.0, %v4949_v4  ;;  %vm1736_vm4 = vmand %vm7114_vm3, %vm1735_vm13  ;;  %v1827_v29 = vld [vmem:[%s7042_s19] sm:$0xff]  ;;  %v6011_v43 = vld [vmem:[%s7043_s20 + $0x28] sm:$0xff] }
0x1245   :  { %v2002_v20 = vmul.f32 %v4633_v48, %v2000_v34  ;;  %v2001_v37 = vmul.f32 %v4631_v47, %v2000_v34  ;;  %v1695_v47 = vadd.f32 %v1693_v45, %v1684_v44  ;;  %v1702_v48 = vsel %vm1700_vm15, 1.0, %v4949_v4  ;;  %vm1727_vm14 = vmand %vm7113_vm8, %vm1726_vm6  ;;  %1858 = vmatpush.msrb.mxu3 %v1827_v29  ;;  %v5897_v34 = vld [vmem:[#allocation15 + $0x18] sm:$0xff] }
0x1246   :  { %v1729_v7 = vsel %vm1727_vm14, 1.0, %v4949_v4  ;;  %vm1745_vm15 = vmand %vm7115_vm7, %vm1744_vm12  ;;  %v1738_v12 = vsel %vm1736_vm4, 1.0, %v4949_v4  ;;  %vm7116_vm6 = vcmask 130048   ;;  %v6018_v44 = vld [vmem:[%s7043_s20 + $0x20] sm:$0xff]  ;;  %v6024_v45 = vld [vmem:[%s7043_s20 + $0x18] sm:$0xff] }
0x1247   :  { %v2006_v32 = vsel %vm1962_vm11, %v2002_v20, 0.0  ;;  %v2003_v38 = vsel %vm1962_vm11, %v2001_v37, 0.0  ;;  %v1704_v52 = vadd.f32 %v1702_v48, %v1695_v47  ;;  %v1747_v25 = vsel %vm1745_vm15, 1.0, %v4949_v4  ;;  %2297 = vmatpush.msra.mxu3 %v5662_v10  ;;  %v5901_v20 = vld [vmem:[#allocation15 + $0x10] sm:$0xff]  ;;  %v5907_v37 = vld [vmem:[#allocation15] sm:$0xff] }
0x1248   :  { %2007 = vadd.xlane.f32.xlu2 %v2006_v32  ;;  %v5904_v32 = vld [vmem:[#allocation15 + $0x8] sm:$0xff]  ;;  %v1883_v10 = vadd.s32 1, %v5143_v5  ;;  %v6042_v48 = vld [vmem:[%s7043_s20] sm:$0xff]  ;;  %vm7117_vm15 = vcmp.eq.s32.totalorder %v5208_v19, 8 }
0x1249   :  { %v1713_v57 = vadd.f32 %v1711_v53, %v1704_v52  ;;  %2298 = vmatpush.msra.mxu3 %v5664_v13  ;;  %v1881_v13 = vmul.u32 7, %v5143_v5  ;;  %v6036_v47 = vld [vmem:[%s7043_s20 + $0x8] sm:$0xff]  ;;  %v4520_v53 = vld [vmem:[%s7045_s22] ss:$0 sm:$0xff] }
0x124b   :  { %v1722_v31 = vadd.f32 %v1720_v59, %v1713_v57  ;;  %2299 = vmatpush.msra.mxu3 %v5667_v41  ;;  %v1884_v41 = vmul.u32 7, %v1883_v10  ;;  %vm1882_vm10 = vcmp.ge.s32.totalorder %v5145_v6, %v1881_v13 }
0x124d   :  { %v1731_v11 = vadd.f32 %v1729_v7, %v1722_v31  ;;  %2300 = vmatpush.msra.mxu3 %v5670_v15  ;;  %vm1885_vm0 = vcmp.lt.s32.totalorder %v5145_v6, %v1884_v41 }
0x124e   :  { %vm1886_vm1 = vmand %vm1882_vm10, %vm1885_vm0 }
0x124f   :  { %v1740_v18 = vadd.f32 %v1738_v12, %v1731_v11  ;;  %v5917_v42 = vsel %vm1886_vm1, 1.0, %v4949_v4  ;;  %vm7120_vm1 = vcmp.eq.s32.totalorder %v5208_v19, 9 }
0x1250   :  { %2004 = vadd.xlane.f32.xlu2 %v2003_v38 }
0x1251   :  { %v1749_v23 = vadd.f32 %v1747_v25, %v1740_v18 }
0x1253   :  { %1859 = vmatmul.f32.vlgmr.msrb.gmra.mxu3 %v1749_v23 }
0x1254   :  { %2467 = vmatpush.msrb.mxu3 %v5897_v34 }
0x1256   :  { %2468 = vmatpush.msrb.mxu3 %v5901_v20 }
0x1258   :  { %2469 = vmatpush.msrb.mxu3 %v5904_v32 }
0x125a   :  { %2470 = vmatpush.msrb.mxu3 %v5907_v37 }
0x12bb   :  { %v2008_v15 = vpop.xlane.xlu2 %2007 }
0x12bc   :  { %v2010_v38 = vmul.f32 %v2008_v15, %v5658_v28  ;;  %v5952_v28 = vld [vmem:[%s7043_s20 + $0x70] sm:$0xff] }
0x12be   :  { %2028 = vmatpush.msra.mxu2 %v2010_v38 }
0x12c3   :  { %v2005_v39 = vpop.xlane.xlu2 %2004 }
0x12c4   :  { %v2009_v26 = vmul.f32 %v2005_v39, %v5654_v30  ;;  %v5947_v30 = vld [vmem:[%s7043_s20 + $0x78] sm:$0xff] }
0x12c5   :  { %2067 = vmatpush.msra.mxu1 %v5947_v30 }
0x12c6   :  { %2029 = vmatpush.msra.mxu2 %v2009_v26 }
0x12c7   :  { %4422 = vmatmul.msk.f32.vlgmr.msra.gmra.mxu2 %vm7116_vm6, %v5917_v42  ;;  %2068 = vmatpush.msra.mxu1 %v5952_v28 }
0x12c8   :  { %2107 = vmatpush.msrb.mxu2 %v5897_v34 }
0x12ca   :  { %2108 = vmatpush.msrb.mxu2 %v5901_v20 }
0x12cc   :  { %2109 = vmatpush.msrb.mxu2 %v5904_v32 }
0x12ce   :  { %2110 = vmatpush.msrb.mxu2 %v5907_v37 }
0x12cf   :  { %4423 = vmatmul.msk.f32.vlgmr.msrb.gmra.mxu2 %vm361_vm2, %v5719_v51 }
0x12d0   :  { %2246 = vmatpush.msra.mxu2 %v5776_v60  ;;  %v5958_v60 = vld [vmem:[%s7043_s20 + $0x68] sm:$0xff] }
0x12d1   :  { %2069 = vmatpush.msra.mxu1 %v5958_v60 }
0x12d2   :  { %2247 = vmatpush.msra.mxu2 %v5781_v61  ;;  %v5964_v61 = vld [vmem:[%s7043_s20 + $0x60] sm:$0xff] }
0x12d3   :  { %2070 = vmatpush.msra.mxu1 %v5964_v61 }
0x12d4   :  { %2248 = vmatpush.msra.mxu2 %v5787_v63 }
0x12d6   :  { %2249 = vmatpush.msra.mxu2 %v5793_v0  ;;  %v5940_v5 = vpop.f32.mrf.mxu3  ;;  %v4519_v0 = vld [vmem:[%s7046_s23] ss:$0 sm:$0xff] }
0x12d7   :  { %2041 = vrot.lane.b32.xlu1 %v5940_v5, %s4951_s25 }
0x12d8   :  { %2250 = vmatpush.msra.mxu2 %v5799_v55 }
0x12da   :  { %2251 = vmatpush.msra.mxu2 %v5805_v3 }
0x12dc   :  { %2252 = vmatpush.msra.mxu2 %v5811_v56  ;;  %v5976_v56 = vld [vmem:[%s7043_s20 + $0x58] sm:$0xff] }
0x12dd   :  { %2071 = vmatpush.msra.mxu1 %v5976_v56 }
0x12de   :  { %2253 = vmatpush.msra.mxu2 %v5817_v8  ;;  %v5981_v8 = vld [vmem:[%s7043_s20 + $0x50] sm:$0xff] }
0x12df   :  { %2072 = vmatpush.msra.mxu1 %v5981_v8 }
0x12e0   :  { %2254 = vmatpush.msra.mxu2 %v5823_v14  ;;  %v5987_v14 = vld [vmem:[%s7043_s20 + $0x48] sm:$0xff] }
0x12e1   :  { %2073 = vmatpush.msra.mxu1 %v5987_v14 }
0x12e2   :  { %2255 = vmatpush.msra.mxu2 %v5829_v21  ;;  %v5993_v21 = vld [vmem:[%s7043_s20 + $0x40] sm:$0xff] }
0x12e3   :  { %2074 = vmatpush.msra.mxu1 %v5993_v21 }
0x12e4   :  { %2256 = vmatpush.msra.mxu2 %v5857_v50 }
0x12e5   :  { %2075 = vmatpush.msra.mxu1 %v5999_v40 }
0x12e6   :  { %2257 = vmatpush.msra.mxu2 %v5867_v54 }
0x12e7   :  { %2076 = vmatpush.msra.mxu1 %v6005_v36 }
0x12e8   :  { %2258 = vmatpush.msra.mxu2 %v5872_v33 }
0x12e9   :  { %2077 = vmatpush.msra.mxu1 %v6011_v43 }
0x12ea   :  { %2259 = vmatpush.msra.mxu2 %v1829_v62 }
0x12eb   :  { %2078 = vmatpush.msra.mxu1 %v6018_v44 }
0x12ec   :  { %2260 = vmatpush.msra.mxu2 %v1828_v17 }
0x12ed   :  { %2079 = vmatpush.msra.mxu1 %v6024_v45 }
0x12ee   :  { %2261 = vmatpush.msra.mxu2 %v1827_v29 }
0x12ef   :  { %2080 = vmatpush.msra.mxu1 %v6030_v46 }
0x12f1   :  { %2081 = vmatpush.msra.mxu1 %v6036_v47 }
0x12f3   :  { %2082 = vmatpush.msra.mxu1 %v6042_v48 }
0x1349   :  { %v2042_v49 = vpop.permute.xlu1 %2041 }
0x134a   :  { %v2031_v63 = vpop.f32.mrf.mxu2 }
0x134b   :  { %2035 = vrot.lane.b32.xlu0 %v2031_v63, %s4955_s13  ;;  %v6061_v63 = vld [vmem:[#allocation17 + $0x78] sm:$0xff] }
0x134c   :  { %2184 = vmatpush.msra.mxu0 %v6061_v63 }
0x1352   :  { %v2112_v55 = vpop.f32.mrf.mxu2 }
0x1353   :  { %v2113_v3 = vadd.f32 %v4519_v0, %v2112_v55  ;;  %v6063_v0 = vld [vmem:[#allocation17 + $0x70] sm:$0xff]  ;;  %v1761_v55 = vstv %s4411_s17 }
0x1354   :  { %vm1762_vm4 = vcmp.eq.s32.totalorder %v5145_v6, %v1761_v55  ;;  %2185 = vmatpush.msra.mxu0 %v6063_v0 }
0x1355   :  { %2136 = vrot.lane.b32.xlu2 %v2113_v3, %s4950_s7  ;;  %vm1764_vm6 = vmand %vm7120_vm1, %vm1762_vm4 }
0x13af   :  { %v2137_v13 = vpop.permute.xlu2 %2136 }
0x13bd   :  { %v2036_v50 = vpop.permute.xlu0 %2035 }
0x13be   :  { %2039 = vst.msk [vmem:[#allocation3] sm:$0x3] %vm2038_vm9, %v2036_v50  ;;  %v6069_v50 = vld [vmem:[#allocation17 + $0x68] sm:$0xff] }
0x13bf   :  { %2045 = vst.msk [vmem:[#allocation3] sm:$0x3] %vm2044_vm5, %v2042_v49  ;;  %v1779_v49 = vstv %s4413_s24  ;;  %2186 = vmatpush.msra.mxu0 %v6069_v50 }
0x13c0   :  { %vm6074_vm0 = vcmp.eq.s32.totalorder %v5145_v6, %v1779_v49 }
0x13c6   :  { %v2046_v52 = vld [vmem:[#allocation3] sm:$0x3] }
0x13c7   :  { %2083 = vmatmul.f32.vlgmr.msra.gmra.mxu1 %v2046_v52  ;;  %v6128_v52 = vld [vmem:[#allocation17 + $0x28] sm:$0xff] }
0x1444   :  { %v2084_v54 = vpop.f32.mrf.mxu1 }
0x1445   :  { %v2085_v33 = vadd.f32 %v4520_v53, %v2084_v54  ;;  %v1788_v53 = vstv %s4414_s26  ;;  %v1797_v54 = vstv %s4415_s3 }
0x1447   :  { %v2115_v57 = vadd.f32 %v2113_v3, %v2085_v33  ;;  %v1770_v3 = vstv %s4412_s12 }
0x1448   :  { %vm1771_vm7 = vcmp.eq.s32.totalorder %v5145_v6, %v1770_v3  ;;  %v6125_v3 = vld [vmem:[#allocation17 + $0x30] sm:$0xff] }
0x1449   :  { %v4424_v59 = vmul.f32 -1.442695, %v2115_v57  ;;  %v1808_v57 = vstv %s6057_s9 }
0x144a   :  { %vm1809_vm1 = vcmp.eq.s32.totalorder %v5145_v6, %v1808_v57 }
0x144b   :  { %4636 = vpow2.f32 %v4424_v59  ;;  %v6084_v59 = vld [vmem:[#allocation17 + $0x60] sm:$0xff] }
0x144c   :  { %2187 = vmatpush.msra.mxu0 %v6084_v59 }
0x1451   :  { %v4637_v62 = vpop.eup %4636 }
0x1452   :  { %v2119_v31 = vadd.f32 1.0, %v4637_v62  ;;  %v1766_v62 = vsel %vm1764_vm6, 1.0, %v4949_v4  ;;  %vm7124_vm6 = vcmp.eq.s32.totalorder %v5208_v19, 13 }
0x1454   :  { %4638 = vrcp.f32 %v2119_v31  ;;  %v2131_v17 = vand.u32 2147483648, %v2119_v31  ;;  %v2129_v25 = vand.u32 2147483647, %v2119_v31  ;;  %vm2125_vm8 = vweird.f32 %v2119_v31 }
0x1456   :  { %v2132_v23 = vor.u32 1.1754944e-38, %v2131_v17  ;;  %vm2130_vm12 = vcmp.eq.f32.partialorder %v2129_v25, 8.507059e+37  ;;  %v6107_v25 = vld [vmem:[#allocation17 + $0x50] sm:$0xff] }
0x145a   :  { %v4639_v7 = vpop.eup %4638 }
0x145b   :  { %v2121_v11 = vmul.f32 %v4639_v7, %v2119_v31  ;;  %vm2126_vm13 = vweird.f32 %v4639_v7 }
0x145c   :  { %vm2127_vm14 = vmor %vm2125_vm8, %vm2126_vm13  ;;  %vm1789_vm13 = vcmp.eq.s32.totalorder %v5145_v6, %v1788_v53  ;;  %vm7121_vm8 = vcmp.eq.s32.totalorder %v5208_v19, 10  ;;  %v6131_v53 = vld [vmem:[#allocation17 + $0x20] sm:$0xff] }
0x145d   :  { %v2122_v12 = vsub.f32 1.0, %v2121_v11  ;;  %v1819_v11 = vstv %s6059_s2  ;;  %s2623_s2 = scalar_select %p2622_p1, 1, 0 }
0x145f   :  { %v2123_v18 = vmul.f32 %v4639_v7, %v2122_v12  ;;  %v6097_v12 = vld [vmem:[#allocation17 + $0x58] sm:$0xff]  ;;  %s2624_s30 = scvt.s32.f32 %s2623_s2 }
0x1460   :  { %2188 = vmatpush.msra.mxu0 %v6097_v12  ;;  %s3333_s2 = scalar_select %p3332_p3, 1, 0 }
0x1461   :  { %v2124_v29 = vadd.f32 %v4639_v7, %v2123_v18 }
0x1462   :  { %2189 = vmatpush.msra.mxu0 %v6107_v25 }
0x1463   :  { %v2128_v10 = vsel %vm2127_vm14, %v4639_v7, %v2124_v29  ;;  %vm1773_vm14 = vmand %vm7121_vm8, %vm1771_vm7 }
0x1464   :  { %v6050_v41 = vsel %vm2130_vm12, %v2132_v23, %v2128_v10  ;;  %vm1798_vm12 = vcmp.eq.s32.totalorder %v5145_v6, %v1797_v54  ;;  %v1775_v7 = vsel %vm1773_vm14, 1.0, %v4949_v4  ;;  %vm1820_vm14 = vcmp.eq.s32.totalorder %v5145_v6, %v1819_v11  ;;  %v6113_v10 = vld [vmem:[#allocation17 + $0x48] sm:$0xff]  ;;  %v6144_v11 = vld [vmem:[#allocation17 + $0x10] sm:$0xff] }
0x1465   :  { %v2139_v15 = vmul.f32 %v2137_v13, %v6050_v41  ;;  %vm1800_vm8 = vmand %vm7124_vm6, %vm1798_vm12  ;;  %2190 = vmatpush.msra.mxu0 %v6113_v10  ;;  %v2146_v54 = vsub.f32 1.0, %v6050_v41 }
0x1466   :  { %v1802_v13 = vsel %vm1800_vm8, 1.0, %v4949_v4 }
0x1467   :  { %2141 = vrot.lane.b32.xlu0 %v2139_v15, %s4950_s7 }
0x146f   :  { %2152 = vrot.lane.b32.xlu0 %v5719_v51, %s4955_s13  ;;  %v1752_v51 = vstv %s4410_s4 }
0x1470   :  { %vm1753_vm3 = vcmp.eq.s32.totalorder %v5145_v6, %v1752_v51  ;;  %v6122_v51 = vld [vmem:[#allocation17 + $0x38] sm:$0xff] }
0x1471   :  { %vm1755_vm10 = vmand %vm7117_vm15, %vm1753_vm3  ;;  %vm7122_vm3 = vcmp.eq.s32.totalorder %v5208_v19, 11  ;;  %vm7123_vm15 = vcmp.eq.s32.totalorder %v5208_v19, 12 }
0x1472   :  { %vm1782_vm4 = vmand %vm7122_vm3, %vm6074_vm0  ;;  %vm1818_vm0 = vcmp.eq.s32.totalorder %v5208_v19, 15  ;;  %vm2161_vm3 = vcmask 254976  }
0x1473   :  { %v1784_v17 = vsel %vm1782_vm4, 1.0, %v4949_v4  ;;  %vm1791_vm7 = vmand %vm7123_vm15, %vm1789_vm13  ;;  %vm2206_vm4 = vcmask 1041408  }
0x1474   :  { %v1793_v29 = vsel %vm1791_vm7, 1.0, %v4949_v4  ;;  %vm1822_vm12 = vmand %vm1818_vm0, %vm1820_vm14  ;;  %vm7126_vm0 = vcmask 130048  }
0x14d9   :  { %v2142_v38 = vpop.permute.xlu0 %2141 }
0x14da   :  { %v2144_v39 = vadd.f32 %v2142_v38, %v2085_v33  ;;  %v1757_v33 = vsel %vm1755_vm10, 1.0, %v4949_v4  ;;  %vm1807_vm10 = vcmp.eq.s32.totalorder %v5208_v19, 14  ;;  %v6117_v38 = vld [vmem:[#allocation17 + $0x40] sm:$0xff] }
0x14db   :  { %v1768_v31 = vadd.f32 %v1766_v62, %v1757_v33  ;;  %vm1811_vm13 = vmand %vm1807_vm10, %vm1809_vm1  ;;  %2191 = vmatpush.msra.mxu0 %v6117_v38 }
0x14dc   :  { %4640 = vtanh.f32 %v2144_v39  ;;  %v1813_v39 = vsel %vm1811_vm13, 1.0, %v4949_v4  ;;  %vm2404_vm13 = vcmask 913154  }
0x14dd   :  { %v1777_v18 = vadd.f32 %v1775_v7, %v1768_v31  ;;  %2192 = vmatpush.msra.mxu0 %v6122_v51  ;;  %v6141_v7 = vld [vmem:[#allocation17 + $0x18] sm:$0xff] }
0x14df   :  { %v1786_v23 = vadd.f32 %v1784_v17, %v1777_v18  ;;  %2193 = vmatpush.msra.mxu0 %v6125_v3  ;;  %v6147_v17 = vld [vmem:[#allocation17 + $0x8] sm:$0xff]  ;;  %v6150_v18 = vld [vmem:[#allocation17] sm:$0xff] }
0x14e1   :  { %v1795_v15 = vadd.f32 %v1793_v29, %v1786_v23  ;;  %2194 = vmatpush.msra.mxu0 %v6128_v52 }
0x14e2   :  { %v4641_v26 = vpop.eup %4640 }
0x14e3   :  { %2148 = vrot.lane.b32.xlu1 %v4641_v26, %s4951_s25  ;;  %v1804_v19 = vadd.f32 %v1802_v13, %v1795_v15  ;;  %v1824_v26 = vsel %vm1822_vm12, 1.0, %v4949_v4  ;;  %2195 = vmatpush.msra.mxu0 %v6131_v53  ;;  %v2153_v4 = vpop.permute.xlu0 %2152 }
0x14e4   :  { %v2155_v57 = vmul.f32 %v2153_v4, %v6050_v41 }
0x14e5   :  { %v1815_v55 = vadd.f32 %v1813_v39, %v1804_v19  ;;  %2196 = vmatpush.msra.mxu0 %v6141_v7 }
0x14e7   :  { %v1826_v49 = vadd.f32 %v1824_v26, %v1815_v55  ;;  %2197 = vmatpush.msra.mxu0 %v6144_v11 }
0x14e9   :  { %1862 = vmatmul.f32.gmra.mxu3 %v1826_v49  ;;  %2198 = vmatpush.msra.mxu0 %v6147_v17 }
0x14eb   :  { %2199 = vmatpush.msra.mxu0 %v6150_v18 }
0x14ed   :  { %2427 = vmatpush.msrb.mxu0 %v5947_v30 }
0x14ef   :  { %2428 = vmatpush.msrb.mxu0 %v5952_v28 }
0x14f1   :  { %2429 = vmatpush.msrb.mxu0 %v5958_v60 }
0x14f3   :  { %2430 = vmatpush.msrb.mxu0 %v5964_v61 }
0x14f5   :  { %2431 = vmatpush.msrb.mxu0 %v5976_v56  ;;  %v4521_v56 = vld [vmem:[%s7125_s27] ss:$0 sm:$0xff] }
0x14f7   :  { %2432 = vmatpush.msrb.mxu0 %v5981_v8 }
0x14f9   :  { %2433 = vmatpush.msrb.mxu0 %v5987_v14 }
0x14fb   :  { %2434 = vmatpush.msrb.mxu0 %v5993_v21 }
0x14fd   :  { %2435 = vmatpush.msrb.mxu0 %v5999_v40 }
0x14ff   :  { %2436 = vmatpush.msrb.mxu0 %v6005_v36 }
0x1501   :  { %2437 = vmatpush.msrb.mxu0 %v6011_v43 }
0x1503   :  { %2438 = vmatpush.msrb.mxu0 %v6018_v44 }
0x1505   :  { %2439 = vmatpush.msrb.mxu0 %v6024_v45 }
0x1507   :  { %2440 = vmatpush.msrb.mxu0 %v6030_v46 }
0x1509   :  { %2441 = vmatpush.msrb.mxu0 %v6036_v47 }
0x150b   :  { %2442 = vmatpush.msrb.mxu0 %v6042_v48 }
0x1555   :  { %v2149_v33 = vpop.permute.xlu1 %2148 }
0x1556   :  { %v2151_v62 = vmul.f32 %v2149_v33, %v2146_v54 }
0x1558   :  { %v6137_v31 = vadd.f32 %v2155_v57, %v2151_v62 }
0x155a   :  { %2158 = vrot.lane.b32.xlu2 %v6137_v31, %s4951_s25 }
0x156c   :  { %v6176_v60 = vpop.f32.mrf.mxu3 }
0x15b4   :  { %v2159_v30 = vpop.permute.xlu2 %2158 }
0x15b5   :  { %2162 = vst.msk [vmem:[#allocation3] sm:$0x3] %vm2161_vm3, %v2159_v30  ;;  %4428 = vmatmul.msk.f32.vlgmr.msra.gmra.mxu3 %vm361_vm2, %v2159_v30 }
0x15bc   :  { %v2163_v28 = vld [vmem:[#allocation3] sm:$0x3] }
0x15bd   :  { %2200 = vmatmul.f32.vlgmr.msra.gmra.mxu0 %v2163_v28  ;;  %4430 = vmatmul.msk.f32.vlgmr.msrb.gmra.mxu3 %vm361_vm2, %v2159_v30 }
0x15be   :  { %2822 = vmatpush.msra.mxu0 %v5897_v34 }
0x15c0   :  { %2823 = vmatpush.msra.mxu0 %v5901_v20 }
0x15c2   :  { %2824 = vmatpush.msra.mxu0 %v5904_v32 }
0x15c4   :  { %2825 = vmatpush.msra.mxu0 %v5907_v37 }
0x1638   :  { %v2302_v61 = vpop.f32.mrf.mxu3 }
0x1639   :  { %v2305_v8 = vperm.slane %v2302_v61, 0  ;;  %v2308_v14 = vperm.slane %v2302_v61, 1 }
0x163a   :  { %v2201_v21 = vpop.f32.mrf.mxu0 }
0x163b   :  { %v2306_v40 = vmul.f32 %v5729_v35, %v2305_v8  ;;  %v2307_v34 = vmul.f32 %v5727_v22, %v2305_v8  ;;  %v2309_v20 = vmul.f32 %v5725_v58, %v2308_v14  ;;  %v2310_v32 = vmul.f32 %v5723_v16, %v2308_v14 }
0x163c   :  { %v2202_v37 = vadd.f32 %v4521_v56, %v2201_v21 }
0x163d   :  { %v2311_v36 = vadd.f32 %v2309_v20, %v2306_v40  ;;  %v2312_v43 = vadd.f32 %v2310_v32, %v2307_v34 }
0x163e   :  { %2205 = vst [vmem:[#allocation18 + $0x2] sm:$0x3] %v2202_v37  ;;  %v2207_v44 = vsel %vm2206_vm4, %v2202_v37, -inf }
0x163f   :  { %v2313_v45 = vadd.f32 %v2311_v36, %v5738_v1  ;;  %v2314_v46 = vadd.f32 %v2312_v43, %v5740_v2  ;;  %2208 = vmax.xlane.f32.xlu2 %v2207_v44 }
0x1641   :  { %4642 = vtanh.f32 %v2313_v45 }
0x1642   :  { %4644 = vtanh.f32 %v2314_v46 }
0x1647   :  { %v4643_v47 = vpop.eup %4642 }
0x1648   :  { %v4645_v48 = vpop.eup %4644  ;;  %v2317_v41 = vmul.f32 %v4643_v47, %v5747_v9 }
0x1649   :  { %v2318_v29 = vmul.f32 %v4645_v48, %v5747_v9 }
0x164a   :  { %v2319_v23 = vsel %vm361_vm2, %v2317_v41, 0.0 }
0x164b   :  { %v2322_v13 = vsel %vm361_vm2, %v2318_v29, 0.0  ;;  %2320 = vadd.xlane.f32.xlu1 %v2319_v23 }
0x164c   :  { %2323 = vadd.xlane.f32.xlu0 %v2322_v13 }
0x16b2   :  { %v2209_v15 = vpop.xlane.xlu2 %2208 }
0x16b3   :  { %vm2210_vm15 = vcmp.eq.f32.partialorder %v2202_v37, %v2209_v15 }
0x16b4   :  { %v2211_v39 = vsel %vm2210_vm15, %v5145_v6, 128 }
0x16b5   :  { %v2212_v19 = vsel %vm2206_vm4, %v2211_v39, 2147483647 }
0x16b6   :  { %v2214_v26 = vshra.s32 %v2212_v19, 16 }
0x16b8   :  { %v2216_v55 = vcvt.s32.f32 %v2214_v26 }
0x16ba   :  { %2217 = vmin.xlane.f32.xlu1 %v2216_v55 }
0x16be   :  { %v2321_v49 = vpop.xlane.xlu1 %2320 }
0x16bf   :  { %v2324_v4 = vpop.xlane.xlu0 %2323  ;;  %v2325_v54 = vadd.f32 %v2321_v49, %v5765_v27 }
0x16c0   :  { %v2326_v9 = vadd.f32 %v2324_v4, %v5758_v24 }
0x16c1   :  { %v2327_v33 = vsel %vm1962_vm11, %v2325_v54, -inf }
0x16c2   :  { %v2328_v57 = vsel %vm1962_vm11, %v2326_v9, -inf }
0x16c3   :  { %v2329_v62 = vmax.f32 %v2327_v33, %v2328_v57 }
0x16c5   :  { %v2330_v30 = vrot.slane %v2329_v62, 4 }
0x16c7   :  { %v2331_v28 = vmax.f32 %v2329_v62, %v2330_v30 }
0x16c9   :  { %v2332_v61 = vrot.slane %v2331_v28, 2 }
0x16cb   :  { %v2333_v56 = vmax.f32 %v2331_v28, %v2332_v61  ;;  %v4522_v61 = vld [vmem:[%s7046_s23] ss:$0 sm:$0xff] }
0x16cd   :  { %v2334_v8 = vrot.slane %v2333_v56, 1 }
0x16cf   :  { %v2335_v14 = vmax.f32 %v2333_v56, %v2334_v8  ;;  %v2472_v56 = vpop.f32.mrf.mxu3 }
0x16d0   :  { %v6205_v8 = vadd.f32 %v4522_v61, %v2472_v56  ;;  %v2637_v56 = vld [vmem:[#allocation14 + $0x18] sm:$0xff] }
0x16d1   :  { %v2336_v21 = vsub.f32 %v2325_v54, %v2335_v14  ;;  %v2337_v40 = vsub.f32 %v2326_v9, %v2335_v14  ;;  %v2213_v14 = vand.u32 65535, %v2212_v19  ;;  %2652 = vmatpush.msra.mxu3 %v2637_v56 }
0x16d3   :  { %v2338_v34 = vmul.f32 1.442695, %v2336_v21  ;;  %v2340_v20 = vmul.f32 1.442695, %v2337_v40  ;;  %v2215_v40 = vcvt.s32.f32 %v2213_v14  ;;  %v2635_v14 = vld [vmem:[#allocation14 + $0x8] sm:$0xff] }
0x16d5   :  { %4646 = vpow2.f32 %v2338_v34 }
0x16d6   :  { %4648 = vpow2.f32 %v2340_v20 }
0x16db   :  { %v4647_v32 = vpop.eup %4646 }
0x16dc   :  { %v4649_v37 = vpop.eup %4648  ;;  %v2342_v36 = vsel %vm1962_vm11, %v4647_v32, 0.0 }
0x16dd   :  { %v2343_v43 = vsel %vm1962_vm11, %v4649_v37, 0.0 }
0x16de   :  { %v2344_v44 = vadd.f32 %v2343_v43, %v2342_v36  ;;  %v6212_v43 = vld [vmem:[#allocation2] sm:$0xff] }
0x16e0   :  { %v2345_v45 = vrot.slane %v2344_v44, 4 }
0x16e2   :  { %v2346_v46 = vadd.f32 %v2345_v45, %v2344_v44 }
0x16e4   :  { %v2347_v47 = vrot.slane %v2346_v46, 2 }
0x16e6   :  { %v2348_v48 = vadd.f32 %v2347_v47, %v2346_v46 }
0x16e8   :  { %v2349_v41 = vrot.slane %v2348_v48, 1 }
0x16ea   :  { %v2350_v29 = vadd.f32 %v2349_v41, %v2348_v48 }
0x16ec   :  { %4650 = vrcp.f32 %v2350_v29  ;;  %v2362_v39 = vand.u32 2147483648, %v2350_v29  ;;  %v2360_v49 = vand.u32 2147483647, %v2350_v29  ;;  %vm2356_vm10 = vweird.f32 %v2350_v29 }
0x16ee   :  { %v2363_v54 = vor.u32 1.1754944e-38, %v2362_v39  ;;  %vm2361_vm6 = vcmp.eq.f32.partialorder %v2360_v49, 8.507059e+37 }
0x16f2   :  { %v4651_v23 = vpop.eup %4650 }
0x16f3   :  { %v2352_v13 = vmul.f32 %v4651_v23, %v2350_v29  ;;  %vm2357_vm7 = vweird.f32 %v4651_v23 }
0x16f4   :  { %vm2358_vm1 = vmor %vm2356_vm10, %vm2357_vm7 }
0x16f5   :  { %v2353_v15 = vsub.f32 1.0, %v2352_v13 }
0x16f7   :  { %v2354_v26 = vmul.f32 %v4651_v23, %v2353_v15 }
0x16f9   :  { %v2355_v4 = vadd.f32 %v4651_v23, %v2354_v26 }
0x16fb   :  { %v2359_v9 = vsel %vm2358_vm1, %v4651_v23, %v2355_v4 }
0x16fc   :  { %v2364_v33 = vsel %vm2361_vm6, %v2363_v54, %v2359_v9 }
0x16fd   :  { %v2366_v57 = vmul.f32 %v4649_v37, %v2364_v33  ;;  %v2365_v62 = vmul.f32 %v4647_v32, %v2364_v33  ;;  %v6209_v37 = vld [vmem:[#allocation2 + $0x8] sm:$0xff] }
0x16ff   :  { %v2370_v30 = vsel %vm1962_vm11, %v2366_v57, 0.0  ;;  %v2367_v28 = vsel %vm1962_vm11, %v2365_v62, 0.0 }
0x1700   :  { %2371 = vadd.xlane.f32.xlu2 %v2370_v30  ;;  %2368 = vadd.xlane.f32.xlu1 %v2367_v28 }
0x1719   :  { %2496 = vrot.lane.b32.xlu1 %v6205_v8, %s4950_s7 }
0x172d   :  { %v2218_v21 = vpop.xlane.xlu1 %2217 }
0x172e   :  { %vm2219_vm8 = vcmp.eq.f32.partialorder %v2216_v55, %v2218_v21  ;;  %v4523_v55 = vld [vmem:[%s7045_s22] ss:$0 sm:$0xff] }
0x172f   :  { %v2220_v34 = vsel %vm2219_vm8, %v2215_v40, inf }
0x1730   :  { %2221 = vmin.xlane.f32.xlu0 %v2220_v34 }
0x1773   :  { %v2369_v20 = vpop.xlane.xlu1 %2368  ;;  %v2372_v32 = vpop.xlane.xlu2 %2371 }
0x1774   :  { %v2374_v36 = vmul.f32 %v6209_v37, %v2372_v32  ;;  %v2373_v44 = vmul.f32 %v6212_v43, %v2369_v20 }
0x1776   :  { %2389 = vmatpush.msrb.mxu1 %v2374_v36 }
0x1778   :  { %2390 = vmatpush.msrb.mxu1 %v2373_v44 }
0x1779   :  { %4429 = vmatmul.msk.f32.vlgmr.msrb.gmra.mxu1 %vm7126_vm0, %v5917_v42 }
0x177a   :  { %2540 = vmatpush.msra.mxu1 %v6061_v63  ;;  %v2224_v63 = vcvt.f32.s32 %v2218_v21  ;;  %v2634_v21 = vld [vmem:[#allocation14] sm:$0xff] }
0x177c   :  { %2541 = vmatpush.msra.mxu1 %v6063_v0 }
0x177e   :  { %2542 = vmatpush.msra.mxu1 %v6069_v50  ;;  %v2225_v50 = vshll.u32 %v2224_v63, 16 }
0x1780   :  { %2543 = vmatpush.msra.mxu1 %v6084_v59 }
0x1782   :  { %2544 = vmatpush.msra.mxu1 %v6097_v12 }
0x1784   :  { %2545 = vmatpush.msra.mxu1 %v6107_v25  ;;  %v4956_v25 = vmov 1.0  }
0x1786   :  { %2546 = vmatpush.msra.mxu1 %v6113_v10 }
0x1788   :  { %2547 = vmatpush.msra.mxu1 %v6117_v38  ;;  %v2273_v38 = vstv %s2272_s16  ;;  %s2627_s16 = ssub.f32 1.0, %s2624_s30 }
0x178a   :  { %2548 = vmatpush.msra.mxu1 %v6122_v51 }
0x178b   :  { %v2497_v33 = vpop.permute.xlu1 %2496 }
0x178c   :  { %2549 = vmatpush.msra.mxu1 %v6125_v3  ;;  %v2270_v3 = vstv %s2269_s6 }
0x178e   :  { %2550 = vmatpush.msra.mxu1 %v6128_v52 }
0x1790   :  { %2551 = vmatpush.msra.mxu1 %v6131_v53  ;;  %v2271_v53 = vmul.f32 %v2270_v3, %v5940_v5 }
0x1792   :  { %2552 = vmatpush.msra.mxu1 %v6141_v7 }
0x1794   :  { %2553 = vmatpush.msra.mxu1 %v6144_v11 }
0x1796   :  { %2554 = vmatpush.msra.mxu1 %v6147_v17 }
0x1798   :  { %2555 = vmatpush.msra.mxu1 %v6150_v18 }
0x17a3   :  { %v2222_v0 = vpop.xlane.xlu0 %2221 }
0x17a4   :  { %v2223_v59 = vcvt.f32.s32 %v2222_v0 }
0x17a6   :  { %v2226_v12 = vadd.s32 %v2225_v50, %v2223_v59 }
0x17a8   :  { %vm2227_vm14 = vcmp.eq.s32.totalorder %v5145_v6, %v2226_v12 }
0x17a9   :  { %4426 = vmatmul.msk.f32.vlgmr.msra.gmra.mxu2 %vm2227_vm14, %v4956_v25 }
0x17f6   :  { %v2392_v10 = vpop.f32.mrf.mxu1 }
0x17f7   :  { %2396 = vrot.lane.b32.xlu0 %v2392_v10, %s4955_s13 }
0x182c   :  { %v2263_v51 = vpop.f32.mrf.mxu2 }
0x182d   :  { %v2274_v52 = vmul.f32 %v2273_v38, %v2263_v51 }
0x182f   :  { %v2276_v7 = vrot.slane %v2274_v52, 6 }
0x1831   :  { %v2278_v11 = vadd.f32 %v2276_v7, %v2271_v53 }
0x1833   :  { %2401 = vrot.lane.b32.xlu2 %v2278_v11, %s4951_s25 }
0x1869   :  { %v2397_v17 = vpop.permute.xlu0 %2396 }
0x186a   :  { %2399 = vst.msk [vmem:[#allocation3] sm:$0x3] %vm2038_vm9, %v2397_v17 }
0x188d   :  { %v2402_v18 = vpop.permute.xlu2 %2401 }
0x188e   :  { %2405 = vst.msk [vmem:[#allocation3 - $0x2] sm:$0xc] %vm2404_vm13, %v2402_v18 }
0x1895   :  { %v2406_v19 = vld [vmem:[#allocation3] sm:$0x3] }
0x1896   :  { %2443 = vmatmul.f32.vlgmr.msrb.gmra.mxu0 %v2406_v19 }
0x1897   :  { %3007 = vmatpush.msrb.mxu0 %v2637_v56 }
0x1913   :  { %v2444_v45 = vpop.f32.mrf.mxu0 }
0x1914   :  { %v2445_v46 = vadd.f32 %v4523_v55, %v2444_v45  ;;  %v6267_v45 = vld [vmem:[%s7041_s18] ss:$0 sm:$0xff] }
0x1916   :  { %v2475_v47 = vadd.f32 %v6205_v8, %v2445_v46  ;;  %v2636_v8 = vld [vmem:[#allocation14 + $0x10] sm:$0xff] }
0x1917   :  { %2653 = vmatpush.msra.mxu3 %v2636_v8  ;;  %3008 = vmatpush.msrb.mxu0 %v2636_v8 }
0x1918   :  { %v4431_v48 = vmul.f32 -1.442695, %v2475_v47 }
0x1919   :  { %2654 = vmatpush.msra.mxu3 %v2635_v14  ;;  %3009 = vmatpush.msrb.mxu0 %v2635_v14 }
0x191a   :  { %4652 = vpow2.f32 %v4431_v48 }
0x191b   :  { %2655 = vmatpush.msra.mxu3 %v2634_v21  ;;  %3010 = vmatpush.msrb.mxu0 %v2634_v21 }
0x1920   :  { %v4653_v41 = vpop.eup %4652 }
0x1921   :  { %v2479_v29 = vadd.f32 1.0, %v4653_v41 }
0x1923   :  { %4654 = vrcp.f32 %v2479_v29  ;;  %v2491_v39 = vand.u32 2147483648, %v2479_v29  ;;  %v2489_v49 = vand.u32 2147483647, %v2479_v29  ;;  %vm2485_vm15 = vweird.f32 %v2479_v29 }
0x1925   :  { %v2492_v54 = vor.u32 1.1754944e-38, %v2491_v39  ;;  %vm2490_vm10 = vcmp.eq.f32.partialorder %v2489_v49, 8.507059e+37 }
0x1929   :  { %v4655_v23 = vpop.eup %4654 }
0x192a   :  { %v2481_v13 = vmul.f32 %v4655_v23, %v2479_v29  ;;  %vm2486_vm12 = vweird.f32 %v4655_v23 }
0x192b   :  { %vm2487_vm7 = vmor %vm2485_vm15, %vm2486_vm12  ;;  %vm7127_vm15 = vcmask 130048  }
0x192c   :  { %v2482_v15 = vsub.f32 1.0, %v2481_v13 }
0x192e   :  { %v2483_v26 = vmul.f32 %v4655_v23, %v2482_v15 }
0x1930   :  { %v2484_v4 = vadd.f32 %v4655_v23, %v2483_v26 }
0x1932   :  { %v2488_v9 = vsel %vm2487_vm7, %v4655_v23, %v2484_v4 }
0x1933   :  { %v2493_v57 = vsel %vm2490_vm10, %v2492_v54, %v2488_v9  ;;  %vm2759_vm10 = vcmask 915204  }
0x1934   :  { %v2499_v62 = vmul.f32 %v2497_v33, %v2493_v57  ;;  %v2506_v40 = vsub.f32 1.0, %v2493_v57  ;;  %v2512_v20 = vmul.f32 %v2493_v57, %v6137_v31  ;;  %v4525_v31 = vld [vmem:[%s7125_s27] ss:$0 sm:$0xff] }
0x1936   :  { %2501 = vrot.lane.b32.xlu0 %v2499_v62, %s4950_s7 }
0x19a8   :  { %v2502_v30 = vpop.permute.xlu0 %2501 }
0x19a9   :  { %v2504_v28 = vadd.f32 %v2502_v30, %v2445_v46 }
0x19ab   :  { %4656 = vtanh.f32 %v2504_v28 }
0x19b1   :  { %v4657_v61 = vpop.eup %4656 }
0x19b2   :  { %2508 = vrot.lane.b32.xlu2 %v4657_v61, %s4951_s25 }
0x1a0c   :  { %v2509_v34 = vpop.permute.xlu2 %2508 }
0x1a0d   :  { %v2511_v32 = vmul.f32 %v2509_v34, %v2506_v40 }
0x1a0f   :  { %v6247_v36 = vadd.f32 %v2512_v20, %v2511_v32 }
0x1a11   :  { %2515 = vrot.lane.b32.xlu0 %v6247_v36, %s4951_s25 }
0x1a83   :  { %v2516_v44 = vpop.permute.xlu0 %2515 }
0x1a84   :  { %2518 = vst.msk [vmem:[#allocation3] sm:$0x3] %vm2161_vm3, %v2516_v44  ;;  %4435 = vmatmul.msk.f32.vlgmr.msra.gmra.mxu3 %vm361_vm2, %v2516_v44  ;;  %4437 = vmatmul.msk.f32.vlgmr.msra.gmra.mxu0 %vm361_vm2, %v2516_v44 }
0x1a8b   :  { %v2519_v63 = vld [vmem:[#allocation3] sm:$0x3] }
0x1a8c   :  { %2556 = vmatmul.f32.vlgmr.msra.gmra.mxu1 %v2519_v63 }
0x1b07   :  { %v2657_v0 = vpop.f32.mrf.mxu3 }
0x1b08   :  { %v2660_v50 = vperm.slane %v2657_v0, 0  ;;  %v2663_v59 = vperm.slane %v2657_v0, 1 }
0x1b09   :  { %v2557_v12 = vpop.f32.mrf.mxu1 }
0x1b0a   :  { %v2661_v10 = vmul.f32 %v5729_v35, %v2660_v50  ;;  %v2662_v38 = vmul.f32 %v5727_v22, %v2660_v50  ;;  %v2664_v51 = vmul.f32 %v5725_v58, %v2663_v59  ;;  %v2665_v3 = vmul.f32 %v5723_v16, %v2663_v59 }
0x1b0b   :  { %v2558_v52 = vadd.f32 %v4525_v31, %v2557_v12 }
0x1b0c   :  { %v2666_v53 = vadd.f32 %v2664_v51, %v2661_v10  ;;  %v2667_v7 = vadd.f32 %v2665_v3, %v2662_v38 }
0x1b0d   :  { %2561 = vst [vmem:[#allocation18 + $0x4] sm:$0x3] %v2558_v52  ;;  %v2562_v11 = vsel %vm2206_vm4, %v2558_v52, -inf }
0x1b0e   :  { %v2668_v17 = vadd.f32 %v2666_v53, %v5738_v1  ;;  %v2669_v18 = vadd.f32 %v2667_v7, %v5740_v2  ;;  %2563 = vmax.xlane.f32.xlu0 %v2562_v11 }
0x1b10   :  { %4658 = vtanh.f32 %v2668_v17 }
0x1b11   :  { %4660 = vtanh.f32 %v2669_v18 }
0x1b16   :  { %v4659_v19 = vpop.eup %4658 }
0x1b17   :  { %v4661_v55 = vpop.eup %4660  ;;  %v2672_v46 = vmul.f32 %v6267_v45, %v4659_v19 }
0x1b18   :  { %v2673_v47 = vmul.f32 %v6267_v45, %v4661_v55 }
0x1b19   :  { %v2674_v48 = vsel %vm361_vm2, %v2672_v46, 0.0 }
0x1b1a   :  { %v2677_v41 = vsel %vm361_vm2, %v2673_v47, 0.0  ;;  %2675 = vadd.xlane.f32.xlu1 %v2674_v48 }
0x1b1b   :  { %2678 = vadd.xlane.f32.xlu2 %v2677_v41 }
0x1b81   :  { %v2564_v29 = vpop.xlane.xlu0 %2563 }
0x1b82   :  { %vm2565_vm1 = vcmp.eq.f32.partialorder %v2558_v52, %v2564_v29  ;;  %v4524_v29 = vld [vmem:[%s7046_s23] ss:$0 sm:$0xff] }
0x1b83   :  { %v2566_v23 = vsel %vm2565_vm1, %v5145_v6, 128 }
0x1b84   :  { %v2567_v13 = vsel %vm2206_vm4, %v2566_v23, 2147483647  ;;  %v2827_v23 = vpop.f32.mrf.mxu0 }
0x1b85   :  { %v2569_v15 = vshra.s32 %v2567_v13, 16 }
0x1b87   :  { %v2571_v39 = vcvt.s32.f32 %v2569_v15  ;;  %v6286_v15 = vadd.f32 %v4524_v29, %v2827_v23 }
0x1b89   :  { %2572 = vmin.xlane.f32.xlu1 %v2571_v39 }
0x1b8d   :  { %v2676_v26 = vpop.xlane.xlu1 %2675 }
0x1b8e   :  { %v2679_v49 = vpop.xlane.xlu2 %2678  ;;  %v2680_v4 = vadd.f32 %v2676_v26, %v5765_v27  ;;  %v2568_v26 = vand.u32 65535, %v2567_v13  ;;  %v2597_v13 = vld [vmem:[%s7042_s19 + $0x60] sm:$0xff] }
0x1b8f   :  { %v2681_v54 = vadd.f32 %v2679_v49, %v5758_v24 }
0x1b90   :  { %v2682_v9 = vsel %vm1962_vm11, %v2680_v4, -inf }
0x1b91   :  { %v2683_v33 = vsel %vm1962_vm11, %v2681_v54, -inf }
0x1b92   :  { %v2684_v57 = vmax.f32 %v2682_v9, %v2683_v33  ;;  %v2600_v9 = vld [vmem:[%s7042_s19 + $0x78] sm:$0xff]  ;;  %v2599_v33 = vld [vmem:[%s7042_s19 + $0x70] sm:$0xff] }
0x1b93   :  { %2601 = vmatpush.msrb.mxu2 %v2600_v9 }
0x1b94   :  { %v2685_v62 = vrot.slane %v2684_v57, 4 }
0x1b95   :  { %2602 = vmatpush.msrb.mxu2 %v2599_v33 }
0x1b96   :  { %v2686_v30 = vmax.f32 %v2684_v57, %v2685_v62  ;;  %v2598_v57 = vld [vmem:[%s7042_s19 + $0x68] sm:$0xff]  ;;  %v2595_v62 = vld [vmem:[%s7042_s19 + $0x50] sm:$0xff] }
0x1b97   :  { %2603 = vmatpush.msrb.mxu2 %v2598_v57 }
0x1b98   :  { %v2687_v28 = vrot.slane %v2686_v30, 2 }
0x1b99   :  { %2604 = vmatpush.msrb.mxu2 %v2597_v13 }
0x1b9a   :  { %v2688_v61 = vmax.f32 %v2686_v30, %v2687_v28 }
0x1b9c   :  { %v2689_v56 = vrot.slane %v2688_v61, 1 }
0x1b9e   :  { %v2690_v8 = vmax.f32 %v2688_v61, %v2689_v56  ;;  %v2594_v61 = vld [vmem:[%s7042_s19 + $0x48] sm:$0xff] }
0x1ba0   :  { %v2691_v14 = vsub.f32 %v2680_v4, %v2690_v8  ;;  %v2692_v21 = vsub.f32 %v2681_v54, %v2690_v8  ;;  %v2570_v4 = vcvt.s32.f32 %v2568_v26  ;;  %v2593_v8 = vld [vmem:[%s7042_s19 + $0x40] sm:$0xff] }
0x1ba1   :  { %v6416_v26 = vld [vmem:[%s7043_s20 + $0x20] sm:$0xff] }
0x1ba2   :  { %v2693_v40 = vmul.f32 1.442695, %v2691_v14  ;;  %v2695_v34 = vmul.f32 1.442695, %v2692_v21  ;;  %v2592_v21 = vld [vmem:[%s7042_s19 + $0x38] sm:$0xff] }
0x1ba4   :  { %4662 = vpow2.f32 %v2693_v40  ;;  %v2591_v40 = vld [vmem:[%s7042_s19 + $0x30] sm:$0xff] }
0x1ba5   :  { %4664 = vpow2.f32 %v2695_v34  ;;  %v2588_v34 = vld [vmem:[%s7042_s19 + $0x18] sm:$0xff] }
0x1baa   :  { %v4663_v20 = vpop.eup %4662 }
0x1bab   :  { %v4665_v32 = vpop.eup %4664  ;;  %v2697_v44 = vsel %vm1962_vm11, %v4663_v20, 0.0 }
0x1bac   :  { %v2698_v63 = vsel %vm1962_vm11, %v4665_v32, 0.0 }
0x1bad   :  { %v2699_v0 = vadd.f32 %v2698_v63, %v2697_v44  ;;  %v2585_v44 = vld [vmem:[%s7042_s19] sm:$0xff] }
0x1baf   :  { %v2700_v31 = vrot.slane %v2699_v0, 4 }
0x1bb1   :  { %v2701_v50 = vadd.f32 %v2700_v31, %v2699_v0 }
0x1bb3   :  { %v2702_v59 = vrot.slane %v2701_v50, 2 }
0x1bb5   :  { %v2703_v12 = vadd.f32 %v2702_v59, %v2701_v50 }
0x1bb7   :  { %v2704_v10 = vrot.slane %v2703_v12, 1 }
0x1bb9   :  { %v2705_v38 = vadd.f32 %v2704_v10, %v2703_v12  ;;  %v6347_v10 = vld [vmem:[%s7043_s20 + $0x78] sm:$0xff] }
0x1bbb   :  { %4666 = vrcp.f32 %v2705_v38  ;;  %v2717_v53 = vand.u32 2147483648, %v2705_v38  ;;  %v2715_v11 = vand.u32 2147483647, %v2705_v38  ;;  %vm2711_vm8 = vweird.f32 %v2705_v38 }
0x1bbd   :  { %v2718_v18 = vor.u32 1.1754944e-38, %v2717_v53  ;;  %vm2716_vm14 = vcmp.eq.f32.partialorder %v2715_v11, 8.507059e+37  ;;  %v6377_v53 = vld [vmem:[%s7043_s20 + $0x50] sm:$0xff]  ;;  %v6389_v11 = vld [vmem:[%s7043_s20 + $0x40] sm:$0xff] }
0x1bc1   :  { %v4667_v51 = vpop.eup %4666 }
0x1bc2   :  { %v2707_v3 = vmul.f32 %v4667_v51, %v2705_v38  ;;  %vm2712_vm6 = vweird.f32 %v4667_v51  ;;  %v6352_v38 = vld [vmem:[%s7043_s20 + $0x70] sm:$0xff] }
0x1bc3   :  { %vm2713_vm0 = vmor %vm2711_vm8, %vm2712_vm6 }
0x1bc4   :  { %v2708_v52 = vsub.f32 1.0, %v2707_v3  ;;  %v6365_v3 = vld [vmem:[%s7043_s20 + $0x60] sm:$0xff] }
0x1bc6   :  { %v2709_v7 = vmul.f32 %v4667_v51, %v2708_v52  ;;  %v6371_v52 = vld [vmem:[%s7043_s20 + $0x58] sm:$0xff] }
0x1bc8   :  { %v2710_v17 = vadd.f32 %v4667_v51, %v2709_v7  ;;  %v6383_v7 = vld [vmem:[%s7043_s20 + $0x48] sm:$0xff] }
0x1bca   :  { %v2714_v19 = vsel %vm2713_vm0, %v4667_v51, %v2710_v17  ;;  %v6359_v51 = vld [vmem:[%s7043_s20 + $0x68] sm:$0xff]  ;;  %v6395_v17 = vld [vmem:[%s7043_s20 + $0x38] sm:$0xff] }
0x1bcb   :  { %v2719_v55 = vsel %vm2716_vm14, %v2718_v18, %v2714_v19  ;;  %v6401_v18 = vld [vmem:[%s7043_s20 + $0x30] sm:$0xff]  ;;  %v6407_v19 = vld [vmem:[%s7043_s20 + $0x28] sm:$0xff] }
0x1bcc   :  { %v2721_v46 = vmul.f32 %v4665_v32, %v2719_v55  ;;  %v2720_v47 = vmul.f32 %v4663_v20, %v2719_v55  ;;  %v2587_v20 = vld [vmem:[%s7042_s19 + $0x10] sm:$0xff]  ;;  %v2586_v32 = vld [vmem:[%s7042_s19 + $0x8] sm:$0xff]  ;;  %v2628_v55 = vstv %s2627_s16 }
0x1bce   :  { %v2725_v48 = vsel %vm1962_vm11, %v2721_v46, 0.0  ;;  %v2722_v41 = vsel %vm1962_vm11, %v2720_v47, 0.0  ;;  %v2625_v47 = vstv %s2624_s30  ;;  %s2979_s30 = scvt.s32.f32 %s2978_s15  ;;  %s3688_s15 = ssub.f32 1.0, %s3685_s1 }
0x1bcf   :  { %2726 = vadd.xlane.f32.xlu0 %v2725_v48  ;;  %2723 = vadd.xlane.f32.xlu1 %v2722_v41  ;;  %v2626_v41 = vmul.f32 %v2625_v47, %v5940_v5  ;;  %v6451_v47 = vld [vmem:[#allocation15 + $0x18] sm:$0xff] }
0x1bd0   :  { %s2982_s14 = ssub.f32 1.0, %s2979_s30 }
0x1be8   :  { %2851 = vrot.lane.b32.xlu1 %v6286_v15, %s4950_s7 }
0x1bfc   :  { %v2573_v49 = vpop.xlane.xlu1 %2572 }
0x1bfd   :  { %vm2574_vm12 = vcmp.eq.f32.partialorder %v2571_v39, %v2573_v49  ;;  %v2596_v39 = vld [vmem:[%s7042_s19 + $0x58] sm:$0xff]  ;;  %v2579_v63 = vcvt.f32.s32 %v2573_v49 }
0x1bfe   :  { %v2575_v54 = vsel %vm2574_vm12, %v2570_v4, inf  ;;  %2605 = vmatpush.msrb.mxu2 %v2596_v39  ;;  %v6423_v4 = vld [vmem:[%s7043_s20 + $0x18] sm:$0xff] }
0x1bff   :  { %2576 = vmin.xlane.f32.xlu2 %v2575_v54  ;;  %v2580_v31 = vshll.u32 %v2579_v63, 16  ;;  %v6429_v54 = vld [vmem:[%s7043_s20 + $0x10] sm:$0xff] }
0x1c00   :  { %2606 = vmatpush.msrb.mxu2 %v2595_v62 }
0x1c02   :  { %2607 = vmatpush.msrb.mxu2 %v2594_v61 }
0x1c04   :  { %2608 = vmatpush.msrb.mxu2 %v2593_v8 }
0x1c06   :  { %2609 = vmatpush.msrb.mxu2 %v2592_v21 }
0x1c08   :  { %2610 = vmatpush.msrb.mxu2 %v2591_v40 }
0x1c42   :  { %v2724_v30 = vpop.xlane.xlu1 %2723  ;;  %v2727_v28 = vpop.xlane.xlu0 %2726 }
0x1c43   :  { %v2729_v56 = vmul.f32 %v6209_v37, %v2727_v28  ;;  %v2728_v14 = vmul.f32 %v6212_v43, %v2724_v30  ;;  %v2590_v37 = vld [vmem:[%s7042_s19 + $0x28] sm:$0xff]  ;;  %v2589_v43 = vld [vmem:[%s7042_s19 + $0x20] sm:$0xff] }
0x1c44   :  { %2611 = vmatpush.msrb.mxu2 %v2590_v37 }
0x1c45   :  { %2744 = vmatpush.msrb.mxu3 %v2729_v56 }
0x1c46   :  { %2612 = vmatpush.msrb.mxu2 %v2589_v43 }
0x1c47   :  { %2745 = vmatpush.msrb.mxu3 %v2728_v14 }
0x1c48   :  { %4436 = vmatmul.msk.f32.vlgmr.msrb.gmra.mxu3 %vm7127_vm15, %v5917_v42  ;;  %2613 = vmatpush.msrb.mxu2 %v2588_v34 }
0x1c49   :  { %2782 = vmatpush.msra.mxu3 %v6347_v10 }
0x1c4a   :  { %2614 = vmatpush.msrb.mxu2 %v2587_v20 }
0x1c4b   :  { %2783 = vmatpush.msra.mxu3 %v6352_v38 }
0x1c4c   :  { %2615 = vmatpush.msrb.mxu2 %v2586_v32 }
0x1c4d   :  { %2784 = vmatpush.msra.mxu3 %v6359_v51 }
0x1c4e   :  { %2616 = vmatpush.msrb.mxu2 %v2585_v44 }
0x1c4f   :  { %2785 = vmatpush.msra.mxu3 %v6365_v3 }
0x1c50   :  { %2956 = vmatpush.msra.mxu2 %v2600_v9  ;;  %v6435_v9 = vld [vmem:[%s7043_s20 + $0x8] sm:$0xff] }
0x1c51   :  { %2786 = vmatpush.msra.mxu3 %v6371_v52 }
0x1c52   :  { %2957 = vmatpush.msra.mxu2 %v2599_v33  ;;  %v6441_v33 = vld [vmem:[%s7043_s20] sm:$0xff] }
0x1c53   :  { %2787 = vmatpush.msra.mxu3 %v6377_v53 }
0x1c54   :  { %2958 = vmatpush.msra.mxu2 %v2598_v57 }
0x1c55   :  { %2788 = vmatpush.msra.mxu3 %v6383_v7 }
0x1c56   :  { %2959 = vmatpush.msra.mxu2 %v2597_v13 }
0x1c57   :  { %2789 = vmatpush.msra.mxu3 %v6389_v11 }
0x1c58   :  { %2960 = vmatpush.msra.mxu2 %v2596_v39  ;;  %v4526_v39 = vld [vmem:[%s7045_s22] ss:$0 sm:$0xff] }
0x1c59   :  { %2790 = vmatpush.msra.mxu3 %v6395_v17 }
0x1c5a   :  { %2961 = vmatpush.msra.mxu2 %v2595_v62  ;;  %v2852_v63 = vpop.permute.xlu1 %2851 }
0x1c5b   :  { %2791 = vmatpush.msra.mxu3 %v6401_v18 }
0x1c5c   :  { %2962 = vmatpush.msra.mxu2 %v2594_v61 }
0x1c5d   :  { %2792 = vmatpush.msra.mxu3 %v6407_v19 }
0x1c5e   :  { %2963 = vmatpush.msra.mxu2 %v2593_v8 }
0x1c5f   :  { %2793 = vmatpush.msra.mxu3 %v6416_v26 }
0x1c60   :  { %2964 = vmatpush.msra.mxu2 %v2592_v21 }
0x1c61   :  { %2794 = vmatpush.msra.mxu3 %v6423_v4 }
0x1c62   :  { %2965 = vmatpush.msra.mxu2 %v2591_v40 }
0x1c63   :  { %2795 = vmatpush.msra.mxu3 %v6429_v54 }
0x1c64   :  { %2966 = vmatpush.msra.mxu2 %v2590_v37 }
0x1c65   :  { %2796 = vmatpush.msra.mxu3 %v6435_v9 }
0x1c66   :  { %2967 = vmatpush.msra.mxu2 %v2589_v43 }
0x1c67   :  { %2797 = vmatpush.msra.mxu3 %v6441_v33 }
0x1c68   :  { %2968 = vmatpush.msra.mxu2 %v2588_v34 }
0x1c69   :  { %3177 = vmatpush.msrb.mxu3 %v6451_v47 }
0x1c6a   :  { %2969 = vmatpush.msra.mxu2 %v2587_v20 }
0x1c6c   :  { %2970 = vmatpush.msra.mxu2 %v2586_v32 }
0x1c6e   :  { %2971 = vmatpush.msra.mxu2 %v2585_v44 }
0x1c72   :  { %v2577_v0 = vpop.xlane.xlu2 %2576 }
0x1c73   :  { %v2578_v50 = vcvt.f32.s32 %v2577_v0 }
0x1c75   :  { %v2581_v59 = vadd.s32 %v2580_v31, %v2578_v50 }
0x1c77   :  { %vm2582_vm7 = vcmp.eq.s32.totalorder %v5145_v6, %v2581_v59 }
0x1c78   :  { %4433 = vmatmul.msk.f32.vlgmr.msrb.gmra.mxu2 %vm2582_vm7, %v4956_v25 }
0x1ccb   :  { %v2747_v12 = vpop.f32.mrf.mxu3 }
0x1ccc   :  { %2751 = vrot.lane.b32.xlu2 %v2747_v12, %s4955_s13  ;;  %v2890_v12 = vld [vmem:[#allocation17 + $0x78] sm:$0xff] }
0x1ccd   :  { %2895 = vmatpush.msrb.mxu1 %v2890_v12 }
0x1cfb   :  { %v2618_v46 = vpop.f32.mrf.mxu2 }
0x1cfc   :  { %v2629_v48 = vmul.f32 %v2628_v55, %v2618_v46  ;;  %v2889_v55 = vld [vmem:[#allocation17 + $0x70] sm:$0xff]  ;;  %v2888_v46 = vld [vmem:[#allocation17 + $0x68] sm:$0xff] }
0x1cfd   :  { %2896 = vmatpush.msrb.mxu1 %v2889_v55 }
0x1cfe   :  { %v2631_v29 = vrot.slane %v2629_v48, 4  ;;  %v6453_v48 = vld [vmem:[#allocation15 + $0x10] sm:$0xff] }
0x1cff   :  { %2897 = vmatpush.msrb.mxu1 %v2888_v46  ;;  %3178 = vmatpush.msrb.mxu3 %v6453_v48 }
0x1d00   :  { %v2633_v23 = vadd.f32 %v2631_v29, %v2626_v41  ;;  %v2887_v41 = vld [vmem:[#allocation17 + $0x60] sm:$0xff]  ;;  %v6456_v29 = vld [vmem:[#allocation15 + $0x8] sm:$0xff] }
0x1d01   :  { %2898 = vmatpush.msrb.mxu1 %v2887_v41  ;;  %3179 = vmatpush.msrb.mxu3 %v6456_v29 }
0x1d02   :  { %2756 = vrot.lane.b32.xlu0 %v2633_v23, %s4951_s25  ;;  %v2886_v23 = vld [vmem:[#allocation17 + $0x58] sm:$0xff] }
0x1d03   :  { %2899 = vmatpush.msrb.mxu1 %v2886_v23 }
0x1d26   :  { %v2752_v49 = vpop.permute.xlu2 %2751 }
0x1d27   :  { %2754 = vst.msk [vmem:[#allocation3] sm:$0x3] %vm2038_vm9, %v2752_v49  ;;  %v6459_v49 = vld [vmem:[#allocation15] sm:$0xff] }
0x1d28   :  { %3180 = vmatpush.msrb.mxu3 %v6459_v49 }
0x1d74   :  { %v2757_v57 = vpop.permute.xlu0 %2756 }
0x1d75   :  { %2760 = vst.msk [vmem:[#allocation3 - $0x4] sm:$0x30] %vm2759_vm10, %v2757_v57  ;;  %v2885_v57 = vld [vmem:[#allocation17 + $0x50] sm:$0xff] }
0x1d76   :  { %2900 = vmatpush.msrb.mxu1 %v2885_v57 }
0x1d7c   :  { %v2761_v13 = vld [vmem:[#allocation3] sm:$0x3] }
0x1d7d   :  { %2798 = vmatmul.f32.vlgmr.msra.gmra.mxu3 %v2761_v13  ;;  %v2884_v13 = vld [vmem:[#allocation17 + $0x48] sm:$0xff] }
0x1d7e   :  { %3250 = vmatpush.msra.mxu3 %v2890_v12  ;;  %2901 = vmatpush.msrb.mxu1 %v2884_v13 }
0x1d80   :  { %3251 = vmatpush.msra.mxu3 %v2889_v55 }
0x1d82   :  { %3252 = vmatpush.msra.mxu3 %v2888_v46  ;;  %v4528_v46 = vld [vmem:[%s7125_s27] ss:$0 sm:$0xff] }
0x1d84   :  { %3253 = vmatpush.msra.mxu3 %v2887_v41 }
0x1d86   :  { %3254 = vmatpush.msra.mxu3 %v2886_v23 }
0x1d88   :  { %3255 = vmatpush.msra.mxu3 %v2885_v57 }
0x1d8a   :  { %3256 = vmatpush.msra.mxu3 %v2884_v13 }
0x1e00   :  { %v2799_v62 = vpop.f32.mrf.mxu3 }
0x1e01   :  { %v2800_v30 = vadd.f32 %v4526_v39, %v2799_v62  ;;  %v2883_v39 = vld [vmem:[#allocation17 + $0x40] sm:$0xff]  ;;  %v2882_v62 = vld [vmem:[#allocation17 + $0x38] sm:$0xff] }
0x1e02   :  { %2902 = vmatpush.msrb.mxu1 %v2883_v39  ;;  %3257 = vmatpush.msra.mxu3 %v2883_v39 }
0x1e03   :  { %v2830_v28 = vadd.f32 %v6286_v15, %v2800_v30 }
0x1e04   :  { %2903 = vmatpush.msrb.mxu1 %v2882_v62  ;;  %3258 = vmatpush.msra.mxu3 %v2882_v62 }
0x1e05   :  { %v4438_v61 = vmul.f32 -1.442695, %v2830_v28  ;;  %v2880_v28 = vld [vmem:[#allocation17 + $0x28] sm:$0xff] }
0x1e07   :  { %4668 = vpow2.f32 %v4438_v61  ;;  %v2879_v61 = vld [vmem:[#allocation17 + $0x20] sm:$0xff] }
0x1e0d   :  { %v4669_v56 = vpop.eup %4668 }
0x1e0e   :  { %v2834_v8 = vadd.f32 1.0, %v4669_v56 }
0x1e10   :  { %4670 = vrcp.f32 %v2834_v8  ;;  %v2846_v37 = vand.u32 2147483648, %v2834_v8  ;;  %v2844_v34 = vand.u32 2147483647, %v2834_v8  ;;  %vm2840_vm6 = vweird.f32 %v2834_v8 }
0x1e12   :  { %v2847_v32 = vor.u32 1.1754944e-38, %v2846_v37  ;;  %vm2845_vm0 = vcmp.eq.f32.partialorder %v2844_v34, 8.507059e+37  ;;  %v2878_v37 = vld [vmem:[#allocation17 + $0x18] sm:$0xff]  ;;  %v2876_v34 = vld [vmem:[#allocation17 + $0x8] sm:$0xff] }
0x1e16   :  { %v4671_v14 = vpop.eup %4670 }
0x1e17   :  { %v2836_v21 = vmul.f32 %v4671_v14, %v2834_v8  ;;  %vm2841_vm1 = vweird.f32 %v4671_v14 }
0x1e18   :  { %vm2842_vm8 = vmor %vm2840_vm6, %vm2841_vm1 }
0x1e19   :  { %v2837_v40 = vsub.f32 1.0, %v2836_v21 }
0x1e1b   :  { %v2838_v43 = vmul.f32 %v4671_v14, %v2837_v40 }
0x1e1d   :  { %v2839_v20 = vadd.f32 %v4671_v14, %v2838_v43  ;;  %v2877_v43 = vld [vmem:[#allocation17 + $0x10] sm:$0xff] }
0x1e1f   :  { %v2843_v44 = vsel %vm2842_vm8, %v4671_v14, %v2839_v20  ;;  %v2875_v20 = vld [vmem:[#allocation17] sm:$0xff]  ;;  %vm7128_vm8 = vcmask 130048  }
0x1e20   :  { %v2848_v15 = vsel %vm2845_vm0, %v2847_v32, %v2843_v44 }
0x1e21   :  { %v2854_v0 = vmul.f32 %v2852_v63, %v2848_v15  ;;  %v2861_v56 = vsub.f32 1.0, %v2848_v15  ;;  %v2867_v14 = vmul.f32 %v2848_v15, %v6247_v36 }
0x1e23   :  { %2856 = vrot.lane.b32.xlu0 %v2854_v0, %s4950_s7 }
0x1e95   :  { %v2857_v31 = vpop.permute.xlu0 %2856 }
0x1e96   :  { %v2859_v50 = vadd.f32 %v2857_v31, %v2800_v30  ;;  %v2881_v30 = vld [vmem:[#allocation17 + $0x30] sm:$0xff] }
0x1e97   :  { %2904 = vmatpush.msrb.mxu1 %v2881_v30  ;;  %3259 = vmatpush.msra.mxu3 %v2881_v30 }
0x1e98   :  { %4672 = vtanh.f32 %v2859_v50 }
0x1e99   :  { %2905 = vmatpush.msrb.mxu1 %v2880_v28  ;;  %3260 = vmatpush.msra.mxu3 %v2880_v28 }
0x1e9b   :  { %2906 = vmatpush.msrb.mxu1 %v2879_v61  ;;  %3261 = vmatpush.msra.mxu3 %v2879_v61 }
0x1e9d   :  { %2907 = vmatpush.msrb.mxu1 %v2878_v37  ;;  %3262 = vmatpush.msra.mxu3 %v2878_v37 }
0x1e9e   :  { %v4673_v59 = vpop.eup %4672 }
0x1e9f   :  { %2863 = vrot.lane.b32.xlu2 %v4673_v59, %s4951_s25  ;;  %2908 = vmatpush.msrb.mxu1 %v2877_v43 }
0x1ea0   :  { %3263 = vmatpush.msra.mxu3 %v2877_v43 }
0x1ea1   :  { %2909 = vmatpush.msrb.mxu1 %v2876_v34 }
0x1ea2   :  { %3264 = vmatpush.msra.mxu3 %v2876_v34 }
0x1ea3   :  { %2910 = vmatpush.msrb.mxu1 %v2875_v20 }
0x1ea4   :  { %3265 = vmatpush.msra.mxu3 %v2875_v20 }
0x1ef9   :  { %v2864_v8 = vpop.permute.xlu2 %2863 }
0x1efa   :  { %v2866_v21 = vmul.f32 %v2864_v8, %v2861_v56 }
0x1efc   :  { %v6464_v40 = vadd.f32 %v2867_v14, %v2866_v21 }
0x1efe   :  { %2870 = vrot.lane.b32.xlu1 %v6464_v40, %s4951_s25 }
0x1f70   :  { %v2871_v36 = vpop.permute.xlu1 %2870 }
0x1f71   :  { %2873 = vst.msk [vmem:[#allocation3] sm:$0x3] %vm2161_vm3, %v2871_v36  ;;  %4442 = vmatmul.msk.f32.vlgmr.msrb.gmra.mxu0 %vm361_vm2, %v2871_v36  ;;  %4444 = vmatmul.msk.f32.vlgmr.msrb.gmra.mxu3 %vm361_vm2, %v2871_v36 }
0x1f78   :  { %v2874_v32 = vld [vmem:[#allocation3] sm:$0x3] }
0x1f79   :  { %2911 = vmatmul.f32.vlgmr.msrb.gmra.mxu1 %v2874_v32 }
0x1fee   :  { %v3012_v44 = vpop.f32.mrf.mxu0 }
0x1fef   :  { %v3015_v63 = vperm.slane %v3012_v44, 0  ;;  %v3018_v15 = vperm.slane %v3012_v44, 1 }
0x1ff1   :  { %v3016_v0 = vmul.f32 %v5729_v35, %v3015_v63  ;;  %v3017_v31 = vmul.f32 %v5727_v22, %v3015_v63  ;;  %v3019_v50 = vmul.f32 %v5725_v58, %v3018_v15  ;;  %v3020_v59 = vmul.f32 %v5723_v16, %v3018_v15 }
0x1ff3   :  { %v3021_v12 = vadd.f32 %v3019_v50, %v3016_v0  ;;  %v3022_v55 = vadd.f32 %v3020_v59, %v3017_v31 }
0x1ff5   :  { %v3023_v41 = vadd.f32 %v3021_v12, %v5738_v1  ;;  %v3024_v23 = vadd.f32 %v3022_v55, %v5740_v2 }
0x1ff6   :  { %v2912_v57 = vpop.f32.mrf.mxu1 }
0x1ff7   :  { %4674 = vtanh.f32 %v3023_v41  ;;  %v2913_v13 = vadd.f32 %v4528_v46, %v2912_v57 }
0x1ff8   :  { %4676 = vtanh.f32 %v3024_v23 }
0x1ff9   :  { %2916 = vst [vmem:[#allocation18 + $0x6] sm:$0x3] %v2913_v13  ;;  %v2917_v39 = vsel %vm2206_vm4, %v2913_v13, -inf }
0x1ffa   :  { %2918 = vmax.xlane.f32.xlu1 %v2917_v39 }
0x1ffd   :  { %v4675_v62 = vpop.eup %4674 }
0x1ffe   :  { %v4677_v30 = vpop.eup %4676  ;;  %v3027_v28 = vmul.f32 %v6267_v45, %v4675_v62 }
0x1fff   :  { %v3028_v61 = vmul.f32 %v6267_v45, %v4677_v30 }
0x2000   :  { %v3029_v56 = vsel %vm361_vm2, %v3027_v28, 0.0 }
0x2001   :  { %v3032_v8 = vsel %vm361_vm2, %v3028_v61, 0.0  ;;  %3030 = vadd.xlane.f32.xlu0 %v3029_v56 }
0x2002   :  { %3033 = vadd.xlane.f32.xlu2 %v3032_v8 }
0x206d   :  { %v2919_v14 = vpop.xlane.xlu1 %2918 }
0x206e   :  { %vm2920_vm14 = vcmp.eq.f32.partialorder %v2913_v13, %v2919_v14 }
0x206f   :  { %v2921_v21 = vsel %vm2920_vm14, %v5145_v6, 128  ;;  %vm3114_vm14 = vcmask 917254  }
0x2070   :  { %v2922_v37 = vsel %vm2206_vm4, %v2921_v21, 2147483647 }
0x2071   :  { %v2924_v43 = vshra.s32 %v2922_v37, 16 }
0x2073   :  { %v2926_v34 = vcvt.s32.f32 %v2924_v43 }
0x2074   :  { %v3031_v20 = vpop.xlane.xlu0 %3030 }
0x2075   :  { %v3034_v36 = vpop.xlane.xlu2 %3033  ;;  %v3035_v32 = vadd.f32 %v3031_v20, %v5765_v27  ;;  %2927 = vmin.xlane.f32.xlu0 %v2926_v34 }
0x2076   :  { %v3036_v45 = vadd.f32 %v3034_v36, %v5758_v24 }
0x2077   :  { %v3037_v44 = vsel %vm1962_vm11, %v3035_v32, -inf }
0x2078   :  { %v3038_v63 = vsel %vm1962_vm11, %v3036_v45, -inf }
0x2079   :  { %v3039_v15 = vmax.f32 %v3037_v44, %v3038_v63 }
0x207b   :  { %v3040_v0 = vrot.slane %v3039_v15, 4 }
0x207d   :  { %v3041_v31 = vmax.f32 %v3039_v15, %v3040_v0 }
0x207f   :  { %v3042_v50 = vrot.slane %v3041_v31, 2 }
0x2081   :  { %v3043_v59 = vmax.f32 %v3041_v31, %v3042_v50 }
0x2083   :  { %v3044_v12 = vrot.slane %v3043_v59, 1 }
0x2085   :  { %v3045_v55 = vmax.f32 %v3043_v59, %v3044_v12 }
0x2087   :  { %v3046_v46 = vsub.f32 %v3035_v32, %v3045_v55  ;;  %v3047_v41 = vsub.f32 %v3036_v45, %v3045_v55 }
0x2089   :  { %v3048_v23 = vmul.f32 1.442695, %v3046_v46  ;;  %v3050_v57 = vmul.f32 1.442695, %v3047_v41  ;;  %v4527_v41 = vld [vmem:[%s7046_s23] ss:$0 sm:$0xff] }
0x208b   :  { %4678 = vpow2.f32 %v3048_v23  ;;  %v3182_v23 = vpop.f32.mrf.mxu3 }
0x208c   :  { %4680 = vpow2.f32 %v3050_v57  ;;  %v6498_v57 = vadd.f32 %v4527_v41, %v3182_v23  ;;  %v6542_v41 = vld [vmem:[#allocation14 + $0x18] sm:$0xff]  ;;  %v6544_v23 = vld [vmem:[#allocation14 + $0x10] sm:$0xff] }
0x208d   :  { %3359 = vmatpush.msrb.mxu2 %v6542_v41 }
0x208f   :  { %3360 = vmatpush.msrb.mxu2 %v6544_v23 }
0x2091   :  { %v4679_v13 = vpop.eup %4678 }
0x2092   :  { %v4681_v39 = vpop.eup %4680  ;;  %v3052_v62 = vsel %vm1962_vm11, %v4679_v13, 0.0 }
0x2093   :  { %v3053_v30 = vsel %vm1962_vm11, %v4681_v39, 0.0 }
0x2094   :  { %v3054_v28 = vadd.f32 %v3053_v30, %v3052_v62  ;;  %v2923_v62 = vand.u32 65535, %v2922_v37 }
0x2096   :  { %v3055_v61 = vrot.slane %v3054_v28, 4 }
0x2098   :  { %v3056_v56 = vadd.f32 %v3055_v61, %v3054_v28 }
0x209a   :  { %v3057_v8 = vrot.slane %v3056_v56, 2 }
0x209c   :  { %v3058_v14 = vadd.f32 %v3057_v8, %v3056_v56  ;;  %v6502_v56 = vld [vmem:[#allocation2 + $0x8] sm:$0xff] }
0x209e   :  { %v3059_v21 = vrot.slane %v3058_v14, 1 }
0x20a0   :  { %v3060_v43 = vadd.f32 %v3059_v21, %v3058_v14  ;;  %v6505_v14 = vld [vmem:[#allocation2] sm:$0xff] }
0x20a2   :  { %4682 = vrcp.f32 %v3060_v43  ;;  %v3072_v45 = vand.u32 2147483648, %v3060_v43  ;;  %v3070_v63 = vand.u32 2147483647, %v3060_v43  ;;  %vm3066_vm15 = vweird.f32 %v3060_v43 }
0x20a4   :  { %v3073_v0 = vor.u32 1.1754944e-38, %v3072_v45  ;;  %vm3071_vm1 = vcmp.eq.f32.partialorder %v3070_v63, 8.507059e+37 }
0x20a8   :  { %v4683_v20 = vpop.eup %4682 }
0x20a9   :  { %v3062_v36 = vmul.f32 %v4683_v20, %v3060_v43  ;;  %vm3067_vm12 = vweird.f32 %v4683_v20 }
0x20aa   :  { %vm3068_vm7 = vmor %vm3066_vm15, %vm3067_vm12 }
0x20ab   :  { %v3063_v32 = vsub.f32 1.0, %v3062_v36 }
0x20ad   :  { %v3064_v44 = vmul.f32 %v4683_v20, %v3063_v32 }
0x20af   :  { %v3065_v15 = vadd.f32 %v4683_v20, %v3064_v44 }
0x20b1   :  { %v3069_v31 = vsel %vm3068_vm7, %v4683_v20, %v3065_v15 }
0x20b2   :  { %v3074_v50 = vsel %vm3071_vm1, %v3073_v0, %v3069_v31 }
0x20b3   :  { %v3076_v59 = vmul.f32 %v4681_v39, %v3074_v50  ;;  %v3075_v12 = vmul.f32 %v4679_v13, %v3074_v50  ;;  %v2925_v39 = vcvt.s32.f32 %v2923_v62  ;;  %v6550_v62 = vld [vmem:[#allocation14] sm:$0xff] }
0x20b5   :  { %v3080_v55 = vsel %vm1962_vm11, %v3076_v59, 0.0  ;;  %v3077_v46 = vsel %vm1962_vm11, %v3075_v12, 0.0 }
0x20b6   :  { %3081 = vadd.xlane.f32.xlu1 %v3080_v55  ;;  %3078 = vadd.xlane.f32.xlu0 %v3077_v46 }
0x20ca   :  { %3206 = vrot.lane.b32.xlu0 %v6498_v57, %s4950_s7 }
0x20e8   :  { %v2928_v30 = vpop.xlane.xlu0 %2927 }
0x20e9   :  { %vm2929_vm6 = vcmp.eq.f32.partialorder %v2926_v34, %v2928_v30 }
0x20ea   :  { %v2930_v13 = vsel %vm2929_vm6, %v2925_v39, inf }
0x20eb   :  { %2931 = vmin.xlane.f32.xlu2 %v2930_v13 }
0x2129   :  { %v3079_v28 = vpop.xlane.xlu0 %3078  ;;  %v3082_v61 = vpop.xlane.xlu1 %3081 }
0x212a   :  { %v3084_v8 = vmul.f32 %v6502_v56, %v3082_v61  ;;  %v3083_v21 = vmul.f32 %v6505_v14, %v3079_v28 }
0x212c   :  { %3099 = vmatpush.msra.mxu0 %v3084_v8 }
0x212e   :  { %3100 = vmatpush.msra.mxu0 %v3083_v21 }
0x212f   :  { %4443 = vmatmul.msk.f32.vlgmr.msra.gmra.mxu0 %vm7128_vm8, %v5917_v42 }
0x2130   :  { %3137 = vmatpush.msrb.mxu0 %v6347_v10  ;;  %v2934_v10 = vcvt.f32.s32 %v2928_v30 }
0x2132   :  { %3138 = vmatpush.msrb.mxu0 %v6352_v38 }
0x2134   :  { %3139 = vmatpush.msrb.mxu0 %v6359_v51  ;;  %v2935_v51 = vshll.u32 %v2934_v10, 16 }
0x2136   :  { %3140 = vmatpush.msrb.mxu0 %v6365_v3 }
0x2138   :  { %3141 = vmatpush.msrb.mxu0 %v6371_v52 }
0x213a   :  { %3142 = vmatpush.msrb.mxu0 %v6377_v53 }
0x213c   :  { %3143 = vmatpush.msrb.mxu0 %v6383_v7  ;;  %v2983_v7 = vstv %s2982_s14  ;;  %v3207_v31 = vpop.permute.xlu0 %3206 }
0x213e   :  { %3144 = vmatpush.msrb.mxu0 %v6389_v11 }
0x2140   :  { %3145 = vmatpush.msrb.mxu0 %v6395_v17  ;;  %v2980_v17 = vstv %s2979_s30  ;;  %s3334_s30 = scvt.s32.f32 %s3333_s2 }
0x2142   :  { %3146 = vmatpush.msrb.mxu0 %v6401_v18  ;;  %s3337_s14 = ssub.f32 1.0, %s3334_s30 }
0x2144   :  { %3147 = vmatpush.msrb.mxu0 %v6407_v19  ;;  %v2981_v19 = vmul.f32 %v2980_v17, %v5940_v5  ;;  %v4531_v17 = vld [vmem:[%s7125_s27] ss:$0 sm:$0xff] }
0x2146   :  { %3148 = vmatpush.msrb.mxu0 %v6416_v26 }
0x2148   :  { %3149 = vmatpush.msrb.mxu0 %v6423_v4 }
0x214a   :  { %3150 = vmatpush.msrb.mxu0 %v6429_v54 }
0x214c   :  { %3151 = vmatpush.msrb.mxu0 %v6435_v9 }
0x214e   :  { %3152 = vmatpush.msrb.mxu0 %v6441_v33 }
0x2150   :  { %3528 = vmatpush.msra.mxu0 %v6451_v47  ;;  %v4529_v47 = vld [vmem:[%s7045_s22] ss:$0 sm:$0xff] }
0x2152   :  { %3529 = vmatpush.msra.mxu0 %v6453_v48 }
0x2154   :  { %3530 = vmatpush.msra.mxu0 %v6456_v29 }
0x2156   :  { %3531 = vmatpush.msra.mxu0 %v6459_v49 }
0x215e   :  { %v2932_v38 = vpop.xlane.xlu2 %2931 }
0x215f   :  { %v2933_v3 = vcvt.f32.s32 %v2932_v38 }
0x2161   :  { %v2936_v52 = vadd.s32 %v2935_v51, %v2933_v3 }
0x2163   :  { %vm2937_vm0 = vcmp.eq.s32.totalorder %v5145_v6, %v2936_v52 }
0x2164   :  { %4440 = vmatmul.msk.f32.vlgmr.msra.gmra.mxu2 %vm2937_vm0, %v4956_v25 }
0x21ac   :  { %v3102_v53 = vpop.f32.mrf.mxu0 }
0x21ad   :  { %3106 = vrot.lane.b32.xlu2 %v3102_v53, %s4955_s13 }
0x21e7   :  { %v2973_v11 = vpop.f32.mrf.mxu2 }
0x21e8   :  { %v2984_v18 = vmul.f32 %v2983_v7, %v2973_v11 }
0x21ea   :  { %v2986_v26 = vrot.slane %v2984_v18, 2 }
0x21ec   :  { %v2988_v4 = vadd.f32 %v2986_v26, %v2981_v19 }
0x21ee   :  { %3111 = vrot.lane.b32.xlu1 %v2988_v4, %s4951_s25 }
0x2207   :  { %v3107_v54 = vpop.permute.xlu2 %3106 }
0x2208   :  { %3109 = vst.msk [vmem:[#allocation3] sm:$0x3] %vm2038_vm9, %v3107_v54 }
0x2260   :  { %v3112_v9 = vpop.permute.xlu1 %3111 }
0x2261   :  { %3115 = vst.msk [vmem:[#allocation3 - $0x6] sm:$0xc0] %vm3114_vm14, %v3112_v9 }
0x2268   :  { %v3116_v33 = vld [vmem:[#allocation3] sm:$0x3] }
0x2269   :  { %3153 = vmatmul.f32.vlgmr.msrb.gmra.mxu0 %v3116_v33 }
0x22e6   :  { %v3154_v48 = vpop.f32.mrf.mxu0 }
0x22e7   :  { %v3155_v29 = vadd.f32 %v4529_v47, %v3154_v48  ;;  %v6575_v47 = vld [vmem:[%s7041_s18] ss:$0 sm:$0xff] }
0x22e9   :  { %v3185_v5 = vadd.f32 %v6498_v57, %v3155_v29  ;;  %v6547_v57 = vld [vmem:[#allocation14 + $0x8] sm:$0xff] }
0x22ea   :  { %3361 = vmatpush.msrb.mxu2 %v6547_v57 }
0x22eb   :  { %v4445_v49 = vmul.f32 -1.442695, %v3185_v5 }
0x22ec   :  { %3362 = vmatpush.msrb.mxu2 %v6550_v62 }
0x22ed   :  { %4684 = vpow2.f32 %v4445_v49 }
0x22f3   :  { %v4685_v37 = vpop.eup %4684 }
0x22f4   :  { %v3189_v34 = vadd.f32 1.0, %v4685_v37 }
0x22f6   :  { %4686 = vrcp.f32 %v3189_v34  ;;  %v3201_v32 = vand.u32 2147483648, %v3189_v34  ;;  %v3199_v44 = vand.u32 2147483647, %v3189_v34  ;;  %vm3195_vm15 = vweird.f32 %v3189_v34 }
0x22f8   :  { %v3202_v15 = vor.u32 1.1754944e-38, %v3201_v32  ;;  %vm3200_vm1 = vcmp.eq.f32.partialorder %v3199_v44, 8.507059e+37 }
0x22fc   :  { %v4687_v43 = vpop.eup %4686 }
0x22fd   :  { %v3191_v20 = vmul.f32 %v4687_v43, %v3189_v34  ;;  %vm3196_vm12 = vweird.f32 %v4687_v43 }
0x22fe   :  { %vm3197_vm7 = vmor %vm3195_vm15, %vm3196_vm12 }
0x22ff   :  { %v3192_v36 = vsub.f32 1.0, %v3191_v20 }
0x2301   :  { %v3193_v45 = vmul.f32 %v4687_v43, %v3192_v36 }
0x2303   :  { %v3194_v63 = vadd.f32 %v4687_v43, %v3193_v45 }
0x2305   :  { %v3198_v0 = vsel %vm3197_vm7, %v4687_v43, %v3194_v63  ;;  %vm7129_vm7 = vcmask 130048  }
0x2306   :  { %v3203_v50 = vsel %vm3200_vm1, %v3202_v15, %v3198_v0 }
0x2307   :  { %v3209_v59 = vmul.f32 %v3207_v31, %v3203_v50  ;;  %v3216_v30 = vsub.f32 1.0, %v3203_v50  ;;  %v3222_v13 = vmul.f32 %v3203_v50, %v6464_v40 }
0x2309   :  { %3211 = vrot.lane.b32.xlu2 %v3209_v59, %s4950_s7 }
0x2363   :  { %v3212_v12 = vpop.permute.xlu2 %3211 }
0x2364   :  { %v3214_v55 = vadd.f32 %v3212_v12, %v3155_v29 }
0x2366   :  { %4688 = vtanh.f32 %v3214_v55 }
0x236c   :  { %v4689_v46 = vpop.eup %4688 }
0x236d   :  { %3218 = vrot.lane.b32.xlu0 %v4689_v46, %s4951_s25 }
0x23df   :  { %v3219_v39 = vpop.permute.xlu0 %3218 }
0x23e0   :  { %v3221_v28 = vmul.f32 %v3219_v39, %v3216_v30 }
0x23e2   :  { %v6555_v61 = vadd.f32 %v3222_v13, %v3221_v28 }
0x23e4   :  { %3225 = vrot.lane.b32.xlu1 %v6555_v61, %s4951_s25 }
0x2456   :  { %v3226_v8 = vpop.permute.xlu1 %3225 }
0x2457   :  { %3228 = vst.msk [vmem:[#allocation3] sm:$0x3] %vm2161_vm3, %v3226_v8  ;;  %4449 = vmatmul.msk.f32.vlgmr.msrb.gmra.mxu2 %vm361_vm2, %v3226_v8  ;;  %4451 = vmatmul.msk.f32.vlgmr.msra.gmra.mxu0 %vm361_vm2, %v3226_v8 }
0x245e   :  { %v3229_v21 = vld [vmem:[#allocation3] sm:$0x3] }
0x245f   :  { %3266 = vmatmul.f32.vlgmr.msra.gmra.mxu3 %v3229_v21 }
0x24da   :  { %v3364_v10 = vpop.f32.mrf.mxu2 }
0x24db   :  { %v3367_v38 = vperm.slane %v3364_v10, 0  ;;  %v3370_v51 = vperm.slane %v3364_v10, 1 }
0x24dd   :  { %v3368_v40 = vmul.f32 %v5729_v35, %v3367_v38  ;;  %v3369_v3 = vmul.f32 %v5727_v22, %v3367_v38  ;;  %v3371_v52 = vmul.f32 %v5725_v58, %v3370_v51  ;;  %v3372_v53 = vmul.f32 %v5723_v16, %v3370_v51 }
0x24df   :  { %v3373_v7 = vadd.f32 %v3371_v52, %v3368_v40  ;;  %v3374_v11 = vadd.f32 %v3372_v53, %v3369_v3 }
0x24e1   :  { %v3375_v18 = vadd.f32 %v3373_v7, %v5738_v1  ;;  %v3376_v19 = vadd.f32 %v3374_v11, %v5740_v2 }
0x24e2   :  { %v3267_v26 = vpop.f32.mrf.mxu3 }
0x24e3   :  { %4690 = vtanh.f32 %v3375_v18  ;;  %v3268_v4 = vadd.f32 %v4531_v17, %v3267_v26 }
0x24e4   :  { %4692 = vtanh.f32 %v3376_v19 }
0x24e5   :  { %3271 = vst [vmem:[#allocation18 + $0x8] sm:$0x3] %v3268_v4  ;;  %v3272_v54 = vsel %vm2206_vm4, %v3268_v4, -inf }
0x24e6   :  { %3273 = vmax.xlane.f32.xlu1 %v3272_v54 }
0x24e9   :  { %v4691_v9 = vpop.eup %4690 }
0x24ea   :  { %v4693_v33 = vpop.eup %4692  ;;  %v3379_v48 = vmul.f32 %v6575_v47, %v4691_v9 }
0x24eb   :  { %v3380_v29 = vmul.f32 %v6575_v47, %v4693_v33 }
0x24ec   :  { %v3381_v5 = vsel %vm361_vm2, %v3379_v48, 0.0 }
0x24ed   :  { %v3384_v49 = vsel %vm361_vm2, %v3380_v29, 0.0  ;;  %3382 = vadd.xlane.f32.xlu2 %v3381_v5 }
0x24ee   :  { %3385 = vadd.xlane.f32.xlu0 %v3384_v49 }
0x2559   :  { %v3274_v37 = vpop.xlane.xlu1 %3273 }
0x255a   :  { %vm3275_vm6 = vcmp.eq.f32.partialorder %v3268_v4, %v3274_v37 }
0x255b   :  { %v3276_v34 = vsel %vm3275_vm6, %v5145_v6, 128 }
0x255c   :  { %v3277_v43 = vsel %vm2206_vm4, %v3276_v34, 2147483647 }
0x255d   :  { %v3279_v20 = vshra.s32 %v3277_v43, 16 }
0x255f   :  { %v3281_v36 = vcvt.s32.f32 %v3279_v20 }
0x2560   :  { %v3383_v32 = vpop.xlane.xlu2 %3382 }
0x2561   :  { %v3386_v45 = vpop.xlane.xlu0 %3385  ;;  %v3387_v44 = vadd.f32 %v3383_v32, %v5765_v27  ;;  %3282 = vmin.xlane.f32.xlu2 %v3281_v36  ;;  %v3278_v32 = vand.u32 65535, %v3277_v43  ;;  %v3310_v43 = vld [vmem:[%s7042_s19 + $0x78] sm:$0xff] }
0x2562   :  { %v3388_v63 = vadd.f32 %v3386_v45, %v5758_v24  ;;  %3311 = vmatpush.msra.mxu1 %v3310_v43  ;;  %3662 = vmatpush.msrb.mxu3 %v3310_v43 }
0x2563   :  { %v3389_v15 = vsel %vm1962_vm11, %v3387_v44, -inf }
0x2564   :  { %v3390_v0 = vsel %vm1962_vm11, %v3388_v63, -inf }
0x2565   :  { %v3391_v31 = vmax.f32 %v3389_v15, %v3390_v0  ;;  %v4530_v15 = vld [vmem:[%s7046_s23] ss:$0 sm:$0xff]  ;;  %v3533_v0 = vpop.f32.mrf.mxu0 }
0x2567   :  { %v3392_v50 = vrot.slane %v3391_v31, 4 }
0x2569   :  { %v3393_v59 = vmax.f32 %v3391_v31, %v3392_v50  ;;  %v6597_v31 = vadd.f32 %v4530_v15, %v3533_v0  ;;  %v3308_v50 = vld [vmem:[%s7042_s19 + $0x68] sm:$0xff]  ;;  %v6755_v0 = vld [vmem:[%s7043_s20] sm:$0xff] }
0x256b   :  { %v3394_v12 = vrot.slane %v3393_v59, 2 }
0x256d   :  { %v3395_v55 = vmax.f32 %v3393_v59, %v3394_v12  ;;  %v3307_v59 = vld [vmem:[%s7042_s19 + $0x60] sm:$0xff]  ;;  %v3306_v12 = vld [vmem:[%s7042_s19 + $0x58] sm:$0xff] }
0x256f   :  { %v3396_v46 = vrot.slane %v3395_v55, 1 }
0x2571   :  { %v3397_v30 = vmax.f32 %v3395_v55, %v3396_v46  ;;  %v3305_v55 = vld [vmem:[%s7042_s19 + $0x50] sm:$0xff]  ;;  %v3304_v46 = vld [vmem:[%s7042_s19 + $0x48] sm:$0xff] }
0x2573   :  { %v3398_v39 = vsub.f32 %v3387_v44, %v3397_v30  ;;  %v3399_v13 = vsub.f32 %v3388_v63, %v3397_v30  ;;  %v3280_v44 = vcvt.s32.f32 %v3278_v32  ;;  %v3303_v30 = vld [vmem:[%s7042_s19 + $0x40] sm:$0xff] }
0x2574   :  { %v6732_v32 = vld [vmem:[%s7043_s20 + $0x20] sm:$0xff] }
0x2575   :  { %v3400_v28 = vmul.f32 1.442695, %v3398_v39  ;;  %v3402_v8 = vmul.f32 1.442695, %v3399_v13  ;;  %v3302_v39 = vld [vmem:[%s7042_s19 + $0x38] sm:$0xff]  ;;  %v3301_v13 = vld [vmem:[%s7042_s19 + $0x30] sm:$0xff] }
0x2577   :  { %4694 = vpow2.f32 %v3400_v28  ;;  %v3300_v28 = vld [vmem:[%s7042_s19 + $0x28] sm:$0xff] }
0x2578   :  { %4696 = vpow2.f32 %v3402_v8  ;;  %v3299_v8 = vld [vmem:[%s7042_s19 + $0x20] sm:$0xff] }
0x257d   :  { %v4695_v21 = vpop.eup %4694 }
0x257e   :  { %v4697_v10 = vpop.eup %4696  ;;  %v3404_v38 = vsel %vm1962_vm11, %v4695_v21, 0.0 }
0x257f   :  { %v3405_v51 = vsel %vm1962_vm11, %v4697_v10, 0.0 }
0x2580   :  { %v3406_v40 = vadd.f32 %v3405_v51, %v3404_v38 }
0x2582   :  { %v3407_v3 = vrot.slane %v3406_v40, 4 }
0x2584   :  { %v3408_v52 = vadd.f32 %v3407_v3, %v3406_v40  ;;  %v3297_v3 = vld [vmem:[%s7042_s19 + $0x10] sm:$0xff] }
0x2586   :  { %v3409_v53 = vrot.slane %v3408_v52, 2 }
0x2588   :  { %v3410_v7 = vadd.f32 %v3409_v53, %v3408_v52  ;;  %v3296_v52 = vld [vmem:[%s7042_s19 + $0x8] sm:$0xff] }
0x258a   :  { %v3411_v11 = vrot.slane %v3410_v7, 1 }
0x258c   :  { %v3412_v17 = vadd.f32 %v3411_v11, %v3410_v7 }
0x258e   :  { %4698 = vrcp.f32 %v3412_v17  ;;  %v3424_v4 = vand.u32 2147483648, %v3412_v17  ;;  %v3422_v9 = vand.u32 2147483647, %v3412_v17  ;;  %vm3418_vm0 = vweird.f32 %v3412_v17 }
0x2590   :  { %v3425_v48 = vor.u32 1.1754944e-38, %v3424_v4  ;;  %vm3423_vm12 = vcmp.eq.f32.partialorder %v3422_v9, 8.507059e+37  ;;  %v6699_v4 = vld [vmem:[%s7043_s20 + $0x48] sm:$0xff]  ;;  %v6711_v9 = vld [vmem:[%s7043_s20 + $0x38] sm:$0xff] }
0x2594   :  { %v4699_v18 = vpop.eup %4698 }
0x2595   :  { %v3414_v19 = vmul.f32 %v4699_v18, %v3412_v17  ;;  %vm3419_vm8 = vweird.f32 %v4699_v18 }
0x2596   :  { %vm3420_vm14 = vmor %vm3418_vm0, %vm3419_vm8 }
0x2597   :  { %v3415_v26 = vsub.f32 1.0, %v3414_v19  ;;  %v6687_v19 = vld [vmem:[%s7043_s20 + $0x58] sm:$0xff] }
0x2599   :  { %v3416_v54 = vmul.f32 %v4699_v18, %v3415_v26  ;;  %v6693_v26 = vld [vmem:[%s7043_s20 + $0x50] sm:$0xff] }
0x259b   :  { %v3417_v33 = vadd.f32 %v4699_v18, %v3416_v54  ;;  %v6705_v54 = vld [vmem:[%s7043_s20 + $0x40] sm:$0xff] }
0x259d   :  { %v3421_v29 = vsel %vm3420_vm14, %v4699_v18, %v3417_v33  ;;  %v6717_v33 = vld [vmem:[%s7043_s20 + $0x30] sm:$0xff] }
0x259e   :  { %v3426_v5 = vsel %vm3423_vm12, %v3425_v48, %v3421_v29  ;;  %v6723_v48 = vld [vmem:[%s7043_s20 + $0x28] sm:$0xff]  ;;  %v3335_v29 = vstv %s3334_s30 }
0x259f   :  { %v3428_v49 = vmul.f32 %v4697_v10, %v3426_v5  ;;  %v3427_v37 = vmul.f32 %v4695_v21, %v3426_v5  ;;  %v3298_v21 = vld [vmem:[%s7042_s19 + $0x18] sm:$0xff]  ;;  %v3338_v5 = vstv %s3337_s14 }
0x25a1   :  { %v3432_v34 = vsel %vm1962_vm11, %v3428_v49, 0.0  ;;  %v3429_v20 = vsel %vm1962_vm11, %v3427_v37, 0.0  ;;  %v3336_v37 = vmul.f32 %v3335_v29, %v6176_v60  ;;  %v6767_v29 = vld [vmem:[#allocation15 + $0x18] sm:$0xff] }
0x25a2   :  { %3433 = vadd.xlane.f32.xlu0 %v3432_v34  ;;  %3430 = vadd.xlane.f32.xlu2 %v3429_v20 }
0x25d4   :  { %v6591_v45 = vpop.xlane.xlu2 %3282 }
0x25d5   :  { %vm3284_vm15 = vcmp.eq.f32.partialorder %v3281_v36, %v6591_v45  ;;  %v3309_v36 = vld [vmem:[%s7042_s19 + $0x70] sm:$0xff] }
0x25d6   :  { %v3285_v63 = vsel %vm3284_vm15, %v3280_v44, inf  ;;  %3312 = vmatpush.msra.mxu1 %v3309_v36  ;;  %3663 = vmatpush.msrb.mxu3 %v3309_v36  ;;  %v6743_v44 = vld [vmem:[%s7043_s20 + $0x10] sm:$0xff] }
0x25d7   :  { %3286 = vmin.xlane.f32.xlu1 %v3285_v63  ;;  %v6749_v63 = vld [vmem:[%s7043_s20 + $0x8] sm:$0xff] }
0x25d8   :  { %3313 = vmatpush.msra.mxu1 %v3308_v50  ;;  %3664 = vmatpush.msrb.mxu3 %v3308_v50  ;;  %v4532_v50 = vld [vmem:[%s7045_s22] ss:$0 sm:$0xff] }
0x25da   :  { %3314 = vmatpush.msra.mxu1 %v3307_v59  ;;  %3665 = vmatpush.msrb.mxu3 %v3307_v59 }
0x25dc   :  { %3315 = vmatpush.msra.mxu1 %v3306_v12  ;;  %3666 = vmatpush.msrb.mxu3 %v3306_v12 }
0x25de   :  { %3316 = vmatpush.msra.mxu1 %v3305_v55  ;;  %3667 = vmatpush.msrb.mxu3 %v3305_v55 }
0x25e0   :  { %3317 = vmatpush.msra.mxu1 %v3304_v46  ;;  %3668 = vmatpush.msrb.mxu3 %v3304_v46 }
0x25e2   :  { %3318 = vmatpush.msra.mxu1 %v3303_v30  ;;  %3669 = vmatpush.msrb.mxu3 %v3303_v30 }
0x25e4   :  { %3319 = vmatpush.msra.mxu1 %v3302_v39  ;;  %3670 = vmatpush.msrb.mxu3 %v3302_v39 }
0x25e6   :  { %3320 = vmatpush.msra.mxu1 %v3301_v13  ;;  %3671 = vmatpush.msrb.mxu3 %v3301_v13 }
0x25e8   :  { %3321 = vmatpush.msra.mxu1 %v3300_v28  ;;  %3672 = vmatpush.msrb.mxu3 %v3300_v28 }
0x25ea   :  { %3322 = vmatpush.msra.mxu1 %v3299_v8  ;;  %3673 = vmatpush.msrb.mxu3 %v3299_v8 }
0x25ec   :  { %3323 = vmatpush.msra.mxu1 %v3298_v21  ;;  %3674 = vmatpush.msrb.mxu3 %v3298_v21 }
0x25ee   :  { %3324 = vmatpush.msra.mxu1 %v3297_v3  ;;  %3675 = vmatpush.msrb.mxu3 %v3297_v3 }
0x25f0   :  { %3557 = vrot.lane.b32.xlu1 %v6597_v31, %s4950_s7  ;;  %3325 = vmatpush.msra.mxu1 %v3296_v52 }
0x25f1   :  { %3676 = vmatpush.msrb.mxu3 %v3296_v52 }
0x2615   :  { %v3434_v10 = vpop.xlane.xlu0 %3433  ;;  %v3431_v38 = vpop.xlane.xlu2 %3430 }
0x2616   :  { %v3436_v51 = vmul.f32 %v6502_v56, %v3434_v10  ;;  %v3435_v40 = vmul.f32 %v6505_v14, %v3431_v38  ;;  %v3295_v56 = vld [vmem:[%s7042_s19] sm:$0xff]  ;;  %v3289_v14 = vcvt.f32.s32 %v6591_v45  ;;  %v6738_v45 = vld [vmem:[%s7043_s20 + $0x18] sm:$0xff] }
0x2617   :  { %3326 = vmatpush.msra.mxu1 %v3295_v56  ;;  %3677 = vmatpush.msrb.mxu3 %v3295_v56 }
0x2618   :  { %3451 = vmatpush.msra.mxu2 %v3436_v51  ;;  %v3290_v7 = vshll.u32 %v3289_v14, 16 }
0x2619   :  { %3713 = vmatpush.msrb.mxu1 %v6542_v41  ;;  %v6664_v41 = vld [vmem:[%s7043_s20 + $0x78] sm:$0xff] }
0x261a   :  { %3452 = vmatpush.msra.mxu2 %v3435_v40 }
0x261b   :  { %4450 = vmatmul.msk.f32.vlgmr.msra.gmra.mxu2 %vm7129_vm7, %v5917_v42  ;;  %3714 = vmatpush.msrb.mxu1 %v6544_v23  ;;  %v6669_v23 = vld [vmem:[%s7043_s20 + $0x70] sm:$0xff] }
0x261c   :  { %3488 = vmatpush.msrb.mxu2 %v6664_v41 }
0x261d   :  { %3715 = vmatpush.msrb.mxu1 %v6547_v57  ;;  %v6675_v57 = vld [vmem:[%s7043_s20 + $0x68] sm:$0xff] }
0x261e   :  { %3489 = vmatpush.msrb.mxu2 %v6669_v23 }
0x261f   :  { %3716 = vmatpush.msrb.mxu1 %v6550_v62  ;;  %v6681_v62 = vld [vmem:[%s7043_s20 + $0x60] sm:$0xff] }
0x2620   :  { %3490 = vmatpush.msrb.mxu2 %v6675_v57 }
0x2622   :  { %3491 = vmatpush.msrb.mxu2 %v6681_v62 }
0x2624   :  { %3492 = vmatpush.msrb.mxu2 %v6687_v19 }
0x2626   :  { %3493 = vmatpush.msrb.mxu2 %v6693_v26 }
0x2628   :  { %3494 = vmatpush.msrb.mxu2 %v6699_v4 }
0x262a   :  { %3495 = vmatpush.msrb.mxu2 %v6705_v54 }
0x262c   :  { %3496 = vmatpush.msrb.mxu2 %v6711_v9 }
0x262e   :  { %3497 = vmatpush.msrb.mxu2 %v6717_v33 }
0x2630   :  { %3498 = vmatpush.msrb.mxu2 %v6723_v48 }
0x2632   :  { %3499 = vmatpush.msrb.mxu2 %v6732_v32 }
0x2634   :  { %3500 = vmatpush.msrb.mxu2 %v6738_v45 }
0x2636   :  { %3501 = vmatpush.msrb.mxu2 %v6743_v44 }
0x2638   :  { %3502 = vmatpush.msrb.mxu2 %v6749_v63 }
0x263a   :  { %3503 = vmatpush.msrb.mxu2 %v6755_v0 }
0x263c   :  { %3882 = vmatpush.msra.mxu2 %v6767_v29 }
0x264a   :  { %v3287_v53 = vpop.xlane.xlu1 %3286 }
0x264b   :  { %v3288_v11 = vcvt.f32.s32 %v3287_v53 }
0x264d   :  { %v3291_v17 = vadd.s32 %v3290_v7, %v3288_v11  ;;  %v3596_v11 = vld [vmem:[#allocation17 + $0x78] sm:$0xff] }
0x264e   :  { %3601 = vmatpush.msrb.mxu0 %v3596_v11 }
0x264f   :  { %vm3292_vm1 = vcmp.eq.s32.totalorder %v5145_v6, %v3291_v17  ;;  %v3595_v17 = vld [vmem:[#allocation17 + $0x70] sm:$0xff] }
0x2650   :  { %4447 = vmatmul.msk.f32.vlgmr.msra.gmra.mxu1 %vm3292_vm1, %v4956_v25  ;;  %3602 = vmatpush.msrb.mxu0 %v3595_v17 }
0x2662   :  { %v3558_v52 = vpop.permute.xlu1 %3557 }
0x269e   :  { %v3454_v18 = vpop.f32.mrf.mxu2 }
0x269f   :  { %3458 = vrot.lane.b32.xlu0 %v3454_v18, %s4955_s13  ;;  %v3594_v18 = vld [vmem:[#allocation17 + $0x68] sm:$0xff] }
0x26a0   :  { %3603 = vmatpush.msrb.mxu0 %v3594_v18 }
0x26cd   :  { %v3328_v49 = vpop.f32.mrf.mxu1 }
0x26ce   :  { %v3339_v34 = vmul.f32 %v3338_v5, %v3328_v49  ;;  %v6769_v5 = vld [vmem:[#allocation15 + $0x10] sm:$0xff]  ;;  %v3593_v49 = vld [vmem:[#allocation17 + $0x60] sm:$0xff] }
0x26cf   :  { %3883 = vmatpush.msra.mxu2 %v6769_v5  ;;  %3604 = vmatpush.msrb.mxu0 %v3593_v49 }
0x26d0   :  { %v3340_v20 = vadd.f32 %v3339_v34, %v3336_v37  ;;  %v6772_v37 = vld [vmem:[#allocation15 + $0x8] sm:$0xff]  ;;  %v3592_v34 = vld [vmem:[#allocation17 + $0x58] sm:$0xff] }
0x26d1   :  { %3884 = vmatpush.msra.mxu2 %v6772_v37  ;;  %3605 = vmatpush.msrb.mxu0 %v3592_v34 }
0x26d2   :  { %3463 = vrot.lane.b32.xlu2 %v3340_v20, %s4951_s25  ;;  %v6775_v20 = vld [vmem:[#allocation15] sm:$0xff] }
0x26d3   :  { %3885 = vmatpush.msra.mxu2 %v6775_v20 }
0x2711   :  { %v3459_v15 = vpop.permute.xlu0 %3458 }
0x2712   :  { %3461 = vst.msk [vmem:[#allocation3] sm:$0x3] %vm2038_vm9, %v3459_v15  ;;  %v3591_v15 = vld [vmem:[#allocation17 + $0x50] sm:$0xff] }
0x2713   :  { %3606 = vmatpush.msrb.mxu0 %v3591_v15 }
0x272c   :  { %v3464_v43 = vpop.permute.xlu2 %3463 }
0x272d   :  { %3466 = vst.msk [vmem:[#allocation3] sm:$0x3] %vm2044_vm5, %v3464_v43  ;;  %v3590_v43 = vld [vmem:[#allocation17 + $0x48] sm:$0xff] }
0x272e   :  { %3607 = vmatpush.msrb.mxu0 %v3590_v43 }
0x2734   :  { %v3467_v36 = vld [vmem:[#allocation3] sm:$0x3] }
0x2735   :  { %3504 = vmatmul.f32.vlgmr.msrb.gmra.mxu2 %v3467_v36  ;;  %v3589_v36 = vld [vmem:[#allocation17 + $0x40] sm:$0xff] }
0x2736   :  { %3955 = vmatpush.msrb.mxu2 %v3596_v11  ;;  %3608 = vmatpush.msrb.mxu0 %v3589_v36 }
0x2738   :  { %3956 = vmatpush.msrb.mxu2 %v3595_v17  ;;  %v4534_v17 = vld [vmem:[%s7125_s27] ss:$0 sm:$0xff] }
0x273a   :  { %3957 = vmatpush.msrb.mxu2 %v3594_v18 }
0x273c   :  { %3958 = vmatpush.msrb.mxu2 %v3593_v49 }
0x273e   :  { %3959 = vmatpush.msrb.mxu2 %v3592_v34 }
0x2740   :  { %3960 = vmatpush.msrb.mxu2 %v3591_v15 }
0x2742   :  { %3961 = vmatpush.msrb.mxu2 %v3590_v43 }
0x2744   :  { %3962 = vmatpush.msrb.mxu2 %v3589_v36 }
0x27b8   :  { %v3505_v59 = vpop.f32.mrf.mxu2 }
0x27b9   :  { %v3506_v12 = vadd.f32 %v4532_v50, %v3505_v59  ;;  %v3588_v50 = vld [vmem:[#allocation17 + $0x38] sm:$0xff]  ;;  %v3587_v59 = vld [vmem:[#allocation17 + $0x30] sm:$0xff] }
0x27ba   :  { %3609 = vmatpush.msrb.mxu0 %v3588_v50  ;;  %3963 = vmatpush.msrb.mxu2 %v3588_v50 }
0x27bb   :  { %v3536_v55 = vadd.f32 %v6597_v31, %v3506_v12 }
0x27bc   :  { %3610 = vmatpush.msrb.mxu0 %v3587_v59  ;;  %3964 = vmatpush.msrb.mxu2 %v3587_v59 }
0x27bd   :  { %v4452_v46 = vmul.f32 -1.442695, %v3536_v55  ;;  %v3585_v55 = vld [vmem:[#allocation17 + $0x20] sm:$0xff] }
0x27bf   :  { %4700 = vpow2.f32 %v4452_v46 }
0x27c5   :  { %v4701_v30 = vpop.eup %4700 }
0x27c6   :  { %v3540_v39 = vadd.f32 1.0, %v4701_v30 }
0x27c8   :  { %4702 = vrcp.f32 %v3540_v39  ;;  %v3552_v21 = vand.u32 2147483648, %v3540_v39  ;;  %v3550_v38 = vand.u32 2147483647, %v3540_v39  ;;  %vm3546_vm6 = vweird.f32 %v3540_v39 }
0x27ca   :  { %v3553_v40 = vor.u32 1.1754944e-38, %v3552_v21  ;;  %vm3551_vm0 = vcmp.eq.f32.partialorder %v3550_v38, 8.507059e+37  ;;  %v3583_v21 = vld [vmem:[#allocation17 + $0x10] sm:$0xff]  ;;  %v3581_v38 = vld [vmem:[#allocation17] sm:$0xff] }
0x27ce   :  { %v4703_v13 = vpop.eup %4702 }
0x27cf   :  { %v3542_v28 = vmul.f32 %v4703_v13, %v3540_v39  ;;  %vm3547_vm5 = vweird.f32 %v4703_v13 }
0x27d0   :  { %vm3548_vm8 = vmor %vm3546_vm6, %vm3547_vm5  ;;  %vm7130_vm6 = vcmask 130048  }
0x27d1   :  { %v3543_v8 = vsub.f32 1.0, %v3542_v28 }
0x27d3   :  { %v3544_v10 = vmul.f32 %v4703_v13, %v3543_v8  ;;  %v3584_v8 = vld [vmem:[#allocation17 + $0x18] sm:$0xff] }
0x27d5   :  { %v3545_v51 = vadd.f32 %v4703_v13, %v3544_v10  ;;  %v3582_v10 = vld [vmem:[#allocation17 + $0x8] sm:$0xff] }
0x27d7   :  { %v3549_v3 = vsel %vm3548_vm8, %v4703_v13, %v3545_v51 }
0x27d8   :  { %v3554_v31 = vsel %vm3551_vm0, %v3553_v40, %v3549_v3 }
0x27d9   :  { %v3560_v56 = vmul.f32 %v3558_v52, %v3554_v31  ;;  %v3567_v46 = vsub.f32 1.0, %v3554_v31  ;;  %v3573_v39 = vmul.f32 %v3554_v31, %v6555_v61 }
0x27db   :  { %3562 = vrot.lane.b32.xlu0 %v3560_v56, %s4950_s7 }
0x284d   :  { %v3563_v14 = vpop.permute.xlu0 %3562 }
0x284e   :  { %v3565_v53 = vadd.f32 %v3563_v14, %v3506_v12  ;;  %v3586_v12 = vld [vmem:[#allocation17 + $0x28] sm:$0xff] }
0x284f   :  { %3611 = vmatpush.msrb.mxu0 %v3586_v12  ;;  %3965 = vmatpush.msrb.mxu2 %v3586_v12 }
0x2850   :  { %4704 = vtanh.f32 %v3565_v53 }
0x2851   :  { %3612 = vmatpush.msrb.mxu0 %v3585_v55  ;;  %3966 = vmatpush.msrb.mxu2 %v3585_v55 }
0x2853   :  { %3613 = vmatpush.msrb.mxu0 %v3584_v8  ;;  %3967 = vmatpush.msrb.mxu2 %v3584_v8 }
0x2855   :  { %3614 = vmatpush.msrb.mxu0 %v3583_v21  ;;  %3968 = vmatpush.msrb.mxu2 %v3583_v21 }
0x2856   :  { %v4705_v7 = vpop.eup %4704 }
0x2857   :  { %3569 = vrot.lane.b32.xlu2 %v4705_v7, %s4951_s25  ;;  %3615 = vmatpush.msrb.mxu0 %v3582_v10 }
0x2858   :  { %3969 = vmatpush.msrb.mxu2 %v3582_v10 }
0x2859   :  { %3616 = vmatpush.msrb.mxu0 %v3581_v38 }
0x285a   :  { %3970 = vmatpush.msrb.mxu2 %v3581_v38 }
0x28b1   :  { %v3570_v30 = vpop.permute.xlu2 %3569 }
0x28b2   :  { %v3572_v13 = vmul.f32 %v3570_v30, %v3567_v46 }
0x28b4   :  { %v6780_v28 = vadd.f32 %v3573_v39, %v3572_v13 }
0x28b6   :  { %3576 = vrot.lane.b32.xlu0 %v6780_v28, %s4951_s25 }
0x2928   :  { %v3577_v61 = vpop.permute.xlu0 %3576 }
0x2929   :  { %3579 = vst.msk [vmem:[#allocation3] sm:$0x3] %vm2161_vm3, %v3577_v61  ;;  %4456 = vmatmul.msk.f32.vlgmr.msrb.gmra.mxu1 %vm361_vm2, %v3577_v61  ;;  %4458 = vmatmul.msk.f32.vlgmr.msra.gmra.mxu2 %vm361_vm2, %v3577_v61 }
0x2930   :  { %v3580_v51 = vld [vmem:[#allocation3] sm:$0x3] }
0x2931   :  { %3617 = vmatmul.f32.vlgmr.msrb.gmra.mxu0 %v3580_v51 }
0x29a6   :  { %v3718_v40 = vpop.f32.mrf.mxu1 }
0x29a7   :  { %v3721_v3 = vperm.slane %v3718_v40, 0  ;;  %v3724_v52 = vperm.slane %v3718_v40, 1 }
0x29a9   :  { %v3722_v31 = vmul.f32 %v5729_v35, %v3721_v3  ;;  %v3723_v56 = vmul.f32 %v5727_v22, %v3721_v3  ;;  %v3725_v14 = vmul.f32 %v5725_v58, %v3724_v52  ;;  %v3726_v53 = vmul.f32 %v5723_v16, %v3724_v52 }
0x29ab   :  { %v3727_v7 = vadd.f32 %v3725_v14, %v3722_v31  ;;  %v3728_v11 = vadd.f32 %v3726_v53, %v3723_v56 }
0x29ad   :  { %v3729_v18 = vadd.f32 %v3727_v7, %v5738_v1  ;;  %v3730_v49 = vadd.f32 %v3728_v11, %v5740_v2 }
0x29ae   :  { %v3618_v34 = vpop.f32.mrf.mxu0 }
0x29af   :  { %4706 = vtanh.f32 %v3729_v18  ;;  %v3619_v15 = vadd.f32 %v4534_v17, %v3618_v34 }
0x29b0   :  { %4708 = vtanh.f32 %v3730_v49 }
0x29b1   :  { %3622 = vst [vmem:[#allocation18 + $0xa] sm:$0x3] %v3619_v15  ;;  %v3623_v43 = vsel %vm2206_vm4, %v3619_v15, -inf }
0x29b2   :  { %3624 = vmax.xlane.f32.xlu0 %v3623_v43 }
0x29b5   :  { %v4707_v36 = vpop.eup %4706 }
0x29b6   :  { %v4709_v50 = vpop.eup %4708  ;;  %v3733_v59 = vmul.f32 %v6575_v47, %v4707_v36 }
0x29b7   :  { %v3734_v12 = vmul.f32 %v6575_v47, %v4709_v50 }
0x29b8   :  { %v3735_v55 = vsel %vm361_vm2, %v3733_v59, 0.0 }
0x29b9   :  { %v3738_v46 = vsel %vm361_vm2, %v3734_v12, 0.0  ;;  %3736 = vadd.xlane.f32.xlu1 %v3735_v55 }
0x29ba   :  { %3739 = vadd.xlane.f32.xlu2 %v3738_v46 }
0x2a25   :  { %v3625_v30 = vpop.xlane.xlu0 %3624 }
0x2a26   :  { %vm3626_vm14 = vcmp.eq.f32.partialorder %v3619_v15, %v3625_v30 }
0x2a27   :  { %v3627_v39 = vsel %vm3626_vm14, %v5145_v6, 128 }
0x2a28   :  { %v3628_v13 = vsel %vm2206_vm4, %v3627_v39, 2147483647 }
0x2a29   :  { %v3630_v8 = vshra.s32 %v3628_v13, 16 }
0x2a2b   :  { %v3632_v21 = vcvt.s32.f32 %v3630_v8 }
0x2a2c   :  { %v3737_v10 = vpop.xlane.xlu1 %3736 }
0x2a2d   :  { %v3740_v38 = vpop.xlane.xlu2 %3739  ;;  %v3741_v61 = vadd.f32 %v3737_v10, %v5765_v27  ;;  %3633 = vmin.xlane.f32.xlu1 %v3632_v21 }
0x2a2e   :  { %v3742_v47 = vadd.f32 %v3740_v38, %v5758_v24 }
0x2a2f   :  { %v3743_v51 = vsel %vm1962_vm11, %v3741_v61, -inf }
0x2a30   :  { %v3744_v40 = vsel %vm1962_vm11, %v3742_v47, -inf }
0x2a31   :  { %v3745_v3 = vmax.f32 %v3743_v51, %v3744_v40 }
0x2a33   :  { %v3746_v52 = vrot.slane %v3745_v3, 4 }
0x2a35   :  { %v3747_v31 = vmax.f32 %v3745_v3, %v3746_v52 }
0x2a37   :  { %v3748_v56 = vrot.slane %v3747_v31, 2 }
0x2a39   :  { %v3749_v14 = vmax.f32 %v3747_v31, %v3748_v56 }
0x2a3b   :  { %v3750_v53 = vrot.slane %v3749_v14, 1 }
0x2a3d   :  { %v3751_v7 = vmax.f32 %v3749_v14, %v3750_v53 }
0x2a3f   :  { %v3752_v11 = vsub.f32 %v3741_v61, %v3751_v7  ;;  %v3753_v17 = vsub.f32 %v3742_v47, %v3751_v7 }
0x2a41   :  { %v3754_v18 = vmul.f32 1.442695, %v3752_v11  ;;  %v3756_v49 = vmul.f32 1.442695, %v3753_v17  ;;  %v4533_v11 = vld [vmem:[%s7046_s23] ss:$0 sm:$0xff]  ;;  %v3887_v17 = vpop.f32.mrf.mxu2 }
0x2a43   :  { %4710 = vpow2.f32 %v3754_v18  ;;  %v6814_v18 = vadd.f32 %v4533_v11, %v3887_v17  ;;  %v4052_v11 = vld [vmem:[#allocation14 + $0x18] sm:$0xff]  ;;  %v4051_v17 = vld [vmem:[#allocation14 + $0x10] sm:$0xff] }
0x2a44   :  { %4712 = vpow2.f32 %v3756_v49  ;;  %v3629_v49 = vand.u32 65535, %v3628_v13  ;;  %4067 = vmatpush.msra.mxu3 %v4052_v11 }
0x2a46   :  { %4068 = vmatpush.msra.mxu3 %v4051_v17 }
0x2a49   :  { %v4711_v34 = vpop.eup %4710 }
0x2a4a   :  { %v4713_v15 = vpop.eup %4712  ;;  %v3758_v43 = vsel %vm1962_vm11, %v4711_v34, 0.0 }
0x2a4b   :  { %v3759_v36 = vsel %vm1962_vm11, %v4713_v15, 0.0 }
0x2a4c   :  { %v3760_v50 = vadd.f32 %v3759_v36, %v3758_v43 }
0x2a4e   :  { %v3761_v59 = vrot.slane %v3760_v50, 4 }
0x2a50   :  { %v3762_v12 = vadd.f32 %v3761_v59, %v3760_v50  ;;  %v6818_v59 = vld [vmem:[#allocation2 + $0x8] sm:$0xff] }
0x2a52   :  { %v3763_v55 = vrot.slane %v3762_v12, 2 }
0x2a54   :  { %v3764_v46 = vadd.f32 %v3763_v55, %v3762_v12  ;;  %v6821_v55 = vld [vmem:[#allocation2] sm:$0xff] }
0x2a56   :  { %v3765_v30 = vrot.slane %v3764_v46, 1 }
0x2a58   :  { %v3766_v39 = vadd.f32 %v3765_v30, %v3764_v46 }
0x2a5a   :  { %4714 = vrcp.f32 %v3766_v39  ;;  %v3778_v61 = vand.u32 2147483648, %v3766_v39  ;;  %v3776_v51 = vand.u32 2147483647, %v3766_v39  ;;  %vm3772_vm15 = vweird.f32 %v3766_v39 }
0x2a5c   :  { %v3779_v3 = vor.u32 1.1754944e-38, %v3778_v61  ;;  %vm3777_vm1 = vcmp.eq.f32.partialorder %v3776_v51, 8.507059e+37 }
0x2a60   :  { %v4715_v8 = vpop.eup %4714 }
0x2a61   :  { %v3768_v10 = vmul.f32 %v4715_v8, %v3766_v39  ;;  %vm3773_vm12 = vweird.f32 %v4715_v8 }
0x2a62   :  { %vm3774_vm7 = vmor %vm3772_vm15, %vm3773_vm12 }
0x2a63   :  { %v3769_v38 = vsub.f32 1.0, %v3768_v10 }
0x2a65   :  { %v3770_v47 = vmul.f32 %v4715_v8, %v3769_v38 }
0x2a67   :  { %v3771_v40 = vadd.f32 %v4715_v8, %v3770_v47 }
0x2a69   :  { %v3775_v52 = vsel %vm3774_vm7, %v4715_v8, %v3771_v40 }
0x2a6a   :  { %v3780_v31 = vsel %vm3777_vm1, %v3779_v3, %v3775_v52 }
0x2a6b   :  { %v3782_v56 = vmul.f32 %v4713_v15, %v3780_v31  ;;  %v3781_v14 = vmul.f32 %v4711_v34, %v3780_v31  ;;  %v3631_v15 = vcvt.s32.f32 %v3629_v49  ;;  %v4049_v49 = vld [vmem:[#allocation14] sm:$0xff] }
0x2a6d   :  { %v3786_v53 = vsel %vm1962_vm11, %v3782_v56, 0.0  ;;  %v3783_v7 = vsel %vm1962_vm11, %v3781_v14, 0.0 }
0x2a6e   :  { %3787 = vadd.xlane.f32.xlu0 %v3786_v53  ;;  %3784 = vadd.xlane.f32.xlu1 %v3783_v7 }
0x2a87   :  { %3911 = vrot.lane.b32.xlu1 %v6814_v18, %s4950_s7 }
0x2aa0   :  { %v3634_v43 = vpop.xlane.xlu1 %3633 }
0x2aa1   :  { %vm3635_vm5 = vcmp.eq.f32.partialorder %v3632_v21, %v3634_v43 }
0x2aa2   :  { %v3636_v34 = vsel %vm3635_vm5, %v3631_v15, inf }
0x2aa3   :  { %3637 = vmin.xlane.f32.xlu2 %v3636_v34 }
0x2ae1   :  { %v3785_v36 = vpop.xlane.xlu1 %3784  ;;  %v3788_v50 = vpop.xlane.xlu0 %3787 }
0x2ae2   :  { %v3790_v12 = vmul.f32 %v6818_v59, %v3788_v50  ;;  %v3789_v46 = vmul.f32 %v6821_v55, %v3785_v36 }
0x2ae4   :  { %3805 = vmatpush.msra.mxu1 %v3790_v12 }
0x2ae6   :  { %3806 = vmatpush.msra.mxu1 %v3789_v46 }
0x2ae7   :  { %4457 = vmatmul.msk.f32.vlgmr.msra.gmra.mxu1 %vm7130_vm6, %v5917_v42 }
0x2ae8   :  { %3842 = vmatpush.msrb.mxu1 %v6664_v41  ;;  %v3640_v41 = vcvt.f32.s32 %v3634_v43 }
0x2aea   :  { %3843 = vmatpush.msrb.mxu1 %v6669_v23 }
0x2aec   :  { %3844 = vmatpush.msrb.mxu1 %v6675_v57  ;;  %v3641_v57 = vshll.u32 %v3640_v41, 16 }
0x2aee   :  { %3845 = vmatpush.msrb.mxu1 %v6681_v62 }
0x2af0   :  { %3846 = vmatpush.msrb.mxu1 %v6687_v19 }
0x2af2   :  { %3847 = vmatpush.msrb.mxu1 %v6693_v26 }
0x2af4   :  { %3848 = vmatpush.msrb.mxu1 %v6699_v4  ;;  %v3689_v4 = vstv %s3688_s15 }
0x2af6   :  { %3849 = vmatpush.msrb.mxu1 %v6705_v54  ;;  %v3686_v54 = vstv %s3685_s1 }
0x2af8   :  { %3850 = vmatpush.msrb.mxu1 %v6711_v9 }
0x2af9   :  { %v3912_v52 = vpop.permute.xlu1 %3911 }
0x2afa   :  { %3851 = vmatpush.msrb.mxu1 %v6717_v33 }
0x2afc   :  { %3852 = vmatpush.msrb.mxu1 %v6723_v48  ;;  %v3687_v48 = vmul.f32 %v3686_v54, %v6176_v60 }
0x2afe   :  { %3853 = vmatpush.msrb.mxu1 %v6732_v32 }
0x2b00   :  { %3854 = vmatpush.msrb.mxu1 %v6738_v45 }
0x2b02   :  { %3855 = vmatpush.msrb.mxu1 %v6743_v44 }
0x2b04   :  { %3856 = vmatpush.msrb.mxu1 %v6749_v63 }
0x2b06   :  { %3857 = vmatpush.msrb.mxu1 %v6755_v0 }
0x2b08   :  { %4236 = vmatpush.msra.mxu1 %v6767_v29  ;;  %v4535_v29 = vld [vmem:[%s7045_s22] ss:$0 sm:$0xff] }
0x2b0a   :  { %4237 = vmatpush.msra.mxu1 %v6769_v5 }
0x2b0c   :  { %4238 = vmatpush.msra.mxu1 %v6772_v37 }
0x2b0e   :  { %4239 = vmatpush.msra.mxu1 %v6775_v20 }
0x2b16   :  { %v3638_v23 = vpop.xlane.xlu2 %3637 }
0x2b17   :  { %v3639_v62 = vcvt.f32.s32 %v3638_v23 }
0x2b19   :  { %v3642_v19 = vadd.s32 %v3641_v57, %v3639_v62 }
0x2b1b   :  { %vm3643_vm8 = vcmp.eq.s32.totalorder %v5145_v6, %v3642_v19 }
0x2b1c   :  { %4454 = vmatmul.msk.f32.vlgmr.msrb.gmra.mxu3 %vm3643_vm8, %v4956_v25 }
0x2b64   :  { %v3808_v26 = vpop.f32.mrf.mxu1 }
0x2b65   :  { %3812 = vrot.lane.b32.xlu2 %v3808_v26, %s4955_s13 }
0x2b9f   :  { %v3679_v9 = vpop.f32.mrf.mxu3 }
0x2ba0   :  { %v3690_v33 = vmul.f32 %v3689_v4, %v3679_v9  ;;  %v4537_v9 = vld [vmem:[%s7125_s27] ss:$0 sm:$0xff] }
0x2ba2   :  { %v3692_v32 = vrot.slane %v3690_v33, 6 }
0x2ba4   :  { %v3694_v45 = vadd.f32 %v3692_v32, %v3687_v48 }
0x2ba6   :  { %3817 = vrot.lane.b32.xlu0 %v3694_v45, %s4951_s25 }
0x2bbf   :  { %v3813_v44 = vpop.permute.xlu2 %3812 }
0x2bc0   :  { %3815 = vst.msk [vmem:[#allocation3] sm:$0x3] %vm2038_vm9, %v3813_v44 }
0x2c18   :  { %v3818_v63 = vpop.permute.xlu0 %3817 }
0x2c19   :  { %3820 = vst.msk [vmem:[#allocation3 - $0x2] sm:$0xc] %vm2404_vm13, %v3818_v63 }
0x2c20   :  { %v3821_v0 = vld [vmem:[#allocation3] sm:$0x3] }
0x2c21   :  { %3858 = vmatmul.f32.vlgmr.msrb.gmra.mxu1 %v3821_v0 }
0x2c9e   :  { %v3859_v5 = vpop.f32.mrf.mxu1 }
0x2c9f   :  { %v3860_v37 = vadd.f32 %v4535_v29, %v3859_v5 }
0x2ca1   :  { %v3890_v20 = vadd.f32 %v6814_v18, %v3860_v37  ;;  %v4050_v18 = vld [vmem:[#allocation14 + $0x8] sm:$0xff] }
0x2ca2   :  { %4069 = vmatpush.msra.mxu3 %v4050_v18 }
0x2ca3   :  { %v4459_v13 = vmul.f32 -1.442695, %v3890_v20 }
0x2ca4   :  { %4070 = vmatpush.msra.mxu3 %v4049_v49 }
0x2ca5   :  { %4716 = vpow2.f32 %v4459_v13 }
0x2cab   :  { %v4717_v21 = vpop.eup %4716 }
0x2cac   :  { %v3894_v30 = vadd.f32 1.0, %v4717_v21 }
0x2cae   :  { %4718 = vrcp.f32 %v3894_v30  ;;  %v3906_v38 = vand.u32 2147483648, %v3894_v30  ;;  %v3904_v47 = vand.u32 2147483647, %v3894_v30  ;;  %vm3900_vm0 = vweird.f32 %v3894_v30 }
0x2cb0   :  { %v3907_v40 = vor.u32 1.1754944e-38, %v3906_v38  ;;  %vm3905_vm12 = vcmp.eq.f32.partialorder %v3904_v47, 8.507059e+37 }
0x2cb4   :  { %v4719_v39 = vpop.eup %4718 }
0x2cb5   :  { %v3896_v8 = vmul.f32 %v4719_v39, %v3894_v30  ;;  %vm3901_vm13 = vweird.f32 %v4719_v39 }
0x2cb6   :  { %vm3902_vm14 = vmor %vm3900_vm0, %vm3901_vm13 }
0x2cb7   :  { %v3897_v10 = vsub.f32 1.0, %v3896_v8 }
0x2cb9   :  { %v3898_v61 = vmul.f32 %v4719_v39, %v3897_v10 }
0x2cbb   :  { %v3899_v51 = vadd.f32 %v4719_v39, %v3898_v61 }
0x2cbd   :  { %v3903_v3 = vsel %vm3902_vm14, %v4719_v39, %v3899_v51 }
0x2cbe   :  { %v3908_v31 = vsel %vm3905_vm12, %v3907_v40, %v3903_v3 }
0x2cbf   :  { %v3914_v56 = vmul.f32 %v3912_v52, %v3908_v31  ;;  %v3921_v43 = vsub.f32 1.0, %v3908_v31  ;;  %v3927_v34 = vmul.f32 %v3908_v31, %v6780_v28 }
0x2cc1   :  { %3916 = vrot.lane.b32.xlu0 %v3914_v56, %s4950_s7 }
0x2d33   :  { %v3917_v14 = vpop.permute.xlu0 %3916 }
0x2d34   :  { %v3919_v53 = vadd.f32 %v3917_v14, %v3860_v37 }
0x2d36   :  { %4720 = vtanh.f32 %v3919_v53 }
0x2d3c   :  { %v4721_v7 = vpop.eup %4720 }
0x2d3d   :  { %3923 = vrot.lane.b32.xlu2 %v4721_v7, %s4951_s25 }
0x2d97   :  { %v3924_v15 = vpop.permute.xlu2 %3923 }
0x2d98   :  { %v3926_v36 = vmul.f32 %v3924_v15, %v3921_v43 }
0x2d9a   :  { %v6860_v50 = vadd.f32 %v3927_v34, %v3926_v36 }
0x2d9c   :  { %3930 = vrot.lane.b32.xlu1 %v6860_v50, %s4951_s25 }
0x2e0e   :  { %v3931_v12 = vpop.permute.xlu1 %3930 }
0x2e0f   :  { %3933 = vst.msk [vmem:[#allocation3] sm:$0x3] %vm2161_vm3, %v3931_v12  ;;  %4463 = vmatmul.msk.f32.vlgmr.msra.gmra.mxu3 %vm361_vm2, %v3931_v12  ;;  %4465 = vmatmul.msk.f32.vlgmr.msra.gmra.mxu1 %vm361_vm2, %v3931_v12 }
0x2e16   :  { %v3934_v46 = vld [vmem:[#allocation3] sm:$0x3] }
0x2e17   :  { %3971 = vmatmul.f32.vlgmr.msrb.gmra.mxu2 %v3934_v46 }
0x2e92   :  { %v4072_v41 = vpop.f32.mrf.mxu3 }
0x2e93   :  { %v4075_v23 = vperm.slane %v4072_v41, 0  ;;  %v4078_v57 = vperm.slane %v4072_v41, 1 }
0x2e95   :  { %v4076_v28 = vmul.f32 %v5729_v35, %v4075_v23  ;;  %v4077_v62 = vmul.f32 %v5727_v22, %v4075_v23  ;;  %v4079_v19 = vmul.f32 %v5725_v58, %v4078_v57  ;;  %v4080_v26 = vmul.f32 %v5723_v16, %v4078_v57  ;;  %v4746_v35 = vld [vmem:[%s7041_s18] ss:$0 sm:$0xff]  ;;  %s4957_s18 = smov [#allocation18]  }
0x2e96   :  { %s4335_s10 = sshll.u32 %s4957_s18, 4  ;;  %s4336_s10 = int_to_ptr.vmem [resolvable:$true] %s4335_s10 }
0x2e97   :  { %v4081_v4 = vadd.f32 %v4079_v19, %v4076_v28  ;;  %v4082_v54 = vadd.f32 %v4080_v26, %v4077_v62 }
0x2e99   :  { %v4083_v33 = vadd.f32 %v4081_v4, %v5738_v1  ;;  %v4084_v48 = vadd.f32 %v4082_v54, %v5740_v2 }
0x2e9a   :  { %v3972_v32 = vpop.f32.mrf.mxu2 }
0x2e9b   :  { %4722 = vtanh.f32 %v4083_v33  ;;  %v3973_v45 = vadd.f32 %v4537_v9, %v3972_v32  ;;  %v4536_v32 = vld [vmem:[%s7046_s23] ss:$0 sm:$0xff] }
0x2e9c   :  { %4724 = vtanh.f32 %v4084_v48 }
0x2e9d   :  { %3976 = vst [vmem:[#allocation18 + $0xc] sm:$0x3] %v3973_v45  ;;  %v3977_v22 = vsel %vm2206_vm4, %v3973_v45, -inf }
0x2e9e   :  { %3978 = vmax.xlane.f32.xlu1 %v3977_v22 }
0x2ea1   :  { %v4723_v58 = vpop.eup %4722 }
0x2ea2   :  { %v4725_v16 = vpop.eup %4724  ;;  %v4087_v44 = vmul.f32 %v4746_v35, %v4723_v58 }
0x2ea3   :  { %v4088_v63 = vmul.f32 %v4746_v35, %v4725_v16 }
0x2ea4   :  { %v4089_v1 = vsel %vm361_vm2, %v4087_v44, 0.0 }
0x2ea5   :  { %v4092_v2 = vsel %vm361_vm2, %v4088_v63, 0.0  ;;  %4090 = vadd.xlane.f32.xlu0 %v4089_v1  ;;  %v4015_v63 = vld [vmem:[%s7042_s19 + $0x78] sm:$0xff]  ;;  %v4014_v1 = vld [vmem:[%s7042_s19 + $0x70] sm:$0xff] }
0x2ea6   :  { %4093 = vadd.xlane.f32.xlu2 %v4092_v2  ;;  %4016 = vmatpush.msra.mxu0 %v4015_v63  ;;  %v4013_v2 = vld [vmem:[%s7042_s19 + $0x68] sm:$0xff] }
0x2ea8   :  { %4017 = vmatpush.msra.mxu0 %v4014_v1 }
0x2eaa   :  { %4018 = vmatpush.msra.mxu0 %v4013_v2 }
0x2f11   :  { %v3979_v0 = vpop.xlane.xlu1 %3978 }
0x2f12   :  { %vm3980_vm15 = vcmp.eq.f32.partialorder %v3973_v45, %v3979_v0  ;;  %v4241_v45 = vpop.f32.mrf.mxu1  ;;  %v4012_v0 = vld [vmem:[%s7042_s19 + $0x60] sm:$0xff] }
0x2f13   :  { %v3981_v29 = vsel %vm3980_vm15, %v5145_v6, 128  ;;  %v6895_v22 = vadd.f32 %v4536_v32, %v4241_v45  ;;  %4019 = vmatpush.msra.mxu0 %v4012_v0 }
0x2f14   :  { %v3982_v5 = vsel %vm2206_vm4, %v3981_v29, 2147483647  ;;  %v4011_v29 = vld [vmem:[%s7042_s19 + $0x58] sm:$0xff] }
0x2f15   :  { %v3984_v37 = vshra.s32 %v3982_v5, 16  ;;  %v3983_v58 = vand.u32 65535, %v3982_v5  ;;  %v4010_v5 = vld [vmem:[%s7042_s19 + $0x50] sm:$0xff]  ;;  %4020 = vmatpush.msra.mxu0 %v4011_v29 }
0x2f17   :  { %v3986_v20 = vcvt.s32.f32 %v3984_v37  ;;  %v3985_v35 = vcvt.s32.f32 %v3983_v58  ;;  %v4009_v37 = vld [vmem:[%s7042_s19 + $0x48] sm:$0xff]  ;;  %4021 = vmatpush.msra.mxu0 %v4010_v5 }
0x2f18   :  { %v4091_v13 = vpop.xlane.xlu0 %4090 }
0x2f19   :  { %v4094_v21 = vpop.xlane.xlu2 %4093  ;;  %v4095_v30 = vadd.f32 %v4091_v13, %v5765_v27  ;;  %3987 = vmin.xlane.f32.xlu0 %v3986_v20  ;;  %4022 = vmatpush.msra.mxu0 %v4009_v37 }
0x2f1a   :  { %v4096_v39 = vadd.f32 %v4094_v21, %v5758_v24 }
0x2f1b   :  { %v4097_v8 = vsel %vm1962_vm11, %v4095_v30, -inf }
0x2f1c   :  { %v4098_v10 = vsel %vm1962_vm11, %v4096_v39, -inf }
0x2f1d   :  { %v4099_v38 = vmax.f32 %v4097_v8, %v4098_v10  ;;  %v4006_v10 = vld [vmem:[%s7042_s19 + $0x30] sm:$0xff] }
0x2f1f   :  { %v4100_v61 = vrot.slane %v4099_v38, 4 }
0x2f21   :  { %v4101_v47 = vmax.f32 %v4099_v38, %v4100_v61  ;;  %v4005_v38 = vld [vmem:[%s7042_s19 + $0x28] sm:$0xff]  ;;  %v4002_v61 = vld [vmem:[%s7042_s19 + $0x10] sm:$0xff] }
0x2f23   :  { %v4102_v51 = vrot.slane %v4101_v47, 2 }
0x2f25   :  { %v4103_v40 = vmax.f32 %v4101_v47, %v4102_v51  ;;  %v4000_v47 = vld [vmem:[%s7042_s19] sm:$0xff] }
0x2f27   :  { %v4104_v3 = vrot.slane %v4103_v40, 1 }
0x2f29   :  { %v4105_v52 = vmax.f32 %v4103_v40, %v4104_v3 }
0x2f2b   :  { %v4106_v31 = vsub.f32 %v4095_v30, %v4105_v52  ;;  %v4107_v56 = vsub.f32 %v4096_v39, %v4105_v52  ;;  %v4007_v39 = vld [vmem:[%s7042_s19 + $0x38] sm:$0xff] }
0x2f2d   :  { %v4108_v14 = vmul.f32 1.442695, %v4106_v31  ;;  %v4110_v53 = vmul.f32 1.442695, %v4107_v56 }
0x2f2f   :  { %4726 = vpow2.f32 %v4108_v14  ;;  %v4191_v14 = vld [vmem:[%s7043_s20 + $0x78] sm:$0xff] }
0x2f30   :  { %4728 = vpow2.f32 %v4110_v53  ;;  %v4190_v53 = vld [vmem:[%s7043_s20 + $0x70] sm:$0xff] }
0x2f35   :  { %v4727_v27 = vpop.eup %4726 }
0x2f36   :  { %v4729_v7 = vpop.eup %4728  ;;  %v4112_v24 = vsel %vm1962_vm11, %v4727_v27, 0.0 }
0x2f37   :  { %v4113_v11 = vsel %vm1962_vm11, %v4729_v7, 0.0 }
0x2f38   :  { %v4114_v17 = vadd.f32 %v4113_v11, %v4112_v24  ;;  %v4185_v24 = vld [vmem:[%s7043_s20 + $0x48] sm:$0xff]  ;;  %v4184_v11 = vld [vmem:[%s7043_s20 + $0x40] sm:$0xff] }
0x2f3a   :  { %v4115_v18 = vrot.slane %v4114_v17, 4 }
0x2f3c   :  { %v4116_v49 = vadd.f32 %v4115_v18, %v4114_v17  ;;  %v4183_v17 = vld [vmem:[%s7043_s20 + $0x38] sm:$0xff]  ;;  %v4182_v18 = vld [vmem:[%s7043_s20 + $0x30] sm:$0xff] }
0x2f3e   :  { %v4117_v43 = vrot.slane %v4116_v49, 2 }
0x2f40   :  { %v4118_v15 = vadd.f32 %v4117_v43, %v4116_v49  ;;  %v4181_v49 = vld [vmem:[%s7043_s20 + $0x28] sm:$0xff] }
0x2f42   :  { %v4119_v34 = vrot.slane %v4118_v15, 1 }
0x2f44   :  { %v4120_v36 = vadd.f32 %v4119_v34, %v4118_v15 }
0x2f46   :  { %4730 = vrcp.f32 %v4120_v36  ;;  %v4132_v23 = vand.u32 2147483648, %v4120_v36  ;;  %v4130_v28 = vand.u32 2147483647, %v4120_v36  ;;  %vm4126_vm4 = vweird.f32 %v4120_v36 }
0x2f48   :  { %v4133_v19 = vor.u32 1.1754944e-38, %v4132_v23  ;;  %vm4131_vm1 = vcmp.eq.f32.partialorder %v4130_v28, 8.507059e+37  ;;  %v4180_v23 = vld [vmem:[%s7043_s20 + $0x20] sm:$0xff]  ;;  %v4179_v28 = vld [vmem:[%s7043_s20 + $0x18] sm:$0xff] }
0x2f4c   :  { %v4731_v12 = vpop.eup %4730 }
0x2f4d   :  { %v4122_v46 = vmul.f32 %v4731_v12, %v4120_v36  ;;  %vm4127_vm2 = vweird.f32 %v4731_v12 }
0x2f4e   :  { %vm4128_vm7 = vmor %vm4126_vm4, %vm4127_vm2 }
0x2f4f   :  { %v4123_v41 = vsub.f32 1.0, %v4122_v46 }
0x2f51   :  { %v4124_v57 = vmul.f32 %v4731_v12, %v4123_v41 }
0x2f53   :  { %v4125_v62 = vadd.f32 %v4731_v12, %v4124_v57 }
0x2f55   :  { %v4129_v26 = vsel %vm4128_vm7, %v4731_v12, %v4125_v62  ;;  %v4177_v62 = vld [vmem:[%s7043_s20 + $0x8] sm:$0xff] }
0x2f56   :  { %v4134_v4 = vsel %vm4131_vm1, %v4133_v19, %v4129_v26  ;;  %v4176_v19 = vld [vmem:[%s7043_s20] sm:$0xff] }
0x2f57   :  { %v4136_v54 = vmul.f32 %v4729_v7, %v4134_v4  ;;  %v4135_v9 = vmul.f32 %v4727_v27, %v4134_v4  ;;  %v4189_v27 = vld [vmem:[%s7043_s20 + $0x68] sm:$0xff]  ;;  %v4186_v7 = vld [vmem:[%s7043_s20 + $0x50] sm:$0xff] }
0x2f59   :  { %v4140_v33 = vsel %vm1962_vm11, %v4136_v54, 0.0  ;;  %v4137_v48 = vsel %vm1962_vm11, %v4135_v9, 0.0  ;;  %vm7131_vm11 = vmmov %vm7130_vm6  ;;  %v4538_v54 = vld [vmem:[%s7045_s22] ss:$0 sm:$0xff] }
0x2f5a   :  { %4141 = vadd.xlane.f32.xlu2 %v4140_v33  ;;  %4138 = vadd.xlane.f32.xlu0 %v4137_v48 }
0x2f6e   :  { %4265 = vrot.lane.b32.xlu0 %v6895_v22, %s4950_s7 }
0x2f8c   :  { %v3988_v16 = vpop.xlane.xlu0 %3987 }
0x2f8d   :  { %vm3989_vm5 = vcmp.eq.f32.partialorder %v3986_v20, %v3988_v16  ;;  %v4008_v20 = vld [vmem:[%s7042_s19 + $0x40] sm:$0xff]  ;;  %v3994_v51 = vcvt.f32.s32 %v3988_v16 }
0x2f8e   :  { %v3990_v44 = vsel %vm3989_vm5, %v3985_v35, inf  ;;  %4023 = vmatpush.msra.mxu0 %v4008_v20 }
0x2f8f   :  { %3991 = vmin.xlane.f32.xlu1 %v3990_v44  ;;  %v3995_v3 = vshll.u32 %v3994_v51, 16  ;;  %v4295_v51 = vld [vmem:[#allocation17 + $0x30] sm:$0xff] }
0x2f90   :  { %4024 = vmatpush.msra.mxu0 %v4007_v39  ;;  %v4304_v39 = vld [vmem:[#allocation17 + $0x78] sm:$0xff] }
0x2f91   :  { %4309 = vmatpush.msrb.mxu1 %v4304_v39 }
0x2f92   :  { %4025 = vmatpush.msra.mxu0 %v4006_v10  ;;  %v4302_v10 = vld [vmem:[#allocation17 + $0x68] sm:$0xff] }
0x2f94   :  { %4026 = vmatpush.msra.mxu0 %v4005_v38  ;;  %v4301_v38 = vld [vmem:[#allocation17 + $0x60] sm:$0xff] }
0x2fcd   :  { %v4142_v13 = vpop.xlane.xlu2 %4141  ;;  %v4139_v21 = vpop.xlane.xlu0 %4138 }
0x2fce   :  { %v4144_v30 = vmul.f32 %v6818_v59, %v4142_v13  ;;  %v4143_v8 = vmul.f32 %v6821_v55, %v4139_v21  ;;  %v4004_v59 = vld [vmem:[%s7042_s19 + $0x20] sm:$0xff]  ;;  %v4003_v55 = vld [vmem:[%s7042_s19 + $0x18] sm:$0xff] }
0x2fcf   :  { %4027 = vmatpush.msra.mxu0 %v4004_v59  ;;  %v4300_v59 = vld [vmem:[#allocation17 + $0x58] sm:$0xff] }
0x2fd0   :  { %4159 = vmatpush.msrb.mxu3 %v4144_v30 }
0x2fd1   :  { %4028 = vmatpush.msra.mxu0 %v4003_v55  ;;  %v4299_v55 = vld [vmem:[#allocation17 + $0x50] sm:$0xff] }
0x2fd2   :  { %4160 = vmatpush.msrb.mxu3 %v4143_v8  ;;  %v4303_v8 = vld [vmem:[#allocation17 + $0x70] sm:$0xff] }
0x2fd3   :  { %4464 = vmatmul.msk.f32.vlgmr.msrb.gmra.mxu3 %vm7131_vm11, %v5917_v42  ;;  %4029 = vmatpush.msra.mxu0 %v4002_v61  ;;  %v4001_v42 = vld [vmem:[%s7042_s19 + $0x8] sm:$0xff]  ;;  %s4462_s19 = sld [smem:[#allocation10 + $0x6]] }
0x2fd4   :  { %4196 = vmatpush.msra.mxu3 %v4191_v14  ;;  %4310 = vmatpush.msrb.mxu1 %v4303_v8  ;;  %v4298_v61 = vld [vmem:[#allocation17 + $0x48] sm:$0xff] }
0x2fd5   :  { %4030 = vmatpush.msra.mxu0 %v4001_v42  ;;  %v4297_v42 = vld [vmem:[#allocation17 + $0x40] sm:$0xff] }
0x2fd6   :  { %4197 = vmatpush.msra.mxu3 %v4190_v53  ;;  %4311 = vmatpush.msrb.mxu1 %v4302_v10 }
0x2fd7   :  { %4031 = vmatpush.msra.mxu0 %v4000_v47  ;;  %v4296_v47 = vld [vmem:[#allocation17 + $0x38] sm:$0xff] }
0x2fd8   :  { %4198 = vmatpush.msra.mxu3 %v4189_v27  ;;  %4312 = vmatpush.msrb.mxu1 %v4301_v38  ;;  %v4292_v27 = vld [vmem:[#allocation17 + $0x18] sm:$0xff] }
0x2fd9   :  { %p4037_p5 = scmp.gt.s32.totalorder %s4462_s19, 0 }
0x2fda   :  { %4313 = vmatpush.msrb.mxu1 %v4300_v59 }
0x2fdb   :  { %s4038_s28 = scalar_select %p4037_p5, 1, 0 }
0x2fdc   :  { %4314 = vmatpush.msrb.mxu1 %v4299_v55 }
0x2fdd   :  { %s4039_s17 = scvt.s32.f32 %s4038_s28  ;;  %s4958_s28 = smov 2  }
0x2fde   :  { %4315 = vmatpush.msrb.mxu1 %v4298_v61 }
0x2fdf   :  { %s4042_s26 = ssub.f32 1.0, %s4039_s17  ;;  %v4040_v15 = vstv %s4039_s17 }
0x2fe0   :  { %v4041_v12 = vmul.f32 %v4040_v15, %v6176_v60  ;;  %v4178_v60 = vld [vmem:[%s7043_s20 + $0x10] sm:$0xff]  ;;  %v4266_v37 = vpop.permute.xlu0 %4265  ;;  %4316 = vmatpush.msrb.mxu1 %v4297_v42 }
0x2fe1   :  { %v4043_v43 = vstv %s4042_s26 }
0x2fe2   :  { %4317 = vmatpush.msrb.mxu1 %v4296_v47 }
0x2fe4   :  { %4318 = vmatpush.msrb.mxu1 %v4295_v51 }
0x3002   :  { %v3992_v40 = vpop.xlane.xlu1 %3991 }
0x3003   :  { %v3993_v52 = vcvt.f32.s32 %v3992_v40  ;;  %v4294_v40 = vld [vmem:[#allocation17 + $0x28] sm:$0xff] }
0x3004   :  { %4319 = vmatpush.msrb.mxu1 %v4294_v40 }
0x3005   :  { %v3996_v31 = vadd.s32 %v3995_v3, %v3993_v52  ;;  %v4293_v3 = vld [vmem:[#allocation17 + $0x20] sm:$0xff] }
0x3006   :  { %4320 = vmatpush.msrb.mxu1 %v4293_v3 }
0x3007   :  { %vm3997_vm6 = vcmp.eq.s32.totalorder %v5145_v6, %v3996_v31  ;;  %v4188_v6 = vld [vmem:[%s7043_s20 + $0x60] sm:$0xff] }
0x3008   :  { %4461 = vmatmul.msk.f32.vlgmr.msra.gmra.mxu0 %vm3997_vm6, %v4956_v25  ;;  %v4187_v25 = vld [vmem:[%s7043_s20 + $0x58] sm:$0xff]  ;;  %4199 = vmatpush.msra.mxu3 %v4188_v6 }
0x3009   :  { %v4291_v6 = vld [vmem:[#allocation17 + $0x10] sm:$0xff]  ;;  %4321 = vmatpush.msrb.mxu1 %v4292_v27 }
0x300a   :  { %4200 = vmatpush.msra.mxu3 %v4187_v25  ;;  %v4290_v25 = vld [vmem:[#allocation17 + $0x8] sm:$0xff] }
0x300b   :  { %4322 = vmatpush.msrb.mxu1 %v4291_v6 }
0x300c   :  { %4201 = vmatpush.msra.mxu3 %v4186_v7  ;;  %v4289_v7 = vld [vmem:[#allocation17] sm:$0xff] }
0x300d   :  { %4323 = vmatpush.msrb.mxu1 %v4290_v25 }
0x300e   :  { %4202 = vmatpush.msra.mxu3 %v4185_v24 }
0x300f   :  { %4324 = vmatpush.msrb.mxu1 %v4289_v7 }
0x3010   :  { %4203 = vmatpush.msra.mxu3 %v4184_v11 }
0x3012   :  { %4204 = vmatpush.msra.mxu3 %v4183_v17 }
0x3014   :  { %4205 = vmatpush.msra.mxu3 %v4182_v18 }
0x3016   :  { %4206 = vmatpush.msra.mxu3 %v4181_v49 }
0x3018   :  { %4207 = vmatpush.msra.mxu3 %v4180_v23 }
0x301a   :  { %4208 = vmatpush.msra.mxu3 %v4179_v28 }
0x301c   :  { %4209 = vmatpush.msra.mxu3 %v4178_v60 }
0x301e   :  { %4210 = vmatpush.msra.mxu3 %v4177_v62 }
0x3020   :  { %4211 = vmatpush.msra.mxu3 %v4176_v19 }
0x3056   :  { %v4162_v56 = vpop.f32.mrf.mxu3 }
0x3057   :  { %4166 = vrot.lane.b32.xlu2 %v4162_v56, %s4955_s13 }
0x3085   :  { %v4033_v34 = vpop.f32.mrf.mxu0 }
0x3086   :  { %v4044_v36 = vmul.f32 %v4043_v43, %v4033_v34 }
0x3088   :  { %v4046_v46 = vrot.slane %v4044_v36, 4 }
0x308a   :  { %v4048_v41 = vadd.f32 %v4046_v46, %v4041_v12 }
0x308c   :  { %4171 = vrot.lane.b32.xlu1 %v4048_v41, %s4951_s25 }
0x30b1   :  { %v4167_v57 = vpop.permute.xlu2 %4166 }
0x30b2   :  { %4169 = vst.msk [vmem:[#allocation3] sm:$0x3] %vm2038_vm9, %v4167_v57 }
0x30fe   :  { %v4172_v26 = vpop.permute.xlu1 %4171 }
0x30ff   :  { %4174 = vst.msk [vmem:[#allocation3 - $0x4] sm:$0x30] %vm2759_vm10, %v4172_v26 }
0x3106   :  { %v4175_v4 = vld [vmem:[#allocation3] sm:$0x3] }
0x3107   :  { %4212 = vmatmul.f32.vlgmr.msra.gmra.mxu3 %v4175_v4 }
0x318a   :  { %v4213_v9 = vpop.f32.mrf.mxu3 }
0x318b   :  { %v4214_v33 = vadd.f32 %v4538_v54, %v4213_v9 }
0x318d   :  { %v4244_v48 = vadd.f32 %v6895_v22, %v4214_v33 }
0x318f   :  { %v4466_v32 = vmul.f32 -1.442695, %v4244_v48 }
0x3191   :  { %4732 = vpow2.f32 %v4466_v32 }
0x3197   :  { %v4733_v45 = vpop.eup %4732 }
0x3198   :  { %v4248_v58 = vadd.f32 1.0, %v4733_v45 }
0x319a   :  { %4734 = vrcp.f32 %v4248_v58  ;;  %v4260_v63 = vand.u32 2147483648, %v4248_v58  ;;  %v4258_v2 = vand.u32 2147483647, %v4248_v58  ;;  %vm4254_vm10 = vweird.f32 %v4248_v58 }
0x319c   :  { %v4261_v29 = vor.u32 1.1754944e-38, %v4260_v63  ;;  %vm4259_vm13 = vcmp.eq.f32.partialorder %v4258_v2, 8.507059e+37 }
0x31a0   :  { %v4735_v16 = vpop.eup %4734 }
0x31a1   :  { %v4250_v35 = vmul.f32 %v4735_v16, %v4248_v58  ;;  %vm4255_vm9 = vweird.f32 %v4735_v16 }
0x31a2   :  { %vm4256_vm8 = vmor %vm4254_vm10, %vm4255_vm9 }
0x31a3   :  { %v4251_v44 = vsub.f32 1.0, %v4250_v35 }
0x31a5   :  { %v4252_v1 = vmul.f32 %v4735_v16, %v4251_v44 }
0x31a7   :  { %v4253_v0 = vadd.f32 %v4735_v16, %v4252_v1 }
0x31a9   :  { %v4257_v5 = vsel %vm4256_vm8, %v4735_v16, %v4253_v0 }
0x31aa   :  { %v4262_v22 = vsel %vm4259_vm13, %v4261_v29, %v4257_v5 }
0x31ab   :  { %v4268_v20 = vmul.f32 %v4266_v37, %v4262_v22  ;;  %v4275_v52 = vsub.f32 1.0, %v4262_v22  ;;  %v4281_v56 = vmul.f32 %v4262_v22, %v6860_v50  ;;  %v4539_v50 = vld [vmem:[%s7125_s27] ss:$0 sm:$0xff] }
0x31ad   :  { %4270 = vrot.lane.b32.xlu2 %v4268_v20, %s4950_s7 }
0x3207   :  { %v4271_v13 = vpop.permute.xlu2 %4270 }
0x3208   :  { %v4273_v21 = vadd.f32 %v4271_v13, %v4214_v33 }
0x320a   :  { %4736 = vtanh.f32 %v4273_v21 }
0x3210   :  { %v4737_v30 = vpop.eup %4736 }
0x3211   :  { %4277 = vrot.lane.b32.xlu0 %v4737_v30, %s4951_s25 }
0x3283   :  { %v4278_v31 = vpop.permute.xlu0 %4277 }
0x3284   :  { %v4280_v14 = vmul.f32 %v4278_v31, %v4275_v52 }
0x3286   :  { %v4282_v53 = vadd.f32 %v4281_v56, %v4280_v14 }
0x3288   :  { %4284 = vrot.lane.b32.xlu1 %v4282_v53, %s4951_s25  ;;  %s7132_s25 = sld [smem:[#allocation37_spill]] }
0x328e   :  { %s4337_s29 = sshll.u32 %s7132_s25, 4  ;;  %s4338_s29 = int_to_ptr.hbm [resolvable:$true] %s4337_s29 }
0x32fa   :  { %v4285_v24 = vpop.permute.xlu1 %4284 }
0x32fb   :  { %4287 = vst.msk [vmem:[#allocation3] sm:$0x3] %vm2161_vm3, %v4285_v24 }
0x3302   :  { %v4288_v11 = vld [vmem:[#allocation3] sm:$0x3] }
0x3303   :  { %4325 = vmatmul.f32.vlgmr.msrb.gmra.mxu1 %v4288_v11 }
0x3380   :  { %v4326_v17 = vpop.f32.mrf.mxu1 }
0x3381   :  { %v4327_v18 = vadd.f32 %v4539_v50, %v4326_v17 }
0x3383   :  { %4330 = vst [vmem:[#allocation18 + $0xe] sm:$0x3] %v4327_v18 }
0x3384   :  { %4343 = dma.vmem_to_hbm [thread:$0]  %s4336_s10, 256, %s4338_s29, [#allocation6], %s4955_s13, %s4955_s13, %s4958_s28  }
0x3385   :  { %4937 = dma.done.wait [#allocation6], 256  }
0x3386   :  { %4938 = vsyncadd [#allocation6], 4294967040 }
0x3387   :  { %4348 = vsyncpa [#allocation5], 1 }
0x3388   :  { %4349 = vsyncpa [#allocation13], 1 }
0x3389   :  { %4350 = vsyncpa [#allocation16], 1 }
0x338a   :  { %4351 = vsyncpa [#allocation6], 1 }
0x338b   :  { %4352 = vsyncpa [#allocation7], 1 }
0x338c   :  { %4353 = vsyncpa [#allocation9], 1 }

</bundles_post_ra>
